<compile_context>
chip_gen: v7x
topology: tpu7x:2x2x1
jax: 0.10.0
libtpu: 0.0.40
codegen_flags: <defaults>
</compile_context>

<pallas_src>
import functools

import jax
import jax.numpy as jnp
from jax import lax
from jax.experimental import pallas as pl
from jax.experimental.pallas import tpu as pltpu


def _vmem_limit_bytes():
    # Derive the scoped-VMEM budget from the actual chip (v7x has 64 MiB physical VMEM,
    # v5e/v6e have 128 MiB); fall back to a safe value if the query is unavailable.
    try:
        cap = int(pltpu.get_tpu_info().vmem_capacity_bytes)
    except Exception:  # pragma: no cover - conservative fallback
        cap = 64 * 1024 * 1024
    return int(min(cap // 2, 64 * 1024 * 1024))


_VMEM_LIMIT = _vmem_limit_bytes()


# --------------------------------------------------------------------------------------
# Kernel 1: per-channel batch statistics (sum, sum of squares) for BN1.
#   grid = (n_groups, tiles_per_group): leading "parallel" group axis (both v7x TCs),
#   inner "arbitrary" reduction axis; cdiv tiling with in-kernel row masking for the tail.
# --------------------------------------------------------------------------------------
def _bn_stats_kernel(x_ref, sum_ref, sq_ref, *, rows, tr, tiles_total, tpg):
    g = pl.program_id(0)
    i = pl.program_id(1)

    @pl.when(i == 0)
    def _init():
        sum_ref[...] = jnp.zeros(sum_ref.shape, sum_ref.dtype)
        sq_ref[...] = jnp.zeros(sq_ref.shape, sq_ref.dtype)

    tile = g * tpg + i

    @pl.when(tile < tiles_total)
    def _acc():
        x = x_ref[...]                                          # (tr, C) f32
        if rows % tr != 0:                                      # mask the ragged tail tile
            row0 = tile * tr
            ridx = row0 + lax.broadcasted_iota(jnp.int32, (tr, 1), 0)
            x = jnp.where(ridx < rows, x, 0.0)
        sum_ref[...] += jnp.sum(x, axis=0, keepdims=True).reshape(1, 1, -1)
        sq_ref[...] += jnp.sum(x * x, axis=0, keepdims=True).reshape(1, 1, -1)


def pallas_bn_stats(x2d, row_tile=1024):
    rows, c = x2d.shape
    tr = rows if rows <= row_tile else row_tile                 # row_tile is a multiple of 8
    tiles_total = pl.cdiv(rows, tr)
    n_groups = 2 if tiles_total >= 2 else 1                     # v7x: use both TensorCores
    tpg = pl.cdiv(tiles_total, n_groups)

    kernel = functools.partial(_bn_stats_kernel, rows=rows, tr=tr,
                               tiles_total=tiles_total, tpg=tpg)
    out = jax.ShapeDtypeStruct((n_groups, 1, c), jnp.float32)
    psum, psq = pl.pallas_call(
        kernel,
        grid=(n_groups, tpg),
        in_specs=[pl.BlockSpec(
            (tr, c),
            lambda g, i: (jnp.minimum(g * tpg + i, tiles_total - 1), 0))],
        out_specs=(pl.BlockSpec((1, 1, c), lambda g, i: (g, 0, 0)),
                   pl.BlockSpec((1, 1, c), lambda g, i: (g, 0, 0))),
        out_shape=(out, out),
        compiler_params=pltpu.CompilerParams(
            dimension_semantics=("parallel", "arbitrary"),
            vmem_limit_bytes=_VMEM_LIMIT),
    )(x2d)
    return jnp.sum(psum, axis=(0, 1)), jnp.sum(psq, axis=(0, 1))


def _bn_affine(s, sq, gamma, beta, n, eps=1e-5):
    """Fold batch stats + BN affine into one per-channel scale/shift (training-mode BN)."""
    mean = s / n
    var = sq / n - mean * mean                  # biased variance
    inv = gamma * lax.rsqrt(var + eps)
    return inv.reshape(1, -1), (beta - mean * inv).reshape(1, -1)


# --------------------------------------------------------------------------------------
# Shared conv core: BN affine + SiLU -> bf16 cast -> VMEM halo padding -> bf16 im2col ->
# single (H*W, 9*Cin) x (9*Cin, Cout) matmul with f32 accumulation -> + bias.
# --------------------------------------------------------------------------------------
def _bn_silu_conv_core(x, a_ref, b_ref, w_ref, bias_ref, ypad_ref, col_ref, H, W):
    cin = x.shape[-1]

    # BN affine + SiLU (f32 on VPU/EUP), single bf16 cast.
    y = x * a_ref[...] + b_ref[...]                             # (H, W, Cin)
    y = (y * jax.nn.sigmoid(y)).astype(jnp.bfloat16)

    # Zero only the 1-pixel halo; the interior is fully overwritten every step.
    zero_row = jnp.zeros((1, W + 2, cin), jnp.bfloat16)
    zero_col = jnp.zeros((H, 1, cin), jnp.bfloat16)
    ypad_ref[0:1, :, :] = zero_row
    ypad_ref[H + 1:H + 2, :, :] = zero_row
    ypad_ref[1:H + 1, 0:1, :] = zero_col
    ypad_ref[1:H + 1, W + 1:W + 2, :] = zero_col
    ypad_ref[1:H + 1, 1:W + 1, :] = y

    # Build the bf16 im2col slab once; one fat-K matmul instead of 9 thin ones.
    for t in range(9):
        dy, dx = divmod(t, 3)
        col_ref[:, t * cin:(t + 1) * cin] = (
            ypad_ref[dy:dy + H, dx:dx + W, :].reshape(H * W, cin))

    acc = jnp.dot(col_ref[...], w_ref[...],
                  preferred_element_type=jnp.float32)           # (H*W, Cout) f32
    return acc + bias_ref[...]


# --------------------------------------------------------------------------------------
# Kernel 2: conv1 = BN1+SiLU prologue + 3x3 conv + bias; epilogue emits per-batch partial
# BN2 statistics (sum, sum-sq) so no second stats pass over h is needed.
# --------------------------------------------------------------------------------------
def _conv1_kernel(x_ref, a_ref, b_ref, w_ref, bias_ref,
                  o_ref, psum_ref, psq_ref, ypad_ref, col_ref, *, H, W):
    acc = _bn_silu_conv_core(x_ref[0], a_ref, b_ref, w_ref, bias_ref,
                             ypad_ref, col_ref, H, W)
    o_ref[0] = acc                                              # lane-dense flat (H*W, Cout)
    psum_ref[0] = jnp.sum(acc, axis=0, keepdims=True)
    psq_ref[0] = jnp.sum(acc * acc, axis=0, keepdims=True)


def pallas_bn_silu_conv3x3_stats(x, scale, shift, w, bias):
    B, H, W, cin = x.shape
    cout = w.shape[-1]
    kernel = functools.partial(_conv1_kernel, H=H, W=W)
    stat = jax.ShapeDtypeStruct((B, 1, cout), jnp.float32)
    return pl.pallas_call(
        kernel,
        grid=(B,),
        in_specs=[
            pl.BlockSpec((1, H, W, cin), lambda b: (b, 0, 0, 0)),
            pl.BlockSpec((1, cin), lambda b: (0, 0)),
            pl.BlockSpec((1, cin), lambda b: (0, 0)),
            pl.BlockSpec((9 * cin, cout), lambda b: (0, 0)),
            pl.BlockSpec((1, cout), lambda b: (0, 0)),
        ],
        out_specs=(
            pl.BlockSpec((1, H * W, cout), lambda b: (b, 0, 0)),
            pl.BlockSpec((1, 1, cout), lambda b: (b, 0, 0)),
            pl.BlockSpec((1, 1, cout), lambda b: (b, 0, 0)),
        ),
        out_shape=(
            jax.ShapeDtypeStruct((B, H * W, cout), jnp.float32),
            stat, stat,
        ),
        scratch_shapes=[
            pltpu.VMEM((H + 2, W + 2, cin), jnp.bfloat16),       # halo-padded activations
            pltpu.VMEM((H * W, 9 * cin), jnp.bfloat16),          # im2col slab
        ],
        compiler_params=pltpu.CompilerParams(
            dimension_semantics=("parallel",),
            vmem_limit_bytes=_VMEM_LIMIT),
    )(x, scale, shift, w, bias)


# --------------------------------------------------------------------------------------
# Kernel 3: conv2 = BN2+SiLU prologue + 3x3 conv + bias, fused with the SELayer
# (pool -> FC -> ReLU -> FC -> sigmoid -> scale, computed on VPU/XLU) and the residual add.
# The skip input aliases the output buffer.
# --------------------------------------------------------------------------------------
def _conv2_se_res_kernel(h_ref, skip_ref, a_ref, b_ref, w_ref, bias_ref,
                         w1_ref, w2_ref, o_ref, ypad_ref, col_ref, *, H, W):
    acc = _bn_silu_conv_core(h_ref[0], a_ref, b_ref, w_ref, bias_ref,
                             ypad_ref, col_ref, H, W)            # (H*W, Cout) f32
    # SELayer on the conv output (no M=1 MXU matmuls: broadcast-multiply + reductions).
    pooled = jnp.mean(acc, axis=0, keepdims=True)                # (1, Cout)
    z = jnp.maximum(jnp.sum(pooled * w1_ref[...], axis=-1, keepdims=True), 0.0)   # (Cr, 1)
    gate = jax.nn.sigmoid(jnp.sum(z * w2_ref[...], axis=0, keepdims=True))        # (1, Cout)
    o_ref[0] = acc * gate + skip_ref[0]


def pallas_bn_silu_conv3x3_se_res(h, skip, scale, shift, w, bias, se_w1, se_w2):
    B, H, W, c = h.shape
    cout = w.shape[-1]
    cr = se_w1.shape[0]
    kernel = functools.partial(_conv2_se_res_kernel, H=H, W=W)
    return pl.pallas_call(
        kernel,
        grid=(B,),
        in_specs=[
            pl.BlockSpec((1, H, W, c), lambda b: (b, 0, 0, 0)),
            pl.BlockSpec((1, H * W, cout), lambda b: (b, 0, 0)),
            pl.BlockSpec((1, c), lambda b: (0, 0)),
            pl.BlockSpec((1, c), lambda b: (0, 0)),
            pl.BlockSpec((9 * c, cout), lambda b: (0, 0)),
            pl.BlockSpec((1, cout), lambda b: (0, 0)),
            pl.BlockSpec((cr, cout), lambda b: (0, 0)),
            pl.BlockSpec((cr, cout), lambda b: (0, 0)),
        ],
        out_specs=pl.BlockSpec((1, H * W, cout), lambda b: (b, 0, 0)),
        out_shape=jax.ShapeDtypeStruct((B, H * W, cout), jnp.float32),
        scratch_shapes=[
            pltpu.VMEM((H + 2, W + 2, c), jnp.bfloat16),
            pltpu.VMEM((H * W, 9 * c), jnp.bfloat16),
        ],
        input_output_aliases={1: 0},                 # residual input reuses the output HBM
        compiler_params=pltpu.CompilerParams(
            dimension_semantics=("parallel",),
            vmem_limit_bytes=_VMEM_LIMIT),
    )(h, skip, scale, shift, w, bias, se_w1, se_w2)


# --------------------------------------------------------------------------------------
# Parameter construction (spectral norm folded at init; deterministic).
# --------------------------------------------------------------------------------------
def _spectral_normalize(w, iters=8):
    wm = w.reshape(w.shape[0], -1)
    u = jnp.ones((wm.shape[0],), jnp.float32)
    u = u / (jnp.linalg.norm(u) + 1e-12)
    v = None
    for _ in range(iters):
        v = wm.T @ u
        v = v / (jnp.linalg.norm(v) + 1e-12)
        u = wm @ v
        u = u / (jnp.linalg.norm(u) + 1e-12)
    sigma = u @ (wm @ v)
    return w / sigma


def _conv_weight(key, cin, cout):
    w = jax.random.normal(key, (cout, cin, 3, 3), jnp.float32) / jnp.sqrt(9.0 * cin)
    w = _spectral_normalize(w)
    # (Cout, Cin, 3, 3) -> (3, 3, Cin, Cout) -> (9*Cin, Cout), bf16 MXU operand layout.
    return jnp.transpose(w, (2, 3, 1, 0)).reshape(9 * cin, cout).astype(jnp.bfloat16)


def make_encoder_res_block_params(seed, cin, cout, reduction=8):
    k = jax.random.split(jax.random.PRNGKey(seed), 6)
    cr = max(cout // reduction, 1)
    return {
        "bn1_gamma": jnp.ones((cin,), jnp.float32),
        "bn1_beta": jnp.zeros((cin,), jnp.float32),
        "conv1_w": _conv_weight(k[0], cin, cout),
        "conv1_b": jax.random.normal(k[1], (1, cout), jnp.float32) * 0.01,
        "bn2_gamma": jnp.ones((cout,), jnp.float32),
        "bn2_beta": jnp.zeros((cout,), jnp.float32),
        "conv2_w": _conv_weight(k[2], cout, cout),
        "conv2_b": jax.random.normal(k[3], (1, cout), jnp.float32) * 0.01,
        # SELayer: Linear(C->C/r, no bias) weight (Cr, C); Linear(C/r->C, no bias) weight^T (Cr, C).
        "se_w1": jax.random.normal(k[4], (cr, cout), jnp.float32) / jnp.sqrt(cout),
        "se_w2": jax.random.normal(k[5], (cr, cout), jnp.float32) / jnp.sqrt(cr),
    }


# --------------------------------------------------------------------------------------
# EncoderResBlock forward (3 Pallas launches).
# --------------------------------------------------------------------------------------
def encoder_res_block_forward(params, x_nchw):
    x = jnp.transpose(x_nchw, (0, 2, 3, 1)).astype(jnp.float32)     # NHWC, once at boundary
    B, H, W, cin = x.shape
    n = B * H * W

    # K1: BN1 batch statistics; BN1+SiLU are fused into the conv1 prologue.
    s1, q1 = pallas_bn_stats(x.reshape(-1, cin))
    a1, b1 = _bn_affine(s1, q1, params["bn1_gamma"], params["bn1_beta"], n)

    # K2: conv1 (+ per-batch BN2 partial stats emitted from VMEM-resident output).
    h_flat, ps2, pq2 = pallas_bn_silu_conv3x3_stats(
        x, a1, b1, params["conv1_w"], params["conv1_b"])
    cout = h_flat.shape[-1]

    # TODO(synk): n reuse assumes stride == 1 (spatial dims unchanged by conv1).
    a2, b2 = _bn_affine(jnp.sum(ps2, axis=(0, 1)), jnp.sum(pq2, axis=(0, 1)),
                        params["bn2_gamma"], params["bn2_beta"], n)

    # K3: conv2 + SELayer + residual add (identity skip), one pass.
    h = h_flat.reshape(B, H, W, cout)            # metadata-only reshape in HBM
    skip = x.reshape(B, H * W, cin)              # identity skip in lane-dense flat layout
    out_flat = pallas_bn_silu_conv3x3_se_res(
        h, skip, a2, b2, params["conv2_w"], params["conv2_b"],
        params["se_w1"], params["se_w2"])
    out = out_flat.reshape(B, H, W, cout)
    return jnp.transpose(out, (0, 3, 1, 2))


# --------------------------------------------------------------------------------------
# Pure-JAX reference (same folded weights / batch-stat semantics) for a tolerance check.
# --------------------------------------------------------------------------------------
def _reference_forward(params, x_nchw):
    x = jnp.transpose(x_nchw, (0, 2, 3, 1)).astype(jnp.float32)
    B, H, W, cin = x.shape
    cout = params["conv1_b"].shape[-1]
    w1 = params["conv1_w"].astype(jnp.float32).reshape(3, 3, cin, cout)
    w2 = params["conv2_w"].astype(jnp.float32).reshape(3, 3, cout, cout)

    def bn_silu(h, gamma, beta):
        hf = h.reshape(-1, h.shape[-1])
        a, b = _bn_affine(jnp.sum(hf, axis=0), jnp.sum(hf * hf, axis=0),
                          gamma, beta, hf.shape[0])
        y = h * a + b
        return y * jax.nn.sigmoid(y)

    def conv(h, w, bias):
        hb = h.astype(jnp.bfloat16).astype(jnp.float32)          # match kernel's bf16 operands
        return lax.conv_general_dilated(
            hb, w, window_strides=(1, 1), padding=((1, 1), (1, 1)),
            dimension_numbers=("NHWC", "HWIO", "NHWC"),
            precision=lax.Precision.HIGHEST) + bias.reshape(1, 1, 1, -1)

    h = conv(bn_silu(x, params["bn1_gamma"], params["bn1_beta"]), w1, params["conv1_b"])
    h = conv(bn_silu(h, params["bn2_gamma"], params["bn2_beta"]), w2, params["conv2_b"])
    pooled = jnp.mean(h, axis=(1, 2))                                           # (B, C)
    z = jnp.maximum(jnp.dot(pooled, params["se_w1"].T,
                            precision=lax.Precision.HIGHEST), 0.0)              # (B, Cr)
    gate = jax.nn.sigmoid(jnp.dot(z, params["se_w2"],
                                  precision=lax.Precision.HIGHEST))             # (B, C)
    out = h * gate[:, None, None, :] + x
    return jnp.transpose(out, (0, 3, 1, 2))


# --------------------------------------------------------------------------------------
if __name__ == "__main__":
    # identity skip => in_channels == out_channels, stride = 1
    B, C, H, W = 2, 64, 16, 16

    params = make_encoder_res_block_params(seed=0, cin=C, cout=C)
    x = jax.random.normal(jax.random.PRNGKey(0), (B, C, H, W), jnp.float32)

    fwd = jax.jit(functools.partial(encoder_res_block_forward, params))
    y = fwd(x)
    jax.block_until_ready(y)

    y_ref = jax.jit(functools.partial(_reference_forward, params))(x)
    jax.block_until_ready(y_ref)

    assert y.shape == (B, C, H, W)
    assert bool(jnp.all(jnp.isfinite(y)))
    err = float(jnp.max(jnp.abs(y - y_ref)))
    assert err < 5e-2, f"max abs error vs JAX reference: {err}"
    print("KERNEL_OK")
</pallas_src>

<mosaic_0001>
module attributes {stable_mosaic.version = 11 : i64} {
  func.func @_bn_stats_kernel(%arg0: i32, %arg1: i32, %arg2: memref<512x64xf32, #tpu.memory_space<vmem>>, %arg3: memref<1x1x64xf32, #tpu.memory_space<vmem>>, %arg4: memref<1x1x64xf32, #tpu.memory_space<vmem>>) attributes {dimension_semantics = [#tpu.dimension_semantics<parallel>, #tpu.dimension_semantics<arbitrary>], iteration_bounds = array<i64: 1, 1>, scalar_prefetch = 0 : i64, scratch_operands = 0 : i64, tpu.core_type = #tpu.core_type<tc>, window_params = [{transform_indices = @transform_0, window_bounds = array<i64: 512, 64>}, {transform_indices = @transform_1, window_bounds = array<i64: 1, 1, 64>}, {transform_indices = @transform_2, window_bounds = array<i64: 1, 1, 64>}]} {
    %c0_i32 = arith.constant 0 : i32
    %0 = arith.cmpi eq, %arg1, %c0_i32 : i32
    %1 = arith.extui %0 : i1 to i32
    %c0_i32_0 = arith.constant 0 : i32
    %2 = arith.cmpi ne, %1, %c0_i32_0 : i32
    scf.if %2 {
      %cst = arith.constant 0.000000e+00 : f32
      %8 = vector.broadcast %cst : f32 to vector<1x1x64xf32>
      %c0 = arith.constant 0 : index
      %c0_3 = arith.constant 0 : index
      %c0_4 = arith.constant 0 : index
      %9 = vector.load %arg3[%c0, %c0_3, %c0_4] : memref<1x1x64xf32, #tpu.memory_space<vmem>>, vector<1x1x64xf32>
      tpu.vector_store %arg3[%c0, %c0_3, %c0_4], %8 {strides = array<i32>} : memref<1x1x64xf32, #tpu.memory_space<vmem>>, vector<1x1x64xf32>,
      %cst_5 = arith.constant 0.000000e+00 : f32
      %10 = vector.broadcast %cst_5 : f32 to vector<1x1x64xf32>
      %c0_6 = arith.constant 0 : index
      %c0_7 = arith.constant 0 : index
      %c0_8 = arith.constant 0 : index
      %11 = vector.load %arg4[%c0_6, %c0_7, %c0_8] : memref<1x1x64xf32, #tpu.memory_space<vmem>>, vector<1x1x64xf32>
      tpu.vector_store %arg4[%c0_6, %c0_7, %c0_8], %10 {strides = array<i32>} : memref<1x1x64xf32, #tpu.memory_space<vmem>>, vector<1x1x64xf32>,
    } else {
    }
    %c1_i32 = arith.constant 1 : i32
    %3 = arith.muli %arg0, %c1_i32 : i32
    %4 = arith.addi %3, %arg1 : i32
    %c1_i32_1 = arith.constant 1 : i32
    %5 = arith.cmpi slt, %4, %c1_i32_1 : i32
    %6 = arith.extui %5 : i1 to i32
    %c0_i32_2 = arith.constant 0 : i32
    %7 = arith.cmpi ne, %6, %c0_i32_2 : i32
    scf.if %7 {
      %c0 = arith.constant 0 : index
      %c0_3 = arith.constant 0 : index
      %8 = vector.load %arg2[%c0, %c0_3] : memref<512x64xf32, #tpu.memory_space<vmem>>, vector<512x64xf32>
      %c0_4 = arith.constant 0 : index
      %c0_5 = arith.constant 0 : index
      %c0_6 = arith.constant 0 : index
      %9 = vector.load %arg3[%c0_4, %c0_5, %c0_6] : memref<1x1x64xf32, #tpu.memory_space<vmem>>, vector<1x1x64xf32>
      %cst = arith.constant dense<0.000000e+00> : vector<64xf32>
      %10 = vector.multi_reduction <add>, %8, %cst [0] : vector<512x64xf32> to vector<64xf32>
      %11 = vector.shape_cast %10 : vector<64xf32> to vector<1x64xf32>
      %12 = vector.shape_cast %11 : vector<1x64xf32> to vector<1x1x64xf32>
      %13 = arith.addf %9, %12 : vector<1x1x64xf32>
      %c0_7 = arith.constant 0 : index
      %c0_8 = arith.constant 0 : index
      %c0_9 = arith.constant 0 : index
      %14 = vector.load %arg3[%c0_7, %c0_8, %c0_9] : memref<1x1x64xf32, #tpu.memory_space<vmem>>, vector<1x1x64xf32>
      tpu.vector_store %arg3[%c0_7, %c0_8, %c0_9], %13 {strides = array<i32>} : memref<1x1x64xf32, #tpu.memory_space<vmem>>, vector<1x1x64xf32>,
      %c0_10 = arith.constant 0 : index
      %c0_11 = arith.constant 0 : index
      %c0_12 = arith.constant 0 : index
      %15 = vector.load %arg4[%c0_10, %c0_11, %c0_12] : memref<1x1x64xf32, #tpu.memory_space<vmem>>, vector<1x1x64xf32>
      %16 = arith.mulf %8, %8 : vector<512x64xf32>
      %cst_13 = arith.constant dense<0.000000e+00> : vector<64xf32>
      %17 = vector.multi_reduction <add>, %16, %cst_13 [0] : vector<512x64xf32> to vector<64xf32>
      %18 = vector.shape_cast %17 : vector<64xf32> to vector<1x64xf32>
      %19 = vector.shape_cast %18 : vector<1x64xf32> to vector<1x1x64xf32>
      %20 = arith.addf %15, %19 : vector<1x1x64xf32>
      %c0_14 = arith.constant 0 : index
      %c0_15 = arith.constant 0 : index
      %c0_16 = arith.constant 0 : index
      %21 = vector.load %arg4[%c0_14, %c0_15, %c0_16] : memref<1x1x64xf32, #tpu.memory_space<vmem>>, vector<1x1x64xf32>
      tpu.vector_store %arg4[%c0_14, %c0_15, %c0_16], %20 {strides = array<i32>} : memref<1x1x64xf32, #tpu.memory_space<vmem>>, vector<1x1x64xf32>,
    } else {
    }
    return
  }
  func.func @transform_0(%arg0: i32, %arg1: i32) -> (i32, i32) {
    %c1_i32 = arith.constant 1 : i32
    %0 = arith.muli %arg0, %c1_i32 : i32
    %1 = arith.addi %0, %arg1 : i32
    %c0_i32 = arith.constant 0 : i32
    %2 = arith.minsi %1, %c0_i32 : i32
    %c0_i32_0 = arith.constant 0 : i32
    %c0_i32_1 = arith.constant 0 : i32
    return %2, %c0_i32_0 : i32, i32
  }
  func.func @transform_1(%arg0: i32, %arg1: i32) -> (i32, i32, i32) {
    %c0_i32 = arith.constant 0 : i32
    %c0_i32_0 = arith.constant 0 : i32
    %c0_i32_1 = arith.constant 0 : i32
    return %arg0, %c0_i32, %c0_i32_0 : i32, i32, i32
  }
  func.func @transform_2(%arg0: i32, %arg1: i32) -> (i32, i32, i32) {
    %c0_i32 = arith.constant 0 : i32
    %c0_i32_0 = arith.constant 0 : i32
    %c0_i32_1 = arith.constant 0 : i32
    return %arg0, %c0_i32, %c0_i32_0 : i32, i32, i32
  }
}

module attributes {stable_mosaic.version = 11 : i64} {
  func.func @_conv1_kernel(%arg0: i32, %arg1: memref<1x16x16x64xf32, #tpu.memory_space<vmem>>, %arg2: memref<1x64xf32, #tpu.memory_space<vmem>>, %arg3: memref<1x64xf32, #tpu.memory_space<vmem>>, %arg4: memref<576x64xbf16, #tpu.memory_space<vmem>>, %arg5: memref<1x64xf32, #tpu.memory_space<vmem>>, %arg6: memref<1x256x64xf32, #tpu.memory_space<vmem>>, %arg7: memref<1x1x64xf32, #tpu.memory_space<vmem>>, %arg8: memref<1x1x64xf32, #tpu.memory_space<vmem>>, %arg9: memref<18x18x64xbf16, #tpu.memory_space<vmem>>, %arg10: memref<256x576xbf16, #tpu.memory_space<vmem>>) attributes {dimension_semantics = [#tpu.dimension_semantics<parallel>], iteration_bounds = array<i64: 2>, scalar_prefetch = 0 : i64, scratch_operands = 2 : i64, tpu.core_type = #tpu.core_type<tc>, window_params = [{transform_indices = @transform_0, window_bounds = array<i64: 1, 16, 16, 64>}, {pipeline_mode = #tpu.pipeline_mode<synchronous>, transform_indices = @transform_1, window_bounds = array<i64: 1, 64>}, {pipeline_mode = #tpu.pipeline_mode<synchronous>, transform_indices = @transform_2, window_bounds = array<i64: 1, 64>}, {pipeline_mode = #tpu.pipeline_mode<synchronous>, transform_indices = @transform_3, window_bounds = array<i64: 576, 64>}, {pipeline_mode = #tpu.pipeline_mode<synchronous>, transform_indices = @transform_4, window_bounds = array<i64: 1, 64>}, {transform_indices = @transform_5, window_bounds = array<i64: 1, 256, 64>}, {transform_indices = @transform_6, window_bounds = array<i64: 1, 1, 64>}, {transform_indices = @transform_7, window_bounds = array<i64: 1, 1, 64>}]} {
    %c0 = arith.constant 0 : index
    %c0_0 = arith.constant 0 : index
    %c0_1 = arith.constant 0 : index
    %c0_2 = arith.constant 0 : index
    %0 = vector.load %arg1[%c0, %c0_0, %c0_1, %c0_2] : memref<1x16x16x64xf32, #tpu.memory_space<vmem>>, vector<1x16x16x64xf32>
    %1 = vector.shape_cast %0 : vector<1x16x16x64xf32> to vector<16x16x64xf32>
    %c0_3 = arith.constant 0 : index
    %c0_4 = arith.constant 0 : index
    %2 = vector.load %arg2[%c0_3, %c0_4] : memref<1x64xf32, #tpu.memory_space<vmem>>, vector<1x64xf32>
    %3 = vector.shape_cast %2 : vector<1x64xf32> to vector<1x1x64xf32>
    %4 = vector.broadcast %3 : vector<1x1x64xf32> to vector<16x16x64xf32>
    %5 = arith.mulf %1, %4 : vector<16x16x64xf32>
    %c0_5 = arith.constant 0 : index
    %c0_6 = arith.constant 0 : index
    %6 = vector.load %arg3[%c0_5, %c0_6] : memref<1x64xf32, #tpu.memory_space<vmem>>, vector<1x64xf32>
    %7 = vector.shape_cast %6 : vector<1x64xf32> to vector<1x1x64xf32>
    %8 = vector.broadcast %7 : vector<1x1x64xf32> to vector<16x16x64xf32>
    %9 = arith.addf %5, %8 : vector<16x16x64xf32>
    %10 = arith.negf %9 : vector<16x16x64xf32>
    %11 = math.exp %10 : vector<16x16x64xf32>
    %cst = arith.constant 1.000000e+00 : f32
    %12 = vector.broadcast %cst : f32 to vector<16x16x64xf32>
    %13 = arith.addf %12, %11 : vector<16x16x64xf32>
    %14 = arith.divf %12, %13 : vector<16x16x64xf32>
    %15 = arith.mulf %9, %14 : vector<16x16x64xf32>
    %16 = arith.truncf %15 : vector<16x16x64xf32> to vector<16x16x64xbf16>
    %cst_7 = arith.constant 0.000000e+00 : bf16
    %17 = vector.broadcast %cst_7 : bf16 to vector<1x18x64xbf16>
    %cst_8 = arith.constant 0.000000e+00 : bf16
    %18 = vector.broadcast %cst_8 : bf16 to vector<16x1x64xbf16>
    %c0_9 = arith.constant 0 : index
    %c0_10 = arith.constant 0 : index
    %c0_11 = arith.constant 0 : index
    %19 = vector.load %arg9[%c0_9, %c0_10, %c0_11] : memref<18x18x64xbf16, #tpu.memory_space<vmem>>, vector<1x18x64xbf16>
    tpu.vector_store %arg9[%c0_9, %c0_10, %c0_11], %17 {strides = array<i32>} : memref<18x18x64xbf16, #tpu.memory_space<vmem>>, vector<1x18x64xbf16>,
    %c17 = arith.constant 17 : index
    %c0_12 = arith.constant 0 : index
    %c0_13 = arith.constant 0 : index
    %20 = vector.load %arg9[%c17, %c0_12, %c0_13] : memref<18x18x64xbf16, #tpu.memory_space<vmem>>, vector<1x18x64xbf16>
    tpu.vector_store %arg9[%c17, %c0_12, %c0_13], %17 {strides = array<i32>} : memref<18x18x64xbf16, #tpu.memory_space<vmem>>, vector<1x18x64xbf16>,
    %c1 = arith.constant 1 : index
    %c0_14 = arith.constant 0 : index
    %c0_15 = arith.constant 0 : index
    %21 = vector.load %arg9[%c1, %c0_14, %c0_15] : memref<18x18x64xbf16, #tpu.memory_space<vmem>>, vector<16x1x64xbf16>
    tpu.vector_store %arg9[%c1, %c0_14, %c0_15], %18 {strides = array<i32>} : memref<18x18x64xbf16, #tpu.memory_space<vmem>>, vector<16x1x64xbf16>,
    %c1_16 = arith.constant 1 : index
    %c17_17 = arith.constant 17 : index
    %c0_18 = arith.constant 0 : index
    %22 = vector.load %arg9[%c1_16, %c17_17, %c0_18] : memref<18x18x64xbf16, #tpu.memory_space<vmem>>, vector<16x1x64xbf16>
    tpu.vector_store %arg9[%c1_16, %c17_17, %c0_18], %18 {strides = array<i32>} : memref<18x18x64xbf16, #tpu.memory_space<vmem>>, vector<16x1x64xbf16>,
    %c1_19 = arith.constant 1 : index
    %c1_20 = arith.constant 1 : index
    %c0_21 = arith.constant 0 : index
    %23 = vector.load %arg9[%c1_19, %c1_20, %c0_21] : memref<18x18x64xbf16, #tpu.memory_space<vmem>>, vector<16x16x64xbf16>
    tpu.vector_store %arg9[%c1_19, %c1_20, %c0_21], %16 {strides = array<i32>} : memref<18x18x64xbf16, #tpu.memory_space<vmem>>, vector<16x16x64xbf16>,
    %c0_22 = arith.constant 0 : index
    %c0_23 = arith.constant 0 : index
    %c0_24 = arith.constant 0 : index
    %24 = vector.load %arg9[%c0_22, %c0_23, %c0_24] : memref<18x18x64xbf16, #tpu.memory_space<vmem>>, vector<16x16x64xbf16>
    %25 = vector.shape_cast %24 : vector<16x16x64xbf16> to vector<256x64xbf16>
    %c0_25 = arith.constant 0 : index
    %c0_26 = arith.constant 0 : index
    %26 = vector.load %arg10[%c0_25, %c0_26] : memref<256x576xbf16, #tpu.memory_space<vmem>>, vector<256x64xbf16>
    tpu.vector_store %arg10[%c0_25, %c0_26], %25 {strides = array<i32>} : memref<256x576xbf16, #tpu.memory_space<vmem>>, vector<256x64xbf16>,
    %c0_27 = arith.constant 0 : index
    %c1_28 = arith.constant 1 : index
    %c0_29 = arith.constant 0 : index
    %27 = vector.load %arg9[%c0_27, %c1_28, %c0_29] : memref<18x18x64xbf16, #tpu.memory_space<vmem>>, vector<16x16x64xbf16>
    %28 = vector.shape_cast %27 : vector<16x16x64xbf16> to vector<256x64xbf16>
    %c0_30 = arith.constant 0 : index
    %c64 = arith.constant 64 : index
    %29 = vector.load %arg10[%c0_30, %c64] : memref<256x576xbf16, #tpu.memory_space<vmem>>, vector<256x64xbf16>
    tpu.vector_store %arg10[%c0_30, %c64], %28 {strides = array<i32>} : memref<256x576xbf16, #tpu.memory_space<vmem>>, vector<256x64xbf16>,
    %c0_31 = arith.constant 0 : index
    %c2 = arith.constant 2 : index
    %c0_32 = arith.constant 0 : index
    %30 = vector.load %arg9[%c0_31, %c2, %c0_32] : memref<18x18x64xbf16, #tpu.memory_space<vmem>>, vector<16x16x64xbf16>
    %31 = vector.shape_cast %30 : vector<16x16x64xbf16> to vector<256x64xbf16>
    %c0_33 = arith.constant 0 : index
    %c128 = arith.constant 128 : index
    %32 = vector.load %arg10[%c0_33, %c128] : memref<256x576xbf16, #tpu.memory_space<vmem>>, vector<256x64xbf16>
    tpu.vector_store %arg10[%c0_33, %c128], %31 {strides = array<i32>} : memref<256x576xbf16, #tpu.memory_space<vmem>>, vector<256x64xbf16>,
    %c1_34 = arith.constant 1 : index
    %c0_35 = arith.constant 0 : index
    %c0_36 = arith.constant 0 : index
    %33 = vector.load %arg9[%c1_34, %c0_35, %c0_36] : memref<18x18x64xbf16, #tpu.memory_space<vmem>>, vector<16x16x64xbf16>
    %34 = vector.shape_cast %33 : vector<16x16x64xbf16> to vector<256x64xbf16>
    %c0_37 = arith.constant 0 : index
    %c192 = arith.constant 192 : index
    %35 = vector.load %arg10[%c0_37, %c192] : memref<256x576xbf16, #tpu.memory_space<vmem>>, vector<256x64xbf16>
    tpu.vector_store %arg10[%c0_37, %c192], %34 {strides = array<i32>} : memref<256x576xbf16, #tpu.memory_space<vmem>>, vector<256x64xbf16>,
    %c1_38 = arith.constant 1 : index
    %c1_39 = arith.constant 1 : index
    %c0_40 = arith.constant 0 : index
    %36 = vector.load %arg9[%c1_38, %c1_39, %c0_40] : memref<18x18x64xbf16, #tpu.memory_space<vmem>>, vector<16x16x64xbf16>
    %37 = vector.shape_cast %36 : vector<16x16x64xbf16> to vector<256x64xbf16>
    %c0_41 = arith.constant 0 : index
    %c256 = arith.constant 256 : index
    %38 = vector.load %arg10[%c0_41, %c256] : memref<256x576xbf16, #tpu.memory_space<vmem>>, vector<256x64xbf16>
    tpu.vector_store %arg10[%c0_41, %c256], %37 {strides = array<i32>} : memref<256x576xbf16, #tpu.memory_space<vmem>>, vector<256x64xbf16>,
    %c1_42 = arith.constant 1 : index
    %c2_43 = arith.constant 2 : index
    %c0_44 = arith.constant 0 : index
    %39 = vector.load %arg9[%c1_42, %c2_43, %c0_44] : memref<18x18x64xbf16, #tpu.memory_space<vmem>>, vector<16x16x64xbf16>
    %40 = vector.shape_cast %39 : vector<16x16x64xbf16> to vector<256x64xbf16>
    %c0_45 = arith.constant 0 : index
    %c320 = arith.constant 320 : index
    %41 = vector.load %arg10[%c0_45, %c320] : memref<256x576xbf16, #tpu.memory_space<vmem>>, vector<256x64xbf16>
    tpu.vector_store %arg10[%c0_45, %c320], %40 {strides = array<i32>} : memref<256x576xbf16, #tpu.memory_space<vmem>>, vector<256x64xbf16>,
    %c2_46 = arith.constant 2 : index
    %c0_47 = arith.constant 0 : index
    %c0_48 = arith.constant 0 : index
    %42 = vector.load %arg9[%c2_46, %c0_47, %c0_48] : memref<18x18x64xbf16, #tpu.memory_space<vmem>>, vector<16x16x64xbf16>
    %43 = vector.shape_cast %42 : vector<16x16x64xbf16> to vector<256x64xbf16>
    %c0_49 = arith.constant 0 : index
    %c384 = arith.constant 384 : index
    %44 = vector.load %arg10[%c0_49, %c384] : memref<256x576xbf16, #tpu.memory_space<vmem>>, vector<256x64xbf16>
    tpu.vector_store %arg10[%c0_49, %c384], %43 {strides = array<i32>} : memref<256x576xbf16, #tpu.memory_space<vmem>>, vector<256x64xbf16>,
    %c2_50 = arith.constant 2 : index
    %c1_51 = arith.constant 1 : index
    %c0_52 = arith.constant 0 : index
    %45 = vector.load %arg9[%c2_50, %c1_51, %c0_52] : memref<18x18x64xbf16, #tpu.memory_space<vmem>>, vector<16x16x64xbf16>
    %46 = vector.shape_cast %45 : vector<16x16x64xbf16> to vector<256x64xbf16>
    %c0_53 = arith.constant 0 : index
    %c448 = arith.constant 448 : index
    %47 = vector.load %arg10[%c0_53, %c448] : memref<256x576xbf16, #tpu.memory_space<vmem>>, vector<256x64xbf16>
    tpu.vector_store %arg10[%c0_53, %c448], %46 {strides = array<i32>} : memref<256x576xbf16, #tpu.memory_space<vmem>>, vector<256x64xbf16>,
    %c2_54 = arith.constant 2 : index
    %c2_55 = arith.constant 2 : index
    %c0_56 = arith.constant 0 : index
    %48 = vector.load %arg9[%c2_54, %c2_55, %c0_56] : memref<18x18x64xbf16, #tpu.memory_space<vmem>>, vector<16x16x64xbf16>
    %49 = vector.shape_cast %48 : vector<16x16x64xbf16> to vector<256x64xbf16>
    %c0_57 = arith.constant 0 : index
    %c512 = arith.constant 512 : index
    %50 = vector.load %arg10[%c0_57, %c512] : memref<256x576xbf16, #tpu.memory_space<vmem>>, vector<256x64xbf16>
    tpu.vector_store %arg10[%c0_57, %c512], %49 {strides = array<i32>} : memref<256x576xbf16, #tpu.memory_space<vmem>>, vector<256x64xbf16>,
    %c0_58 = arith.constant 0 : index
    %c0_59 = arith.constant 0 : index
    %51 = vector.load %arg10[%c0_58, %c0_59] : memref<256x576xbf16, #tpu.memory_space<vmem>>, vector<256x576xbf16>
    %c0_60 = arith.constant 0 : index
    %c0_61 = arith.constant 0 : index
    %52 = vector.load %arg4[%c0_60, %c0_61] : memref<576x64xbf16, #tpu.memory_space<vmem>>, vector<576x64xbf16>
    %cst_62 = arith.constant dense<0.000000e+00> : vector<256x64xf32>
    %53 = tpu.matmul %51, %52, %cst_62 {dimension_numbers = #tpu.dot_dimension_numbers<[1], [0], [0], [1], [0, 0, 1, 1], [], []>} : vector<256x576xbf16>, vector<576x64xbf16>, vector<256x64xf32> -> vector<256x64xf32>
    %c0_63 = arith.constant 0 : index
    %c0_64 = arith.constant 0 : index
    %54 = vector.load %arg5[%c0_63, %c0_64] : memref<1x64xf32, #tpu.memory_space<vmem>>, vector<1x64xf32>
    %55 = vector.broadcast %54 : vector<1x64xf32> to vector<256x64xf32>
    %56 = arith.addf %53, %55 : vector<256x64xf32>
    %c0_65 = arith.constant 0 : index
    %c0_66 = arith.constant 0 : index
    %c0_67 = arith.constant 0 : index
    %57 = vector.load %arg6[%c0_65, %c0_66, %c0_67] : memref<1x256x64xf32, #tpu.memory_space<vmem>>, vector<1x256x64xf32>
    %58 = vector.shape_cast %57 : vector<1x256x64xf32> to vector<256x64xf32>
    %59 = vector.shape_cast %56 : vector<256x64xf32> to vector<1x256x64xf32>
    tpu.vector_store %arg6[%c0_65, %c0_66, %c0_67], %59 {strides = array<i32>} : memref<1x256x64xf32, #tpu.memory_space<vmem>>, vector<1x256x64xf32>,
    %cst_68 = arith.constant dense<0.000000e+00> : vector<64xf32>
    %60 = vector.multi_reduction <add>, %56, %cst_68 [0] : vector<256x64xf32> to vector<64xf32>
    %61 = vector.shape_cast %60 : vector<64xf32> to vector<1x64xf32>
    %c0_69 = arith.constant 0 : index
    %c0_70 = arith.constant 0 : index
    %c0_71 = arith.constant 0 : index
    %62 = vector.load %arg7[%c0_69, %c0_70, %c0_71] : memref<1x1x64xf32, #tpu.memory_space<vmem>>, vector<1x1x64xf32>
    %63 = vector.shape_cast %62 : vector<1x1x64xf32> to vector<1x64xf32>
    %64 = vector.shape_cast %61 : vector<1x64xf32> to vector<1x1x64xf32>
    tpu.vector_store %arg7[%c0_69, %c0_70, %c0_71], %64 {strides = array<i32>} : memref<1x1x64xf32, #tpu.memory_space<vmem>>, vector<1x1x64xf32>,
    %65 = arith.mulf %56, %56 : vector<256x64xf32>
    %cst_72 = arith.constant dense<0.000000e+00> : vector<64xf32>
    %66 = vector.multi_reduction <add>, %65, %cst_72 [0] : vector<256x64xf32> to vector<64xf32>
    %67 = vector.shape_cast %66 : vector<64xf32> to vector<1x64xf32>
    %c0_73 = arith.constant 0 : index
    %c0_74 = arith.constant 0 : index
    %c0_75 = arith.constant 0 : index
    %68 = vector.load %arg8[%c0_73, %c0_74, %c0_75] : memref<1x1x64xf32, #tpu.memory_space<vmem>>, vector<1x1x64xf32>
    %69 = vector.shape_cast %68 : vector<1x1x64xf32> to vector<1x64xf32>
    %70 = vector.shape_cast %67 : vector<1x64xf32> to vector<1x1x64xf32>
    tpu.vector_store %arg8[%c0_73, %c0_74, %c0_75], %70 {strides = array<i32>} : memref<1x1x64xf32, #tpu.memory_space<vmem>>, vector<1x1x64xf32>,
    return
  }
  func.func @transform_0(%arg0: i32) -> (i32, i32, i32, i32) {
    %c0_i32 = arith.constant 0 : i32
    %c0_i32_0 = arith.constant 0 : i32
    %c0_i32_1 = arith.constant 0 : i32
    %c0_i32_2 = arith.constant 0 : i32
    return %arg0, %c0_i32, %c0_i32_0, %c0_i32_1 : i32, i32, i32, i32
  }
  func.func @transform_1(%arg0: i32) -> (i32, i32) {
    %c0_i32 = arith.constant 0 : i32
    %c0_i32_0 = arith.constant 0 : i32
    %c0_i32_1 = arith.constant 0 : i32
    return %c0_i32, %c0_i32_0 : i32, i32
  }
  func.func @transform_2(%arg0: i32) -> (i32, i32) {
    %c0_i32 = arith.constant 0 : i32
    %c0_i32_0 = arith.constant 0 : i32
    %c0_i32_1 = arith.constant 0 : i32
    return %c0_i32, %c0_i32_0 : i32, i32
  }
  func.func @transform_3(%arg0: i32) -> (i32, i32) {
    %c0_i32 = arith.constant 0 : i32
    %c0_i32_0 = arith.constant 0 : i32
    %c0_i32_1 = arith.constant 0 : i32
    return %c0_i32, %c0_i32_0 : i32, i32
  }
  func.func @transform_4(%arg0: i32) -> (i32, i32) {
    %c0_i32 = arith.constant 0 : i32
    %c0_i32_0 = arith.constant 0 : i32
    %c0_i32_1 = arith.constant 0 : i32
    return %c0_i32, %c0_i32_0 : i32, i32
  }
  func.func @transform_5(%arg0: i32) -> (i32, i32, i32) {
    %c0_i32 = arith.constant 0 : i32
    %c0_i32_0 = arith.constant 0 : i32
    %c0_i32_1 = arith.constant 0 : i32
    return %arg0, %c0_i32, %c0_i32_0 : i32, i32, i32
  }
  func.func @transform_6(%arg0: i32) -> (i32, i32, i32) {
    %c0_i32 = arith.constant 0 : i32
    %c0_i32_0 = arith.constant 0 : i32
    %c0_i32_1 = arith.constant 0 : i32
    return %arg0, %c0_i32, %c0_i32_0 : i32, i32, i32
  }
  func.func @transform_7(%arg0: i32) -> (i32, i32, i32) {
    %c0_i32 = arith.constant 0 : i32
    %c0_i32_0 = arith.constant 0 : i32
    %c0_i32_1 = arith.constant 0 : i32
    return %arg0, %c0_i32, %c0_i32_0 : i32, i32, i32
  }
}

module attributes {stable_mosaic.version = 11 : i64} {
  func.func @_conv2_se_res_kernel(%arg0: i32, %arg1: memref<1x16x16x64xf32, #tpu.memory_space<vmem>>, %arg2: memref<1x256x64xf32, #tpu.memory_space<vmem>>, %arg3: memref<1x64xf32, #tpu.memory_space<vmem>>, %arg4: memref<1x64xf32, #tpu.memory_space<vmem>>, %arg5: memref<576x64xbf16, #tpu.memory_space<vmem>>, %arg6: memref<1x64xf32, #tpu.memory_space<vmem>>, %arg7: memref<8x64xf32, #tpu.memory_space<vmem>>, %arg8: memref<8x64xf32, #tpu.memory_space<vmem>>, %arg9: memref<1x256x64xf32, #tpu.memory_space<vmem>>, %arg10: memref<18x18x64xbf16, #tpu.memory_space<vmem>>, %arg11: memref<256x576xbf16, #tpu.memory_space<vmem>>) attributes {dimension_semantics = [#tpu.dimension_semantics<parallel>], iteration_bounds = array<i64: 2>, scalar_prefetch = 0 : i64, scratch_operands = 2 : i64, tpu.core_type = #tpu.core_type<tc>, window_params = [{transform_indices = @transform_0, window_bounds = array<i64: 1, 16, 16, 64>}, {transform_indices = @transform_1, window_bounds = array<i64: 1, 256, 64>}, {pipeline_mode = #tpu.pipeline_mode<synchronous>, transform_indices = @transform_2, window_bounds = array<i64: 1, 64>}, {pipeline_mode = #tpu.pipeline_mode<synchronous>, transform_indices = @transform_3, window_bounds = array<i64: 1, 64>}, {pipeline_mode = #tpu.pipeline_mode<synchronous>, transform_indices = @transform_4, window_bounds = array<i64: 576, 64>}, {pipeline_mode = #tpu.pipeline_mode<synchronous>, transform_indices = @transform_5, window_bounds = array<i64: 1, 64>}, {pipeline_mode = #tpu.pipeline_mode<synchronous>, transform_indices = @transform_6, window_bounds = array<i64: 8, 64>}, {pipeline_mode = #tpu.pipeline_mode<synchronous>, transform_indices = @transform_7, window_bounds = array<i64: 8, 64>}, {transform_indices = @transform_8, window_bounds = array<i64: 1, 256, 64>}]} {
    %c0 = arith.constant 0 : index
    %c0_0 = arith.constant 0 : index
    %c0_1 = arith.constant 0 : index
    %c0_2 = arith.constant 0 : index
    %0 = vector.load %arg1[%c0, %c0_0, %c0_1, %c0_2] : memref<1x16x16x64xf32, #tpu.memory_space<vmem>>, vector<1x16x16x64xf32>
    %1 = vector.shape_cast %0 : vector<1x16x16x64xf32> to vector<16x16x64xf32>
    %c0_3 = arith.constant 0 : index
    %c0_4 = arith.constant 0 : index
    %2 = vector.load %arg3[%c0_3, %c0_4] : memref<1x64xf32, #tpu.memory_space<vmem>>, vector<1x64xf32>
    %3 = vector.shape_cast %2 : vector<1x64xf32> to vector<1x1x64xf32>
    %4 = vector.broadcast %3 : vector<1x1x64xf32> to vector<16x16x64xf32>
    %5 = arith.mulf %1, %4 : vector<16x16x64xf32>
    %c0_5 = arith.constant 0 : index
    %c0_6 = arith.constant 0 : index
    %6 = vector.load %arg4[%c0_5, %c0_6] : memref<1x64xf32, #tpu.memory_space<vmem>>, vector<1x64xf32>
    %7 = vector.shape_cast %6 : vector<1x64xf32> to vector<1x1x64xf32>
    %8 = vector.broadcast %7 : vector<1x1x64xf32> to vector<16x16x64xf32>
    %9 = arith.addf %5, %8 : vector<16x16x64xf32>
    %10 = arith.negf %9 : vector<16x16x64xf32>
    %11 = math.exp %10 : vector<16x16x64xf32>
    %cst = arith.constant 1.000000e+00 : f32
    %12 = vector.broadcast %cst : f32 to vector<16x16x64xf32>
    %13 = arith.addf %12, %11 : vector<16x16x64xf32>
    %14 = arith.divf %12, %13 : vector<16x16x64xf32>
    %15 = arith.mulf %9, %14 : vector<16x16x64xf32>
    %16 = arith.truncf %15 : vector<16x16x64xf32> to vector<16x16x64xbf16>
    %cst_7 = arith.constant 0.000000e+00 : bf16
    %17 = vector.broadcast %cst_7 : bf16 to vector<1x18x64xbf16>
    %cst_8 = arith.constant 0.000000e+00 : bf16
    %18 = vector.broadcast %cst_8 : bf16 to vector<16x1x64xbf16>
    %c0_9 = arith.constant 0 : index
    %c0_10 = arith.constant 0 : index
    %c0_11 = arith.constant 0 : index
    %19 = vector.load %arg10[%c0_9, %c0_10, %c0_11] : memref<18x18x64xbf16, #tpu.memory_space<vmem>>, vector<1x18x64xbf16>
    tpu.vector_store %arg10[%c0_9, %c0_10, %c0_11], %17 {strides = array<i32>} : memref<18x18x64xbf16, #tpu.memory_space<vmem>>, vector<1x18x64xbf16>,
    %c17 = arith.constant 17 : index
    %c0_12 = arith.constant 0 : index
    %c0_13 = arith.constant 0 : index
    %20 = vector.load %arg10[%c17, %c0_12, %c0_13] : memref<18x18x64xbf16, #tpu.memory_space<vmem>>, vector<1x18x64xbf16>
    tpu.vector_store %arg10[%c17, %c0_12, %c0_13], %17 {strides = array<i32>} : memref<18x18x64xbf16, #tpu.memory_space<vmem>>, vector<1x18x64xbf16>,
    %c1 = arith.constant 1 : index
    %c0_14 = arith.constant 0 : index
    %c0_15 = arith.constant 0 : index
    %21 = vector.load %arg10[%c1, %c0_14, %c0_15] : memref<18x18x64xbf16, #tpu.memory_space<vmem>>, vector<16x1x64xbf16>
    tpu.vector_store %arg10[%c1, %c0_14, %c0_15], %18 {strides = array<i32>} : memref<18x18x64xbf16, #tpu.memory_space<vmem>>, vector<16x1x64xbf16>,
    %c1_16 = arith.constant 1 : index
    %c17_17 = arith.constant 17 : index
    %c0_18 = arith.constant 0 : index
    %22 = vector.load %arg10[%c1_16, %c17_17, %c0_18] : memref<18x18x64xbf16, #tpu.memory_space<vmem>>, vector<16x1x64xbf16>
    tpu.vector_store %arg10[%c1_16, %c17_17, %c0_18], %18 {strides = array<i32>} : memref<18x18x64xbf16, #tpu.memory_space<vmem>>, vector<16x1x64xbf16>,
    %c1_19 = arith.constant 1 : index
    %c1_20 = arith.constant 1 : index
    %c0_21 = arith.constant 0 : index
    %23 = vector.load %arg10[%c1_19, %c1_20, %c0_21] : memref<18x18x64xbf16, #tpu.memory_space<vmem>>, vector<16x16x64xbf16>
    tpu.vector_store %arg10[%c1_19, %c1_20, %c0_21], %16 {strides = array<i32>} : memref<18x18x64xbf16, #tpu.memory_space<vmem>>, vector<16x16x64xbf16>,
    %c0_22 = arith.constant 0 : index
    %c0_23 = arith.constant 0 : index
    %c0_24 = arith.constant 0 : index
    %24 = vector.load %arg10[%c0_22, %c0_23, %c0_24] : memref<18x18x64xbf16, #tpu.memory_space<vmem>>, vector<16x16x64xbf16>
    %25 = vector.shape_cast %24 : vector<16x16x64xbf16> to vector<256x64xbf16>
    %c0_25 = arith.constant 0 : index
    %c0_26 = arith.constant 0 : index
    %26 = vector.load %arg11[%c0_25, %c0_26] : memref<256x576xbf16, #tpu.memory_space<vmem>>, vector<256x64xbf16>
    tpu.vector_store %arg11[%c0_25, %c0_26], %25 {strides = array<i32>} : memref<256x576xbf16, #tpu.memory_space<vmem>>, vector<256x64xbf16>,
    %c0_27 = arith.constant 0 : index
    %c1_28 = arith.constant 1 : index
    %c0_29 = arith.constant 0 : index
    %27 = vector.load %arg10[%c0_27, %c1_28, %c0_29] : memref<18x18x64xbf16, #tpu.memory_space<vmem>>, vector<16x16x64xbf16>
    %28 = vector.shape_cast %27 : vector<16x16x64xbf16> to vector<256x64xbf16>
    %c0_30 = arith.constant 0 : index
    %c64 = arith.constant 64 : index
    %29 = vector.load %arg11[%c0_30, %c64] : memref<256x576xbf16, #tpu.memory_space<vmem>>, vector<256x64xbf16>
    tpu.vector_store %arg11[%c0_30, %c64], %28 {strides = array<i32>} : memref<256x576xbf16, #tpu.memory_space<vmem>>, vector<256x64xbf16>,
    %c0_31 = arith.constant 0 : index
    %c2 = arith.constant 2 : index
    %c0_32 = arith.constant 0 : index
    %30 = vector.load %arg10[%c0_31, %c2, %c0_32] : memref<18x18x64xbf16, #tpu.memory_space<vmem>>, vector<16x16x64xbf16>
    %31 = vector.shape_cast %30 : vector<16x16x64xbf16> to vector<256x64xbf16>
    %c0_33 = arith.constant 0 : index
    %c128 = arith.constant 128 : index
    %32 = vector.load %arg11[%c0_33, %c128] : memref<256x576xbf16, #tpu.memory_space<vmem>>, vector<256x64xbf16>
    tpu.vector_store %arg11[%c0_33, %c128], %31 {strides = array<i32>} : memref<256x576xbf16, #tpu.memory_space<vmem>>, vector<256x64xbf16>,
    %c1_34 = arith.constant 1 : index
    %c0_35 = arith.constant 0 : index
    %c0_36 = arith.constant 0 : index
    %33 = vector.load %arg10[%c1_34, %c0_35, %c0_36] : memref<18x18x64xbf16, #tpu.memory_space<vmem>>, vector<16x16x64xbf16>
    %34 = vector.shape_cast %33 : vector<16x16x64xbf16> to vector<256x64xbf16>
    %c0_37 = arith.constant 0 : index
    %c192 = arith.constant 192 : index
    %35 = vector.load %arg11[%c0_37, %c192] : memref<256x576xbf16, #tpu.memory_space<vmem>>, vector<256x64xbf16>
    tpu.vector_store %arg11[%c0_37, %c192], %34 {strides = array<i32>} : memref<256x576xbf16, #tpu.memory_space<vmem>>, vector<256x64xbf16>,
    %c1_38 = arith.constant 1 : index
    %c1_39 = arith.constant 1 : index
    %c0_40 = arith.constant 0 : index
    %36 = vector.load %arg10[%c1_38, %c1_39, %c0_40] : memref<18x18x64xbf16, #tpu.memory_space<vmem>>, vector<16x16x64xbf16>
    %37 = vector.shape_cast %36 : vector<16x16x64xbf16> to vector<256x64xbf16>
    %c0_41 = arith.constant 0 : index
    %c256 = arith.constant 256 : index
    %38 = vector.load %arg11[%c0_41, %c256] : memref<256x576xbf16, #tpu.memory_space<vmem>>, vector<256x64xbf16>
    tpu.vector_store %arg11[%c0_41, %c256], %37 {strides = array<i32>} : memref<256x576xbf16, #tpu.memory_space<vmem>>, vector<256x64xbf16>,
    %c1_42 = arith.constant 1 : index
    %c2_43 = arith.constant 2 : index
    %c0_44 = arith.constant 0 : index
    %39 = vector.load %arg10[%c1_42, %c2_43, %c0_44] : memref<18x18x64xbf16, #tpu.memory_space<vmem>>, vector<16x16x64xbf16>
    %40 = vector.shape_cast %39 : vector<16x16x64xbf16> to vector<256x64xbf16>
    %c0_45 = arith.constant 0 : index
    %c320 = arith.constant 320 : index
    %41 = vector.load %arg11[%c0_45, %c320] : memref<256x576xbf16, #tpu.memory_space<vmem>>, vector<256x64xbf16>
    tpu.vector_store %arg11[%c0_45, %c320], %40 {strides = array<i32>} : memref<256x576xbf16, #tpu.memory_space<vmem>>, vector<256x64xbf16>,
    %c2_46 = arith.constant 2 : index
    %c0_47 = arith.constant 0 : index
    %c0_48 = arith.constant 0 : index
    %42 = vector.load %arg10[%c2_46, %c0_47, %c0_48] : memref<18x18x64xbf16, #tpu.memory_space<vmem>>, vector<16x16x64xbf16>
    %43 = vector.shape_cast %42 : vector<16x16x64xbf16> to vector<256x64xbf16>
    %c0_49 = arith.constant 0 : index
    %c384 = arith.constant 384 : index
    %44 = vector.load %arg11[%c0_49, %c384] : memref<256x576xbf16, #tpu.memory_space<vmem>>, vector<256x64xbf16>
    tpu.vector_store %arg11[%c0_49, %c384], %43 {strides = array<i32>} : memref<256x576xbf16, #tpu.memory_space<vmem>>, vector<256x64xbf16>,
    %c2_50 = arith.constant 2 : index
    %c1_51 = arith.constant 1 : index
    %c0_52 = arith.constant 0 : index
    %45 = vector.load %arg10[%c2_50, %c1_51, %c0_52] : memref<18x18x64xbf16, #tpu.memory_space<vmem>>, vector<16x16x64xbf16>
    %46 = vector.shape_cast %45 : vector<16x16x64xbf16> to vector<256x64xbf16>
    %c0_53 = arith.constant 0 : index
    %c448 = arith.constant 448 : index
    %47 = vector.load %arg11[%c0_53, %c448] : memref<256x576xbf16, #tpu.memory_space<vmem>>, vector<256x64xbf16>
    tpu.vector_store %arg11[%c0_53, %c448], %46 {strides = array<i32>} : memref<256x576xbf16, #tpu.memory_space<vmem>>, vector<256x64xbf16>,
    %c2_54 = arith.constant 2 : index
    %c2_55 = arith.constant 2 : index
    %c0_56 = arith.constant 0 : index
    %48 = vector.load %arg10[%c2_54, %c2_55, %c0_56] : memref<18x18x64xbf16, #tpu.memory_space<vmem>>, vector<16x16x64xbf16>
    %49 = vector.shape_cast %48 : vector<16x16x64xbf16> to vector<256x64xbf16>
    %c0_57 = arith.constant 0 : index
    %c512 = arith.constant 512 : index
    %50 = vector.load %arg11[%c0_57, %c512] : memref<256x576xbf16, #tpu.memory_space<vmem>>, vector<256x64xbf16>
    tpu.vector_store %arg11[%c0_57, %c512], %49 {strides = array<i32>} : memref<256x576xbf16, #tpu.memory_space<vmem>>, vector<256x64xbf16>,
    %c0_58 = arith.constant 0 : index
    %c0_59 = arith.constant 0 : index
    %51 = vector.load %arg11[%c0_58, %c0_59] : memref<256x576xbf16, #tpu.memory_space<vmem>>, vector<256x576xbf16>
    %c0_60 = arith.constant 0 : index
    %c0_61 = arith.constant 0 : index
    %52 = vector.load %arg5[%c0_60, %c0_61] : memref<576x64xbf16, #tpu.memory_space<vmem>>, vector<576x64xbf16>
    %cst_62 = arith.constant dense<0.000000e+00> : vector<256x64xf32>
    %53 = tpu.matmul %51, %52, %cst_62 {dimension_numbers = #tpu.dot_dimension_numbers<[1], [0], [0], [1], [0, 0, 1, 1], [], []>} : vector<256x576xbf16>, vector<576x64xbf16>, vector<256x64xf32> -> vector<256x64xf32>
    %c0_63 = arith.constant 0 : index
    %c0_64 = arith.constant 0 : index
    %54 = vector.load %arg6[%c0_63, %c0_64] : memref<1x64xf32, #tpu.memory_space<vmem>>, vector<1x64xf32>
    %55 = vector.broadcast %54 : vector<1x64xf32> to vector<256x64xf32>
    %56 = arith.addf %53, %55 : vector<256x64xf32>
    %cst_65 = arith.constant dense<0.000000e+00> : vector<64xf32>
    %57 = vector.multi_reduction <add>, %56, %cst_65 [0] : vector<256x64xf32> to vector<64xf32>
    %58 = vector.shape_cast %57 : vector<64xf32> to vector<1x64xf32>
    %cst_66 = arith.constant 2.560000e+02 : f32
    %59 = vector.broadcast %cst_66 : f32 to vector<1x64xf32>
    %60 = arith.divf %58, %59 : vector<1x64xf32>
    %c0_67 = arith.constant 0 : index
    %c0_68 = arith.constant 0 : index
    %61 = vector.load %arg7[%c0_67, %c0_68] : memref<8x64xf32, #tpu.memory_space<vmem>>, vector<8x64xf32>
    %62 = vector.broadcast %60 : vector<1x64xf32> to vector<8x64xf32>
    %63 = arith.mulf %62, %61 : vector<8x64xf32>
    %cst_69 = arith.constant dense<0.000000e+00> : vector<8xf32>
    %64 = vector.multi_reduction <add>, %63, %cst_69 [1] : vector<8x64xf32> to vector<8xf32>
    %65 = vector.shape_cast %64 : vector<8xf32> to vector<8x1xf32>
    %cst_70 = arith.constant 0.000000e+00 : f32
    %66 = vector.broadcast %cst_70 : f32 to vector<8x1xf32>
    %67 = arith.maximumf %65, %66 : vector<8x1xf32>
    %c0_71 = arith.constant 0 : index
    %c0_72 = arith.constant 0 : index
    %68 = vector.load %arg8[%c0_71, %c0_72] : memref<8x64xf32, #tpu.memory_space<vmem>>, vector<8x64xf32>
    %69 = vector.broadcast %67 : vector<8x1xf32> to vector<8x64xf32>
    %70 = arith.mulf %69, %68 : vector<8x64xf32>
    %cst_73 = arith.constant dense<0.000000e+00> : vector<64xf32>
    %71 = vector.multi_reduction <add>, %70, %cst_73 [0] : vector<8x64xf32> to vector<64xf32>
    %72 = vector.shape_cast %71 : vector<64xf32> to vector<1x64xf32>
    %73 = arith.negf %72 : vector<1x64xf32>
    %74 = math.exp %73 : vector<1x64xf32>
    %cst_74 = arith.constant 1.000000e+00 : f32
    %75 = vector.broadcast %cst_74 : f32 to vector<1x64xf32>
    %76 = arith.addf %75, %74 : vector<1x64xf32>
    %77 = arith.divf %75, %76 : vector<1x64xf32>
    %78 = vector.broadcast %77 : vector<1x64xf32> to vector<256x64xf32>
    %79 = arith.mulf %56, %78 : vector<256x64xf32>
    %c0_75 = arith.constant 0 : index
    %c0_76 = arith.constant 0 : index
    %c0_77 = arith.constant 0 : index
    %80 = vector.load %arg2[%c0_75, %c0_76, %c0_77] : memref<1x256x64xf32, #tpu.memory_space<vmem>>, vector<1x256x64xf32>
    %81 = vector.shape_cast %80 : vector<1x256x64xf32> to vector<256x64xf32>
    %82 = arith.addf %79, %81 : vector<256x64xf32>
    %c0_78 = arith.constant 0 : index
    %c0_79 = arith.constant 0 : index
    %c0_80 = arith.constant 0 : index
    %83 = vector.load %arg9[%c0_78, %c0_79, %c0_80] : memref<1x256x64xf32, #tpu.memory_space<vmem>>, vector<1x256x64xf32>
    %84 = vector.shape_cast %83 : vector<1x256x64xf32> to vector<256x64xf32>
    %85 = vector.shape_cast %82 : vector<256x64xf32> to vector<1x256x64xf32>
    tpu.vector_store %arg9[%c0_78, %c0_79, %c0_80], %85 {strides = array<i32>} : memref<1x256x64xf32, #tpu.memory_space<vmem>>, vector<1x256x64xf32>,
    return
  }
  func.func @transform_0(%arg0: i32) -> (i32, i32, i32, i32) {
    %c0_i32 = arith.constant 0 : i32
    %c0_i32_0 = arith.constant 0 : i32
    %c0_i32_1 = arith.constant 0 : i32
    %c0_i32_2 = arith.constant 0 : i32
    return %arg0, %c0_i32, %c0_i32_0, %c0_i32_1 : i32, i32, i32, i32
  }
  func.func @transform_1(%arg0: i32) -> (i32, i32, i32) {
    %c0_i32 = arith.constant 0 : i32
    %c0_i32_0 = arith.constant 0 : i32
    %c0_i32_1 = arith.constant 0 : i32
    return %arg0, %c0_i32, %c0_i32_0 : i32, i32, i32
  }
  func.func @transform_2(%arg0: i32) -> (i32, i32) {
    %c0_i32 = arith.constant 0 : i32
    %c0_i32_0 = arith.constant 0 : i32
    %c0_i32_1 = arith.constant 0 : i32
    return %c0_i32, %c0_i32_0 : i32, i32
  }
  func.func @transform_3(%arg0: i32) -> (i32, i32) {
    %c0_i32 = arith.constant 0 : i32
    %c0_i32_0 = arith.constant 0 : i32
    %c0_i32_1 = arith.constant 0 : i32
    return %c0_i32, %c0_i32_0 : i32, i32
  }
  func.func @transform_4(%arg0: i32) -> (i32, i32) {
    %c0_i32 = arith.constant 0 : i32
    %c0_i32_0 = arith.constant 0 : i32
    %c0_i32_1 = arith.constant 0 : i32
    return %c0_i32, %c0_i32_0 : i32, i32
  }
  func.func @transform_5(%arg0: i32) -> (i32, i32) {
    %c0_i32 = arith.constant 0 : i32
    %c0_i32_0 = arith.constant 0 : i32
    %c0_i32_1 = arith.constant 0 : i32
    return %c0_i32, %c0_i32_0 : i32, i32
  }
  func.func @transform_6(%arg0: i32) -> (i32, i32) {
    %c0_i32 = arith.constant 0 : i32
    %c0_i32_0 = arith.constant 0 : i32
    %c0_i32_1 = arith.constant 0 : i32
    return %c0_i32, %c0_i32_0 : i32, i32
  }
  func.func @transform_7(%arg0: i32) -> (i32, i32) {
    %c0_i32 = arith.constant 0 : i32
    %c0_i32_0 = arith.constant 0 : i32
    %c0_i32_1 = arith.constant 0 : i32
    return %c0_i32, %c0_i32_0 : i32, i32
  }
  func.func @transform_8(%arg0: i32) -> (i32, i32, i32) {
    %c0_i32 = arith.constant 0 : i32
    %c0_i32_0 = arith.constant 0 : i32
    %c0_i32_1 = arith.constant 0 : i32
    return %arg0, %c0_i32, %c0_i32_0 : i32, i32, i32
  }
}

</mosaic_0001>

<bundles_post_ra>
// kernel: encoder_res_block_forward.3
= control target key start
LH: loop header
LB: loop body
LE: loop exit
PB: predicated region body
PF: predicated region fallthrough
CT: control target
= control target key end

     0   :  { %vm46_vm0 = vcmask 516096   ;;  %vm119_vm1 = vcmask 523264   ;;  %v471_v0 = vmov 0.0   ;;  %s1361_s0 = inlined_call_operand.vmem [shape: f32[512,64], index: 0, kind: input, shape index: {}]   ;;  %s1362_s1 = inlined_call_operand.vmem [shape: f32[1,1,64], index: 1, kind: output, shape index: {0}]   ;;  %s1363_s2 = inlined_call_operand.vmem [shape: f32[1,1,64], index: 2, kind: output, shape index: {1}]  }
   0x1   :  { %47 = vst.msk [vmem:[%s1362_s1] sm:$0x1] %vm46_vm0, %v471_v0  ;;  %48 = vst.msk [vmem:[%s1363_s2] sm:$0x1] %vm46_vm0, %v471_v0  ;;  %v498_v1 = vld [vmem:[%s1361_s0] sm:$0xff]  ;;  %v503_v2 = vld [vmem:[%s1361_s0 + $0x8] sm:$0xff] }
   0x2   :  { %v508_v3 = vld [vmem:[%s1361_s0 + $0x10] sm:$0xff]  ;;  %v120_v4 = vsel %vm119_vm1, %v498_v1, 0.0  ;;  %v121_v5 = vsel %vm119_vm1, %v503_v2, 0.0  ;;  %v519_v7 = vld [vmem:[%s1361_s0 + $0x18] sm:$0xff]  ;;  %v526_v10 = vld [vmem:[%s1361_s0 + $0x20] sm:$0xff] }
   0x3   :  { %v123_v6 = vsel %vm119_vm1, %v508_v3, 0.0  ;;  %v122_v8 = vadd.f32 %v121_v5, %v120_v4  ;;  %v125_v9 = vsel %vm119_vm1, %v519_v7, 0.0  ;;  %v127_v12 = vsel %vm119_vm1, %v526_v10, 0.0  ;;  %v533_v13 = vld [vmem:[%s1361_s0 + $0x28] sm:$0xff]  ;;  %v540_v16 = vld [vmem:[%s1361_s0 + $0x30] sm:$0xff]  ;;  %v545_v18 = vld [vmem:[%s1361_s0 + $0x38] sm:$0xff] }
   0x4   :  { %v129_v15 = vsel %vm119_vm1, %v533_v13, 0.0  ;;  %v550_v19 = vld [vmem:[%s1361_s0 + $0x40] sm:$0xff]  ;;  %v131_v20 = vsel %vm119_vm1, %v540_v16, 0.0  ;;  %v557_v21 = vld [vmem:[%s1361_s0 + $0x48] sm:$0xff]  ;;  %v562_v22 = vld [vmem:[%s1361_s0 + $0x50] sm:$0xff]  ;;  %v133_v25 = vsel %vm119_vm1, %v545_v18, 0.0 }
   0x5   :  { %v124_v11 = vadd.f32 %v123_v6, %v122_v8  ;;  %v567_v23 = vld [vmem:[%s1361_s0 + $0x58] sm:$0xff]  ;;  %v135_v26 = vsel %vm119_vm1, %v550_v19, 0.0  ;;  %v576_v27 = vld [vmem:[%s1361_s0 + $0x108] sm:$0xff]  ;;  %v581_v28 = vld [vmem:[%s1361_s0 + $0x110] sm:$0xff]  ;;  %v137_v30 = vsel %vm119_vm1, %v557_v21, 0.0  ;;  %v139_v31 = vsel %vm119_vm1, %v562_v22, 0.0 }
   0x6   :  { %v586_v29 = vld [vmem:[%s1361_s0 + $0x118] sm:$0xff]  ;;  %v594_v32 = vsel %vm119_vm1, %v567_v23, 0.0  ;;  %v599_v33 = vld [vmem:[%s1361_s0 + $0x120] sm:$0xff]  ;;  %v604_v34 = vld [vmem:[%s1361_s0 + $0x128] sm:$0xff]  ;;  %v613_v37 = vsel %vm119_vm1, %v576_v27, 0.0  ;;  %v617_v38 = vsel %vm119_vm1, %v581_v28, 0.0 }
   0x7   :  { %v126_v14 = vadd.f32 %v125_v9, %v124_v11  ;;  %v609_v35 = vld [vmem:[%s1361_s0 + $0x130] sm:$0xff]  ;;  %1382 = vst [vmem:[#allocation2_spill] sm:$0xff] %v613_v37  ;;  %1383 = vst [vmem:[#allocation3_spill] sm:$0xff] %v617_v38  ;;  %v621_v39 = vsel %vm119_vm1, %v586_v29, 0.0  ;;  %v626_v40 = vld [vmem:[%s1361_s0 + $0x138] sm:$0xff]  ;;  %v640_v43 = vsel %vm119_vm1, %v599_v33, 0.0  ;;  %v259_v37 = vmul.f32 %v508_v3, %v508_v3 }
   0x8   :  { %1384 = vst [vmem:[#allocation4_spill] sm:$0xff] %v621_v39  ;;  %v631_v41 = vld [vmem:[%s1361_s0 + $0x140] sm:$0xff]  ;;  %v636_v42 = vld [vmem:[%s1361_s0 + $0x148] sm:$0xff]  ;;  %1385 = vst [vmem:[#allocation5_spill] sm:$0xff] %v640_v43  ;;  %v644_v44 = vsel %vm119_vm1, %v604_v34, 0.0  ;;  %v648_v45 = vsel %vm119_vm1, %v609_v35, 0.0 }
   0x9   :  { %v128_v17 = vadd.f32 %v127_v12, %v126_v14  ;;  %1386 = vst [vmem:[#allocation6_spill] sm:$0xff] %v644_v44  ;;  %1387 = vst [vmem:[#allocation7_spill] sm:$0xff] %v648_v45  ;;  %v653_v46 = vld [vmem:[%s1361_s0 + $0x150] sm:$0xff]  ;;  %v658_v47 = vld [vmem:[%s1361_s0 + $0x158] sm:$0xff]  ;;  %v667_v50 = vsel %vm119_vm1, %v626_v40, 0.0  ;;  %v671_v51 = vsel %vm119_vm1, %v631_v41, 0.0 }
   0xa   :  { %v663_v48 = vld [vmem:[%s1361_s0 + $0x160] sm:$0xff]  ;;  %1388 = vst [vmem:[#allocation8_spill] sm:$0xff] %v667_v50  ;;  %1389 = vst [vmem:[#allocation9_spill] sm:$0xff] %v671_v51  ;;  %v675_v52 = vsel %vm119_vm1, %v636_v42, 0.0  ;;  %v680_v53 = vld [vmem:[%s1361_s0 + $0x168] sm:$0xff]  ;;  %v694_v56 = vsel %vm119_vm1, %v653_v46, 0.0 }
   0xb   :  { %v130_v24 = vadd.f32 %v129_v15, %v128_v17  ;;  %1390 = vst [vmem:[#allocation10_spill] sm:$0xff] %v675_v52  ;;  %v685_v54 = vld [vmem:[%s1361_s0 + $0x170] sm:$0xff]  ;;  %v690_v55 = vld [vmem:[%s1361_s0 + $0x178] sm:$0xff]  ;;  %1391 = vst [vmem:[#allocation11_spill] sm:$0xff] %v694_v56  ;;  %v698_v57 = vsel %vm119_vm1, %v658_v47, 0.0  ;;  %v702_v58 = vsel %vm119_vm1, %v663_v48, 0.0 }
   0xc   :  { %1392 = vst [vmem:[#allocation12_spill] sm:$0xff] %v698_v57  ;;  %1393 = vst [vmem:[#allocation13_spill] sm:$0xff] %v702_v58  ;;  %v707_v59 = vld [vmem:[%s1361_s0 + $0x180] sm:$0xff]  ;;  %v712_v60 = vld [vmem:[%s1361_s0 + $0x188] sm:$0xff]  ;;  %v721_v63 = vsel %vm119_vm1, %v680_v53, 0.0  ;;  %v725_v0 = vsel %vm119_vm1, %v685_v54, 0.0 }
   0xd   :  { %v132_v36 = vadd.f32 %v131_v20, %v130_v24  ;;  %v717_v61 = vld [vmem:[%s1361_s0 + $0x190] sm:$0xff]  ;;  %1394 = vst [vmem:[#allocation14_spill] sm:$0xff] %v721_v63  ;;  %1395 = vst [vmem:[#allocation15_spill] sm:$0xff] %v725_v0  ;;  %v729_v4 = vsel %vm119_vm1, %v690_v55, 0.0  ;;  %v734_v5 = vld [vmem:[%s1361_s0 + $0x198] sm:$0xff]  ;;  %v748_v9 = vsel %vm119_vm1, %v707_v59, 0.0 }
   0xe   :  { %1396 = vst [vmem:[#allocation16_spill] sm:$0xff] %v729_v4  ;;  %v739_v6 = vld [vmem:[%s1361_s0 + $0x1a0] sm:$0xff]  ;;  %v744_v8 = vld [vmem:[%s1361_s0 + $0x1a8] sm:$0xff]  ;;  %1397 = vst [vmem:[#allocation17_spill] sm:$0xff] %v748_v9  ;;  %v752_v11 = vsel %vm119_vm1, %v712_v60, 0.0  ;;  %v756_v12 = vsel %vm119_vm1, %v717_v61, 0.0 }
   0xf   :  { %v134_v49 = vadd.f32 %v133_v25, %v132_v36  ;;  %1398 = vst [vmem:[#allocation18_spill] sm:$0xff] %v752_v11  ;;  %1399 = vst [vmem:[#allocation19_spill] sm:$0xff] %v756_v12  ;;  %v761_v14 = vld [vmem:[%s1361_s0 + $0x60] sm:$0xff]  ;;  %v766_v15 = vld [vmem:[%s1361_s0 + $0x1b0] sm:$0xff]  ;;  %v780_v25 = vsel %vm119_vm1, %v734_v5, 0.0  ;;  %v788_v36 = vsel %vm119_vm1, %v744_v8, 0.0 }
  0x10   :  { %v771_v17 = vld [vmem:[%s1361_s0 + $0x1b8] sm:$0xff]  ;;  %v776_v20 = vld [vmem:[%s1361_s0 + $0x1c0] sm:$0xff]  ;;  %1400 = vst [vmem:[#allocation20_spill] sm:$0xff] %v780_v25  ;;  %1402 = vst [vmem:[#allocation22_spill] sm:$0xff] %v788_v36 }
  0x11   :  { %v136_v62 = vadd.f32 %v135_v26, %v134_v49  ;;  %v784_v26 = vsel %vm119_vm1, %v739_v6, 0.0  ;;  %v793_v49 = vld [vmem:[%s1361_s0 + $0x1c8] sm:$0xff]  ;;  %v811_v36 = vsel %vm119_vm1, %v771_v17, 0.0  ;;  %v815_v25 = vsel %vm119_vm1, %v776_v20, 0.0  ;;  %v820_v12 = vld [vmem:[%s1361_s0 + $0x1e0] sm:$0xff]  ;;  %v847_v0 = vld [vmem:[%s1361_s0 + $0x1f8] sm:$0xff] }
  0x12   :  { %1401 = vst [vmem:[#allocation21_spill] sm:$0xff] %v784_v26  ;;  %v807_v26 = vsel %vm119_vm1, %v766_v15, 0.0  ;;  %1404 = vst [vmem:[#allocation24_spill] sm:$0xff] %v811_v36  ;;  %v825_v11 = vld [vmem:[%s1361_s0 + $0x1e8] sm:$0xff]  ;;  %v834_v9 = vsel %vm119_vm1, %v793_v49, 0.0  ;;  %v869_v58 = vsel %vm119_vm1, %v847_v0, 0.0 }
  0x13   :  { %v138_v24 = vadd.f32 %v137_v30, %v136_v62  ;;  %v798_v30 = vld [vmem:[%s1361_s0 + $0x1d0] sm:$0xff]  ;;  %v803_v62 = vld [vmem:[%s1361_s0 + $0x1d8] sm:$0xff]  ;;  %1403 = vst [vmem:[#allocation23_spill] sm:$0xff] %v807_v26  ;;  %1405 = vst [vmem:[#allocation25_spill] sm:$0xff] %v815_v25 }
  0x14   :  { %v830_v26 = vld [vmem:[%s1361_s0 + $0x1f0] sm:$0xff]  ;;  %1407 = vst [vmem:[#allocation27_spill] sm:$0xff] %v834_v9  ;;  %v838_v25 = vsel %vm119_vm1, %v798_v30, 0.0  ;;  %v842_v4 = vsel %vm119_vm1, %v803_v62, 0.0  ;;  %1410 = vst [vmem:[#allocation30_spill] sm:$0xff] %v847_v0  ;;  %v857_v9 = vsel %vm119_vm1, %v825_v11, 0.0 }
  0x15   :  { %1406 = vst [vmem:[#allocation26_spill] sm:$0xff] %v830_v26  ;;  %v140_v36 = vadd.f32 %v139_v31, %v138_v24  ;;  %1408 = vst [vmem:[#allocation28_spill] sm:$0xff] %v838_v25  ;;  %v143_v31 = vsel %vm119_vm1, %v761_v14, 0.0  ;;  %v853_v24 = vsel %vm119_vm1, %v820_v12, 0.0  ;;  %v861_v25 = vsel %vm119_vm1, %v830_v26, 0.0  ;;  %v898_v56 = vld [vmem:[%s1361_s0 + $0x90] sm:$0xff] }
  0x16   :  { %1409 = vst [vmem:[#allocation29_spill] sm:$0xff] %v842_v4  ;;  %1411 = vst [vmem:[#allocation31_spill] sm:$0xff] %v853_v24  ;;  %v67_v4 = vld [vmem:[%s1361_s0 + $0x68] sm:$0xff]  ;;  %v903_v52 = vld [vmem:[%s1361_s0 + $0x98] sm:$0xff] }
  0x17   :  { %1412 = vst [vmem:[#allocation32_spill] sm:$0xff] %v857_v9  ;;  %1413 = vst [vmem:[#allocation33_spill] sm:$0xff] %v861_v25  ;;  %v142_v63 = vadd.f32 %v594_v32, %v140_v36  ;;  %v145_v24 = vsel %vm119_vm1, %v67_v4, 0.0  ;;  %v68_v9 = vld [vmem:[%s1361_s0 + $0x70] sm:$0xff]  ;;  %v878_v25 = vld [vmem:[%s1361_s0 + $0x78] sm:$0xff]  ;;  %v157_v39 = vsel %vm119_vm1, %v903_v52, 0.0 }
  0x18   :  { %1414 = vst [vmem:[#allocation34_spill] sm:$0xff] %v869_v58  ;;  %1415 = vst [vmem:[#allocation35_spill] sm:$0xff] %v878_v25  ;;  %v883_v32 = vld [vmem:[%s1361_s0 + $0x80] sm:$0xff]  ;;  %v888_v36 = vld [vmem:[%s1361_s0 + $0x88] sm:$0xff]  ;;  %v147_v58 = vsel %vm119_vm1, %v68_v9, 0.0 }
  0x19   :  { %v144_v57 = vadd.f32 %v143_v31, %v142_v63  ;;  %1416 = vst [vmem:[#allocation36_spill] sm:$0xff] %v883_v32  ;;  %1417 = vst [vmem:[#allocation37_spill] sm:$0xff] %v888_v36  ;;  %v257_v63 = vmul.f32 %v498_v1, %v498_v1  ;;  %v258_v31 = vmul.f32 %v503_v2, %v503_v2  ;;  %v908_v51 = vld [vmem:[%s1361_s0 + $0xa0] sm:$0xff]  ;;  %v149_v1 = vsel %vm119_vm1, %v878_v25, 0.0  ;;  %v919_v44 = vld [vmem:[%s1361_s0 + $0xa8] sm:$0xff] }
  0x1a   :  { %1418 = vst [vmem:[#allocation38_spill] sm:$0xff] %v898_v56  ;;  %1419 = vst [vmem:[#allocation39_spill] sm:$0xff] %v903_v52  ;;  %v151_v2 = vsel %vm119_vm1, %v883_v32, 0.0  ;;  %v153_v45 = vsel %vm119_vm1, %v888_v36, 0.0  ;;  %v924_v43 = vld [vmem:[%s1361_s0 + $0xb0] sm:$0xff]  ;;  %v159_v38 = vsel %vm119_vm1, %v908_v51, 0.0  ;;  %v260_v25 = vmul.f32 %v519_v7, %v519_v7 }
  0x1b   :  { %1420 = vst [vmem:[#allocation40_spill] sm:$0xff] %v908_v51  ;;  %v146_v50 = vadd.f32 %v145_v24, %v144_v57  ;;  %1421 = vst [vmem:[#allocation41_spill] sm:$0xff] %v919_v44  ;;  %v929_v57 = vld [vmem:[%s1361_s0 + $0xb8] sm:$0xff]  ;;  %v155_v24 = vsel %vm119_vm1, %v898_v56, 0.0  ;;  %v942_v36 = vld [vmem:[%s1361_s0 + $0xc0] sm:$0xff]  ;;  %v161_v51 = vsel %vm119_vm1, %v919_v44, 0.0 }
  0x1c   :  { %1422 = vst [vmem:[#allocation42_spill] sm:$0xff] %v924_v43  ;;  %1423 = vst [vmem:[#allocation43_spill] sm:$0xff] %v929_v57  ;;  %v947_v32 = vld [vmem:[%s1361_s0 + $0xc8] sm:$0xff]  ;;  %v952_v52 = vld [vmem:[%s1361_s0 + $0xd0] sm:$0xff]  ;;  %v958_v3 = vsel %vm119_vm1, %v924_v43, 0.0 }
  0x1d   :  { %1424 = vst [vmem:[#allocation44_spill] sm:$0xff] %v942_v36  ;;  %1425 = vst [vmem:[#allocation45_spill] sm:$0xff] %v947_v32  ;;  %v148_v56 = vadd.f32 %v147_v58, %v146_v50  ;;  %v965_v0 = vld [vmem:[%s1361_s0 + $0xd8] sm:$0xff]  ;;  %v970_v26 = vld [vmem:[%s1361_s0 + $0xe0] sm:$0xff]  ;;  %v974_v50 = vsel %vm119_vm1, %v929_v57, 0.0  ;;  %v978_v58 = vsel %vm119_vm1, %v942_v36, 0.0 }
  0x1e   :  { %1426 = vst [vmem:[#allocation46_spill] sm:$0xff] %v952_v52  ;;  %1427 = vst [vmem:[#allocation47_spill] sm:$0xff] %v965_v0  ;;  %v982_v7 = vsel %vm119_vm1, %v947_v32, 0.0  ;;  %v986_v43 = vsel %vm119_vm1, %v952_v52, 0.0  ;;  %v991_v44 = vld [vmem:[%s1361_s0 + $0xe8] sm:$0xff]  ;;  %v996_v57 = vld [vmem:[%s1361_s0 + $0xf0] sm:$0xff]  ;;  %v261_v52 = vmul.f32 %v526_v10, %v526_v10  ;;  %v265_v10 = vmul.f32 %v550_v19, %v550_v19 }
  0x1f   :  { %1428 = vst [vmem:[#allocation48_spill] sm:$0xff] %v970_v26  ;;  %1429 = vst [vmem:[#allocation49_spill] sm:$0xff] %v978_v58  ;;  %v150_v36 = vadd.f32 %v149_v1, %v148_v56  ;;  %v1000_v58 = vsel %vm119_vm1, %v965_v0, 0.0  ;;  %v1004_v32 = vsel %vm119_vm1, %v970_v26, 0.0  ;;  %v262_v56 = vmul.f32 %v533_v13, %v533_v13 }
  0x20   :  { %1430 = vst [vmem:[#allocation50_spill] sm:$0xff] %v982_v7  ;;  %1431 = vst [vmem:[#allocation51_spill] sm:$0xff] %v986_v43  ;;  %v1010_v43 = vsel %vm119_vm1, %v991_v44, 0.0  ;;  %v1014_v7 = vsel %vm119_vm1, %v996_v57, 0.0  ;;  %v263_v1 = vmul.f32 %v540_v16, %v540_v16  ;;  %v264_v26 = vmul.f32 %v545_v18, %v545_v18 }
  0x21   :  { %1432 = vst [vmem:[#allocation52_spill] sm:$0xff] %v991_v44  ;;  %1433 = vst [vmem:[#allocation53_spill] sm:$0xff] %v996_v57  ;;  %v152_v0 = vadd.f32 %v151_v2, %v150_v36  ;;  %v266_v44 = vmul.f32 %v557_v21, %v557_v21  ;;  %v267_v57 = vmul.f32 %v562_v22, %v562_v22 }
  0x22   :  { %1434 = vst [vmem:[#allocation54_spill] sm:$0xff] %v1014_v7  ;;  %v268_v7 = vmul.f32 %v567_v23, %v567_v23  ;;  %v269_v13 = vmul.f32 %v761_v14, %v761_v14  ;;  %v1032_v16 = vmul.f32 %v67_v4, %v67_v4  ;;  %v1034_v2 = vmul.f32 %v68_v9, %v68_v9 }
  0x23   :  { %v154_v36 = vadd.f32 %v153_v45, %v152_v0  ;;  %v290_v18 = vmul.f32 %v576_v27, %v576_v27  ;;  %v291_v19 = vmul.f32 %v581_v28, %v581_v28  ;;  %v292_v21 = vmul.f32 %v586_v29, %v586_v29 }
  0x24   :  { %v293_v22 = vmul.f32 %v599_v33, %v599_v33  ;;  %v294_v23 = vmul.f32 %v604_v34, %v604_v34  ;;  %v295_v45 = vmul.f32 %v609_v35, %v609_v35  ;;  %v296_v4 = vmul.f32 %v626_v40, %v626_v40 }
  0x25   :  { %v156_v0 = vadd.f32 %v155_v24, %v154_v36  ;;  %v297_v27 = vmul.f32 %v631_v41, %v631_v41  ;;  %v298_v28 = vmul.f32 %v636_v42, %v636_v42  ;;  %v299_v29 = vmul.f32 %v653_v46, %v653_v46 }
  0x26   :  { %v300_v33 = vmul.f32 %v658_v47, %v658_v47  ;;  %v321_v34 = vsel %vm119_vm1, %v257_v63, 0.0  ;;  %v322_v35 = vsel %vm119_vm1, %v258_v31, 0.0  ;;  %v301_v40 = vmul.f32 %v663_v48, %v663_v48 }
  0x27   :  { %v158_v9 = vadd.f32 %v157_v39, %v156_v0  ;;  %v323_v14 = vadd.f32 %v322_v35, %v321_v34  ;;  %v324_v41 = vsel %vm119_vm1, %v259_v37, 0.0  ;;  %v302_v42 = vmul.f32 %v680_v53, %v680_v53  ;;  %v1435_v0 = vld [vmem:[#allocation26_spill] sm:$0xff] }
  0x28   :  { %v303_v46 = vmul.f32 %v685_v54, %v685_v54  ;;  %v304_v47 = vmul.f32 %v690_v55, %v690_v55  ;;  %v326_v63 = vsel %vm119_vm1, %v260_v25, 0.0  ;;  %v305_v39 = vmul.f32 %v707_v59, %v707_v59  ;;  %v1436_v34 = vld [vmem:[#allocation30_spill] sm:$0xff] }
  0x29   :  { %v160_v24 = vadd.f32 %v159_v38, %v158_v9  ;;  %v306_v48 = vmul.f32 %v712_v60, %v712_v60  ;;  %v325_v31 = vadd.f32 %v324_v41, %v323_v14  ;;  %v307_v37 = vmul.f32 %v717_v61, %v717_v61  ;;  %v1437_v41 = vld [vmem:[#allocation49_spill] sm:$0xff] }
  0x2a   :  { %v308_v53 = vmul.f32 %v734_v5, %v734_v5  ;;  %v309_v54 = vmul.f32 %v739_v6, %v739_v6  ;;  %v328_v55 = vsel %vm119_vm1, %v261_v52, 0.0  ;;  %v310_v38 = vmul.f32 %v744_v8, %v744_v8 }
  0x2b   :  { %v162_v25 = vadd.f32 %v161_v51, %v160_v24  ;;  %v311_v59 = vmul.f32 %v766_v15, %v766_v15  ;;  %v327_v60 = vadd.f32 %v326_v63, %v325_v31  ;;  %v312_v36 = vmul.f32 %v771_v17, %v771_v17 }
  0x2c   :  { %v313_v61 = vmul.f32 %v776_v20, %v776_v20  ;;  %v314_v5 = vmul.f32 %v793_v49, %v793_v49  ;;  %v330_v6 = vsel %vm119_vm1, %v262_v56, 0.0  ;;  %v315_v52 = vmul.f32 %v798_v30, %v798_v30 }
  0x2d   :  { %v164_v51 = vadd.f32 %v958_v3, %v162_v25  ;;  %v316_v8 = vmul.f32 %v803_v62, %v803_v62  ;;  %v329_v15 = vadd.f32 %v328_v55, %v327_v60  ;;  %v317_v17 = vmul.f32 %v820_v12, %v820_v12  ;;  %v1439_v25 = vld [vmem:[#allocation51_spill] sm:$0xff] }
  0x2e   :  { %v318_v20 = vmul.f32 %v825_v11, %v825_v11  ;;  %v319_v49 = vmul.f32 %v1435_v0, %v1435_v0  ;;  %v332_v56 = vsel %vm119_vm1, %v263_v1, 0.0  ;;  %v320_v30 = vmul.f32 %v1436_v34, %v1436_v34  ;;  %v1441_v34 = vld [vmem:[#allocation54_spill] sm:$0xff] }
  0x2f   :  { %v166_v3 = vadd.f32 %v974_v50, %v164_v51  ;;  %v331_v35 = vadd.f32 %v330_v6, %v329_v15  ;;  %v334_v62 = vsel %vm119_vm1, %v264_v26, 0.0  ;;  %v336_v9 = vsel %vm119_vm1, %v265_v10, 0.0 }
  0x30   :  { %v338_v12 = vsel %vm119_vm1, %v266_v44, 0.0  ;;  %v340_v14 = vsel %vm119_vm1, %v267_v57, 0.0  ;;  %v342_v11 = vsel %vm119_vm1, %v268_v7, 0.0  ;;  %v344_v1 = vsel %vm119_vm1, %v269_v13, 0.0  ;;  %v1438_v7 = vld [vmem:[#allocation50_spill] sm:$0xff] }
  0x31   :  { %v168_v63 = vadd.f32 %v1437_v41, %v166_v3  ;;  %v333_v24 = vadd.f32 %v332_v56, %v331_v35  ;;  %v1115_v50 = vsel %vm119_vm1, %v290_v18, 0.0  ;;  %v1118_v31 = vsel %vm119_vm1, %v291_v19, 0.0  ;;  %v1440_v56 = vld [vmem:[#allocation35_spill] sm:$0xff] }
  0x32   :  { %v1121_v26 = vsel %vm119_vm1, %v292_v21, 0.0  ;;  %v1124_v44 = vsel %vm119_vm1, %v293_v22, 0.0  ;;  %v1127_v57 = vsel %vm119_vm1, %v294_v23, 0.0  ;;  %v1131_v13 = vsel %vm119_vm1, %v295_v45, 0.0 }
  0x33   :  { %v170_v10 = vadd.f32 %v1438_v7, %v168_v63  ;;  %v335_v55 = vadd.f32 %v334_v62, %v333_v24  ;;  %v1134_v18 = vsel %vm119_vm1, %v296_v4, 0.0  ;;  %v1137_v19 = vsel %vm119_vm1, %v297_v27, 0.0  ;;  %v1442_v62 = vld [vmem:[#allocation36_spill] sm:$0xff] }
  0x34   :  { %v1140_v21 = vsel %vm119_vm1, %v298_v28, 0.0  ;;  %v1143_v22 = vsel %vm119_vm1, %v299_v29, 0.0  ;;  %v1146_v23 = vsel %vm119_vm1, %v300_v33, 0.0  ;;  %v1150_v45 = vsel %vm119_vm1, %v301_v40, 0.0 }
  0x35   :  { %v172_v60 = vadd.f32 %v1439_v25, %v170_v10  ;;  %v337_v6 = vadd.f32 %v336_v9, %v335_v55  ;;  %v1153_v4 = vsel %vm119_vm1, %v302_v42, 0.0  ;;  %v1156_v27 = vsel %vm119_vm1, %v303_v46, 0.0  ;;  %v1444_v10 = vld [vmem:[#allocation38_spill] sm:$0xff] }
  0x36   :  { %v1159_v28 = vsel %vm119_vm1, %v304_v47, 0.0  ;;  %v1162_v29 = vsel %vm119_vm1, %v305_v39, 0.0  ;;  %v1165_v33 = vsel %vm119_vm1, %v306_v48, 0.0  ;;  %v1169_v40 = vsel %vm119_vm1, %v307_v37, 0.0  ;;  %v1445_v25 = vld [vmem:[#allocation2_spill] sm:$0xff] }
  0x37   :  { %v174_v51 = vadd.f32 %v1000_v58, %v172_v60  ;;  %v339_v15 = vadd.f32 %v338_v12, %v337_v6  ;;  %v1172_v42 = vsel %vm119_vm1, %v308_v53, 0.0  ;;  %v1175_v46 = vsel %vm119_vm1, %v309_v54, 0.0 }
  0x38   :  { %v1178_v47 = vsel %vm119_vm1, %v310_v38, 0.0  ;;  %v1181_v39 = vsel %vm119_vm1, %v311_v59, 0.0  ;;  %v1184_v48 = vsel %vm119_vm1, %v312_v36, 0.0  ;;  %v1188_v37 = vsel %vm119_vm1, %v313_v61, 0.0 }
  0x39   :  { %v176_v58 = vadd.f32 %v1004_v32, %v174_v51  ;;  %v341_v0 = vadd.f32 %v340_v14, %v339_v15  ;;  %v1191_v53 = vsel %vm119_vm1, %v314_v5, 0.0  ;;  %v1194_v54 = vsel %vm119_vm1, %v315_v52, 0.0  ;;  %v1208_v32 = vld [vmem:[%s1361_s0 + $0xf8] sm:$0xff]  ;;  %v1446_v51 = vld [vmem:[#allocation39_spill] sm:$0xff] }
  0x3a   :  { %v1197_v38 = vsel %vm119_vm1, %v316_v8, 0.0  ;;  %v1200_v59 = vsel %vm119_vm1, %v317_v17, 0.0  ;;  %v1203_v36 = vsel %vm119_vm1, %v318_v20, 0.0  ;;  %v1212_v52 = vsel %vm119_vm1, %v319_v49, 0.0 }
  0x3b   :  { %v178_v61 = vadd.f32 %v1010_v43, %v176_v58  ;;  %v343_v5 = vadd.f32 %v342_v11, %v341_v0  ;;  %v1215_v8 = vsel %vm119_vm1, %v320_v30, 0.0  ;;  %v181_v17 = vsel %vm119_vm1, %v1208_v32, 0.0  ;;  %v1226_v43 = vld [vmem:[%s1361_s0 + $0x100] sm:$0xff]  ;;  %v1447_v58 = vld [vmem:[#allocation3_spill] sm:$0xff] }
  0x3c   :  { %v272_v20 = vmul.f32 %v1440_v56, %v1440_v56  ;;  %v346_v3 = vsel %vm119_vm1, %v1032_v16, 0.0  ;;  %v183_v30 = vsel %vm119_vm1, %v1226_v43, 0.0  ;;  %v273_v9 = vmul.f32 %v1442_v62, %v1442_v62  ;;  %v1443_v16 = vld [vmem:[#allocation37_spill] sm:$0xff] }
  0x3d   :  { %v180_v49 = vadd.f32 %v1441_v34, %v178_v61  ;;  %v345_v35 = vadd.f32 %v344_v1, %v343_v5  ;;  %v348_v12 = vsel %vm119_vm1, %v1034_v2, 0.0  ;;  %v274_v41 = vmul.f32 %v1443_v16, %v1443_v16  ;;  %v1448_v5 = vld [vmem:[#allocation40_spill] sm:$0xff]  ;;  %v1451_v62 = vld [vmem:[#allocation5_spill] sm:$0xff] }
  0x3e   :  { %v350_v63 = vsel %vm119_vm1, %v272_v20, 0.0  ;;  %v275_v1 = vmul.f32 %v1444_v10, %v1444_v10  ;;  %v352_v55 = vsel %vm119_vm1, %v273_v9, 0.0  ;;  %v276_v2 = vmul.f32 %v1446_v51, %v1446_v51  ;;  %v1449_v20 = vld [vmem:[#allocation4_spill] sm:$0xff] }
  0x3f   :  { %v182_v14 = vadd.f32 %v181_v17, %v180_v49  ;;  %v347_v11 = vadd.f32 %v346_v3, %v345_v35  ;;  %v354_v15 = vsel %vm119_vm1, %v274_v41, 0.0  ;;  %v277_v17 = vmul.f32 %v1448_v5, %v1448_v5  ;;  %v1450_v49 = vld [vmem:[#allocation41_spill] sm:$0xff]  ;;  %v1453_v41 = vld [vmem:[#allocation6_spill] sm:$0xff] }
  0x40   :  { %v356_v56 = vsel %vm119_vm1, %v275_v1, 0.0  ;;  %v278_v35 = vmul.f32 %v1450_v49, %v1450_v49 }
  0x41   :  { %v184_v24 = vadd.f32 %v183_v30, %v182_v14  ;;  %v349_v7 = vadd.f32 %v348_v12, %v347_v11  ;;  %v358_v30 = vsel %vm119_vm1, %v276_v2, 0.0  ;;  %v1452_v14 = vld [vmem:[#allocation42_spill] sm:$0xff]  ;;  %v360_v16 = vsel %vm119_vm1, %v277_v17, 0.0 }
  0x42   :  { %v279_v11 = vmul.f32 %v1452_v14, %v1452_v14  ;;  %v362_v1 = vsel %vm119_vm1, %v278_v35, 0.0 }
  0x43   :  { %v186_v60 = vadd.f32 %v1445_v25, %v184_v24  ;;  %v351_v6 = vadd.f32 %v350_v63, %v349_v7  ;;  %v1454_v7 = vld [vmem:[#allocation43_spill] sm:$0xff] }
  0x44   :  { %v280_v10 = vmul.f32 %v1454_v7, %v1454_v7  ;;  %v364_v2 = vsel %vm119_vm1, %v279_v11, 0.0 }
  0x45   :  { %v188_v0 = vadd.f32 %v1447_v58, %v186_v60  ;;  %v353_v61 = vadd.f32 %v352_v55, %v351_v6  ;;  %v1455_v55 = vld [vmem:[#allocation7_spill] sm:$0xff]  ;;  %v1456_v6 = vld [vmem:[#allocation44_spill] sm:$0xff] }
  0x46   :  { %v281_v51 = vmul.f32 %v1456_v6, %v1456_v6  ;;  %v366_v17 = vsel %vm119_vm1, %v280_v10, 0.0 }
  0x47   :  { %v190_v3 = vadd.f32 %v1449_v20, %v188_v0  ;;  %v355_v34 = vadd.f32 %v354_v15, %v353_v61  ;;  %v1457_v15 = vld [vmem:[#allocation8_spill] sm:$0xff]  ;;  %v1458_v61 = vld [vmem:[#allocation45_spill] sm:$0xff] }
  0x48   :  { %v282_v5 = vmul.f32 %v1458_v61, %v1458_v61  ;;  %v368_v35 = vsel %vm119_vm1, %v281_v51, 0.0 }
  0x49   :  { %v192_v9 = vadd.f32 %v1451_v62, %v190_v3  ;;  %v357_v12 = vadd.f32 %v356_v56, %v355_v34  ;;  %v1459_v56 = vld [vmem:[#allocation9_spill] sm:$0xff]  ;;  %v1460_v34 = vld [vmem:[#allocation46_spill] sm:$0xff] }
  0x4a   :  { %v283_v49 = vmul.f32 %v1460_v34, %v1460_v34  ;;  %v370_v11 = vsel %vm119_vm1, %v282_v5, 0.0 }
  0x4b   :  { %v194_v63 = vadd.f32 %v1453_v41, %v192_v9  ;;  %v359_v24 = vadd.f32 %v358_v30, %v357_v12  ;;  %v1461_v30 = vld [vmem:[#allocation10_spill] sm:$0xff]  ;;  %v1462_v12 = vld [vmem:[#allocation47_spill] sm:$0xff] }
  0x4c   :  { %v284_v14 = vmul.f32 %v1462_v12, %v1462_v12  ;;  %v372_v10 = vsel %vm119_vm1, %v283_v49, 0.0  ;;  %v1470_v49 = vld [vmem:[#allocation15_spill] sm:$0xff]  ;;  %v1471_v12 = vld [vmem:[#allocation16_spill] sm:$0xff] }
  0x4d   :  { %v196_v25 = vadd.f32 %v1455_v55, %v194_v63  ;;  %v361_v60 = vadd.f32 %v360_v16, %v359_v24  ;;  %v1463_v16 = vld [vmem:[#allocation11_spill] sm:$0xff]  ;;  %v1464_v24 = vld [vmem:[#allocation48_spill] sm:$0xff] }
  0x4e   :  { %v285_v7 = vmul.f32 %v1464_v24, %v1464_v24  ;;  %v374_v51 = vsel %vm119_vm1, %v284_v14, 0.0 }
  0x4f   :  { %v198_v58 = vadd.f32 %v1457_v15, %v196_v25  ;;  %v363_v0 = vadd.f32 %v362_v1, %v361_v60  ;;  %v1465_v1 = vld [vmem:[#allocation12_spill] sm:$0xff] }
  0x50   :  { %v1466_v60 = vld [vmem:[#allocation52_spill] sm:$0xff]  ;;  %v376_v5 = vsel %vm119_vm1, %v285_v7, 0.0  ;;  %v1473_v7 = vld [vmem:[#allocation18_spill] sm:$0xff] }
  0x51   :  { %v200_v20 = vadd.f32 %v1459_v56, %v198_v58  ;;  %v365_v3 = vadd.f32 %v364_v2, %v363_v0  ;;  %v286_v6 = vmul.f32 %v1466_v60, %v1466_v60  ;;  %v1467_v2 = vld [vmem:[#allocation13_spill] sm:$0xff] }
  0x52   :  { %v1468_v0 = vld [vmem:[#allocation53_spill] sm:$0xff] }
  0x53   :  { %v202_v62 = vadd.f32 %v1461_v30, %v200_v20  ;;  %v367_v9 = vadd.f32 %v366_v17, %v365_v3  ;;  %v287_v61 = vmul.f32 %v1468_v0, %v1468_v0  ;;  %v1469_v17 = vld [vmem:[#allocation14_spill] sm:$0xff]  ;;  %v288_v3 = vmul.f32 %v1208_v32, %v1208_v32 }
  0x54   :  { %v378_v34 = vsel %vm119_vm1, %v286_v6, 0.0  ;;  %v1475_v6 = vld [vmem:[#allocation20_spill] sm:$0xff]  ;;  %v1477_v0 = vld [vmem:[#allocation22_spill] sm:$0xff] }
  0x55   :  { %v204_v41 = vadd.f32 %v1463_v16, %v202_v62  ;;  %v369_v63 = vadd.f32 %v368_v35, %v367_v9  ;;  %v289_v62 = vmul.f32 %v1226_v43, %v1226_v43  ;;  %v380_v9 = vsel %vm119_vm1, %v287_v61, 0.0 }
  0x56   :  { %v382_v16 = vsel %vm119_vm1, %v288_v3, 0.0  ;;  %v1479_v3 = vld [vmem:[#allocation24_spill] sm:$0xff] }
  0x57   :  { %v206_v55 = vadd.f32 %v1465_v1, %v204_v41  ;;  %v371_v25 = vadd.f32 %v370_v11, %v369_v63  ;;  %v1472_v41 = vld [vmem:[#allocation17_spill] sm:$0xff]  ;;  %v384_v32 = vsel %vm119_vm1, %v289_v62, 0.0  ;;  %v1481_v62 = vld [vmem:[#allocation27_spill] sm:$0xff] }
  0x59   :  { %v208_v15 = vadd.f32 %v1467_v2, %v206_v55  ;;  %v373_v58 = vadd.f32 %v372_v10, %v371_v25  ;;  %v1474_v55 = vld [vmem:[#allocation19_spill] sm:$0xff]  ;;  %v1476_v2 = vld [vmem:[#allocation21_spill] sm:$0xff] }
  0x5b   :  { %v210_v56 = vadd.f32 %v1469_v17, %v208_v15  ;;  %v375_v20 = vadd.f32 %v374_v51, %v373_v58  ;;  %v1478_v17 = vld [vmem:[#allocation23_spill] sm:$0xff] }
  0x5d   :  { %v212_v35 = vadd.f32 %v1470_v49, %v210_v56  ;;  %v377_v30 = vadd.f32 %v376_v5, %v375_v20 }
  0x5f   :  { %v214_v14 = vadd.f32 %v1471_v12, %v212_v35  ;;  %v379_v11 = vadd.f32 %v378_v34, %v377_v30  ;;  %v1480_v35 = vld [vmem:[#allocation25_spill] sm:$0xff]  ;;  %v1482_v12 = vld [vmem:[#allocation28_spill] sm:$0xff] }
  0x61   :  { %v216_v63 = vadd.f32 %v1472_v41, %v214_v14  ;;  %v381_v24 = vadd.f32 %v380_v9, %v379_v11  ;;  %v1483_v11 = vld [vmem:[#allocation29_spill] sm:$0xff]  ;;  %v1484_v41 = vld [vmem:[#allocation31_spill] sm:$0xff] }
  0x63   :  { %v218_v10 = vadd.f32 %v1473_v7, %v216_v63  ;;  %v383_v1 = vadd.f32 %v382_v16, %v381_v24  ;;  %v1485_v24 = vld [vmem:[#allocation32_spill] sm:$0xff]  ;;  %v1486_v7 = vld [vmem:[#allocation33_spill] sm:$0xff] }
  0x65   :  { %v220_v25 = vadd.f32 %v1474_v55, %v218_v10  ;;  %v385_v60 = vadd.f32 %v384_v32, %v383_v1  ;;  %v1487_v1 = vld [vmem:[#allocation34_spill] sm:$0xff] }
  0x67   :  { %v222_v43 = vadd.f32 %v1475_v6, %v220_v25  ;;  %v387_v51 = vadd.f32 %v1115_v50, %v385_v60 }
  0x69   :  { %v224_v15 = vadd.f32 %v1476_v2, %v222_v43  ;;  %v389_v58 = vadd.f32 %v1118_v31, %v387_v51 }
  0x6b   :  { %v226_v61 = vadd.f32 %v1477_v0, %v224_v15  ;;  %v391_v5 = vadd.f32 %v1121_v26, %v389_v58 }
  0x6d   :  { %v228_v56 = vadd.f32 %v1478_v17, %v226_v61  ;;  %v393_v20 = vadd.f32 %v1124_v44, %v391_v5 }
  0x6f   :  { %v230_v34 = vadd.f32 %v1479_v3, %v228_v56  ;;  %v395_v49 = vadd.f32 %v1127_v57, %v393_v20 }
  0x71   :  { %v232_v30 = vadd.f32 %v1480_v35, %v230_v34  ;;  %v397_v50 = vadd.f32 %v1131_v13, %v395_v49 }
  0x73   :  { %v234_v9 = vadd.f32 %v1481_v62, %v232_v30  ;;  %v399_v31 = vadd.f32 %v1134_v18, %v397_v50 }
  0x75   :  { %v236_v14 = vadd.f32 %v1482_v12, %v234_v9  ;;  %v401_v26 = vadd.f32 %v1137_v19, %v399_v31 }
  0x77   :  { %v238_v16 = vadd.f32 %v1483_v11, %v236_v14  ;;  %v403_v44 = vadd.f32 %v1140_v21, %v401_v26 }
  0x79   :  { %v240_v63 = vadd.f32 %v1484_v41, %v238_v16  ;;  %v405_v57 = vadd.f32 %v1143_v22, %v403_v44 }
  0x7b   :  { %v242_v32 = vadd.f32 %v1485_v24, %v240_v63  ;;  %v407_v13 = vadd.f32 %v1146_v23, %v405_v57 }
  0x7d   :  { %v244_v10 = vadd.f32 %v1486_v7, %v242_v32  ;;  %v409_v18 = vadd.f32 %v1150_v45, %v407_v13  ;;  %v118_v45 = vld [vmem:[%s1362_s1] sm:$0x1] }
  0x7f   :  { %v246_v55 = vadd.f32 %v1487_v1, %v244_v10  ;;  %v411_v19 = vadd.f32 %v1153_v4, %v409_v18 }
  0x81   :  { %v247_v25 = vrot.slane %v246_v55, 4  ;;  %v413_v60 = vadd.f32 %v1156_v27, %v411_v19 }
  0x83   :  { %v248_v21 = vadd.f32 %v247_v25, %v246_v55  ;;  %v415_v6 = vadd.f32 %v1159_v28, %v413_v60 }
  0x85   :  { %v249_v43 = vrot.slane %v248_v21, 2  ;;  %v417_v22 = vadd.f32 %v1162_v29, %v415_v6 }
  0x87   :  { %v250_v51 = vadd.f32 %v249_v43, %v248_v21  ;;  %v419_v23 = vadd.f32 %v1165_v33, %v417_v22 }
  0x89   :  { %v251_v2 = vrot.slane %v250_v51, 1  ;;  %v421_v15 = vadd.f32 %v1169_v40, %v419_v23 }
  0x8b   :  { %v252_v4 = vadd.f32 %v251_v2, %v250_v51  ;;  %v423_v58 = vadd.f32 %v1172_v42, %v421_v15 }
  0x8d   :  { %v253_v27 = vadd.f32 %v252_v4, %v118_v45  ;;  %v425_v0 = vadd.f32 %v1175_v46, %v423_v58 }
  0x8f   :  { %255 = vst.msk [vmem:[%s1362_s1] sm:$0x1] %vm46_vm0, %v253_v27  ;;  %v427_v28 = vadd.f32 %v1178_v47, %v425_v0 }
  0x91   :  { %v429_v29 = vadd.f32 %v1181_v39, %v427_v28 }
  0x93   :  { %v431_v33 = vadd.f32 %v1184_v48, %v429_v29 }
  0x95   :  { %v433_v40 = vadd.f32 %v1188_v37, %v431_v33  ;;  %v256_v37 = vld [vmem:[%s1363_s2] sm:$0x1] }
  0x97   :  { %v435_v61 = vadd.f32 %v1191_v53, %v433_v40 }
  0x99   :  { %v437_v42 = vadd.f32 %v1194_v54, %v435_v61 }
  0x9b   :  { %v439_v5 = vadd.f32 %v1197_v38, %v437_v42 }
  0x9d   :  { %v441_v46 = vadd.f32 %v1200_v59, %v439_v5 }
  0x9f   :  { %v443_v17 = vadd.f32 %v1203_v36, %v441_v46 }
  0xa1   :  { %v445_v56 = vadd.f32 %v1212_v52, %v443_v17 }
  0xa3   :  { %v447_v47 = vadd.f32 %v1215_v8, %v445_v56 }
  0xa5   :  { %v448_v20 = vrot.slane %v447_v47, 4 }
  0xa7   :  { %v449_v39 = vadd.f32 %v448_v20, %v447_v47 }
  0xa9   :  { %v450_v3 = vrot.slane %v449_v39, 2 }
  0xab   :  { %v451_v48 = vadd.f32 %v450_v3, %v449_v39 }
  0xad   :  { %v452_v34 = vrot.slane %v451_v48, 1 }
  0xaf   :  { %v453_v53 = vadd.f32 %v452_v34, %v451_v48 }
  0xb1   :  { %v454_v54 = vadd.f32 %v453_v53, %v256_v37 }
  0xb3   :  { %455 = vst.msk [vmem:[%s1363_s2] sm:$0x1] %vm46_vm0, %v454_v54 }

// kernel: encoder_res_block_forward.4
= control target key start
LH: loop header
LB: loop body
LE: loop exit
PB: predicated region body
PF: predicated region fallthrough
CT: control target
= control target key end

     0   :  { %s6391_s24 = smov 0   ;;  %s8395_s0 = inlined_call_operand.vmem [shape: f32[2,16,16,64], index: 0, kind: input, shape index: {}]   ;;  %s8396_s1 = inlined_call_operand.vmem [shape: f32[1,64], index: 1, kind: input, shape index: {}]   ;;  %s8397_s2 = inlined_call_operand.vmem [shape: f32[1,64], index: 2, kind: input, shape index: {}]   ;;  %s8398_s3 = inlined_call_operand.vmem [shape: bf16[576,64], index: 3, kind: input, shape index: {}]   ;;  %s8399_s4 = inlined_call_operand.vmem [shape: f32[1,64], index: 4, kind: input, shape index: {}]   ;;  %s8400_s5 = inlined_call_operand.vmem [shape: f32[2,256,64], index: 5, kind: output, shape index: {0}]   ;;  %s8401_s6 = inlined_call_operand.vmem [shape: f32[2,1,64], index: 6, kind: output, shape index: {1}]   ;;  %s8402_s7 = inlined_call_operand.vmem [shape: f32[2,1,64], index: 7, kind: output, shape index: {2}]  }
   0x1 LB: > { %s5458_s25 = sadd.s32 4294967295, %s6347_s24   ;;  %p5462_p0 = scmp.ge.s32.totalorder %s6347_s24, 1  ;;  %s6347_s24 = sphi %s6391_s24, %s18_s24  }
   0x2   : > { %p242_p1 = scmp.lt.s32.totalorder %s6347_s24, 3 }
   0x4   : > { %p243_p2 = pnand %p5462_p0, %p242_p1 }
   0x6   : > { %246 = sbr.rel (%p243_p2) target bundleno = 721 (0x2d1), region = 40 }
   0xd   : > { %p280_p3 = scmp.lt.s32.totalorder %s5458_s25, 1  ;;  %vm647_vm0 = vcmask 519168   ;;  %vm650_vm1 = vcmask 516096   ;;  %vm658_vm2 = vsmask.f32 256  ;;  %v8406_v1 = vmov 0 }
   0xe   : > { %v660_v0 = vld [vmem:[#allocation2 + $0xc] sm:$0x1]  ;;  %vm6403_vm3 = vmand %vm650_vm1, %vm658_vm2  ;;  %vm708_vm4 = vsmask.f32 7938  ;;  %v6410_v2 = vld [vmem:[%s8396_s1] ss:$0 sm:$0xff] }
   0xf   : > { %s8435_s25 = smov (!%p280_p3, %s5458_s25), 1  ;;  %v8407_v1 = vsel %vm6403_vm3, 4294967295, %v8406_v1  ;;  %v661_v3 = vsel %vm6403_vm3, 0, %v660_v0  ;;  %vm6416_vm5 = vmand %vm650_vm1, %vm708_vm4  ;;  %v8409_v4 = vmov 0  ;;  %v6349_v5 = vmov 0   ;;  %s6350_s11 = smov 64  }
  0x10   : > { %8408 = vst [vmem:[#allocation4_spill] sm:$0xff] %v8407_v1  ;;  %v8410_v4 = vsel %vm6416_vm5, 4294967295, %v8409_v4  ;;  %648 = vst.msk [vmem:[#allocation2] sm:$0xf] %vm647_vm0, %v6349_v5  ;;  %s5780_s28 = sshll.u32 %s8435_s25, 8  ;;  %vm2063_vm12 = vcmask 1042432   ;;  %s292_s26 = scalar_lea.vmem %s8401_s6, %s8435_s25 }
  0x11   : > { %8411 = vst [vmem:[#allocation5_spill] sm:$0xff] %v8410_v4  ;;  %649 = vst.msk [vmem:[#allocation2 + $0x4] sm:$0xf] %vm647_vm0, %v6349_v5  ;;  %v696_v6 = vld [vmem:[#allocation2 + $0x9c] sm:$0x1]  ;;  %s6432_s8 = scalar_lea.vmem %s8395_s0, %s5780_s28  ;;  %vm2064_vm13 = vcmask 1046532   ;;  %s8186_s22 = scalar_lea.vmem %s8400_s5, %s5780_s28 }
  0x12   : > { %651 = vst.msk [vmem:[#allocation2 + $0x8] sm:$0x1] %vm650_vm1, %v6349_v5  ;;  %655 = vst.msk [vmem:[#allocation2 + $0xd4] sm:$0x1] %vm650_vm1, %v6349_v5  ;;  %v663_v7 = vld [vmem:[#allocation2 + $0x18] sm:$0x1]  ;;  %s295_s30 = scalar_lea.vmem %s8402_s7, %s8435_s25 }
  0x13   : > { %653 = vst.msk [vmem:[#allocation2 + $0xcc] sm:$0xf] %vm647_vm0, %v6349_v5  ;;  %654 = vst.msk [vmem:[#allocation2 + $0xd0] sm:$0xf] %vm647_vm0, %v6349_v5  ;;  %v697_v8 = vsel %vm6403_vm3, 0, %v696_v6  ;;  %v664_v9 = vsel %vm6403_vm3, 0, %v663_v7 }
  0x14   : > { %662 = vst [vmem:[#allocation2 + $0xc] sm:$0x1] %v661_v3  ;;  %v693_v10 = vld [vmem:[#allocation2 + $0x90] sm:$0x1]  ;;  %v743_v11 = vld [vmem:[#allocation2 + $0x98] sm:$0x1]  ;;  %vm6622_vm10 = vmand %vm647_vm0, %vm708_vm4 }
  0x15   : > { %v297_v12 = vld [vmem:[%s6432_s8] sm:$0xff]  ;;  %v298_v13 = vld [vmem:[%s6432_s8 + $0x8] sm:$0xff]  ;;  %698 = vst [vmem:[#allocation2 + $0x9c] sm:$0x1] %v697_v8  ;;  %665 = vst [vmem:[#allocation2 + $0x18] sm:$0x1] %v664_v9 }
  0x16   : > { %v6443_v14 = vld [vmem:[%s8397_s2] ss:$0 sm:$0xff]  ;;  %v694_v15 = vsel %vm6403_vm3, 0, %v693_v10  ;;  %v744_v16 = vsel %vm6416_vm5, 0, %v743_v11  ;;  %v336_v17 = vmul.f32 %v6410_v2, %v297_v12  ;;  %v337_v18 = vmul.f32 %v6410_v2, %v298_v13  ;;  %v322_v20 = vld [vmem:[%s6432_s8 + $0xc8] sm:$0xff]  ;;  %v299_v21 = vld [vmem:[%s6432_s8 + $0x10] sm:$0xff] }
  0x17   : > { %vm1467_vm6 = vsmask.f32 3328  ;;  %v321_v19 = vld [vmem:[%s6432_s8 + $0xc0] sm:$0xff]  ;;  %695 = vst [vmem:[#allocation2 + $0x90] sm:$0x1] %v694_v15  ;;  %v361_v23 = vmul.f32 %v6410_v2, %v322_v20  ;;  %v300_v24 = vld [vmem:[%s6432_s8 + $0x18] sm:$0xff]  ;;  %v338_v25 = vmul.f32 %v6410_v2, %v299_v21  ;;  %vm6915_vm14 = vmor %vm2063_vm12, %vm2064_vm13 }
  0x18   : > { %745 = vst [vmem:[#allocation2 + $0x98] sm:$0x1] %v744_v16  ;;  %vm1468_vm7 = vsmask.f32 7440  ;;  %v360_v22 = vmul.f32 %v6410_v2, %v321_v19  ;;  %v319_v26 = vld [vmem:[%s6432_s8 + $0xb0] sm:$0xff]  ;;  %v320_v27 = vld [vmem:[%s6432_s8 + $0xb8] sm:$0xff]  ;;  %v6461_v28 = vadd.f32 %v6443_v14, %v336_v17  ;;  %v6464_v29 = vadd.f32 %v6443_v14, %v337_v18 }
  0x19   : > { %v339_v30 = vmul.f32 %v6410_v2, %v300_v24  ;;  %v358_v31 = vmul.f32 %v6410_v2, %v319_v26  ;;  %v1419_v32 = vld [vmem:[#allocation2] sm:$0xf]  ;;  %v1420_v33 = vld [vmem:[#allocation2 + $0x4] sm:$0xf]  ;;  %v1421_v34 = vld [vmem:[#allocation2 + $0x8] sm:$0x1]  ;;  %v6472_v36 = vadd.f32 %v6443_v14, %v361_v23  ;;  %v6475_v37 = vadd.f32 %v6443_v14, %v338_v25 }
  0x1a   : > { %v6469_v35 = vadd.f32 %v6443_v14, %v360_v22  ;;  %v359_v38 = vmul.f32 %v6410_v2, %v320_v27  ;;  %v5469_v39 = vmul.f32 -1.442695, %v6461_v28  ;;  %v5470_v40 = vmul.f32 -1.442695, %v6464_v29  ;;  %v710_v53 = vld [vmem:[#allocation2 + $0x14] sm:$0x1]  ;;  %vm6497_vm8 = vmor %vm1467_vm6, %vm1468_vm7 }
  0x1b   : > { %v6481_v41 = vadd.f32 %v6443_v14, %v339_v30  ;;  %v6484_v42 = vadd.f32 %v6443_v14, %v358_v31  ;;  %v1471_v43 = vshrl.u32 %v1419_v32, 16  ;;  %v1474_v44 = vshll.u32 %v1419_v32, 16  ;;  %v323_v57 = vld [vmem:[%s6432_s8 + $0xd0] sm:$0xff]  ;;  %v324_v61 = vld [vmem:[%s6432_s8 + $0xd8] sm:$0xff]  ;;  %v699_v62 = vld [vmem:[#allocation2 + $0xa8] sm:$0x1] }
  0x1c   : > { %v1480_v45 = vshll.u32 %v1420_v33, 16  ;;  %v1484_v46 = vshrl.u32 %v1420_v33, 16  ;;  %6208 = vpow2.f32 %v5469_v39  ;;  %v1490_v47 = vshll.u32 %v1421_v34, 16  ;;  %v301_v6 = vld [vmem:[%s6432_s8 + $0x20] sm:$0xff]  ;;  %v302_v10 = vld [vmem:[%s6432_s8 + $0x28] sm:$0xff] }
  0x1d   : > { %v5493_v48 = vmul.f32 -1.442695, %v6469_v35  ;;  %v5494_v49 = vmul.f32 -1.442695, %v6472_v36  ;;  %6210 = vpow2.f32 %v5470_v40  ;;  %v1473_v50 = vrot.slane %v1471_v43, 4  ;;  %v325_v21 = vld [vmem:[%s6432_s8 + $0xe0] sm:$0xff] }
  0x1e   : > { %v1476_v51 = vrot.slane %v1474_v44, 5  ;;  %v1482_v52 = vrot.slane %v1480_v45, 5  ;;  %v1486_v54 = vrot.slane %v1484_v46, 4  ;;  %v1492_v55 = vrot.slane %v1490_v47, 5  ;;  %v666_v11 = vld [vmem:[#allocation2 + $0x24] sm:$0x1] }
  0x1f   : > { %6212 = vpow2.f32 %v5493_v48  ;;  %v5471_v56 = vmul.f32 -1.442695, %v6475_v37  ;;  %v5472_v59 = vmul.f32 -1.442695, %v6481_v41  ;;  %v6492_v60 = vadd.f32 %v6443_v14, %v359_v38  ;;  %v746_v16 = vld [vmem:[#allocation2 + $0xa4] sm:$0x1] }
  0x20   : > { %v1477_v58 = vor.u32 %v1476_v51, %v1473_v50  ;;  %6214 = vpow2.f32 %v5494_v49  ;;  %v1487_v0 = vor.u32 %v1486_v54, %v1482_v52  ;;  %v5491_v3 = vmul.f32 -1.442695, %v6484_v42  ;;  %v713_v20 = vld [vmem:[#allocation2 + $0x20] sm:$0x1]  ;;  %v326_v26 = vld [vmem:[%s6432_s8 + $0xe8] sm:$0xff]  ;;  %v303_v47 = vld [vmem:[%s6432_s8 + $0x30] sm:$0xff] }
  0x21   : > { %6216 = vpow2.f32 %v5471_v56  ;;  %v711_v5 = vsel %vm6416_vm5, 0, %v710_v53  ;;  %v5492_v8 = vmul.f32 -1.442695, %v6492_v60  ;;  %v362_v9 = vmul.f32 %v6410_v2, %v323_v57  ;;  %v702_v43 = vld [vmem:[#allocation2 + $0xb4] sm:$0x1] }
  0x22   : > { %v1478_v7 = vrot.slane %v1477_v58, 4  ;;  %6218 = vpow2.f32 %v5472_v59  ;;  %712 = vst [vmem:[#allocation2 + $0x14] sm:$0x1] %v711_v5  ;;  %v1488_v12 = vrot.slane %v1487_v0, 4  ;;  %v363_v13 = vmul.f32 %v6410_v2, %v324_v61  ;;  %v669_v57 = vld [vmem:[#allocation2 + $0x30] sm:$0x1] }
  0x23   : > { %6220 = vpow2.f32 %v5491_v3  ;;  %v700_v15 = vsel %vm6403_vm3, 0, %v699_v62  ;;  %v6514_v18 = vadd.f32 %v6443_v14, %v362_v9  ;;  %v340_v19 = vmul.f32 %v6410_v2, %v301_v6  ;;  %v749_v0 = vld [vmem:[#allocation2 + $0xb0] sm:$0x1] }
  0x24   : > { %v1483_v17 = vsel %vm6497_vm8, %v1478_v7, %v1482_v52  ;;  %6222 = vpow2.f32 %v5492_v8  ;;  %701 = vst [vmem:[#allocation2 + $0xa8] sm:$0x1] %v700_v15  ;;  %v1493_v22 = vsel %vm6497_vm8, %v1488_v12, %v1492_v55  ;;  %v6521_v23 = vadd.f32 %v6443_v14, %v363_v13  ;;  %v304_v52 = vld [vmem:[%s6432_s8 + $0x38] sm:$0xff]  ;;  %v716_v8 = vld [vmem:[#allocation2 + $0x2c] sm:$0x1]  ;;  %v327_v13 = vld [vmem:[%s6432_s8 + $0xf0] sm:$0xff] }
  0x25   : > { %v341_v24 = vmul.f32 %v6410_v2, %v302_v10  ;;  %v667_v25 = vsel %vm6403_vm3, 0, %v666_v11  ;;  %v5549_v27 = vcombine.low %v1483_v17, %v1493_v22  ;;  %v5495_v30 = vmul.f32 -1.442695, %v6514_v18  ;;  %v328_v15 = vld [vmem:[%s6432_s8 + $0xf8] sm:$0xff]  ;;  %v305_v22 = vld [vmem:[%s6432_s8 + $0x40] sm:$0xff] }
  0x26   : > { %v6529_v31 = vadd.f32 %v6443_v14, %v340_v19  ;;  %668 = vst [vmem:[#allocation2 + $0x24] sm:$0x1] %v667_v25  ;;  %v747_v32 = vsel %vm6416_vm5, 0, %v746_v16  ;;  %v6209_v33 = vpop.eup %6208  ;;  %v5496_v34 = vmul.f32 -1.442695, %v6521_v23  ;;  %v714_v39 = vsel %vm6416_vm5, 0, %v713_v20 }
  0x27   : > { %v6535_v38 = vadd.f32 %v6443_v14, %v341_v24  ;;  %748 = vst [vmem:[#allocation2 + $0xa4] sm:$0x1] %v747_v32  ;;  %v364_v40 = vmul.f32 %v6410_v2, %v325_v21  ;;  %v6211_v44 = vpop.eup %6210  ;;  %v503_v45 = vadd.f32 1.0, %v6209_v33  ;;  %1902 = vrot.lane.b32.xlu1 %v5549_v27, %s6350_s11  ;;  %6224 = vpow2.f32 %v5495_v30  ;;  %715 = vst [vmem:[#allocation2 + $0x20] sm:$0x1] %v714_v39  ;;  %v306_v24 = vld [vmem:[%s6432_s8 + $0x48] sm:$0xff] }
  0x28   : > { %v365_v46 = vmul.f32 %v6410_v2, %v326_v26  ;;  %v504_v49 = vadd.f32 1.0, %v6211_v44  ;;  %6226 = vpow2.f32 %v5496_v34  ;;  %v5473_v50 = vmul.f32 -1.442695, %v6529_v31  ;;  %v705_v16 = vld [vmem:[#allocation2 + $0xc0] sm:$0x1] }
  0x29   : > { %v6213_v48 = vpop.eup %6212  ;;  %v6545_v51 = vadd.f32 %v6443_v14, %v364_v40  ;;  %6228 = vrcp.f32 %v503_v45  ;;  %v703_v56 = vsel %vm6403_vm3, 0, %v702_v43  ;;  %v5474_v61 = vmul.f32 -1.442695, %v6535_v38  ;;  %v672_v30 = vld [vmem:[#allocation2 + $0x3c] sm:$0x1] }
  0x2a   : > { %v6215_v53 = vpop.eup %6214  ;;  %v527_v54 = vadd.f32 1.0, %v6213_v48  ;;  %v6549_v55 = vadd.f32 %v6443_v14, %v365_v46  ;;  %6230 = vrcp.f32 %v504_v49  ;;  %704 = vst [vmem:[#allocation2 + $0xb4] sm:$0x1] %v703_v56  ;;  %v342_v62 = vmul.f32 %v6410_v2, %v303_v47  ;;  %v752_v44 = vld [vmem:[#allocation2 + $0xbc] sm:$0x1] }
  0x2b   : > { %v6217_v58 = vpop.eup %6216  ;;  %v528_v59 = vadd.f32 1.0, %v6215_v53  ;;  %v5497_v6 = vmul.f32 -1.442695, %v6545_v51  ;;  %v343_v7 = vmul.f32 %v6410_v2, %v304_v52  ;;  %v670_v12 = vsel %vm6403_vm3, 0, %v669_v57  ;;  %v719_v49 = vld [vmem:[#allocation2 + $0x38] sm:$0x1] }
  0x2c   : > { %v6219_v3 = vpop.eup %6218  ;;  %6232 = vrcp.f32 %v527_v54  ;;  %v505_v5 = vadd.f32 1.0, %v6217_v58  ;;  %v6558_v11 = vadd.f32 %v6443_v14, %v342_v62  ;;  %v5498_v20 = vmul.f32 -1.442695, %v6549_v55  ;;  %671 = vst [vmem:[#allocation2 + $0x30] sm:$0x1] %v670_v12 }
  0x2d   : > { %v6221_v9 = vpop.eup %6220  ;;  %6234 = vrcp.f32 %v528_v59  ;;  %v506_v10 = vadd.f32 1.0, %v6219_v3  ;;  %v750_v21 = vsel %vm6416_vm5, 0, %v749_v0  ;;  %v6570_v26 = vadd.f32 %v6443_v14, %v343_v7 }
  0x2e   : > { %v6223_v17 = vpop.eup %6222  ;;  %6236 = vrcp.f32 %v505_v5  ;;  %v525_v19 = vadd.f32 1.0, %v6221_v9  ;;  %751 = vst [vmem:[#allocation2 + $0xb0] sm:$0x1] %v750_v21  ;;  %v717_v27 = vsel %vm6416_vm5, 0, %v716_v8  ;;  %v5475_v32 = vmul.f32 -1.442695, %v6558_v11 }
  0x2f   : > { %6238 = vrcp.f32 %v506_v10  ;;  %v526_v25 = vadd.f32 1.0, %v6223_v17  ;;  %718 = vst [vmem:[#allocation2 + $0x2c] sm:$0x1] %v717_v27  ;;  %v366_v33 = vmul.f32 %v6410_v2, %v327_v13  ;;  %v367_v34 = vmul.f32 %v6410_v2, %v328_v15 }
  0x30   : > { %6240 = vrcp.f32 %v525_v19  ;;  %v706_v39 = vsel %vm6403_vm3, 0, %v705_v16  ;;  %v344_v40 = vmul.f32 %v6410_v2, %v305_v22  ;;  %v345_v43 = vmul.f32 %v6410_v2, %v306_v24 }
  0x31   : > { %6242 = vrcp.f32 %v526_v25  ;;  %v6225_v45 = vpop.eup %6224  ;;  %vm838_vm9 = vsmask.f32 4368  ;;  %v6582_v46 = vadd.f32 %v6443_v14, %v366_v33  ;;  %v6585_v47 = vadd.f32 %v6443_v14, %v367_v34  ;;  %707 = vst [vmem:[#allocation2 + $0xc0] sm:$0x1] %v706_v39 }
  0x32   : > { %6244 = vpow2.f32 %v5473_v50  ;;  %v673_v48 = vsel %vm6403_vm3, 0, %v672_v30  ;;  %v6227_v52 = vpop.eup %6226  ;;  %v529_v53 = vadd.f32 1.0, %v6225_v45  ;;  %v6590_v54 = vadd.f32 %v6443_v14, %v344_v40  ;;  %vm6628_vm11 = vmor %vm658_vm2, %vm838_vm9 }
  0x33   : > { %6246 = vpow2.f32 %v5474_v61  ;;  %v6593_v56 = vadd.f32 %v6443_v14, %v345_v43  ;;  %674 = vst [vmem:[#allocation2 + $0x3c] sm:$0x1] %v673_v48  ;;  %v6229_v50 = vpop.eup %6228  ;;  %v530_v57 = vadd.f32 1.0, %v6227_v52  ;;  %v6596_v58 = vmul.f32 -1.442695, %v6570_v26 }
  0x34   : > { %6248 = vpow2.f32 %v5497_v6  ;;  %v6599_v59 = vmul.f32 -1.442695, %v6582_v46  ;;  %v6231_v62 = vpop.eup %6230  ;;  %v599_v0 = vmul.f32 %v6229_v50, %v6461_v28  ;;  %v6603_v61 = vmul.f32 -1.442695, %v6585_v47 }
  0x35   : > { %6250 = vrcp.f32 %v529_v53  ;;  %v6606_v14 = vmul.f32 -1.442695, %v6590_v54  ;;  %v600_v5 = vmul.f32 %v6231_v62, %v6464_v29  ;;  %v753_v6 = vsel %vm6416_vm5, 0, %v752_v44 }
  0x36   : > { %v6233_v3 = vpop.eup %6232  ;;  %6252 = vrcp.f32 %v530_v57  ;;  %v720_v7 = vsel %vm6416_vm5, 0, %v719_v49  ;;  %v5782_v9 = vpack.c.bf16 %v599_v0, %v599_v0  ;;  %v6615_v10 = vmul.f32 -1.442695, %v6593_v56  ;;  %754 = vst [vmem:[#allocation2 + $0xbc] sm:$0x1] %v753_v6 }
  0x37   : > { %v6235_v8 = vpop.eup %6234  ;;  %v623_v28 = vmul.f32 %v6233_v3, %v6469_v35  ;;  %6254 = vpow2.f32 %v5498_v20  ;;  %721 = vst [vmem:[#allocation2 + $0x38] sm:$0x1] %v720_v7  ;;  %v5783_v13 = vpack.c.bf16 %v600_v5, %v600_v5  ;;  %v1162_v20 = vld [vmem:[#allocation2 + $0xc] sm:$0xf]  ;;  %v1246_v5 = vld [vmem:[#allocation2 + $0x9c] sm:$0xf] }
  0x38   : > { %v6237_v12 = vpop.eup %6236  ;;  %v624_v29 = vmul.f32 %v6235_v8, %v6472_v36  ;;  %6256 = vpow2.f32 %v5475_v32  ;;  %v841_v16 = vshrl.u32 %v5782_v9, 16  ;;  %v844_v17 = vshll.u32 %v5782_v9, 16 }
  0x39   : > { %v6239_v15 = vpop.eup %6238  ;;  %v5806_v19 = vpack.c.bf16 %v623_v28, %v623_v28  ;;  %v601_v21 = vmul.f32 %v6237_v12, %v6475_v37  ;;  %v849_v24 = vshrl.u32 %v5783_v13, 16  ;;  %v852_v35 = vshll.u32 %v5783_v13, 16  ;;  %v1169_v13 = vld [vmem:[#allocation2 + $0x18] sm:$0xf] }
  0x3a   : > { %v6241_v22 = vpop.eup %6240  ;;  %v5807_v25 = vpack.c.bf16 %v624_v29, %v624_v29  ;;  %v602_v27 = vmul.f32 %v6239_v15, %v6481_v41  ;;  %v843_v33 = vrot.slane %v841_v16, 7  ;;  %v1166_v29 = vld [vmem:[#allocation2 + $0x14] sm:$0x1]  ;;  %vm1402_vm15 = vcmask 523264  }
  0x3b   : > { %v6243_v30 = vpop.eup %6242  ;;  %v1045_v34 = vshrl.u32 %v5806_v19, 16  ;;  %v1048_v39 = vshll.u32 %v5806_v19, 16  ;;  %v5784_v40 = vpack.c.bf16 %v601_v21, %v601_v21  ;;  %v851_v32 = vrot.slane %v849_v24, 7 }
  0x3c   : > { %v6245_v36 = vpop.eup %6244  ;;  %v1053_v37 = vshrl.u32 %v5807_v25, 16  ;;  %v1056_v44 = vshll.u32 %v5807_v25, 16  ;;  %v5785_v45 = vpack.c.bf16 %v602_v27, %v602_v27  ;;  %v846_v49 = vor.u32 %v844_v17, %v843_v33 }
  0x3d   : > { %v6247_v48 = vpop.eup %6246  ;;  %v847_v52 = vrot.slane %v843_v33, 4  ;;  %v1047_v53 = vrot.slane %v1045_v34, 7  ;;  %v858_v50 = vshrl.u32 %v5784_v40, 16  ;;  %v854_v62 = vor.u32 %v852_v35, %v851_v32 }
  0x3e   : > { %v6632_v57 = vpop.eup %6248  ;;  %v856_v0 = vrot.slane %v851_v32, 4  ;;  %v1055_v3 = vrot.slane %v1053_v37, 7  ;;  %v861_v6 = vshll.u32 %v5784_v40, 16  ;;  %v1163_v8 = vsel %vm6622_vm10, %v846_v49, %v1162_v20  ;;  %v1250_v37 = vld [vmem:[#allocation2 + $0xa4] sm:$0x1] }
  0x3f   : > { %v6251_v7 = vpop.eup %6250  ;;  %v1050_v9 = vor.u32 %v1048_v39, %v1047_v53  ;;  %v1051_v28 = vrot.slane %v1047_v53, 4  ;;  %v860_v12 = vrot.slane %v858_v50, 7  ;;  %v855_v16 = vsel %vm6628_vm11, %v847_v52, %v854_v62  ;;  %1164 = vst [vmem:[#allocation2 + $0xc] sm:$0xf] %v1163_v8 }
  0x40   : > { %v6253_v15 = vpop.eup %6252  ;;  %v1058_v17 = vor.u32 %v1056_v44, %v1055_v3  ;;  %v1060_v19 = vrot.slane %v1055_v3, 4  ;;  %v866_v21 = vshrl.u32 %v5785_v45, 16  ;;  %1165 = vst.msk [vmem:[#allocation2 + $0x10] sm:$0xf] %vm647_vm0, %v855_v16  ;;  %v869_v27 = vshll.u32 %v5785_v45, 16 }
  0x41   : > { %v6638_v24 = vpop.eup %6254  ;;  %v1247_v35 = vsel %vm6622_vm10, %v1050_v9, %v1246_v5  ;;  %v863_v20 = vor.u32 %v861_v6, %v860_v12  ;;  %v864_v25 = vrot.slane %v860_v12, 4  ;;  %v621_v40 = vmul.f32 %v6241_v22, %v6484_v42  ;;  %v1239_v9 = vld [vmem:[#allocation2 + $0x90] sm:$0xf] }
  0x42   : > { %v6643_v33 = vpop.eup %6256  ;;  %v1059_v34 = vsel %vm6628_vm11, %v1051_v28, %v1058_v17  ;;  %1248 = vst [vmem:[#allocation2 + $0x9c] sm:$0xf] %v1247_v35  ;;  %v868_v39 = vrot.slane %v866_v21, 7  ;;  %v622_v32 = vmul.f32 %v6243_v30, %v6492_v60  ;;  %v1167_v45 = vsel %vm6403_vm3, %v856_v0, %v1166_v29  ;;  %v1173_v60 = vld [vmem:[#allocation2 + $0x20] sm:$0x1] }
  0x43   : > { %1249 = vst.msk [vmem:[#allocation2 + $0xa0] sm:$0xf] %vm647_vm0, %v1059_v34  ;;  %v1170_v44 = vsel %vm6622_vm10, %v863_v20, %v1169_v13  ;;  %v625_v49 = vmul.f32 %v6251_v7, %v6514_v18  ;;  %v626_v52 = vmul.f32 %v6253_v15, %v6521_v23  ;;  %v5804_v42 = vpack.c.bf16 %v621_v40, %v621_v40  ;;  %v307_v7 = vld [vmem:[%s6432_s8 + $0x50] sm:$0xff]  ;;  %v1243_v28 = vld [vmem:[#allocation2 + $0x98] sm:$0x1] }
  0x44   : > { %v871_v53 = vor.u32 %v869_v27, %v868_v39  ;;  %v873_v50 = vrot.slane %v868_v39, 4  ;;  %1171 = vst [vmem:[#allocation2 + $0x18] sm:$0xf] %v1170_v44  ;;  %v5805_v22 = vpack.c.bf16 %v622_v32, %v622_v32  ;;  %1168 = vst [vmem:[#allocation2 + $0x14] sm:$0x1] %v1167_v45  ;;  %v507_v3 = vadd.f32 1.0, %v6245_v36 }
  0x45   : > { %v6656_v30 = vpack.c.bf16 %v625_v49, %v625_v49  ;;  %v6658_v62 = vpack.c.bf16 %v626_v52, %v626_v52  ;;  %v508_v5 = vadd.f32 1.0, %v6247_v48  ;;  %v1028_v18 = vshrl.u32 %v5804_v42, 16 }
  0x46   : > { %v872_v0 = vsel %vm6628_vm11, %v864_v25, %v871_v53  ;;  %v1031_v6 = vshll.u32 %v5804_v42, 16  ;;  %v1036_v23 = vshrl.u32 %v5805_v22, 16  ;;  %v1039_v8 = vshll.u32 %v5805_v22, 16  ;;  %v1422_v12 = vld [vmem:[#allocation2 + $0xc] sm:$0xf] }
  0x47   : > { %1172 = vst.msk [vmem:[#allocation2 + $0x1c] sm:$0xf] %vm647_vm0, %v872_v0  ;;  %v1062_v13 = vshrl.u32 %v6656_v30, 16  ;;  %6258 = vrcp.f32 %v507_v3  ;;  %v1251_v36 = vsel %vm6403_vm3, %v1060_v19, %v1250_v37  ;;  %v6124_v48 = vld [vmem:[#allocation2 + $0xc] sm:$0xff]   ;;  %v1030_v29 = vrot.slane %v1028_v18, 7 }
  0x48   : > { %v1038_v15 = vrot.slane %v1036_v23, 7  ;;  %v1495_v16 = vshrl.u32 %v1422_v12, 16  ;;  %6260 = vrcp.f32 %v508_v5  ;;  %1252 = vst [vmem:[#allocation2 + $0xa4] sm:$0x1] %v1251_v36  ;;  %v1423_v17 = vld [vmem:[#allocation2 + $0x10] sm:$0xf]  ;;  %v1174_v20 = vsel %vm6403_vm3, %v873_v50, %v1173_v60  ;;  %2370 = vrot.lane.b32.xlu0 %v6124_v48, %s6350_s11 }
  0x49   : > { %v1498_v21 = vshll.u32 %v1422_v12, 16  ;;  %v6667_v35 = vrot.slane %v1062_v13, 7  ;;  %6262 = vpow2.f32 %v6596_v58  ;;  %v1033_v27 = vor.u32 %v1031_v6, %v1030_v29  ;;  %1175 = vst [vmem:[#allocation2 + $0x20] sm:$0x1] %v1174_v20  ;;  %v1253_v53 = vld [vmem:[#allocation2 + $0xa8] sm:$0xf] }
  0x4a   : > { %v6125_v25 = vld [vmem:[#allocation2 + $0x9c] sm:$0xff]   ;;  %v1034_v19 = vrot.slane %v1030_v29, 4  ;;  %v1041_v34 = vor.u32 %v1039_v8, %v1038_v15  ;;  %v1043_v39 = vrot.slane %v1038_v15, 4  ;;  %v1497_v32 = vrot.slane %v1495_v16, 4  ;;  %v1257_v15 = vld [vmem:[#allocation2 + $0xb0] sm:$0x1] }
  0x4b   : > { %v1424_v40 = vld [vmem:[#allocation2 + $0x14] sm:$0x1]  ;;  %v1500_v37 = vrot.slane %v1498_v21, 5  ;;  %6264 = vpow2.f32 %v6599_v59  ;;  %v6675_v44 = vmul.f32 %v6410_v2, %v307_v7  ;;  %v1240_v58 = vsel %vm6622_vm10, %v1033_v27, %v1239_v9  ;;  %v1458_v50 = vld [vmem:[#allocation2 + $0x9c] sm:$0xf] }
  0x4c   : > { %v1042_v45 = vsel %vm6628_vm11, %v1034_v19, %v1041_v34  ;;  %v1244_v49 = vsel %vm6403_vm3, %v1043_v39, %v1243_v28  ;;  %v1504_v52 = vshll.u32 %v1423_v17, 16  ;;  %1241 = vst [vmem:[#allocation2 + $0x90] sm:$0xf] %v1240_v58  ;;  %v1508_v42 = vshrl.u32 %v1423_v17, 16  ;;  %v6685_v60 = vld [vmem:[#allocation2 + $0xa0] sm:$0xf]  ;;  %2394 = vrot.lane.b32.xlu0 %v6125_v25, %s6350_s11 }
  0x4d   : > { %1242 = vst.msk [vmem:[#allocation2 + $0x94] sm:$0xf] %vm647_vm0, %v1042_v45  ;;  %1245 = vst [vmem:[#allocation2 + $0x98] sm:$0x1] %v1244_v49  ;;  %v1501_v59 = vor.u32 %v1500_v37, %v1497_v32  ;;  %v1514_v2 = vshll.u32 %v1424_v40, 16  ;;  %v1065_v22 = vshll.u32 %v6656_v30, 16  ;;  %6266 = vpow2.f32 %v6603_v61 }
  0x4e   : > { %v6126_v3 = vld [vmem:[#allocation2 + $0x18] sm:$0xff]   ;;  %v1506_v5 = vrot.slane %v1504_v52, 5  ;;  %v1068_v0 = vrot.slane %v6667_v35, 4  ;;  %v1070_v18 = vshrl.u32 %v6658_v62, 16  ;;  %v1510_v23 = vrot.slane %v1508_v42, 4 }
  0x4f   : > { %v1502_v6 = vrot.slane %v1501_v59, 4  ;;  %v1516_v7 = vrot.slane %v1514_v2, 5  ;;  %v1067_v8 = vor.u32 %v1065_v22, %v6667_v35  ;;  %v1073_v30 = vshll.u32 %v6658_v62, 16 }
  0x50   : > { %v1072_v9 = vrot.slane %v1070_v18, 7  ;;  %v1783_v28 = vshrl.u32 %v1458_v50, 16  ;;  %v1786_v12 = vshll.u32 %v1458_v50, 16  ;;  %v1511_v48 = vor.u32 %v1510_v23, %v1506_v5  ;;  %2372 = vrot.lane.b32.xlu0 %v6126_v3, %s6350_s11 }
  0x51   : > { %v6259_v13 = vpop.eup %6258  ;;  %v1507_v36 = vsel %vm6497_vm8, %v1502_v6, %v1506_v5  ;;  %v1254_v29 = vsel %vm6622_vm10, %v1067_v8, %v1253_v53  ;;  %v1792_v61 = vshll.u32 %v6685_v60, 16  ;;  %6268 = vpow2.f32 %v6606_v14  ;;  %v1176_v14 = vld [vmem:[#allocation2 + $0x24] sm:$0xf] }
  0x52   : > { %v6261_v16 = vpop.eup %6260  ;;  %v1075_v17 = vor.u32 %v1073_v30, %v1072_v9  ;;  %v1077_v21 = vrot.slane %v1072_v9, 4  ;;  %1255 = vst [vmem:[#allocation2 + $0xa8] sm:$0xf] %v1254_v29  ;;  %v603_v62 = vmul.f32 %v6259_v13, %v6529_v31  ;;  %v1785_v35 = vrot.slane %v1783_v28, 4  ;;  %v1460_v30 = vld [vmem:[#allocation2 + $0xa4] sm:$0x1] }
  0x53   : > { %v6700_v20 = vpop.eup %6262  ;;  %v1512_v25 = vrot.slane %v1511_v48, 4  ;;  %v604_v27 = vmul.f32 %v6261_v16, %v6535_v38  ;;  %v1788_v19 = vrot.slane %v1786_v12, 5  ;;  %v6703_v34 = vrot.slane %v1792_v61, 5  ;;  %v1455_v39 = vld [vmem:[#allocation2 + $0x90] sm:$0xf] }
  0x54   : > { %v1456_v40 = vld [vmem:[#allocation2 + $0x94] sm:$0xf]  ;;  %v1457_v32 = vld [vmem:[#allocation2 + $0x98] sm:$0x1]  ;;  %v1076_v37 = vsel %vm6628_vm11, %v1068_v0, %v1075_v17  ;;  %v5786_v45 = vpack.c.bf16 %v603_v62, %v603_v62  ;;  %v1258_v58 = vsel %vm6403_vm3, %v1077_v21, %v1257_v15  ;;  %v1759_v49 = vshrl.u32 %v1455_v39, 16 }
  0x55   : > { %v6710_v31 = vpop.eup %6264  ;;  %v1762_v52 = vshll.u32 %v1455_v39, 16  ;;  %v1768_v38 = vshll.u32 %v1456_v40, 16  ;;  %v1772_v53 = vshrl.u32 %v1456_v40, 16  ;;  %1256 = vst.msk [vmem:[#allocation2 + $0xac] sm:$0xf] %vm647_vm0, %v1076_v37  ;;  %v1778_v50 = vshll.u32 %v1457_v32, 16 }
  0x56   : > { %1259 = vst [vmem:[#allocation2 + $0xb0] sm:$0x1] %v1258_v58  ;;  %v1517_v59 = vsel %vm6497_vm8, %v1512_v25, %v1516_v7  ;;  %v5787_v42 = vpack.c.bf16 %v604_v27, %v604_v27  ;;  %v875_v2 = vshrl.u32 %v5786_v45, 16  ;;  %v1761_v22 = vrot.slane %v1759_v49, 4  ;;  %v1425_v29 = vld [vmem:[#allocation2 + $0x18] sm:$0xf] }
  0x57   : > { %v1764_v3 = vrot.slane %v1762_v52, 5  ;;  %v1770_v5 = vrot.slane %v1768_v38, 5  ;;  %v1774_v0 = vrot.slane %v1772_v53, 4  ;;  %v6715_v18 = vpop.eup %6266  ;;  %v1780_v6 = vrot.slane %v1778_v50, 5  ;;  %v1426_v17 = vld [vmem:[#allocation2 + $0x1c] sm:$0xf] }
  0x58   : > { %v5550_v23 = vcombine.low %v1507_v36, %v1517_v59  ;;  %v877_v8 = vrot.slane %v875_v2, 7  ;;  %v878_v9 = vshll.u32 %v5786_v45, 16  ;;  %v883_v13 = vshrl.u32 %v5787_v42, 16  ;;  %v1427_v45 = vld [vmem:[#allocation2 + $0x20] sm:$0x1] }
  0x59   : > { %v1765_v28 = vor.u32 %v1764_v3, %v1761_v22  ;;  %v1775_v12 = vor.u32 %v1774_v0, %v1770_v5  ;;  %v886_v48 = vshll.u32 %v5787_v42, 16  ;;  %v1789_v15 = vor.u32 %v1788_v19, %v1785_v35  ;;  %v1461_v3 = vld [vmem:[#allocation2 + $0xa8] sm:$0xf] }
  0x5a   : > { %1904 = vrot.lane.b32.xlu0 %v5550_v23, %s6350_s11  ;;  %v880_v7 = vor.u32 %v878_v9, %v877_v8  ;;  %v881_v61 = vrot.slane %v877_v8, 4  ;;  %v1796_v16 = vshrl.u32 %v6685_v60, 16  ;;  %v6719_v25 = vrot.slane %v883_v13, 7 }
  0x5b   : > { %v1766_v21 = vrot.slane %v1765_v28, 4  ;;  %v1776_v62 = vrot.slane %v1775_v12, 4  ;;  %v1802_v36 = vshll.u32 %v1460_v30, 16  ;;  %v1790_v39 = vrot.slane %v1789_v15, 4  ;;  %v6729_v58 = vpop.eup %6268 }
  0x5c   : > { %v1177_v27 = vsel %vm6622_vm10, %v880_v7, %v1176_v14  ;;  %v1798_v40 = vrot.slane %v1796_v16, 4  ;;  %v1519_v32 = vshrl.u32 %v1425_v29, 16  ;;  %v888_v60 = vor.u32 %v886_v48, %v6719_v25  ;;  %v6127_v50 = vld [vmem:[#allocation2 + $0xa8] sm:$0xff]  }
  0x5d   : > { %v1771_v37 = vsel %vm6497_vm8, %v1766_v21, %v1770_v5  ;;  %v1781_v35 = vsel %vm6497_vm8, %v1776_v62, %v1780_v6  ;;  %v890_v19 = vrot.slane %v6719_v25, 4  ;;  %1178 = vst [vmem:[#allocation2 + $0x24] sm:$0xf] %v1177_v27  ;;  %v1795_v52 = vsel %vm6497_vm8, %v1790_v39, %v6703_v34  ;;  %v1462_v23 = vld [vmem:[#allocation2 + $0xac] sm:$0xf] }
  0x5e   : > { %v5561_v49 = vcombine.low %v1771_v37, %v1781_v35  ;;  %v1799_v38 = vor.u32 %v1798_v40, %v6703_v34  ;;  %v1804_v53 = vrot.slane %v1802_v36, 5  ;;  %v889_v59 = vsel %vm6628_vm11, %v881_v61, %v888_v60  ;;  %v1463_v28 = vld [vmem:[#allocation2 + $0xb0] sm:$0x1]  ;;  %v1180_v16 = vld [vmem:[#allocation2 + $0x2c] sm:$0x1] }
  0x5f   : > { %v1521_v42 = vrot.slane %v1519_v32, 4  ;;  %v1522_v2 = vshll.u32 %v1425_v29, 16  ;;  %v1528_v22 = vshll.u32 %v1426_v17, 16  ;;  %1179 = vst.msk [vmem:[#allocation2 + $0x28] sm:$0xf] %vm647_vm0, %v889_v59  ;;  %v1532_v0 = vshrl.u32 %v1426_v17, 16 }
  0x60   : > { %1926 = vrot.lane.b32.xlu1 %v5561_v49, %s6350_s11  ;;  %v1800_v5 = vrot.slane %v1799_v38, 4  ;;  %v1538_v14 = vshll.u32 %v1427_v45, 16  ;;  %v531_v6 = vadd.f32 1.0, %v6632_v57  ;;  %v532_v9 = vadd.f32 1.0, %v6638_v24 }
  0x61   : > { %v1524_v34 = vrot.slane %v1522_v2, 5  ;;  %v1530_v8 = vrot.slane %v1528_v22, 5  ;;  %v509_v30 = vadd.f32 1.0, %v6643_v33  ;;  %v1534_v13 = vrot.slane %v1532_v0, 4  ;;  %v308_v2 = vld [vmem:[%s6432_s8 + $0x58] sm:$0xff] }
  0x62   : > { %v1805_v12 = vsel %vm6497_vm8, %v1800_v5, %v1804_v53  ;;  %v1540_v48 = vrot.slane %v1538_v14, 5  ;;  %6270 = vrcp.f32 %v531_v6  ;;  %v510_v61 = vadd.f32 1.0, %v6700_v20 }
  0x63   : > { %v5562_v29 = vcombine.low %v1795_v52, %v1805_v12  ;;  %v1525_v7 = vor.u32 %v1524_v34, %v1521_v42  ;;  %6272 = vrcp.f32 %v532_v9  ;;  %v1535_v57 = vor.u32 %v1534_v13, %v1530_v8 }
  0x64   : > { %2396 = vrot.lane.b32.xlu1 %v6127_v50, %s6350_s11  ;;  %6274 = vrcp.f32 %v509_v30  ;;  %v1807_v15 = vshrl.u32 %v1461_v3, 16  ;;  %v1810_v24 = vshll.u32 %v1461_v3, 16  ;;  %v1816_v17 = vshll.u32 %v1462_v23, 16  ;;  %v1428_v62 = vld [vmem:[#allocation2 + $0x24] sm:$0xf] }
  0x65   : > { %v1526_v33 = vrot.slane %v1525_v7, 4  ;;  %6276 = vrcp.f32 %v510_v61  ;;  %v1820_v21 = vshrl.u32 %v1462_v23, 16  ;;  %v1536_v25 = vrot.slane %v1535_v57, 4  ;;  %v6766_v30 = vld [vmem:[%s8396_s1] ss:$0 sm:$0xff] }
  0x66   : > { %v1809_v36 = vrot.slane %v1807_v15, 4  ;;  %v1812_v27 = vrot.slane %v1810_v24, 5  ;;  %v1826_v39 = vshll.u32 %v1463_v28, 16  ;;  %v6128_v40 = vld [vmem:[#allocation2 + $0x24] sm:$0xff]   ;;  %v6748_v32 = vrot.slane %v1816_v17, 5 }
  0x67   : > { %v1531_v20 = vsel %vm6497_vm8, %v1526_v33, %v1530_v8  ;;  %v1822_v37 = vrot.slane %v1820_v21, 4  ;;  %v1181_v35 = vsel %vm6403_vm3, %v890_v19, %v1180_v16  ;;  %v1541_v60 = vsel %vm6497_vm8, %v1536_v25, %v1540_v48  ;;  %v1429_v52 = vld [vmem:[#allocation2 + $0x28] sm:$0xf]  ;;  %2374 = vrot.lane.b32.xlu0 %v6128_v40, %s6350_s11  ;;  %v6787_v21 = vld [vmem:[#allocation2 + $0x18] sm:$0xf] }
  0x68   : > { %1928 = vrot.lane.b32.xlu1 %v5562_v29, %s6350_s11  ;;  %v1813_v45 = vor.u32 %v1812_v27, %v1809_v36  ;;  %v1828_v49 = vrot.slane %v1826_v39, 5  ;;  %1182 = vst [vmem:[#allocation2 + $0x2c] sm:$0x1] %v1181_v35  ;;  %v1543_v38 = vshrl.u32 %v1428_v62, 16  ;;  %v5551_v53 = vcombine.low %v1531_v20, %v1541_v60  ;;  %v6169_v41 = vld [vmem:[#allocation2 + $0x24] sm:$0xff]  }
  0x69   : > { %v1823_v50 = vor.u32 %v1822_v37, %v6748_v32  ;;  %v1546_v59 = vshll.u32 %v1428_v62, 16  ;;  %v1552_v42 = vshll.u32 %v1429_v52, 16  ;;  %v1556_v3 = vshrl.u32 %v1429_v52, 16  ;;  %1406 = vst.msk [vmem:[#allocation3 + $0x78] sm:$0xff] %vm1402_vm15, %v6169_v41 }
  0x6a   : > { %v1814_v22 = vrot.slane %v1813_v45, 4  ;;  %v1545_v19 = vrot.slane %v1543_v38, 4  ;;  %v533_v5 = vadd.f32 1.0, %v6710_v31  ;;  %v534_v23 = vadd.f32 1.0, %v6715_v18  ;;  %v1183_v38 = vld [vmem:[#allocation2 + $0x30] sm:$0xf] }
  0x6b   : > { %v1824_v0 = vrot.slane %v1823_v50, 4  ;;  %v1548_v14 = vrot.slane %v1546_v59, 5  ;;  %v6759_v6 = vrot.slane %v1552_v42, 5  ;;  %v1558_v8 = vrot.slane %v1556_v3, 4  ;;  %1906 = vrot.lane.b32.xlu0 %v5551_v53, %s6350_s11 }
  0x6c   : > { %v6271_v34 = vpop.eup %6270  ;;  %6278 = vrcp.f32 %v533_v5  ;;  %v511_v9 = vadd.f32 1.0, %v6729_v58  ;;  %v6769_v28 = vmul.f32 %v6766_v30, %v308_v2  ;;  %v1819_v18 = vsel %vm6497_vm8, %v1814_v22, %v6748_v32 }
  0x6d   : > { %v6273_v31 = vpop.eup %6272  ;;  %v627_v12 = vmul.f32 %v6271_v34, %v6545_v51  ;;  %v1549_v13 = vor.u32 %v1548_v14, %v1545_v19  ;;  %6280 = vrcp.f32 %v534_v23  ;;  %v1829_v29 = vsel %vm6497_vm8, %v1824_v0, %v1828_v49  ;;  %v1264_v0 = vld [vmem:[#allocation2 + $0xbc] sm:$0x1] }
  0x6e   : > { %v6275_v58 = vpop.eup %6274  ;;  %v628_v48 = vmul.f32 %v6273_v31, %v6549_v55  ;;  %v1559_v7 = vor.u32 %v1558_v8, %v6759_v6  ;;  %6282 = vpow2.f32 %v6615_v10  ;;  %v6792_v10 = vld [vmem:[%s8397_s2] ss:$0 sm:$0xff]  ;;  %v6800_v60 = vcombine.low %v1819_v18, %v1829_v29  ;;  %v1187_v31 = vld [vmem:[#allocation2 + $0x38] sm:$0x1] }
  0x6f   : > { %v6277_v61 = vpop.eup %6276  ;;  %v5810_v57 = vpack.c.bf16 %v627_v12, %v627_v12  ;;  %v605_v51 = vmul.f32 %v6275_v58, %v6558_v11  ;;  %v1430_v15 = vld [vmem:[#allocation2 + $0x2c] sm:$0x1]  ;;  %v6782_v24 = vrot.slane %v1549_v13, 4  ;;  %6284 = vrcp.f32 %v511_v9 }
  0x70   : > { %v5811_v16 = vpack.c.bf16 %v628_v48, %v628_v48  ;;  %v606_v33 = vmul.f32 %v6277_v61, %v6570_v26  ;;  %v6785_v17 = vrot.slane %v1559_v7, 4  ;;  %v1562_v55 = vshll.u32 %v1430_v15, 16  ;;  %v1260_v26 = vld [vmem:[#allocation2 + $0xb4] sm:$0xf] }
  0x71   : > { %v1079_v62 = vshrl.u32 %v5810_v57, 16  ;;  %v1082_v25 = vshll.u32 %v5810_v57, 16  ;;  %v5788_v36 = vpack.c.bf16 %v605_v51, %v605_v51  ;;  %v6796_v11 = vadd.f32 %v6792_v10, %v6675_v44  ;;  %v3412_v57 = vld [vmem:[#allocation2 + $0x1c] sm:$0xf] }
  0x72   : > { %v1087_v27 = vshrl.u32 %v5811_v16, 16  ;;  %v1090_v39 = vshll.u32 %v5811_v16, 16  ;;  %v5789_v40 = vpack.c.bf16 %v606_v33, %v606_v33  ;;  %v6798_v20 = vrot.slane %v1562_v55, 5 }
  0x73   : > { %v1081_v32 = vrot.slane %v1079_v62, 7  ;;  %v892_v37 = vshrl.u32 %v5788_v36, 16  ;;  %v895_v35 = vshll.u32 %v5788_v36, 16  ;;  %v3460_v53 = vshrl.u32 %v6787_v21, 16  ;;  %v1267_v36 = vld [vmem:[#allocation2 + $0xc0] sm:$0xf] }
  0x74   : > { %v1089_v45 = vrot.slane %v1087_v27, 7  ;;  %v900_v49 = vshrl.u32 %v5789_v40, 16  ;;  %v903_v52 = vshll.u32 %v5789_v40, 16  ;;  %v1555_v42 = vsel %vm6497_vm8, %v6782_v24, %v6759_v6 }
  0x75   : > { %v1084_v50 = vor.u32 %v1082_v25, %v1081_v32  ;;  %v1085_v44 = vrot.slane %v1081_v32, 4  ;;  %v894_v59 = vrot.slane %v892_v37, 7  ;;  %v1565_v5 = vsel %vm6497_vm8, %v6785_v17, %v6798_v20  ;;  %v6828_v17 = vld [vmem:[#allocation2 + $0x20] sm:$0x1] }
  0x76   : > { %v6279_v2 = vpop.eup %6278  ;;  %v1092_v22 = vor.u32 %v1090_v39, %v1089_v45  ;;  %v1094_v19 = vrot.slane %v1089_v45, 4  ;;  %v902_v3 = vrot.slane %v900_v49, 7  ;;  %v3463_v55 = vshll.u32 %v6787_v21, 16 }
  0x77   : > { %v6281_v14 = vpop.eup %6280  ;;  %v1261_v23 = vsel %vm6622_vm10, %v1084_v50, %v1260_v26  ;;  %v897_v34 = vor.u32 %v895_v35, %v894_v59  ;;  %v898_v8 = vrot.slane %v894_v59, 4  ;;  %v629_v9 = vmul.f32 %v6279_v2, %v6582_v46  ;;  %v309_v59 = vld [vmem:[%s6432_s8 + $0x60] sm:$0xff] }
  0x78   : > { %v6283_v6 = vpop.eup %6282  ;;  %v1093_v12 = vsel %vm6628_vm11, %v1085_v44, %v1092_v22  ;;  %1262 = vst [vmem:[#allocation2 + $0xb4] sm:$0xf] %v1261_v23  ;;  %v905_v18 = vor.u32 %v903_v52, %v902_v3  ;;  %v907_v13 = vrot.slane %v902_v3, 4  ;;  %v630_v58 = vmul.f32 %v6281_v14, %v6585_v47 }
  0x79   : > { %v6285_v48 = vpop.eup %6284  ;;  %1263 = vst.msk [vmem:[#allocation2 + $0xb8] sm:$0xf] %vm647_vm0, %v1093_v12  ;;  %v1184_v29 = vsel %vm6622_vm10, %v897_v34, %v1183_v38  ;;  %v5812_v7 = vpack.c.bf16 %v629_v9, %v629_v9  ;;  %v512_v61 = vadd.f32 1.0, %v6283_v6  ;;  %v1265_v46 = vsel %vm6403_vm3, %v1094_v19, %v1264_v0  ;;  %v1190_v38 = vld [vmem:[#allocation2 + $0x3c] sm:$0xf] }
  0x7a   : > { %v906_v51 = vsel %vm6628_vm11, %v898_v8, %v905_v18  ;;  %1185 = vst [vmem:[#allocation2 + $0x30] sm:$0xf] %v1184_v29  ;;  %v5813_v15 = vpack.c.bf16 %v630_v58, %v630_v58  ;;  %v607_v24 = vmul.f32 %v6285_v48, %v6590_v54  ;;  %1266 = vst [vmem:[#allocation2 + $0xbc] sm:$0x1] %v1265_v46  ;;  %v3469_v54 = vshll.u32 %v3412_v57, 16 }
  0x7b   : > { %v1188_v47 = vsel %vm6403_vm3, %v907_v13, %v1187_v31  ;;  %1186 = vst.msk [vmem:[#allocation2 + $0x34] sm:$0xf] %vm647_vm0, %v906_v51  ;;  %v1096_v16 = vshrl.u32 %v5812_v7, 16  ;;  %v1099_v33 = vshll.u32 %v5812_v7, 16  ;;  %6286 = vrcp.f32 %v512_v61 }
  0x7c   : > { %1189 = vst [vmem:[#allocation2 + $0x38] sm:$0x1] %v1188_v47  ;;  %v1104_v62 = vshrl.u32 %v5813_v15, 16  ;;  %v1107_v25 = vshll.u32 %v5813_v15, 16  ;;  %v5790_v27 = vpack.c.bf16 %v607_v24, %v607_v24  ;;  %v6831_v26 = vrot.slane %v3460_v53, 4 }
  0x7d   : > { %v1098_v39 = vrot.slane %v1096_v16, 7  ;;  %v6833_v40 = vrot.slane %v3463_v55, 5  ;;  %v3473_v20 = vshrl.u32 %v3412_v57, 16  ;;  %v6837_v45 = vrot.slane %v3469_v54, 5 }
  0x7e   : > { %v6835_v32 = vrot.slane %v1104_v62, 7  ;;  %v909_v37 = vshrl.u32 %v5790_v27, 16  ;;  %v912_v35 = vshll.u32 %v5790_v27, 16  ;;  %v5552_v49 = vcombine.low %v1555_v42, %v1565_v5 }
  0x7f   : > { %v1101_v21 = vor.u32 %v1099_v33, %v1098_v39  ;;  %v1102_v52 = vrot.slane %v1098_v39, 4  ;;  %v1464_v50 = vld [vmem:[#allocation2 + $0xb4] sm:$0xf]  ;;  %v6839_v44 = vrot.slane %v3473_v20, 4  ;;  %v3479_v3 = vshll.u32 %v6828_v17, 16 }
  0x80   : > { %8418 = vst [vmem:[#allocation6_spill] sm:$0xff] %v6835_v32  ;;  %v6129_v2 = vld [vmem:[#allocation2 + $0xb4] sm:$0xff]   ;;  %v1109_v53 = vor.u32 %v1107_v25, %v6835_v32  ;;  %v6843_v22 = vrot.slane %v909_v37, 7  ;;  %v1831_v19 = vshrl.u32 %v1464_v50, 16  ;;  %v3466_v5 = vor.u32 %v6833_v40, %v6831_v26  ;;  %v310_v40 = vld [vmem:[%s6432_s8 + $0x68] sm:$0xff] }
  0x81   : > { %v1268_v0 = vsel %vm6622_vm10, %v1101_v21, %v1267_v36  ;;  %v1465_v14 = vld [vmem:[#allocation2 + $0xb8] sm:$0xf]  ;;  %v1466_v42 = vld [vmem:[#allocation2 + $0xbc] sm:$0x1]  ;;  %v3476_v23 = vor.u32 %v6839_v44, %v6837_v45  ;;  %v6854_v34 = vadd.f32 %v6792_v10, %v6769_v28  ;;  %2398 = vrot.lane.b32.xlu1 %v6129_v2, %s6350_s11  ;;  %v1834_v18 = vshll.u32 %v1464_v50, 16 }
  0x82   : > { %v6130_v8 = vld [vmem:[#allocation2 + $0x30] sm:$0xff]   ;;  %v1110_v9 = vsel %vm6628_vm11, %v1102_v52, %v1109_v53  ;;  %1269 = vst [vmem:[#allocation2 + $0xc0] sm:$0xf] %v1268_v0  ;;  %v914_v31 = vor.u32 %v912_v35, %v6843_v22  ;;  %v915_v6 = vrot.slane %v6843_v22, 4  ;;  %v1833_v12 = vrot.slane %v1831_v19, 4 }
  0x83   : > { %1270 = vst.msk [vmem:[#allocation2 + $0xc4] sm:$0xf] %vm647_vm0, %v1110_v9  ;;  %v1840_v13 = vshll.u32 %v1465_v14, 16  ;;  %v1844_v58 = vshrl.u32 %v1465_v14, 16  ;;  %v1850_v48 = vshll.u32 %v1466_v42, 16  ;;  %2376 = vrot.lane.b32.xlu0 %v6130_v8, %s6350_s11  ;;  %v6866_v51 = vmul.f32 %v6766_v30, %v309_v59 }
  0x84   : > { %v1431_v28 = vld [vmem:[#allocation2 + $0x30] sm:$0xf]  ;;  %v1191_v29 = vsel %vm6622_vm10, %v914_v31, %v1190_v38  ;;  %v1432_v7 = vld [vmem:[#allocation2 + $0x34] sm:$0xf]  ;;  %v1433_v61 = vld [vmem:[#allocation2 + $0x38] sm:$0x1]  ;;  %v6880_v19 = vmul.f32 %v6766_v30, %v310_v40 }
  0x85   : > { %v1567_v46 = vshrl.u32 %v1431_v28, 16  ;;  %v1570_v57 = vshll.u32 %v1431_v28, 16  ;;  %v6287_v15 = vpop.eup %6286  ;;  %1192 = vst [vmem:[#allocation2 + $0x3c] sm:$0xf] %v1191_v29  ;;  %v1836_v24 = vrot.slane %v1834_v18, 5  ;;  %v1842_v47 = vrot.slane %v1840_v13, 5  ;;  %1930 = vrot.lane.b32.xlu1 %v6800_v60, %s6350_s11 }
  0x86   : > { %v1846_v16 = vrot.slane %v1844_v58, 4  ;;  %v1852_v33 = vrot.slane %v1850_v48, 5  ;;  %v608_v55 = vmul.f32 %v6287_v15, %v6593_v56  ;;  %v1576_v36 = vshll.u32 %v1432_v7, 16  ;;  %v675_v52 = vld [vmem:[#allocation2 + $0x48] sm:$0x1] }
  0x87   : > { %v1569_v62 = vrot.slane %v1567_v46, 4  ;;  %v1572_v25 = vrot.slane %v1570_v57, 5  ;;  %v1837_v27 = vor.u32 %v1836_v24, %v1833_v12  ;;  %v1580_v39 = vshrl.u32 %v1432_v7, 16  ;;  %1908 = vrot.lane.b32.xlu0 %v5552_v49, %s6350_s11  ;;  %v2947_v18 = vld [vmem:[#allocation2 + $0x10] sm:$0xf] }
  0x88   : > { %v1847_v54 = vor.u32 %v1846_v16, %v1842_v47  ;;  %v1586_v26 = vshll.u32 %v1433_v61, 16  ;;  %v5791_v20 = vpack.c.bf16 %v608_v55, %v608_v55  ;;  %v6873_v35 = vrot.slane %v1576_v36, 5  ;;  %v2948_v13 = vld [vmem:[#allocation2 + $0x14] sm:$0x1]  ;;  %v722_v58 = vld [vmem:[#allocation2 + $0x44] sm:$0x1] }
  0x89   : > { %v1573_v37 = vor.u32 %v1572_v25, %v1569_v62  ;;  %v3467_v21 = vrot.slane %v3466_v5, 4  ;;  %v1838_v38 = vrot.slane %v1837_v27, 4  ;;  %v1582_v50 = vrot.slane %v1580_v39, 4  ;;  %v2946_v5 = vld [vmem:[#allocation2 + $0xc] sm:$0xe] }
  0x8a   : > { %v1848_v60 = vrot.slane %v1847_v54, 4  ;;  %v6875_v56 = vrot.slane %v1586_v26, 5  ;;  %v6131_v44 = vld [vmem:[#allocation2 + $0xc0] sm:$0xff]   ;;  %v917_v59 = vshrl.u32 %v5791_v20, 16  ;;  %v920_v2 = vshll.u32 %v5791_v20, 16 }
  0x8b   : > { %v6877_v53 = vrot.slane %v1573_v37, 4  ;;  %v1843_v49 = vsel %vm6497_vm8, %v1838_v38, %v1842_v47  ;;  %v1583_v14 = vor.u32 %v1582_v50, %v6873_v35  ;;  %v3477_v42 = vrot.slane %v3476_v23, 4  ;;  %2400 = vrot.lane.b32.xlu1 %v6131_v44, %s6350_s11  ;;  %v3414_v7 = vld [vmem:[#allocation2 + $0x24] sm:$0xf]  ;;  %v3415_v46 = vld [vmem:[#allocation2 + $0x28] sm:$0xf] }
  0x8c   : > { %v1853_v0 = vsel %vm6497_vm8, %v1848_v60, %v1852_v33  ;;  %v6888_v8 = vrot.slane %v917_v59, 7  ;;  %v3472_v31 = vsel %vm6497_vm8, %v3467_v21, %v6837_v45  ;;  %v3481_v12 = vrot.slane %v3479_v3, 5  ;;  %v1434_v3 = vld [vmem:[#allocation2 + $0x3c] sm:$0xf]  ;;  %v3416_v36 = vld [vmem:[#allocation2 + $0x2c] sm:$0x1] }
  0x8d   : > { %v5564_v9 = vcombine.low %v1843_v49, %v1853_v0  ;;  %v1584_v48 = vrot.slane %v1583_v14, 4  ;;  %v5479_v28 = vmul.f32 -1.442695, %v6796_v11  ;;  %v5480_v23 = vmul.f32 -1.442695, %v6854_v34 }
  0x8e   : > { %v676_v29 = vsel %vm6403_vm3, 0, %v675_v52  ;;  %v922_v61 = vor.u32 %v920_v2, %v6888_v8  ;;  %v1579_v17 = vsel %vm6497_vm8, %v6877_v53, %v6873_v35  ;;  %v3482_v45 = vsel %vm6497_vm8, %v3477_v42, %v3481_v12  ;;  %v678_v26 = vld [vmem:[#allocation2 + $0x54] sm:$0x1]  ;;  %v312_v53 = vld [vmem:[%s6432_s8 + $0x78] sm:$0xff] }
  0x8f   : > { %677 = vst [vmem:[#allocation2 + $0x48] sm:$0x1] %v676_v29  ;;  %v924_v57 = vrot.slane %v6888_v8, 4  ;;  %v1589_v15 = vsel %vm6497_vm8, %v1584_v48, %v6875_v56  ;;  %6288 = vpow2.f32 %v5479_v28  ;;  %1932 = vrot.lane.b32.xlu1 %v5564_v9, %s6350_s11  ;;  %v5677_v47 = vcombine.low %v3472_v31, %v3482_v45  ;;  %v311_v2 = vld [vmem:[%s6432_s8 + $0x70] sm:$0xff]  ;;  %v313_v29 = vld [vmem:[%s6432_s8 + $0x80] sm:$0xff] }
  0x90   : > { %v923_v24 = vsel %vm6628_vm11, %v915_v6, %v922_v61  ;;  %6290 = vpow2.f32 %v5480_v23  ;;  %v5629_v33 = vrot.slane %v2946_v5, 9  ;;  %v3044_v55 = vrot.slane %v2947_v18, 5  ;;  %v2949_v18 = vld [vmem:[#allocation2 + $0x18] sm:$0xe]  ;;  %v2951_v8 = vld [vmem:[#allocation2 + $0x20] sm:$0x1] }
  0x91   : > { %1193 = vst.msk [vmem:[#allocation2 + $0x40] sm:$0xf] %vm647_vm0, %v923_v24  ;;  %v3047_v62 = vrot.slane %v2948_v13, 5  ;;  %v723_v25 = vsel %vm6416_vm5, 0, %v722_v58  ;;  %v1591_v22 = vshrl.u32 %v1434_v3, 16  ;;  %v1594_v6 = vshll.u32 %v1434_v3, 16 }
  0x92   : > { %724 = vst [vmem:[#allocation2 + $0x44] sm:$0x1] %v723_v25  ;;  %v3484_v27 = vshrl.u32 %v3414_v7, 16  ;;  %v3487_v54 = vshll.u32 %v3414_v7, 16  ;;  %v3493_v39 = vshll.u32 %v3415_v46, 16  ;;  %v3045_v40 = vsel %vm6915_vm14, %v5629_v33, %v3044_v55 }
  0x93   : > { %v3046_v20 = vrot.slane %v3044_v55, 4  ;;  %v1593_v37 = vrot.slane %v1591_v22, 4  ;;  %v3497_v35 = vshrl.u32 %v3415_v46, 16  ;;  %3891 = vrot.lane.b32.xlu1 %v5677_v47, %s6350_s11  ;;  %v1596_v21 = vrot.slane %v1594_v6, 5  ;;  %v725_v55 = vld [vmem:[#allocation2 + $0x50] sm:$0x1] }
  0x94   : > { %v3486_v52 = vrot.slane %v3484_v27, 4  ;;  %v3489_v38 = vrot.slane %v3487_v54, 5  ;;  %v3495_v60 = vrot.slane %v3493_v39, 5  ;;  %v3503_v44 = vshll.u32 %v3416_v36, 16 }
  0x95   : > { %v3048_v50 = vsel %vm6915_vm14, %v3046_v20, %v3047_v62  ;;  %v3499_v56 = vrot.slane %v3497_v35, 4  ;;  %v6929_v59 = vadd.f32 %v6792_v10, %v6866_v51  ;;  %v1597_v0 = vor.u32 %v1596_v21, %v1593_v37  ;;  %v2950_v51 = vld [vmem:[#allocation2 + $0x1c] sm:$0xf]  ;;  %v6140_v62 = vld [vmem:[%s8398_s3 + $0x40] sm:$0xff]   ;;  %v3418_v35 = vld [vmem:[#allocation2 + $0x34] sm:$0xf] }
  0x96   : > { %v5645_v49 = vcombine.low %v3045_v40, %v3048_v50  ;;  %v3490_v14 = vor.u32 %v3489_v38, %v3486_v52  ;;  %v6935_v42 = vadd.f32 %v6792_v10, %v6880_v19  ;;  %v3505_v9 = vrot.slane %v3503_v44, 5  ;;  %5814 = vmatprep.subr.bf16.mxu0 %v6140_v62  ;;  %v6142_v40 = vld [vmem:[%s8398_s3 + $0x48] sm:$0xff]   ;;  %6098 = vmatprep.subr.bf16.mxu1 %v6140_v62  ;;  %v3419_v21 = vld [vmem:[#allocation2 + $0x38] sm:$0x1]  ;;  %v681_v44 = vld [vmem:[#allocation2 + $0x60] sm:$0x1] }
  0x97   : > { %v3500_v5 = vor.u32 %v3499_v56, %v3495_v60  ;;  %v5481_v31 = vmul.f32 -1.442695, %v6929_v59  ;;  %v679_v12 = vsel %vm6403_vm3, 0, %v678_v26  ;;  %v5553_v58 = vcombine.low %v1579_v17, %v1589_v15  ;;  %v3417_v26 = vld [vmem:[#allocation2 + $0x30] sm:$0xf]  ;;  %v6143_v38 = vld [vmem:[%s8398_s3 + $0x8] sm:$0xff]  }
  0x98   : > { %v6132_v13 = vld [vmem:[#allocation2 + $0x3c] sm:$0xff]   ;;  %3202 = vrot.lane.b32.xlu1 %v5645_v49, %s6350_s11  ;;  %v6941_v28 = vrot.slane %v1597_v0, 4  ;;  %680 = vst [vmem:[#allocation2 + $0x54] sm:$0x1] %v679_v12  ;;  %v6944_v19 = vmul.f32 %v6766_v30, %v311_v2  ;;  %v6947_v23 = vmul.f32 %v6766_v30, %v312_v53  ;;  %v3491_v46 = vrot.slane %v3490_v14, 4  ;;  %v6144_v2 = vld [vmem:[%s8398_s3 + $0x50] sm:$0xff]  }
  0x99   : > { %v1435_v48 = vld [vmem:[#allocation2 + $0x40] sm:$0xf]  ;;  %v6289_v7 = vpop.eup %6288  ;;  %v1194_v61 = vld [vmem:[#allocation2 + $0x44] sm:$0x1]  ;;  %v3501_v24 = vrot.slane %v3500_v5, 4  ;;  %2378 = vrot.lane.b32.xlu0 %v6132_v13, %s6350_s11  ;;  %6292 = vpow2.f32 %v5481_v31  ;;  %v5630_v54 = vrot.slane %v2949_v18, 9  ;;  %v6973_v52 = vmul.f32 %v6766_v30, %v313_v29 }
  0x9a   : > { %v1600_v45 = vshll.u32 %v1435_v48, 16  ;;  %v1604_v3 = vshrl.u32 %v1435_v48, 16  ;;  %v6291_v17 = vpop.eup %6290  ;;  %v513_v15 = vadd.f32 1.0, %v6289_v7  ;;  %v1195_v47 = vsel %vm6403_vm3, %v924_v57, %v1194_v61  ;;  %v6141_v57 = vld [vmem:[%s8398_s3] sm:$0xff]   ;;  %v2953_v29 = vld [vmem:[#allocation2 + $0x28] sm:$0xf] }
  0x9b   : > { %v5482_v33 = vmul.f32 -1.442695, %v6935_v42  ;;  %v514_v25 = vadd.f32 1.0, %v6291_v17  ;;  %1196 = vst [vmem:[#allocation2 + $0x44] sm:$0x1] %v1195_v47  ;;  %v3496_v6 = vsel %vm6497_vm8, %v3491_v46, %v3495_v60  ;;  %v3506_v27 = vsel %vm6497_vm8, %v3501_v24, %v3505_v9  ;;  %5815 = vmatpush3.bf16.msra.mxu0 %v6141_v57  ;;  %6106 = vmatpush3.bf16.msra.mxu1 %v6141_v57  ;;  %v6145_v7 = vld [vmem:[%s8398_s3 + $0x10] sm:$0xff]  }
  0x9c   : > { %v6959_v22 = vrot.slane %v1600_v45, 5  ;;  %v1606_v36 = vrot.slane %v1604_v3, 4  ;;  %6294 = vrcp.f32 %v513_v15  ;;  %v3051_v39 = vrot.slane %v2950_v51, 5  ;;  %5816 = vmatprep.subr.bf16.mxu0 %v6142_v40  ;;  %v2952_v5 = vld [vmem:[#allocation2 + $0x24] sm:$0xe]  ;;  %6099 = vmatprep.subr.bf16.mxu1 %v6142_v40 }
  0x9d   : > { %6296 = vrcp.f32 %v514_v25  ;;  %v5678_v37 = vcombine.low %v3496_v6, %v3506_v27  ;;  %1910 = vrot.lane.b32.xlu0 %v5553_v58, %s6350_s11  ;;  %v3054_v56 = vrot.slane %v2951_v8, 5  ;;  %v726_v49 = vsel %vm6416_vm5, 0, %v725_v55  ;;  %v2954_v27 = vld [vmem:[#allocation2 + $0x2c] sm:$0x1] }
  0x9e   : > { %v1607_v20 = vor.u32 %v1606_v36, %v6959_v22  ;;  %6298 = vpow2.f32 %v5482_v33  ;;  %v3052_v60 = vsel %vm6915_vm14, %v5630_v54, %v3051_v39  ;;  %v3053_v50 = vrot.slane %v3051_v39, 4  ;;  %727 = vst [vmem:[#allocation2 + $0x50] sm:$0x1] %v726_v49  ;;  %v6147_v54 = vld [vmem:[%s8398_s3 + $0x18] sm:$0xff]  }
  0x9f   : > { %3893 = vrot.lane.b32.xlu1 %v5678_v37, %s6350_s11  ;;  %v3508_v0 = vshrl.u32 %v3417_v26, 16  ;;  %v3511_v14 = vshll.u32 %v3417_v26, 16  ;;  %v3517_v31 = vshll.u32 %v3418_v35, 16  ;;  %v3521_v12 = vshrl.u32 %v3418_v35, 16  ;;  %5817 = vmatpush3.bf16.msra.mxu0 %v6143_v38  ;;  %v728_v37 = vld [vmem:[#allocation2 + $0x5c] sm:$0x1] }
  0xa0   : > { %v6984_v53 = vrot.slane %v1607_v20, 4  ;;  %v3055_v9 = vsel %vm6915_vm14, %v3053_v50, %v3054_v56  ;;  %v3527_v18 = vshll.u32 %v3419_v21, 16  ;;  %v6993_v48 = vadd.f32 %v6792_v10, %v6944_v19  ;;  %6107 = vmatpush3.bf16.msra.mxu1 %v6143_v38  ;;  %5818 = vmatprep.subr.bf16.mxu0 %v6144_v2  ;;  %v6146_v19 = vld [vmem:[%s8398_s3 + $0x58] sm:$0xff]   ;;  %v6148_v35 = vld [vmem:[%s8398_s3 + $0x60] sm:$0xff]  }
  0xa1   : > { %v5646_v51 = vcombine.low %v3052_v60, %v3055_v9  ;;  %v3510_v13 = vrot.slane %v3508_v0, 4  ;;  %v3513_v58 = vrot.slane %v3511_v14, 5  ;;  %v3519_v45 = vrot.slane %v3517_v31, 5  ;;  %6100 = vmatprep.subr.bf16.mxu1 %v6144_v2  ;;  %v3420_v56 = vld [vmem:[#allocation2 + $0x3c] sm:$0xf] }
  0xa2   : > { %v1436_v61 = vld [vmem:[#allocation2 + $0x44] sm:$0x1]  ;;  %v3523_v3 = vrot.slane %v3521_v12, 4  ;;  %v3529_v46 = vrot.slane %v3527_v18, 5  ;;  %v7000_v24 = vadd.f32 %v6792_v10, %v6947_v23  ;;  %v5483_v47 = vmul.f32 -1.442695, %v6993_v48 }
  0xa3   : > { %v1610_v17 = vshll.u32 %v1436_v61, 16  ;;  %3204 = vrot.lane.b32.xlu1 %v5646_v51, %s6350_s11  ;;  %v3514_v15 = vor.u32 %v3513_v58, %v3510_v13  ;;  %v682_v33 = vsel %vm6403_vm3, 0, %v681_v44  ;;  %v6293_v55 = vpop.eup %6292  ;;  %v5631_v25 = vrot.slane %v2952_v5, 9  ;;  %5819 = vmatpush3.bf16.msra.mxu0 %v6145_v7  ;;  %v3421_v12 = vld [vmem:[#allocation2 + $0x40] sm:$0xf] }
  0xa4   : > { %v3524_v62 = vor.u32 %v3523_v3, %v3519_v45  ;;  %v5484_v23 = vmul.f32 -1.442695, %v7000_v24  ;;  %683 = vst [vmem:[#allocation2 + $0x60] sm:$0x1] %v682_v33  ;;  %v3058_v36 = vrot.slane %v2953_v29, 5  ;;  %v515_v8 = vadd.f32 1.0, %v6293_v55  ;;  %6108 = vmatpush3.bf16.msra.mxu1 %v6145_v7  ;;  %5820 = vmatprep.subr.bf16.mxu0 %v6146_v19 }
  0xa5   : > { %v7010_v6 = vrot.slane %v1610_v17, 5  ;;  %v3515_v57 = vrot.slane %v3514_v15, 4  ;;  %6300 = vpow2.f32 %v5483_v47  ;;  %v1603_v26 = vsel %vm6497_vm8, %v6941_v28, %v6959_v22  ;;  %6101 = vmatprep.subr.bf16.mxu1 %v6146_v19  ;;  %v3422_v13 = vld [vmem:[#allocation2 + $0x44] sm:$0x1]  ;;  %v6150_v7 = vld [vmem:[%s8398_s3 + $0x68] sm:$0xff]  }
  0xa6   : > { %v6295_v39 = vpop.eup %6294  ;;  %v3525_v40 = vrot.slane %v3524_v62, 4  ;;  %6302 = vpow2.f32 %v5484_v23  ;;  %v3060_v20 = vrot.slane %v3058_v36, 4  ;;  %v3059_v50 = vsel %vm6915_vm14, %v5631_v25, %v3058_v36  ;;  %v6151_v25 = vld [vmem:[%s8398_s3 + $0x28] sm:$0xff]  }
  0xa7   : > { %v6297_v21 = vpop.eup %6296  ;;  %v609_v38 = vmul.f32 %v6295_v39, %v6796_v11  ;;  %6304 = vrcp.f32 %v515_v8  ;;  %v3520_v60 = vsel %vm6497_vm8, %v3515_v57, %v3519_v45  ;;  %v1613_v49 = vsel %vm6497_vm8, %v6984_v53, %v7010_v6  ;;  %5821 = vmatpush3.bf16.msra.mxu0 %v6147_v54  ;;  %v1197_v8 = vld [vmem:[#allocation2 + $0x48] sm:$0xf]  ;;  %v6153_v39 = vld [vmem:[%s8398_s3 + $0x70] sm:$0xff]  }
  0xa8   : > { %v6299_v44 = vpop.eup %6298  ;;  %v610_v2 = vmul.f32 %v6297_v21, %v6854_v34  ;;  %v3530_v0 = vsel %vm6497_vm8, %v3525_v40, %v3529_v46  ;;  %v3061_v11 = vrot.slane %v2954_v27, 5  ;;  %v729_v31 = vsel %vm6416_vm5, 0, %v728_v37  ;;  %v6149_v34 = vld [vmem:[%s8398_s3 + $0x20] sm:$0xff]   ;;  %6109 = vmatpush3.bf16.msra.mxu1 %v6147_v54  ;;  %5822 = vmatprep.subr.bf16.mxu0 %v6148_v35  ;;  %v314_v46 = vld [vmem:[%s6432_s8 + $0x88] sm:$0xff] }
  0xa9   : > { %v5792_v14 = vpack.c.bf16 %v609_v38, %v609_v38  ;;  %v516_v5 = vadd.f32 1.0, %v6299_v44  ;;  %v5679_v9 = vcombine.low %v3520_v60, %v3530_v0  ;;  %730 = vst [vmem:[#allocation2 + $0x5c] sm:$0x1] %v729_v31  ;;  %v3532_v58 = vshrl.u32 %v3420_v56, 16  ;;  %6102 = vmatprep.subr.bf16.mxu1 %v6148_v35  ;;  %v1201_v35 = vld [vmem:[#allocation2 + $0x50] sm:$0x1] }
  0xaa   : > { %v5793_v18 = vpack.c.bf16 %v610_v2, %v610_v2  ;;  %v3062_v51 = vsel %vm6915_vm14, %v3060_v20, %v3061_v11  ;;  %v3535_v29 = vshll.u32 %v3420_v56, 16  ;;  %v3541_v55 = vshll.u32 %v3421_v12, 16  ;;  %v684_v44 = vld [vmem:[#allocation2 + $0x6c] sm:$0x1]  ;;  %v6154_v31 = vld [vmem:[%s8398_s3 + $0x30] sm:$0xff]  }
  0xab   : > { %v926_v61 = vshrl.u32 %v5792_v14, 16  ;;  %v929_v45 = vshll.u32 %v5792_v14, 16  ;;  %6306 = vrcp.f32 %v516_v5  ;;  %3895 = vrot.lane.b32.xlu1 %v5679_v9, %s6350_s11  ;;  %v5647_v3 = vcombine.low %v3059_v50, %v3062_v51  ;;  %5823 = vmatpush3.bf16.msra.mxu0 %v6149_v34  ;;  %v2955_v9 = vld [vmem:[#allocation2 + $0x30] sm:$0xe]  ;;  %v2956_v51 = vld [vmem:[#allocation2 + $0x34] sm:$0xf] }
  0xac   : > { %v934_v19 = vshrl.u32 %v5793_v18, 16  ;;  %v937_v17 = vshll.u32 %v5793_v18, 16  ;;  %v3534_v15 = vrot.slane %v3532_v58, 4  ;;  %v3537_v47 = vrot.slane %v3535_v29, 5  ;;  %6110 = vmatpush3.bf16.msra.mxu1 %v6149_v34  ;;  %5824 = vmatprep.subr.bf16.mxu0 %v6150_v7  ;;  %v6155_v58 = vld [vmem:[%s8398_s3 + $0x78] sm:$0xff]  }
  0xad   : > { %v928_v33 = vrot.slane %v926_v61, 7  ;;  %v3545_v62 = vshrl.u32 %v3421_v12, 16  ;;  %v3551_v23 = vshll.u32 %v3422_v13, 16  ;;  %v353_v27 = vmul.f32 %v6766_v30, %v314_v46  ;;  %6103 = vmatprep.subr.bf16.mxu1 %v6150_v7  ;;  %v2957_v13 = vld [vmem:[#allocation2 + $0x38] sm:$0x1] }
  0xae   : > { %v936_v36 = vrot.slane %v934_v19, 7  ;;  %v3538_v57 = vor.u32 %v3537_v47, %v3534_v15  ;;  %v7052_v54 = vadd.f32 %v6792_v10, %v6973_v52  ;;  %v3543_v21 = vrot.slane %v3541_v55, 5  ;;  %v731_v19 = vld [vmem:[#allocation2 + $0x68] sm:$0x1]  ;;  %v6156_v55 = vld [vmem:[%s8398_s3 + $0x38] sm:$0xff]  }
  0xaf   : > { %v6301_v40 = vpop.eup %6300  ;;  %v931_v20 = vor.u32 %v929_v45, %v928_v33  ;;  %v932_v37 = vrot.slane %v928_v33, 4  ;;  %3206 = vrot.lane.b32.xlu1 %v5647_v3, %s6350_s11  ;;  %v3547_v38 = vrot.slane %v3545_v62, 4  ;;  %v3553_v5 = vrot.slane %v3551_v23, 5  ;;  %5825 = vmatpush3.bf16.msra.mxu0 %v6151_v25 }
  0xb0   : > { %v6303_v60 = vpop.eup %6302  ;;  %v939_v30 = vor.u32 %v937_v17, %v936_v36  ;;  %v941_v50 = vrot.slane %v936_v36, 4  ;;  %v517_v56 = vadd.f32 1.0, %v6301_v40  ;;  %v3539_v52 = vrot.slane %v3538_v57, 4  ;;  %6111 = vmatpush3.bf16.msra.mxu1 %v6151_v25  ;;  %5826 = vmatprep.subr.bf16.mxu0 %v6153_v39  ;;  %v316_v57 = vld [vmem:[%s6432_s8 + $0x98] sm:$0xff] }
  0xb1   : > { %v6305_v2 = vpop.eup %6304  ;;  %v1198_v0 = vsel %vm6622_vm10, %v931_v20, %v1197_v8  ;;  %v518_v11 = vadd.f32 1.0, %v6303_v60  ;;  %v3548_v14 = vor.u32 %v3547_v38, %v3543_v21  ;;  %6104 = vmatprep.subr.bf16.mxu1 %v6153_v39  ;;  %v7075_v7 = vadd.f32 %v6792_v10, %v353_v27  ;;  %v315_v8 = vld [vmem:[%s6432_s8 + $0x90] sm:$0xff]  ;;  %v6160_v27 = vld [vmem:[%s8398_s3 + $0x100] sm:$0xff]  }
  0xb2   : > { %v940_v12 = vsel %vm6628_vm11, %v932_v37, %v939_v30  ;;  %1199 = vst [vmem:[#allocation2 + $0x48] sm:$0xf] %v1198_v0  ;;  %v611_v34 = vmul.f32 %v6305_v2, %v6929_v59  ;;  %v1202_v18 = vsel %vm6403_vm3, %v941_v50, %v1201_v35  ;;  %6308 = vrcp.f32 %v517_v56  ;;  %v1204_v60 = vld [vmem:[#allocation2 + $0x54] sm:$0xf]  ;;  %v7116_v56 = vld [vmem:[%s8396_s1] ss:$0 sm:$0xff] }
  0xb3   : > { %1200 = vst.msk [vmem:[#allocation2 + $0x4c] sm:$0xf] %vm647_vm0, %v940_v12  ;;  %1203 = vst [vmem:[#allocation2 + $0x50] sm:$0x1] %v1202_v18  ;;  %6310 = vrcp.f32 %v518_v11  ;;  %v3544_v29 = vsel %vm6497_vm8, %v3539_v52, %v3543_v21  ;;  %v3549_v59 = vrot.slane %v3548_v14, 4  ;;  %v685_v3 = vsel %vm6403_vm3, 0, %v684_v44  ;;  %5827 = vmatpush3.bf16.msra.mxu0 %v6154_v31 }
  0xb4   : > { %v5794_v61 = vpack.c.bf16 %v611_v34, %v611_v34  ;;  %v5485_v45 = vmul.f32 -1.442695, %v7052_v54  ;;  %v5632_v46 = vrot.slane %v2955_v9, 9  ;;  %v5486_v47 = vmul.f32 -1.442695, %v7075_v7  ;;  %6112 = vmatpush3.bf16.msra.mxu1 %v6154_v31  ;;  %5828 = vmatprep.subr.bf16.mxu0 %v6155_v58  ;;  %v317_v21 = vld [vmem:[%s6432_s8 + $0xa0] sm:$0xff] }
  0xb5   : > { %v6307_v17 = vpop.eup %6306  ;;  %v3554_v15 = vsel %vm6497_vm8, %v3549_v59, %v3553_v5  ;;  %686 = vst [vmem:[#allocation2 + $0x6c] sm:$0x1] %v685_v3  ;;  %v3065_v33 = vrot.slane %v2956_v51, 5  ;;  %v3068_v10 = vrot.slane %v2957_v13, 5  ;;  %6105 = vmatprep.subr.bf16.mxu1 %v6155_v58  ;;  %v732_v40 = vsel %vm6416_vm5, 0, %v731_v19 }
  0xb6   : > { %v612_v62 = vmul.f32 %v6307_v17, %v6935_v42  ;;  %v943_v23 = vshrl.u32 %v5794_v61, 16  ;;  %v946_v25 = vshll.u32 %v5794_v61, 16  ;;  %v5680_v36 = vcombine.low %v3544_v29, %v3554_v15  ;;  %v6159_v42 = vld [vmem:[%s8398_s3 + $0xc0] sm:$0xff]   ;;  %733 = vst [vmem:[#allocation2 + $0x68] sm:$0x1] %v732_v40 }
  0xb7   : > { %6312 = vpow2.f32 %v5485_v45  ;;  %v3067_v39 = vrot.slane %v3065_v33, 4  ;;  %v3066_v35 = vsel %vm6915_vm14, %v5632_v46, %v3065_v33  ;;  %v5554_v38 = vcombine.low %v1603_v26, %v1613_v49  ;;  %5829 = vmatpush3.bf16.msra.mxu0 %v6156_v55  ;;  %v1208_v51 = vld [vmem:[#allocation2 + $0x5c] sm:$0x1] }
  0xb8   : > { %v5795_v20 = vpack.c.bf16 %v612_v62, %v612_v62  ;;  %v945_v37 = vrot.slane %v943_v23, 7  ;;  %3897 = vrot.lane.b32.xlu1 %v5680_v36, %s6350_s11  ;;  %6314 = vpow2.f32 %v5486_v47  ;;  %v7119_v52 = vmul.f32 %v7116_v56, %v315_v8  ;;  %6113 = vmatpush3.bf16.msra.mxu1 %v6156_v55 }
  0xb9   : > { %v1437_v30 = vld [vmem:[#allocation2 + $0x48] sm:$0xf]  ;;  %v3069_v50 = vsel %vm6915_vm14, %v3067_v39, %v3068_v10  ;;  %v7122_v53 = vmul.f32 %v7116_v56, %v316_v57  ;;  %6058 = vmatprep.subr.bf16.mxu0 %v6160_v27  ;;  %v7125_v5 = vmul.f32 %v7116_v56, %v317_v21  ;;  %5926 = vmatprep.subr.bf16.mxu1 %v6159_v42  ;;  %v1211_v42 = vld [vmem:[#allocation2 + $0x60] sm:$0xf] }
  0xba   : > { %v6133_v6 = vld [vmem:[#allocation2 + $0x48] sm:$0xff]   ;;  %v948_v28 = vor.u32 %v946_v25, %v945_v37  ;;  %v949_v22 = vrot.slane %v945_v37, 4  ;;  %v951_v26 = vshrl.u32 %v5795_v20, 16  ;;  %v954_v49 = vshll.u32 %v5795_v20, 16  ;;  %v1439_v2 = vld [vmem:[#allocation2 + $0x50] sm:$0x1] }
  0xbb   : > { %v1438_v44 = vld [vmem:[#allocation2 + $0x4c] sm:$0xf]  ;;  %v1615_v0 = vshrl.u32 %v1437_v30, 16  ;;  %v1618_v11 = vshll.u32 %v1437_v30, 16  ;;  %v5648_v14 = vcombine.low %v3066_v35, %v3069_v50  ;;  %2380 = vrot.lane.b32.xlu0 %v6133_v6, %s6350_s11  ;;  %v1634_v59 = vshll.u32 %v1439_v2, 16 }
  0xbc   : > { %v6309_v9 = vpop.eup %6308  ;;  %v953_v31 = vrot.slane %v951_v26, 7  ;;  %v1205_v12 = vsel %vm6622_vm10, %v948_v28, %v1204_v60  ;;  %v1624_v34 = vshll.u32 %v1438_v44, 16  ;;  %v1628_v18 = vshrl.u32 %v1438_v44, 16  ;;  %v3423_v45 = vld [vmem:[#allocation2 + $0x48] sm:$0xf] }
  0xbd   : > { %v6311_v13 = vpop.eup %6310  ;;  %1206 = vst [vmem:[#allocation2 + $0x54] sm:$0xf] %v1205_v12  ;;  %v1617_v58 = vrot.slane %v1615_v0, 4  ;;  %v1620_v29 = vrot.slane %v1618_v11, 5  ;;  %v613_v61 = vmul.f32 %v6309_v9, %v6993_v48  ;;  %3208 = vrot.lane.b32.xlu1 %v5648_v14, %s6350_s11  ;;  %v1636_v47 = vrot.slane %v1634_v59, 5  ;;  %v318_v25 = vld [vmem:[%s6432_s8 + $0xa8] sm:$0xff] }
  0xbe   : > { %v956_v3 = vor.u32 %v954_v49, %v953_v31  ;;  %v958_v46 = vrot.slane %v953_v31, 4  ;;  %v1626_v19 = vrot.slane %v1624_v34, 5  ;;  %v1630_v17 = vrot.slane %v1628_v18, 4  ;;  %v3424_v30 = vld [vmem:[#allocation2 + $0x4c] sm:$0xf] }
  0xbf   : > { %v1621_v15 = vor.u32 %v1620_v29, %v1617_v58  ;;  %v614_v33 = vmul.f32 %v6311_v13, %v7000_v24  ;;  %v5796_v10 = vpack.c.bf16 %v613_v61, %v613_v61  ;;  %1912 = vrot.lane.b32.xlu0 %v5554_v38, %s6350_s11  ;;  %v3556_v23 = vshrl.u32 %v3423_v45, 16  ;;  %v1215_v34 = vld [vmem:[#allocation2 + $0x68] sm:$0x1]  ;;  %v3425_v18 = vld [vmem:[#allocation2 + $0x50] sm:$0x1] }
  0xc0   : > { %v957_v55 = vsel %vm6628_vm11, %v949_v22, %v956_v3  ;;  %v1631_v62 = vor.u32 %v1630_v17, %v1626_v19  ;;  %v1209_v48 = vsel %vm6403_vm3, %v958_v46, %v1208_v51  ;;  %v3559_v35 = vshll.u32 %v3423_v45, 16  ;;  %v7152_v61 = vld [vmem:[%s8397_s2] ss:$0 sm:$0xff] }
  0xc1   : > { %v6313_v36 = vpop.eup %6312  ;;  %1207 = vst.msk [vmem:[#allocation2 + $0x58] sm:$0xf] %vm647_vm0, %v957_v55  ;;  %v1622_v8 = vrot.slane %v1621_v15, 4  ;;  %v5797_v57 = vpack.c.bf16 %v614_v33, %v614_v33  ;;  %v960_v27 = vshrl.u32 %v5796_v10, 16  ;;  %v963_v39 = vshll.u32 %v5796_v10, 16 }
  0xc2   : > { %1210 = vst [vmem:[#allocation2 + $0x5c] sm:$0x1] %v1209_v48  ;;  %v6315_v24 = vpop.eup %6314  ;;  %v1632_v40 = vrot.slane %v1631_v62, 4  ;;  %v519_v20 = vadd.f32 1.0, %v6313_v36  ;;  %v3558_v37 = vrot.slane %v3556_v23, 4  ;;  %v7141_v50 = vmul.f32 %v7116_v56, %v318_v25 }
  0xc3   : > { %v962_v21 = vrot.slane %v960_v27, 7  ;;  %v968_v38 = vshrl.u32 %v5797_v57, 16  ;;  %v971_v60 = vshll.u32 %v5797_v57, 16  ;;  %v1627_v6 = vsel %vm6497_vm8, %v1622_v8, %v1626_v19  ;;  %v7172_v36 = vld [vmem:[#allocation2 + $0x3c] sm:$0xe] }
  0xc4   : > { %v1440_v28 = vld [vmem:[#allocation2 + $0x54] sm:$0xf]  ;;  %v520_v22 = vadd.f32 1.0, %v6315_v24  ;;  %6316 = vrcp.f32 %v519_v20  ;;  %v3561_v26 = vrot.slane %v3559_v35, 5  ;;  %v1637_v49 = vsel %vm6497_vm8, %v1632_v40, %v1636_v47 }
  0xc5   : > { %v965_v44 = vor.u32 %v963_v39, %v962_v21  ;;  %v966_v2 = vrot.slane %v962_v21, 4  ;;  %v970_v0 = vrot.slane %v968_v38, 7  ;;  %v1639_v11 = vshrl.u32 %v1440_v28, 16 }
  0xc6   : > { %v1642_v14 = vshll.u32 %v1440_v28, 16  ;;  %6318 = vrcp.f32 %v520_v22  ;;  %v3562_v9 = vor.u32 %v3561_v26, %v3558_v37  ;;  %v3565_v51 = vshll.u32 %v3424_v30, 16  ;;  %v2959_v37 = vld [vmem:[#allocation2 + $0x40] sm:$0xf] }
  0xc7   : > { %v973_v31 = vor.u32 %v971_v60, %v970_v0  ;;  %v975_v56 = vrot.slane %v970_v0, 4  ;;  %v1212_v12 = vsel %vm6622_vm10, %v965_v44, %v1211_v42  ;;  %v5555_v58 = vcombine.low %v1627_v6, %v1637_v49 }
  0xc8   : > { %v6134_v13 = vld [vmem:[#allocation2 + $0x54] sm:$0xff]   ;;  %1213 = vst [vmem:[#allocation2 + $0x60] sm:$0xf] %v1212_v12  ;;  %v1641_v59 = vrot.slane %v1639_v11, 4  ;;  %v7156_v45 = vadd.f32 %v7152_v61, %v7119_v52  ;;  %v7160_v3 = vadd.f32 %v7152_v61, %v7122_v53  ;;  %v1644_v17 = vrot.slane %v1642_v14, 5 }
  0xc9   : > { %v1441_v29 = vld [vmem:[#allocation2 + $0x58] sm:$0xf]  ;;  %v974_v46 = vsel %vm6628_vm11, %v966_v2, %v973_v31  ;;  %v1442_v19 = vld [vmem:[#allocation2 + $0x5c] sm:$0x1]  ;;  %2382 = vrot.lane.b32.xlu0 %v6134_v13, %s6350_s11  ;;  %v1216_v52 = vsel %vm6403_vm3, %v975_v56, %v1215_v34  ;;  %v7168_v10 = vrot.slane %v3562_v9, 4  ;;  %v7170_v55 = vrot.slane %v3565_v51, 5 }
  0xca   : > { %v1648_v15 = vshll.u32 %v1441_v29, 16  ;;  %v1652_v47 = vshrl.u32 %v1441_v29, 16  ;;  %1214 = vst.msk [vmem:[#allocation2 + $0x64] sm:$0xf] %vm647_vm0, %v974_v46  ;;  %v1658_v33 = vshll.u32 %v1442_v19, 16  ;;  %v1645_v62 = vor.u32 %v1644_v17, %v1641_v59 }
  0xcb   : > { %v687_v53 = vld [vmem:[#allocation2 + $0x78] sm:$0x1]  ;;  %1217 = vst [vmem:[#allocation2 + $0x68] sm:$0x1] %v1216_v52  ;;  %v3569_v25 = vshrl.u32 %v3424_v30, 16  ;;  %v3568_v57 = vsel %vm6497_vm8, %v7168_v10, %v7170_v55  ;;  %v3575_v27 = vshll.u32 %v3425_v18, 16 }
  0xcc   : > { %v1650_v48 = vrot.slane %v1648_v15, 5  ;;  %v1654_v23 = vrot.slane %v1652_v47, 4  ;;  %v1660_v8 = vrot.slane %v1658_v33, 5  ;;  %v5487_v39 = vmul.f32 -1.442695, %v7156_v45 }
  0xcd   : > { %v1646_v24 = vrot.slane %v1645_v62, 4  ;;  %v3571_v42 = vrot.slane %v3569_v25, 4  ;;  %v5488_v20 = vmul.f32 -1.442695, %v7160_v3  ;;  %1914 = vrot.lane.b32.xlu0 %v5555_v58, %s6350_s11  ;;  %v3577_v21 = vrot.slane %v3575_v27, 5 }
  0xce   : > { %v1655_v40 = vor.u32 %v1654_v23, %v1650_v48  ;;  %v6317_v35 = vpop.eup %6316  ;;  %6320 = vpow2.f32 %v5487_v39  ;;  %v688_v38 = vsel %vm6403_vm3, 0, %v687_v53  ;;  %v5633_v60 = vrot.slane %v7172_v36, 9  ;;  %v734_v47 = vld [vmem:[#allocation2 + $0x74] sm:$0x1]  ;;  %v2960_v53 = vld [vmem:[#allocation2 + $0x44] sm:$0x1] }
  0xcf   : > { %v1651_v30 = vsel %vm6497_vm8, %v1646_v24, %v1650_v48  ;;  %v615_v28 = vmul.f32 %v6317_v35, %v7052_v54  ;;  %v1443_v22 = vld [vmem:[#allocation2 + $0x60] sm:$0xf]  ;;  %v3572_v26 = vor.u32 %v3571_v42, %v7170_v55  ;;  %689 = vst [vmem:[#allocation2 + $0x78] sm:$0x1] %v688_v38  ;;  %6322 = vpow2.f32 %v5488_v20  ;;  %v1218_v62 = vld [vmem:[#allocation2 + $0x6c] sm:$0xf] }
  0xd0   : > { %v1656_v6 = vrot.slane %v1655_v40, 4  ;;  %v6319_v49 = vpop.eup %6318  ;;  %v1663_v44 = vshrl.u32 %v1443_v22, 16  ;;  %v1666_v2 = vshll.u32 %v1443_v22, 16  ;;  %v3072_v0 = vrot.slane %v2959_v37, 5  ;;  %v3426_v40 = vld [vmem:[#allocation2 + $0x54] sm:$0xf] }
  0xd1   : > { %v6135_v11 = vld [vmem:[#allocation2 + $0x60] sm:$0xff]   ;;  %v616_v9 = vmul.f32 %v6319_v49, %v7075_v7  ;;  %v5798_v31 = vpack.c.bf16 %v615_v28, %v615_v28  ;;  %v3573_v12 = vrot.slane %v3572_v26, 4  ;;  %v7200_v25 = vadd.f32 %v7152_v61, %v7125_v5  ;;  %v3427_v38 = vld [vmem:[#allocation2 + $0x58] sm:$0xf]  ;;  %v3428_v28 = vld [vmem:[#allocation2 + $0x5c] sm:$0x1] }
  0xd2   : > { %v1661_v14 = vsel %vm6497_vm8, %v1656_v6, %v1660_v8  ;;  %v1444_v56 = vld [vmem:[#allocation2 + $0x64] sm:$0xf]  ;;  %v1445_v54 = vld [vmem:[#allocation2 + $0x68] sm:$0x1]  ;;  %v1665_v18 = vrot.slane %v1663_v44, 4  ;;  %v1668_v51 = vrot.slane %v1666_v2, 5  ;;  %2384 = vrot.lane.b32.xlu0 %v6135_v11, %s6350_s11  ;;  %v7204_v36 = vadd.f32 %v7152_v61, %v7141_v50 }
  0xd3   : > { %v5556_v34 = vcombine.low %v1651_v30, %v1661_v14  ;;  %v1672_v13 = vshll.u32 %v1444_v56, 16  ;;  %v5799_v58 = vpack.c.bf16 %v616_v9, %v616_v9  ;;  %v977_v29 = vshrl.u32 %v5798_v31, 16  ;;  %v690_v11 = vld [vmem:[#allocation2 + $0x84] sm:$0x1] }
  0xd4   : > { %v980_v59 = vshll.u32 %v5798_v31, 16  ;;  %v1676_v46 = vshrl.u32 %v1444_v56, 16  ;;  %v1669_v19 = vor.u32 %v1668_v51, %v1665_v18  ;;  %v1682_v15 = vshll.u32 %v1445_v54, 16  ;;  %v2961_v56 = vld [vmem:[#allocation2 + $0x48] sm:$0xe]  ;;  %v6196_v32 = vld [vmem:[#allocation2 + $0x60] sm:$0xff]  }
  0xd5   : > { %v7192_v17 = vrot.slane %v1672_v13, 5  ;;  %v3578_v7 = vsel %vm6497_vm8, %v3573_v12, %v3577_v21  ;;  %v979_v33 = vrot.slane %v977_v29, 7  ;;  %v985_v52 = vshrl.u32 %v5799_v58, 16  ;;  %v737_v12 = vld [vmem:[#allocation2 + $0x80] sm:$0x1]  ;;  %3401 = vst.msk [vmem:[#allocation3 + $0x108] sm:$0xff] %vm1402_vm15, %v6196_v32 }
  0xd6   : > { %v988_v10 = vshll.u32 %v5799_v58, 16  ;;  %v1678_v55 = vrot.slane %v1676_v46, 4  ;;  %v7196_v48 = vrot.slane %v1669_v19, 4  ;;  %v5681_v23 = vcombine.low %v3568_v57, %v3578_v7  ;;  %1916 = vrot.lane.b32.xlu0 %v5556_v34, %s6350_s11  ;;  %v7224_v34 = vpop.permute.xlu0 %2370  ;;  %v2962_v13 = vld [vmem:[#allocation2 + $0x4c] sm:$0xf]  ;;  %v7231_v19 = vpop.permute.xlu1 %1902 }
  0xd7   : > { %v982_v8 = vor.u32 %v980_v59, %v979_v33  ;;  %v983_v27 = vrot.slane %v979_v33, 4  ;;  %v987_v39 = vrot.slane %v985_v52, 7  ;;  %v3073_v57 = vsel %vm6915_vm14, %v5633_v60, %v3072_v0 }
  0xd8   : > { %v1679_v24 = vor.u32 %v1678_v55, %v7192_v17  ;;  %v6321_v42 = vpop.eup %6320  ;;  %3899 = vrot.lane.b32.xlu1 %v5681_v23, %s6350_s11  ;;  %v3074_v5 = vrot.slane %v3072_v0, 4  ;;  %v3075_v20 = vrot.slane %v2960_v53, 5  ;;  %v735_v50 = vsel %vm6416_vm5, 0, %v734_v47  ;;  %v2963_v47 = vld [vmem:[#allocation2 + $0x50] sm:$0x1] }
  0xd9   : > { %v990_v61 = vor.u32 %v988_v10, %v987_v39  ;;  %v1219_v37 = vsel %vm6622_vm10, %v982_v8, %v1218_v62  ;;  %v1675_v35 = vsel %vm6497_vm8, %v7196_v48, %v7192_v17  ;;  %v1684_v21 = vrot.slane %v1682_v15, 5  ;;  %736 = vst [vmem:[#allocation2 + $0x74] sm:$0x1] %v735_v50  ;;  %v6323_v30 = vpop.eup %6322 }
  0xda   : > { %1220 = vst [vmem:[#allocation2 + $0x6c] sm:$0xf] %v1219_v37  ;;  %v521_v60 = vadd.f32 1.0, %v6321_v42  ;;  %v3076_v6 = vsel %vm6915_vm14, %v3074_v5, %v3075_v20  ;;  %v3580_v22 = vshrl.u32 %v3426_v40, 16  ;;  %v3583_v26 = vshll.u32 %v3426_v40, 16  ;;  %v7239_v42 = vpop.permute.xlu0 %2394 }
  0xdb   : > { %v991_v49 = vsel %vm6628_vm11, %v983_v27, %v990_v61  ;;  %v1680_v44 = vrot.slane %v1679_v24, 4  ;;  %v522_v2 = vadd.f32 1.0, %v6323_v30  ;;  %v5649_v0 = vcombine.low %v3073_v57, %v3076_v6  ;;  %v3429_v40 = vld [vmem:[#allocation2 + $0x60] sm:$0xf]  ;;  %v7241_v57 = vpop.permute.xlu1 %1926 }
  0xdc   : > { %v992_v14 = vrot.slane %v987_v39, 4  ;;  %1221 = vst.msk [vmem:[#allocation2 + $0x70] sm:$0xf] %vm647_vm0, %v991_v49  ;;  %6324 = vrcp.f32 %v521_v60  ;;  %v3582_v9 = vrot.slane %v3580_v22, 4  ;;  %v3585_v31 = vrot.slane %v3583_v26, 5 }
  0xdd   : > { %6326 = vrcp.f32 %v522_v2  ;;  %3210 = vrot.lane.b32.xlu1 %v5649_v0, %s6350_s11  ;;  %v3589_v54 = vshll.u32 %v3427_v38, 16  ;;  %v3593_v18 = vshrl.u32 %v3427_v38, 16  ;;  %v3599_v51 = vshll.u32 %v3428_v28, 16 }
  0xde   : > { %v3586_v58 = vor.u32 %v3585_v31, %v3582_v9  ;;  %v5489_v29 = vmul.f32 -1.442695, %v7200_v25  ;;  %v5490_v59 = vmul.f32 -1.442695, %v7204_v36  ;;  %v691_v46 = vsel %vm6403_vm3, 0, %v690_v11 }
  0xdf   : > { %v1685_v17 = vsel %vm6497_vm8, %v1680_v44, %v1684_v21  ;;  %v3591_v15 = vrot.slane %v3589_v54, 5  ;;  %v3595_v7 = vrot.slane %v3593_v18, 4  ;;  %692 = vst [vmem:[#allocation2 + $0x84] sm:$0x1] %v691_v46  ;;  %v5634_v33 = vrot.slane %v2961_v56, 9 }
  0xe0   : > { %v1222_v52 = vld [vmem:[#allocation2 + $0x74] sm:$0x1]  ;;  %v3587_v10 = vrot.slane %v3586_v58, 4  ;;  %v3601_v55 = vrot.slane %v3599_v51, 5  ;;  %6328 = vpow2.f32 %v5489_v29  ;;  %v3079_v53 = vrot.slane %v2962_v13, 5  ;;  %v7259_v58 = vpop.permute.xlu0 %2372  ;;  %v7261_v29 = vpop.permute.xlu1 %2396 }
  0xe1   : > { %v1223_v62 = vsel %vm6403_vm3, %v992_v14, %v1222_v52  ;;  %v1446_v48 = vld [vmem:[#allocation2 + $0x6c] sm:$0xf]  ;;  %v3596_v23 = vor.u32 %v3595_v7, %v3591_v15  ;;  %6330 = vpow2.f32 %v5490_v59  ;;  %v738_v8 = vsel %vm6416_vm5, 0, %v737_v12  ;;  %v3430_v14 = vld [vmem:[#allocation2 + $0x64] sm:$0xf] }
  0xe2   : > { %1224 = vst [vmem:[#allocation2 + $0x74] sm:$0x1] %v1223_v62  ;;  %v1687_v27 = vshrl.u32 %v1446_v48, 16  ;;  %v1690_v39 = vshll.u32 %v1446_v48, 16  ;;  %v3082_v24 = vrot.slane %v2963_v47, 5  ;;  %v5557_v20 = vcombine.low %v1675_v35, %v1685_v17 }
  0xe3   : > { %739 = vst [vmem:[#allocation2 + $0x80] sm:$0x1] %v738_v8  ;;  %v6136_v5 = vld [vmem:[#allocation2 + $0x6c] sm:$0xff]   ;;  %v3592_v61 = vsel %vm6497_vm8, %v3587_v10, %v3591_v15  ;;  %v3597_v37 = vrot.slane %v3596_v23, 4  ;;  %v3080_v21 = vsel %vm6915_vm14, %v5634_v33, %v3079_v53  ;;  %v3081_v22 = vrot.slane %v3079_v53, 4 }
  0xe4   : > { %v1447_v50 = vld [vmem:[#allocation2 + $0x70] sm:$0xf]  ;;  %v1689_v38 = vrot.slane %v1687_v27, 4  ;;  %v1692_v30 = vrot.slane %v1690_v39, 5  ;;  %2386 = vrot.lane.b32.xlu0 %v6136_v5, %s6350_s11  ;;  %v3604_v26 = vshrl.u32 %v3429_v40, 16  ;;  %v3607_v35 = vshll.u32 %v3429_v40, 16 }
  0xe5   : > { %v1696_v60 = vshll.u32 %v1447_v50, 16  ;;  %v1700_v6 = vshrl.u32 %v1447_v50, 16  ;;  %v3602_v28 = vsel %vm6497_vm8, %v3597_v37, %v3601_v55  ;;  %v3083_v56 = vsel %vm6915_vm14, %v3081_v22, %v3082_v24  ;;  %v3431_v48 = vld [vmem:[#allocation2 + $0x68] sm:$0x1]  ;;  %v2964_v40 = vld [vmem:[#allocation2 + $0x54] sm:$0xe] }
  0xe6   : > { %v6325_v49 = vpop.eup %6324  ;;  %v1693_v44 = vor.u32 %v1692_v30, %v1689_v38  ;;  %v5682_v11 = vcombine.low %v3592_v61, %v3602_v28  ;;  %v3606_v12 = vrot.slane %v3604_v26, 4  ;;  %v3609_v54 = vrot.slane %v3607_v35, 5  ;;  %v2965_v5 = vld [vmem:[#allocation2 + $0x58] sm:$0xf]  ;;  %v740_v38 = vld [vmem:[#allocation2 + $0x8c] sm:$0x1]  ;;  %v7273_v26 = vpop.permute.xlu0 %1904 }
  0xe7   : > { %v7250_v2 = vrot.slane %v1696_v60, 5  ;;  %v1702_v0 = vrot.slane %v1700_v6, 4  ;;  %v6327_v9 = vpop.eup %6326  ;;  %v617_v31 = vmul.f32 %v6325_v49, %v7156_v45  ;;  %v5650_v13 = vcombine.low %v3080_v21, %v3083_v56  ;;  %v1225_v61 = vld [vmem:[#allocation2 + $0x78] sm:$0xf]  ;;  %v3432_v22 = vld [vmem:[#allocation2 + $0x6c] sm:$0xf]  ;;  %v7275_v35 = vpop.permute.xlu1 %1928 }
  0xe8   : > { %v618_v18 = vmul.f32 %v6327_v9, %v7160_v3  ;;  %v7256_v51 = vrot.slane %v1693_v44, 4  ;;  %3901 = vrot.lane.b32.xlu1 %v5682_v11, %s6350_s11  ;;  %1918 = vrot.lane.b32.xlu0 %v5557_v20, %s6350_s11  ;;  %v3610_v46 = vor.u32 %v3609_v54, %v3606_v12  ;;  %v3613_v17 = vshll.u32 %v3430_v14, 16  ;;  %v2966_v20 = vld [vmem:[#allocation2 + $0x5c] sm:$0x1] }
  0xe9   : > { %v5800_v59 = vpack.c.bf16 %v617_v31, %v617_v31  ;;  %v1448_v45 = vld [vmem:[#allocation2 + $0x74] sm:$0x1]  ;;  %v3617_v15 = vshrl.u32 %v3430_v14, 16  ;;  %v1703_v33 = vor.u32 %v1702_v0, %v7250_v2  ;;  %v3623_v28 = vshll.u32 %v3431_v48, 16  ;;  %v3433_v14 = vld [vmem:[#allocation2 + $0x70] sm:$0xf] }
  0xea   : > { %v6329_v7 = vpop.eup %6328  ;;  %v5801_v3 = vpack.c.bf16 %v618_v18, %v618_v18  ;;  %v1706_v52 = vshll.u32 %v1448_v45, 16  ;;  %v3611_v23 = vrot.slane %v3610_v46, 4  ;;  %v1699_v39 = vsel %vm6497_vm8, %v7256_v51, %v7250_v2  ;;  %v1229_v6 = vld [vmem:[#allocation2 + $0x80] sm:$0x1]  ;;  %v3434_v9 = vld [vmem:[#allocation2 + $0x74] sm:$0x1] }
  0xeb   : > { %v6331_v10 = vpop.eup %6330  ;;  %v994_v55 = vshrl.u32 %v5800_v59, 16  ;;  %v997_v53 = vshll.u32 %v5800_v59, 16  ;;  %v523_v62 = vadd.f32 1.0, %v6329_v7  ;;  %v3615_v37 = vrot.slane %v3613_v17, 5  ;;  %v2970_v48 = vld [vmem:[#allocation2 + $0x6c] sm:$0xe] }
  0xec   : > { %v1002_v8 = vshrl.u32 %v5801_v3, 16  ;;  %v1005_v27 = vshll.u32 %v5801_v3, 16  ;;  %v524_v24 = vadd.f32 1.0, %v6331_v10  ;;  %3212 = vrot.lane.b32.xlu1 %v5650_v13, %s6350_s11  ;;  %v3619_v21 = vrot.slane %v3617_v15, 4  ;;  %v2967_v3 = vld [vmem:[#allocation2 + $0x60] sm:$0xe] }
  0xed   : > { %v996_v50 = vrot.slane %v994_v55, 7  ;;  %6332 = vrcp.f32 %v523_v62  ;;  %v7271_v60 = vrot.slane %v1703_v33, 4  ;;  %v1708_v0 = vrot.slane %v1706_v52, 5  ;;  %v2968_v33 = vld [vmem:[#allocation2 + $0x64] sm:$0xf] }
  0xee   : > { %v1004_v30 = vrot.slane %v1002_v8, 7  ;;  %6334 = vrcp.f32 %v524_v24  ;;  %v3616_v11 = vsel %vm6497_vm8, %v3611_v23, %v3615_v37  ;;  %v3620_v12 = vor.u32 %v3619_v21, %v3615_v37  ;;  %v7290_v62 = vld [vmem:[#allocation2 + $0x68] sm:$0x1]  ;;  %v7292_v23 = vld [vmem:[#allocation2 + $0x70] sm:$0xf] }
  0xef   : > { %v999_v49 = vor.u32 %v997_v53, %v996_v50  ;;  %v1000_v44 = vrot.slane %v996_v50, 4  ;;  %v3625_v54 = vrot.slane %v3623_v28, 5  ;;  %v5635_v13 = vrot.slane %v2964_v40, 9 }
  0xf0   : > { %v1007_v31 = vor.u32 %v1005_v27, %v1004_v30  ;;  %v1009_v56 = vrot.slane %v1004_v30, 4  ;;  %v3086_v59 = vrot.slane %v2965_v5, 5  ;;  %v3089_v45 = vrot.slane %v2966_v20, 5  ;;  %v7296_v5 = vpop.permute.xlu0 %2374 }
  0xf1   : > { %v1226_v18 = vsel %vm6622_vm10, %v999_v49, %v1225_v61  ;;  %v3621_v15 = vrot.slane %v3620_v12, 4  ;;  %v741_v7 = vsel %vm6416_vm5, 0, %v740_v38  ;;  %v3628_v55 = vshrl.u32 %v3432_v22, 16  ;;  %8421 = vst [vmem:[#allocation7_spill] sm:$0xff] %v7296_v5 }
  0xf2   : > { %v1008_v46 = vsel %vm6628_vm11, %v1000_v44, %v1007_v31  ;;  %1227 = vst [vmem:[#allocation2 + $0x78] sm:$0xf] %v1226_v18  ;;  %v1230_v17 = vsel %vm6403_vm3, %v1009_v56, %v1229_v6  ;;  %v3087_v52 = vsel %vm6915_vm14, %v5635_v13, %v3086_v59  ;;  %v3088_v10 = vrot.slane %v3086_v59, 4  ;;  %742 = vst [vmem:[#allocation2 + $0x8c] sm:$0x1] %v741_v7 }
  0xf3   : > { %1228 = vst.msk [vmem:[#allocation2 + $0x7c] sm:$0xf] %vm647_vm0, %v1008_v46  ;;  %1231 = vst [vmem:[#allocation2 + $0x80] sm:$0x1] %v1230_v17  ;;  %v3631_v53 = vshll.u32 %v3432_v22, 16  ;;  %v3626_v8 = vsel %vm6497_vm8, %v3621_v15, %v3625_v54  ;;  %v3637_v27 = vshll.u32 %v3433_v14, 16  ;;  %v7298_v20 = vpop.permute.xlu1 %2398  ;;  %v1709_v38 = vsel %vm6497_vm8, %v7271_v60, %v1708_v0 }
  0xf4   : > { %v3641_v24 = vshrl.u32 %v3433_v14, 16  ;;  %v3647_v40 = vshll.u32 %v3434_v9, 16  ;;  %8422 = vst [vmem:[#allocation8_spill] sm:$0xff] %v7298_v20  ;;  %v5683_v50 = vcombine.low %v3616_v11, %v3626_v8  ;;  %v3090_v61 = vsel %vm6915_vm14, %v3088_v10, %v3089_v45 }
  0xf5   : > { %v3630_v37 = vrot.slane %v3628_v55, 4  ;;  %v3633_v21 = vrot.slane %v3631_v53, 5  ;;  %v5651_v30 = vcombine.low %v3087_v52, %v3090_v61  ;;  %v7305_v6 = vrot.slane %v3637_v27, 5 }
  0xf6   : > { %v3643_v28 = vrot.slane %v3641_v24, 4  ;;  %3903 = vrot.lane.b32.xlu1 %v5683_v50, %s6350_s11  ;;  %v3649_v44 = vrot.slane %v3647_v40, 5  ;;  %v5636_v14 = vrot.slane %v2967_v3, 9  ;;  %v3093_v11 = vrot.slane %v2968_v33, 5  ;;  %v7324_v33 = vpop.permute.xlu0 %1906 }
  0xf7   : > { %v6333_v22 = vpop.eup %6332  ;;  %v3634_v49 = vor.u32 %v3633_v21, %v3630_v37  ;;  %v3096_v56 = vrot.slane %v7290_v62, 5  ;;  %v5637_v12 = vrot.slane %v2970_v48, 9  ;;  %v3100_v54 = vrot.slane %v7292_v23, 5  ;;  %v7311_v60 = vpop.permute.xlu1 %1930  ;;  %v7392_v23 = vld [vmem:[#allocation2] sm:$0xe] }
  0xf8   : > { %v6335_v9 = vpop.eup %6334  ;;  %v619_v31 = vmul.f32 %v6333_v22, %v7200_v25  ;;  %v5558_v0 = vcombine.low %v1699_v39, %v1709_v38  ;;  %v3095_v45 = vrot.slane %v3093_v11, 4  ;;  %v3644_v7 = vor.u32 %v3643_v28, %v7305_v6 }
  0xf9   : > { %v620_v18 = vmul.f32 %v6335_v9, %v7204_v36  ;;  %v1449_v13 = vld [vmem:[#allocation2 + $0x78] sm:$0xf]  ;;  %v3635_v59 = vrot.slane %v3634_v49, 4  ;;  %v7322_v3 = vsel %vm6915_vm14, %v5636_v14, %v3093_v11  ;;  %v7336_v37 = vsel %vm6915_vm14, %v5637_v12, %v3100_v54 }
  0xfa   : > { %v6137_v46 = vld [vmem:[#allocation2 + $0x78] sm:$0xff]   ;;  %v5802_v25 = vpack.c.bf16 %v619_v31, %v619_v31  ;;  %v1711_v15 = vshrl.u32 %v1449_v13, 16  ;;  %v1451_v2 = vld [vmem:[#allocation2 + $0x80] sm:$0x1]  ;;  %v1714_v51 = vshll.u32 %v1449_v13, 16  ;;  %3214 = vrot.lane.b32.xlu1 %v5651_v30, %s6350_s11  ;;  %v3645_v49 = vrot.slane %v3644_v7, 4  ;;  %v7349_v13 = vpop.permute.xlu0 %2376 }
  0xfb   : > { %v1450_v17 = vld [vmem:[#allocation2 + $0x7c] sm:$0xf]  ;;  %v5803_v52 = vpack.c.bf16 %v620_v18, %v620_v18  ;;  %2388 = vrot.lane.b32.xlu0 %v6137_v46, %s6350_s11  ;;  %v1730_v62 = vshll.u32 %v1451_v2, 16  ;;  %v1232_v30 = vld [vmem:[#allocation2 + $0x84] sm:$0xf]  ;;  %v3640_v22 = vsel %vm6497_vm8, %v3635_v59, %v7305_v6  ;;  %v7347_v12 = vsel %vm6915_vm14, %v3095_v45, %v3096_v56  ;;  %8424 = vst [vmem:[#allocation10_spill] sm:$0xff] %v7349_v13 }
  0xfc   : > { %v1720_v39 = vshll.u32 %v1450_v17, 16  ;;  %v1724_v36 = vshrl.u32 %v1450_v17, 16  ;;  %v1011_v10 = vshrl.u32 %v5802_v25, 16  ;;  %v1014_v55 = vshll.u32 %v5802_v25, 16  ;;  %v3435_v14 = vld [vmem:[#allocation2 + $0x78] sm:$0xf] }
  0xfd   : > { %v1713_v53 = vrot.slane %v1711_v15, 4  ;;  %v1019_v48 = vshrl.u32 %v5803_v52, 16  ;;  %v1022_v8 = vshll.u32 %v5803_v52, 16  ;;  %v1716_v27 = vrot.slane %v1714_v51, 5  ;;  %v7338_v21 = vpop.permute.xlu1 %2400  ;;  %v1236_v18 = vld [vmem:[#allocation2 + $0x8c] sm:$0x1] }
  0xfe   : > { %v7328_v24 = vrot.slane %v1720_v39, 5  ;;  %v1013_v40 = vrot.slane %v1011_v10, 7  ;;  %v1726_v50 = vrot.slane %v1724_v36, 4  ;;  %v7330_v61 = vrot.slane %v1730_v62, 5  ;;  %8423 = vst [vmem:[#allocation9_spill] sm:$0xff] %v7338_v21  ;;  %v6158_v62 = vld [vmem:[#allocation2 + $0xc] sm:$0xff]   ;;  %v1909_v21 = vpop.permute.xlu0 %1908 }
  0xff   : > { %v1021_v38 = vrot.slane %v1019_v48, 7  ;;  %v1717_v28 = vor.u32 %v1716_v27, %v1713_v53  ;;  %1920 = vrot.lane.b32.xlu0 %v5558_v0, %s6350_s11  ;;  %v3650_v6 = vsel %vm6497_vm8, %v3645_v49, %v3649_v44  ;;  %v3436_v59 = vld [vmem:[#allocation2 + $0x7c] sm:$0xf]  ;;  %v3437_v52 = vld [vmem:[#allocation2 + $0x80] sm:$0x1]  ;;  %v3652_v2 = vshrl.u32 %v3435_v14, 16 }
 0x100   : > { %v1016_v11 = vor.u32 %v1014_v55, %v1013_v40  ;;  %v1017_v9 = vrot.slane %v1013_v40, 4  ;;  %v1727_v31 = vor.u32 %v1726_v50, %v7328_v24  ;;  %v5684_v7 = vcombine.low %v3640_v22, %v3650_v6  ;;  %v2972_v56 = vld [vmem:[#allocation2 + $0x74] sm:$0x1]  ;;  %v7367_v36 = vld [vmem:[#allocation2 + $0x78] sm:$0xe]  ;;  %v6152_v55 = vld [vmem:[#allocation2] sm:$0xff]  }
 0x101   : > { %v1024_v46 = vor.u32 %v1022_v8, %v1021_v38  ;;  %v1026_v25 = vrot.slane %v1021_v38, 4  ;;  %v7351_v17 = vrot.slane %v1717_v28, 4  ;;  %v7359_v45 = vpop.permute.xlu1 %1932  ;;  %v5652_v44 = vcombine.low %v7322_v3, %v7347_v12  ;;  %v7369_v10 = vld [vmem:[#allocation2 + $0x7c] sm:$0xf]  ;;  %v6157_v53 = vld [vmem:[#allocation2 + $0x90] sm:$0xff]   ;;  %v6166_v27 = vld [vmem:[#allocation2 + $0xa8] sm:$0xff]  }
 0x102   : > { %v1233_v0 = vsel %vm6622_vm10, %v1016_v11, %v1232_v30  ;;  %v7357_v15 = vrot.slane %v1727_v31, 4  ;;  %v3655_v43 = vshll.u32 %v3435_v14, 16  ;;  %v6161_v48 = vld [vmem:[#allocation2 + $0x9c] sm:$0xff]   ;;  %v6172_v40 = vld [vmem:[#allocation2 + $0xb4] sm:$0xff]   ;;  %v6183_v28 = vld [vmem:[#allocation2 + $0x24] sm:$0xff]   ;;  %3905 = vrot.lane.b32.xlu1 %v5684_v7, %s6350_s11  ;;  %v3661_v12 = vshll.u32 %v3436_v59, 16 }
 0x103   : > { %v1025_v51 = vsel %vm6628_vm11, %v1017_v9, %v1024_v46  ;;  %1234 = vst [vmem:[#allocation2 + $0x84] sm:$0xf] %v1233_v0  ;;  %v1237_v39 = vsel %vm6403_vm3, %v1026_v25, %v1236_v18  ;;  %v6163_v8 = vld [vmem:[#allocation2 + $0x18] sm:$0xff]   ;;  %v6175_v50 = vld [vmem:[#allocation2 + $0x30] sm:$0xff]   ;;  %v6186_v22 = vld [vmem:[#allocation2 + $0x48] sm:$0xff]   ;;  %v3654_v18 = vrot.slane %v3652_v2, 4  ;;  %v8425_v32 = vsel %vm6497_vm8, %v7351_v17, %v7328_v24 }
 0x104   : > { %v6176_v38 = vld [vmem:[#allocation2 + $0x18] sm:$0xff]   ;;  %v6187_v49 = vld [vmem:[#allocation2 + $0x30] sm:$0xff]   ;;  %v6191_v11 = vld [vmem:[#allocation2 + $0x60] sm:$0xff]   ;;  %1235 = vst.msk [vmem:[#allocation2 + $0x88] sm:$0xf] %vm647_vm0, %v1025_v51  ;;  %v3665_v46 = vshrl.u32 %v3436_v59, 16  ;;  %v1733_v0 = vsel %vm6497_vm8, %v7357_v15, %v7330_v61 }
 0x105   : > { %v6182_v30 = vld [vmem:[#allocation2 + $0x3c] sm:$0xff]   ;;  %v6188_v3 = vld [vmem:[#allocation2 + $0x54] sm:$0xff]   ;;  %v6192_v9 = vld [vmem:[#allocation2 + $0x48] sm:$0xff]   ;;  %1238 = vst [vmem:[#allocation2 + $0x8c] sm:$0x1] %v1237_v39  ;;  %v3657_v51 = vrot.slane %v3655_v43, 5  ;;  %v3892_v13 = vpop.permute.xlu1 %3891 }
 0x106   : > { %v6189_v14 = vld [vmem:[#allocation2 + $0x3c] sm:$0xff]   ;;  %v6193_v6 = vld [vmem:[#allocation2 + $0x6c] sm:$0xff]   ;;  %v3671_v47 = vshll.u32 %v3437_v52, 16  ;;  %v3102_v1 = vrot.slane %v3100_v54, 4  ;;  %v6194_v31 = vld [vmem:[#allocation2 + $0x54] sm:$0xff]   ;;  %v7385_v7 = vrot.slane %v3661_v12, 5  ;;  %3216 = vrot.lane.b32.xlu1 %v5652_v44, %s6350_s11 }
 0x107   : > { %v7377_v25 = vld [vmem:[#allocation2 + $0x80] sm:$0x1]  ;;  %v6195_v39 = vld [vmem:[#allocation2 + $0x78] sm:$0xff]   ;;  %v3667_v2 = vrot.slane %v3665_v46, 4  ;;  %v3103_v59 = vrot.slane %v2972_v56, 5  ;;  %v5638_v4 = vrot.slane %v7367_v36, 9  ;;  %v3658_v20 = vor.u32 %v3657_v51, %v3654_v18 }
 0x108   : > { %v7388_v5 = vrot.slane %v3671_v47, 5  ;;  %v3107_v61 = vrot.slane %v7369_v10, 5  ;;  %v3110_v15 = vrot.slane %v7377_v25, 5  ;;  %vm1950_vm0 = vcmask 1048064   ;;  %1403 = vst.msk [vmem:[#allocation3] sm:$0xff] %vm1402_vm15, %v6152_v55  ;;  %1415 = vst.msk [vmem:[#allocation3 + $0x1e0] sm:$0xff] %vm1402_vm15, %v6157_v53 }
 0x109   : > { %v3668_v54 = vor.u32 %v3667_v2, %v7385_v7  ;;  %v3104_v52 = vsel %vm6915_vm14, %v3102_v1, %v3103_v59  ;;  %v3659_v56 = vrot.slane %v3658_v20, 4  ;;  %1404 = vst.msk [vmem:[#allocation3 + $0x28] sm:$0xff] %vm1402_vm15, %v6158_v62  ;;  %1416 = vst.msk [vmem:[#allocation3 + $0x208] sm:$0xff] %vm1402_vm15, %v6161_v48  ;;  %v5565_v44 = vrot.slane %v7392_v23, 9  ;;  %v1968_v17 = vld [vmem:[#allocation2 + $0x4] sm:$0xf] }
 0x10a   : > { %v5653_v43 = vcombine.low %v7336_v37, %v3104_v52  ;;  %v3109_v47 = vrot.slane %v3107_v61, 4  ;;  %1405 = vst.msk [vmem:[#allocation3 + $0x50] sm:$0xff] %vm1402_vm15, %v6163_v8  ;;  %1417 = vst.msk [vmem:[#allocation3 + $0x230] sm:$0xff] %vm1402_vm15, %v6166_v27  ;;  %v1452_v1 = vld [vmem:[#allocation2 + $0x84] sm:$0xf]  ;;  %v3108_v37 = vsel %vm6915_vm14, %v5638_v4, %v3107_v61  ;;  %v2068_v51 = vrot.slane %v1968_v17, 5 }
 0x10b   : > { %1418 = vst.msk [vmem:[#allocation3 + $0x258] sm:$0xff] %vm1402_vm15, %v6172_v40  ;;  %1407 = vst.msk [vmem:[#allocation3 + $0xa0] sm:$0xff] %vm1402_vm15, %v6175_v50  ;;  %v3669_v20 = vrot.slane %v3668_v54, 4  ;;  %v6138_v4 = vld [vmem:[#allocation2 + $0x84] sm:$0xff]   ;;  %v7456_v10 = vpop.permute.xlu0 %2378  ;;  %v2003_v12 = vld [vmem:[#allocation2 + $0x90] sm:$0xe] }
 0x10c   : > { %3395 = vst.msk [vmem:[#allocation3 + $0x18] sm:$0xff] %vm1402_vm15, %v6176_v38  ;;  %1408 = vst.msk [vmem:[#allocation3 + $0xc8] sm:$0xff] %vm1402_vm15, %v6182_v30  ;;  %3218 = vrot.lane.b32.xlu1 %v5653_v43, %s6350_s11  ;;  %2390 = vrot.lane.b32.xlu0 %v6138_v4, %s6350_s11  ;;  %v3438_v48 = vld [vmem:[#allocation2 + $0x84] sm:$0xf]  ;;  %v3439_v8 = vld [vmem:[#allocation2 + $0x88] sm:$0xf] }
 0x10d   : > { %3396 = vst.msk [vmem:[#allocation3 + $0x40] sm:$0xff] %vm1402_vm15, %v6183_v28  ;;  %1409 = vst.msk [vmem:[#allocation3 + $0xf0] sm:$0xff] %vm1402_vm15, %v6186_v22  ;;  %v3674_v24 = vsel %vm6497_vm8, %v3669_v20, %v7388_v5  ;;  %v3440_v38 = vld [vmem:[#allocation2 + $0x8c] sm:$0x1]  ;;  %v3676_v30 = vshrl.u32 %v3438_v48, 16  ;;  %v3679_v28 = vshll.u32 %v3438_v48, 16 }
 0x10e   : > { %3397 = vst.msk [vmem:[#allocation3 + $0x68] sm:$0xff] %vm1402_vm15, %v6187_v49  ;;  %1410 = vst.msk [vmem:[#allocation3 + $0x118] sm:$0xff] %vm1402_vm15, %v6188_v3  ;;  %v3685_v22 = vshll.u32 %v3439_v8, 16  ;;  %v3689_v49 = vshrl.u32 %v3439_v8, 16  ;;  %v1969_v3 = vld [vmem:[#allocation2 + $0x8] sm:$0x1] }
 0x10f   : > { %3398 = vst.msk [vmem:[#allocation3 + $0x90] sm:$0xff] %vm1402_vm15, %v6189_v14  ;;  %1411 = vst.msk [vmem:[#allocation3 + $0x140] sm:$0xff] %vm1402_vm15, %v6191_v11  ;;  %v6139_v14 = vld [vmem:[#allocation2 + $0x90] sm:$0xff]   ;;  %v3695_v18 = vshll.u32 %v3440_v38, 16  ;;  %v1911_v46 = vpop.permute.xlu0 %1910  ;;  %v3681_v25 = vrot.slane %v3679_v28, 5  ;;  %v2070_v43 = vrot.slane %v2068_v51, 4 }
 0x110   : > { %3399 = vst.msk [vmem:[#allocation3 + $0xb8] sm:$0xff] %vm1402_vm15, %v6192_v9  ;;  %1412 = vst.msk [vmem:[#allocation3 + $0x168] sm:$0xff] %vm1402_vm15, %v6193_v6  ;;  %v3687_v6 = vrot.slane %v3685_v22, 5  ;;  %v1971_v17 = vld [vmem:[#allocation2 + $0x10] sm:$0xf] }
 0x111   : > { %3400 = vst.msk [vmem:[#allocation3 + $0xe0] sm:$0xff] %vm1402_vm15, %v6194_v31  ;;  %1413 = vst.msk [vmem:[#allocation3 + $0x190] sm:$0xff] %vm1402_vm15, %v6195_v39  ;;  %v3678_v31 = vrot.slane %v3676_v30, 4  ;;  %v2004_v39 = vld [vmem:[#allocation2 + $0x94] sm:$0xf]  ;;  %v3697_v61 = vrot.slane %v3695_v18, 5 }
 0x112   : > { %1951 = vst.msk [vmem:[#allocation3] sm:$0xff] %vm1950_vm0, %v7231_v19  ;;  %1963 = vst.msk [vmem:[#allocation3 + $0x1e0] sm:$0xff] %vm1950_vm0, %v7241_v57  ;;  %v5559_v19 = vcombine.low %v8425_v32, %v1733_v0  ;;  %v1453_v57 = vld [vmem:[#allocation2 + $0x88] sm:$0xf]  ;;  %v3691_v0 = vrot.slane %v3689_v49, 4  ;;  %v2152_v4 = vrot.slane %v2004_v39, 5 }
 0x113   : > { %1952 = vst.msk [vmem:[#allocation3 + $0x28] sm:$0xff] %vm1950_vm0, %v7273_v26  ;;  %1964 = vst.msk [vmem:[#allocation3 + $0x208] sm:$0xff] %vm1950_vm0, %v7275_v35  ;;  %v1735_v26 = vshrl.u32 %v1452_v1, 16  ;;  %v3664_v35 = vsel %vm6497_vm8, %v3659_v56, %v7385_v7  ;;  %v1748_v36 = vshrl.u32 %v1453_v57, 16  ;;  %v3682_v54 = vor.u32 %v3681_v25, %v3678_v31  ;;  %v3441_v32 = vld [vmem:[#allocation2 + $0x90] sm:$0xf] }
 0x114   : > { %1953 = vst.msk [vmem:[#allocation3 + $0x50] sm:$0xff] %vm1950_vm0, %v7324_v33  ;;  %1965 = vst.msk [vmem:[#allocation3 + $0x230] sm:$0xff] %vm1950_vm0, %v7311_v60  ;;  %v3111_v60 = vsel %vm6915_vm14, %v3109_v47, %v3110_v15  ;;  %v7450_v33 = vpop.permute.xlu1 %3202  ;;  %v7459_v62 = vcombine.low %v3664_v35, %v3674_v24  ;;  %1922 = vrot.lane.b32.xlu0 %v5559_v19, %s6350_s11  ;;  %v2071_v15 = vrot.slane %v1969_v3, 5  ;;  %v2005_v47 = vld [vmem:[#allocation2 + $0x98] sm:$0x1]  ;;  %v3700_v48 = vshrl.u32 %v3441_v32, 16 }
 0x115   : > { %1954 = vst.msk [vmem:[#allocation3 + $0x78] sm:$0xff] %vm1950_vm0, %v1909_v21  ;;  %1966 = vst.msk [vmem:[#allocation3 + $0x258] sm:$0xff] %vm1950_vm0, %v7359_v45  ;;  %v1454_v21 = vld [vmem:[#allocation2 + $0x8c] sm:$0x1]  ;;  %v1744_v45 = vshll.u32 %v1453_v57, 16  ;;  %v1737_v55 = vrot.slane %v1735_v26, 4  ;;  %v5654_v27 = vcombine.low %v3108_v37, %v3111_v60  ;;  %v3692_v52 = vor.u32 %v3691_v0, %v3687_v6 }
 0x116   : > { %3939 = vst.msk [vmem:[#allocation3 + $0x18] sm:$0xff] %vm1950_vm0, %v3892_v13  ;;  %v1738_v13 = vshll.u32 %v1452_v1, 16  ;;  %v1754_v53 = vshll.u32 %v1454_v21, 16  ;;  %v1750_v50 = vrot.slane %v1748_v36, 4  ;;  %1955 = vst.msk [vmem:[#allocation3 + $0xa0] sm:$0xff] %vm1950_vm0, %v1911_v46  ;;  %v2069_v56 = vsel %vm6915_vm14, %v5565_v44, %v2068_v51  ;;  %v6198_v49 = vld [vmem:[#allocation2 + $0x84] sm:$0xff]  }
 0x117   : > { %v1746_v40 = vrot.slane %v1744_v45, 5  ;;  %3220 = vrot.lane.b32.xlu1 %v5654_v27, %s6350_s11  ;;  %v5577_v37 = vrot.slane %v2003_v12, 9  ;;  %v3683_v57 = vrot.slane %v3682_v54, 4  ;;  %v3693_v26 = vrot.slane %v3692_v52, 4  ;;  %v3442_v44 = vld [vmem:[#allocation2 + $0x94] sm:$0xf] }
 0x118   : > { %v1740_v41 = vrot.slane %v1738_v13, 5  ;;  %v1756_v5 = vrot.slane %v1754_v53, 5  ;;  %v3894_v7 = vpop.permute.xlu1 %3893  ;;  %2392 = vrot.lane.b32.xlu0 %v6139_v14, %s6350_s11  ;;  %v2072_v23 = vsel %vm6915_vm14, %v2070_v43, %v2071_v15  ;;  %v3443_v35 = vld [vmem:[#allocation2 + $0x98] sm:$0x1]  ;;  %v2154_v13 = vrot.slane %v2152_v4, 4  ;;  %1414 = vst.msk [vmem:[#allocation3 + $0x1b8] sm:$0xff] %vm1402_vm15, %v6198_v49 }
 0x119   : > { %v1751_v9 = vor.u32 %v1750_v50, %v1746_v40  ;;  %3940 = vst.msk [vmem:[#allocation3 + $0x40] sm:$0xff] %vm1950_vm0, %v3894_v7  ;;  %v5581_v60 = vcombine.low %v2069_v56, %v2072_v23  ;;  %v2153_v21 = vsel %vm6915_vm14, %v5577_v37, %v2152_v4  ;;  %v2155_v45 = vrot.slane %v2005_v47, 5  ;;  %v2976_v36 = vld [vmem:[#allocation2 + $0x84] sm:$0xe]  ;;  %v2977_v24 = vld [vmem:[#allocation2 + $0x88] sm:$0xf] }
 0x11a   : > { %v1741_v11 = vor.u32 %v1740_v41, %v1737_v55  ;;  %v3688_v55 = vsel %vm6497_vm8, %v3683_v57, %v3687_v6  ;;  %v3698_v53 = vsel %vm6497_vm8, %v3693_v26, %v3697_v61  ;;  %v3703_v8 = vshll.u32 %v3441_v32, 16  ;;  %v2978_v27 = vld [vmem:[#allocation2 + $0x8c] sm:$0x1]  ;;  %v1972_v41 = vld [vmem:[#allocation2 + $0x14] sm:$0x1]  ;;  %v6200_v26 = vld [vmem:[#allocation2 + $0x78] sm:$0xff]  }
 0x11b   : > { %v1752_v59 = vrot.slane %v1751_v9, 4  ;;  %v7484_v50 = vcombine.low %v3688_v55, %v3698_v53  ;;  %2242 = vst.msk [vmem:[#allocation3 + $0x8] sm:$0xff] %vm1402_vm15, %v5581_v60  ;;  %v2156_v38 = vsel %vm6915_vm14, %v2154_v13, %v2155_v45  ;;  %v3709_v30 = vshll.u32 %v3442_v44, 16  ;;  %v1970_v28 = vld [vmem:[#allocation2 + $0xc] sm:$0xe]  ;;  %v4243_v60 = vld [vmem:[#allocation3] sm:$0xff] }
 0x11c   : > { %v1742_v2 = vrot.slane %v1741_v11, 4  ;;  %v2006_v22 = vld [vmem:[#allocation2 + $0x9c] sm:$0xe]  ;;  %2418 = vst.msk [vmem:[#allocation3 + $0x8] sm:$0xff] %vm1950_vm0, %v7224_v34  ;;  %v5593_v3 = vcombine.low %v2153_v21, %v2156_v38  ;;  %v3702_v14 = vrot.slane %v3700_v48, 4  ;;  %v3705_v11 = vrot.slane %v3703_v8, 5 }
 0x11d   : > { %v1757_v20 = vsel %vm6497_vm8, %v1752_v59, %v1756_v5  ;;  %v3713_v5 = vshrl.u32 %v3442_v44, 16  ;;  %v3719_v9 = vshll.u32 %v3443_v35, 16  ;;  %v2007_v31 = vld [vmem:[#allocation2 + $0xa0] sm:$0xf]  ;;  %v3711_v18 = vrot.slane %v3709_v30, 5  ;;  %3403 = vst.msk [vmem:[#allocation3 + $0x158] sm:$0xff] %vm1402_vm15, %v6200_v26 }
 0x11e   : > { %v1747_v1 = vsel %vm6497_vm8, %v1742_v2, %v1746_v40  ;;  %v7482_v40 = vpop.permute.xlu1 %3204  ;;  %v5639_v46 = vrot.slane %v2976_v36, 9  ;;  %v3114_v25 = vrot.slane %v2977_v24, 5  ;;  %2254 = vst.msk [vmem:[#allocation3 + $0x1e8] sm:$0xff] %vm1402_vm15, %v5593_v3  ;;  %v3706_v6 = vor.u32 %v3705_v11, %v3702_v14  ;;  %v2008_v7 = vld [vmem:[#allocation2 + $0xa4] sm:$0x1]  ;;  %v6199_v2 = vld [vmem:[#allocation2 + $0x6c] sm:$0xff]  }
 0x11f   : > { %v5560_v19 = vcombine.low %v1747_v1, %v1757_v20  ;;  %v3715_v12 = vrot.slane %v3713_v5, 4  ;;  %v3721_v0 = vrot.slane %v3719_v9, 5  ;;  %v3117_v51 = vrot.slane %v2978_v27, 5  ;;  %2430 = vst.msk [vmem:[#allocation3 + $0x1e8] sm:$0xff] %vm1950_vm0, %v7239_v42  ;;  %v3444_v54 = vld [vmem:[#allocation2 + $0x9c] sm:$0xf] }
 0x120   : > { %v2075_v39 = vrot.slane %v1971_v17, 5  ;;  %v3115_v59 = vsel %vm6915_vm14, %v5639_v46, %v3114_v25  ;;  %v3116_v61 = vrot.slane %v3114_v25, 4  ;;  %v2078_v15 = vrot.slane %v1972_v41, 5  ;;  %v3445_v52 = vld [vmem:[#allocation2 + $0xa0] sm:$0xf]  ;;  %3402 = vst.msk [vmem:[#allocation3 + $0x130] sm:$0xff] %vm1402_vm15, %v6199_v2 }
 0x121   : > { %1924 = vrot.lane.b32.xlu0 %v5560_v19, %s6350_s11  ;;  %v3716_v34 = vor.u32 %v3715_v12, %v3711_v18  ;;  %v3707_v56 = vrot.slane %v3706_v6, 4  ;;  %v5566_v47 = vrot.slane %v1970_v28, 9  ;;  %v5578_v1 = vrot.slane %v2006_v22, 9  ;;  %v3446_v20 = vld [vmem:[#allocation2 + $0xa4] sm:$0x1]  ;;  %v7526_v41 = vld [vmem:[%s8398_s3 + $0x108] sm:$0xff]  }
 0x122   : > { %v2077_v43 = vrot.slane %v2075_v39, 4  ;;  %v3896_v37 = vpop.permute.xlu1 %3895  ;;  %v3118_v4 = vsel %vm6915_vm14, %v3116_v61, %v3117_v51  ;;  %v2159_v32 = vrot.slane %v2007_v31, 5  ;;  %v2162_v19 = vrot.slane %v2008_v7, 5  ;;  %v7503_v57 = vld [vmem:[#allocation2 + $0x90] sm:$0xe]  ;;  %v6162_v27 = vld [vmem:[%s8398_s3 + $0x80] sm:$0xff]  }
 0x123   : > { %v3717_v42 = vrot.slane %v3716_v34, 4  ;;  %3941 = vst.msk [vmem:[#allocation3 + $0x68] sm:$0xff] %vm1950_vm0, %v3896_v37  ;;  %v5655_v23 = vcombine.low %v3115_v59, %v3118_v4  ;;  %v2076_v35 = vsel %vm6915_vm14, %v5566_v47, %v2075_v39  ;;  %v2980_v21 = vld [vmem:[#allocation2 + $0x94] sm:$0xf]  ;;  %v7512_v13 = vld [vmem:[#allocation2 + $0x98] sm:$0x1] }
 0x124   : > { %v2079_v44 = vsel %vm6915_vm14, %v2077_v43, %v2078_v15  ;;  %v4244_v24 = vld [vmem:[#allocation3 + $0x8] sm:$0xff]  ;;  %v2160_v17 = vsel %vm6915_vm14, %v5578_v1, %v2159_v32  ;;  %v2161_v55 = vrot.slane %v2159_v32, 4  ;;  %v1973_v53 = vld [vmem:[#allocation2 + $0x18] sm:$0xe]  ;;  %v1974_v48 = vld [vmem:[#allocation2 + $0x1c] sm:$0xf] }
 0x125   : > { %3907 = vrot.lane.b32.xlu0 %v7459_v62, %s6350_s11  ;;  %v3712_v62 = vsel %vm6497_vm8, %v3707_v56, %v3711_v18  ;;  %v3722_v45 = vsel %vm6497_vm8, %v3717_v42, %v3721_v0  ;;  %v5582_v36 = vcombine.low %v2076_v35, %v2079_v44  ;;  %v7518_v8 = vld [vmem:[#allocation2 + $0x20] sm:$0x1]  ;;  %3222 = vrot.lane.b32.xlu1 %v5655_v23, %s6350_s11  ;;  %v3724_v30 = vshrl.u32 %v3444_v54, 16  ;;  %v7532_v22 = vld [vmem:[#allocation2 + $0xa8] sm:$0xe]  ;;  %v4303_v31 = vld [vmem:[#allocation3 + $0x1e0] sm:$0xff] }
 0x126   : > { %v5687_v38 = vcombine.low %v3712_v62, %v3722_v45  ;;  %v3727_v5 = vshll.u32 %v3444_v54, 16  ;;  %v3733_v28 = vshll.u32 %v3445_v52, 16  ;;  %v6164_v49 = vld [vmem:[%s8398_s3 + $0xc8] sm:$0xff]   ;;  %4698 = vmatprep.mubr.bf16.mxu0 %v4244_v24  ;;  %v2163_v14 = vsel %vm6915_vm14, %v2161_v55, %v2162_v19  ;;  %v4304_v6 = vld [vmem:[#allocation3 + $0x1e8] sm:$0xff]  ;;  %v7550_v34 = vld [vmem:[#allocation2 + $0xb0] sm:$0x1]  ;;  %v7552_v59 = vpop.permute.xlu1 %3206 }
 0x127   : > { %v6201_v3 = vld [vmem:[#allocation2 + $0x84] sm:$0xff]   ;;  %2243 = vst.msk [vmem:[#allocation3 + $0x30] sm:$0xff] %vm1402_vm15, %v5582_v36  ;;  %v3743_v11 = vshll.u32 %v3446_v20, 16  ;;  %v5640_v9 = vrot.slane %v7503_v57, 9  ;;  %4699 = vmatmul.mubr.bf16.vlgmr.msra.gmra.mrb[0].mxu0 %v4243_v60  ;;  %v5594_v18 = vcombine.low %v2160_v17, %v2163_v14  ;;  %v3726_v12 = vrot.slane %v3724_v30, 4  ;;  %4794 = vmatprep.mubr.bf16.mxu1 %v4304_v6  ;;  %v7562_v43 = vld [vmem:[%s8398_s3 + $0x110] sm:$0xff]  }
 0x128   : > { %2419 = vst.msk [vmem:[#allocation3 + $0x30] sm:$0xff] %vm1950_vm0, %v7259_v58  ;;  %v3729_v46 = vrot.slane %v3727_v5, 5  ;;  %v7543_v25 = vrot.slane %v3733_v28, 5  ;;  %v2010_v0 = vld [vmem:[#allocation2 + $0xac] sm:$0xf]  ;;  %v3121_v7 = vrot.slane %v2980_v21, 5  ;;  %4795 = vmatmul.mubr.bf16.vlgmr.msra.gmra.mrb[0].mxu1 %v4303_v31 }
 0x129   : > { %3909 = vrot.lane.b32.xlu0 %v7484_v50, %s6350_s11  ;;  %v3737_v50 = vshrl.u32 %v3445_v52, 16  ;;  %3404 = vst.msk [vmem:[#allocation3 + $0x180] sm:$0xff] %vm1402_vm15, %v6201_v3  ;;  %v3745_v39 = vrot.slane %v3743_v11, 5  ;;  %v3124_v2 = vrot.slane %v7512_v13, 5  ;;  %v6340_v58 = vld [vmem:[%s8398_s3 + $0x100] sm:$0xff]   ;;  %2255 = vst.msk [vmem:[#allocation3 + $0x210] sm:$0xff] %vm1402_vm15, %v5594_v18  ;;  %5927 = vmatpush3.bf16.msra.mxu1 %v6162_v27 }
 0x12a   : > { %6059 = vmatpush3.bf16.msra.mxu0 %v6340_v58  ;;  %v3730_v61 = vor.u32 %v3729_v46, %v3726_v12  ;;  %v5567_v15 = vrot.slane %v1973_v53, 9  ;;  %v2082_v54 = vrot.slane %v1974_v48, 5  ;;  %v2085_v52 = vrot.slane %v7518_v8, 5  ;;  %v7557_v56 = vld [vmem:[#allocation2 + $0xa8] sm:$0xf]  ;;  %2431 = vst.msk [vmem:[#allocation3 + $0x210] sm:$0xff] %vm1950_vm0, %v7261_v29  ;;  %5928 = vmatprep.subr.bf16.mxu1 %v6164_v49  ;;  %v3898_v49 = vpop.permute.xlu1 %3897 }
 0x12b   : > { %v3739_v51 = vrot.slane %v3737_v50, 4  ;;  %v3122_v1 = vsel %vm6915_vm14, %v5640_v9, %v3121_v7  ;;  %v3123_v20 = vrot.slane %v3121_v7, 4  ;;  %v5579_v37 = vrot.slane %v7532_v22, 9  ;;  %v6165_v42 = vld [vmem:[%s8398_s3 + $0x88] sm:$0xff]   ;;  %v6167_v32 = vld [vmem:[%s8398_s3 + $0xd0] sm:$0xff]   ;;  %6060 = vmatprep.subr.bf16.mxu0 %v7526_v41  ;;  %v4248_v45 = vld [vmem:[#allocation3 + $0x28] sm:$0xff] }
 0x12c   : > { %v7573_v4 = vld [vmem:[#allocation2 + $0xac] sm:$0xf]  ;;  %v3731_v29 = vrot.slane %v3730_v61, 4  ;;  %v2083_v19 = vsel %vm6915_vm14, %v5567_v15, %v2082_v54  ;;  %v2084_v57 = vrot.slane %v2082_v54, 4  ;;  %v2166_v26 = vrot.slane %v2010_v0, 5  ;;  %v6202_v35 = vld [vmem:[#allocation2 + $0x90] sm:$0xff]  }
 0x12d   : > { %3911 = vrot.lane.b32.xlu0 %v5687_v38, %s6350_s11  ;;  %v3740_v47 = vor.u32 %v3739_v51, %v7543_v25  ;;  %v3449_v62 = vld [vmem:[#allocation2 + $0xb0] sm:$0x1]  ;;  %v2982_v23 = vld [vmem:[#allocation2 + $0x9c] sm:$0xe]  ;;  %v2983_v44 = vld [vmem:[#allocation2 + $0xa0] sm:$0xf]  ;;  %v3125_v21 = vsel %vm6915_vm14, %v3123_v20, %v3124_v2  ;;  %5929 = vmatpush3.bf16.msra.mxu1 %v6165_v42 }
 0x12e   : > { %v2169_v13 = vrot.slane %v7550_v34, 5  ;;  %v3748_v36 = vshrl.u32 %v7557_v56, 16  ;;  %6061 = vmatpush3.bf16.msra.mxu0 %v7526_v41  ;;  %v3736_v24 = vsel %vm6497_vm8, %v3731_v29, %v7543_v25  ;;  %v5656_v17 = vcombine.low %v3122_v1, %v3125_v21  ;;  %v7593_v48 = vld [vmem:[#allocation2 + $0xa4] sm:$0x1]  ;;  %3405 = vst.msk [vmem:[#allocation3 + $0x1a8] sm:$0xff] %vm1402_vm15, %v6202_v35  ;;  %v6168_v22 = vld [vmem:[%s8398_s3 + $0x90] sm:$0xff]   ;;  %5930 = vmatprep.subr.bf16.mxu1 %v6167_v32  ;;  %v7635_v32 = vpop.permute.xlu0 %2380 }
 0x12f   : > { %v3741_v60 = vrot.slane %v3740_v47, 4  ;;  %v2086_v55 = vsel %vm6915_vm14, %v2084_v57, %v2085_v52  ;;  %v2167_v53 = vsel %vm6915_vm14, %v5579_v37, %v2166_v26  ;;  %6062 = vmatprep.subr.bf16.mxu0 %v7562_v43  ;;  %v4249_v41 = vld [vmem:[#allocation3 + $0x30] sm:$0xff]  ;;  %v2168_v38 = vrot.slane %v2166_v26, 4  ;;  %v7599_v5 = vld [vmem:[#allocation2 + $0x24] sm:$0xe]  ;;  %v6170_v12 = vld [vmem:[%s8398_s3 + $0xd8] sm:$0xff]  }
 0x130   : > { %v5583_v27 = vcombine.low %v2083_v19, %v2086_v55  ;;  %v3750_v30 = vrot.slane %v3748_v36, 4  ;;  %v7601_v28 = vld [vmem:[#allocation2 + $0x28] sm:$0xf]  ;;  %3224 = vrot.lane.b32.xlu1 %v5656_v17, %s6350_s11  ;;  %4706 = vmatprep.mubr.bf16.mxu0 %v4249_v41  ;;  %v3751_v14 = vshll.u32 %v7557_v56, 16  ;;  %v3757_v50 = vshll.u32 %v7573_v4, 16  ;;  %3942 = vst.msk [vmem:[#allocation3 + $0x90] sm:$0xff] %vm1950_vm0, %v3898_v49 }
 0x131   : > { %v3746_v8 = vsel %vm6497_vm8, %v3741_v60, %v3745_v39  ;;  %v3761_v11 = vshrl.u32 %v7573_v4, 16  ;;  %v7610_v9 = vld [vmem:[#allocation2 + $0x2c] sm:$0x1]  ;;  %v2012_v31 = vld [vmem:[#allocation2 + $0xb4] sm:$0xe]  ;;  %v2170_v46 = vsel %vm6915_vm14, %v2168_v38, %v2169_v13  ;;  %4707 = vmatmul.mubr.bf16.gmra.mrb[4].mxu0 %v4248_v45  ;;  %v3767_v25 = vshll.u32 %v3449_v62, 16  ;;  %5931 = vmatpush3.bf16.msra.mxu1 %v6168_v22 }
 0x132   : > { %v5688_v3 = vcombine.low %v3736_v24, %v3746_v8  ;;  %v2013_v18 = vld [vmem:[#allocation2 + $0xb8] sm:$0xf]  ;;  %2244 = vst.msk [vmem:[#allocation3 + $0x58] sm:$0xff] %vm1402_vm15, %v5583_v27  ;;  %v5641_v6 = vrot.slane %v2982_v23, 9  ;;  %v3128_v0 = vrot.slane %v2983_v44, 5  ;;  %v4308_v51 = vld [vmem:[#allocation3 + $0x208] sm:$0xff]  ;;  %v5595_v34 = vcombine.low %v2167_v53, %v2170_v46  ;;  %6063 = vmatpush3.bf16.msra.mxu0 %v7562_v43  ;;  %5932 = vmatprep.subr.bf16.mxu1 %v6170_v12 }
 0x133   : > { %v6171_v39 = vld [vmem:[%s8398_s3 + $0x98] sm:$0xff]   ;;  %v8426_v58 = vld [vmem:[#allocation7_spill] sm:$0xff]  ;;  %v4309_v61 = vld [vmem:[#allocation3 + $0x210] sm:$0xff]  ;;  %v3753_v15 = vrot.slane %v3751_v14, 5  ;;  %v3759_v54 = vrot.slane %v3757_v50, 5  ;;  %v3763_v52 = vrot.slane %v3761_v11, 4 }
 0x134   : > { %v6197_v7 = vld [vmem:[%s8398_s3 + $0x118] sm:$0xff]   ;;  %3913 = vrot.lane.b32.xlu0 %v5688_v3, %s6350_s11  ;;  %2420 = vst.msk [vmem:[#allocation3 + $0x58] sm:$0xff] %vm1950_vm0, %v8426_v58  ;;  %4802 = vmatprep.mubr.bf16.mxu1 %v4309_v61  ;;  %v3769_v47 = vrot.slane %v3767_v25, 5  ;;  %v3129_v1 = vsel %vm6915_vm14, %v5641_v6, %v3128_v0  ;;  %v3130_v20 = vrot.slane %v3128_v0, 4  ;;  %v3131_v37 = vrot.slane %v7593_v48, 5  ;;  %v6173_v4 = vld [vmem:[%s8398_s3 + $0xe0] sm:$0xff]  }
 0x135   : > { %v6203_v2 = vld [vmem:[#allocation2 + $0x9c] sm:$0xff]   ;;  %v3450_v42 = vld [vmem:[#allocation2 + $0xb4] sm:$0xf]  ;;  %2256 = vst.msk [vmem:[#allocation3 + $0x238] sm:$0xff] %vm1402_vm15, %v5595_v34  ;;  %v3754_v43 = vor.u32 %v3753_v15, %v3750_v30  ;;  %v3764_v29 = vor.u32 %v3763_v52, %v3759_v54  ;;  %v5568_v19 = vrot.slane %v7599_v5, 9  ;;  %v2089_v57 = vrot.slane %v7601_v28, 5  ;;  %4803 = vmatmul.mubr.bf16.gmra.mrb[4].mxu1 %v4308_v51  ;;  %6064 = vmatprep.subr.bf16.mxu0 %v6197_v7  ;;  %v1913_v5 = vpop.permute.xlu0 %1912 }
 0x136   : > { %v2014_v56 = vld [vmem:[#allocation2 + $0xbc] sm:$0x1]  ;;  %3406 = vst.msk [vmem:[#allocation3 + $0x1d0] sm:$0xff] %vm1402_vm15, %v6203_v2  ;;  %v7641_v26 = vld [vmem:[#allocation2 + $0xb8] sm:$0xf]  ;;  %v3132_v23 = vsel %vm6915_vm14, %v3130_v20, %v3131_v37  ;;  %v2092_v44 = vrot.slane %v7610_v9, 5  ;;  %6065 = vmatpush3.bf16.msra.mxu0 %v6197_v7  ;;  %5933 = vmatpush3.bf16.msra.mxu1 %v6171_v39 }
 0x137   : > { %v8427_v62 = vld [vmem:[#allocation8_spill] sm:$0xff]  ;;  %v5580_v35 = vrot.slane %v2012_v31, 9  ;;  %v2173_v60 = vrot.slane %v2013_v18, 5  ;;  %v3755_v21 = vrot.slane %v3754_v43, 4  ;;  %v3765_v13 = vrot.slane %v3764_v29, 4  ;;  %v6174_v30 = vld [vmem:[%s8398_s3 + $0xa0] sm:$0xff]   ;;  %5934 = vmatprep.subr.bf16.mxu1 %v6173_v4 }
 0x138   : > { %2432 = vst.msk [vmem:[#allocation3 + $0x238] sm:$0xff] %vm1950_vm0, %v8427_v62  ;;  %v5657_v45 = vcombine.low %v3129_v1, %v3132_v23  ;;  %v2090_v36 = vsel %vm6915_vm14, %v5568_v19, %v2089_v57  ;;  %v3452_v24 = vld [vmem:[#allocation2 + $0xbc] sm:$0x1]  ;;  %v7650_v17 = vld [vmem:[#allocation2 + $0xa8] sm:$0xe]  ;;  %v2091_v55 = vrot.slane %v2089_v57, 4 }
 0x139   : > { %v2174_v53 = vsel %vm6915_vm14, %v5580_v35, %v2173_v60  ;;  %v2175_v48 = vrot.slane %v2173_v60, 4  ;;  %v2176_v8 = vrot.slane %v2014_v56, 5  ;;  %v2986_v27 = vld [vmem:[#allocation2 + $0xac] sm:$0xf]  ;;  %v7654_v41 = vld [vmem:[#allocation2 + $0xb0] sm:$0x1]  ;;  %v3760_v28 = vsel %vm6497_vm8, %v3755_v21, %v3759_v54 }
 0x13a   : > { %v7656_v38 = vld [vmem:[#allocation2 + $0x30] sm:$0xe]  ;;  %v3770_v22 = vsel %vm6497_vm8, %v3765_v13, %v3769_v47  ;;  %3226 = vrot.lane.b32.xlu1 %v5657_v45, %s6350_s11  ;;  %v4253_v49 = vld [vmem:[#allocation3 + $0x50] sm:$0xff]  ;;  %v3772_v3 = vshrl.u32 %v3450_v42, 16  ;;  %v3775_v14 = vshll.u32 %v3450_v42, 16  ;;  %1956 = vst.msk [vmem:[#allocation3 + $0xc8] sm:$0xff] %vm1950_vm0, %v1913_v5  ;;  %v2093_v31 = vsel %vm6915_vm14, %v2091_v55, %v2092_v44  ;;  %5935 = vmatpush3.bf16.msra.mxu1 %v6174_v30 }
 0x13b   : > { %v1980_v50 = vld [vmem:[#allocation2 + $0x34] sm:$0xf]  ;;  %v6177_v11 = vld [vmem:[%s8398_s3 + $0xe8] sm:$0xff]   ;;  %v5689_v9 = vcombine.low %v3760_v28, %v3770_v22  ;;  %v2177_v12 = vsel %vm6915_vm14, %v2175_v48, %v2176_v8  ;;  %v3781_v46 = vshll.u32 %v7641_v26, 16  ;;  %v1981_v25 = vld [vmem:[#allocation2 + $0x38] sm:$0x1]  ;;  %v5584_v0 = vcombine.low %v2090_v36, %v2093_v31 }
 0x13c   : > { %v4254_v18 = vld [vmem:[#allocation3 + $0x58] sm:$0xff]  ;;  %v755_v6 = vld [vmem:[#allocation2 + $0xc8] sm:$0x1]  ;;  %v5596_v51 = vcombine.low %v2174_v53, %v2177_v12  ;;  %v3774_v39 = vrot.slane %v3772_v3, 4  ;;  %v3777_v7 = vrot.slane %v3775_v14, 5  ;;  %v3785_v15 = vshrl.u32 %v7641_v26, 16  ;;  %5936 = vmatprep.subr.bf16.mxu1 %v6177_v11 }
 0x13d   : > { %4714 = vmatprep.mubr.bf16.mxu0 %v4254_v18  ;;  %v4313_v2 = vld [vmem:[#allocation3 + $0x230] sm:$0xff]  ;;  %v3453_v34 = vld [vmem:[#allocation2 + $0xc0] sm:$0xf]  ;;  %3915 = vrot.lane.b32.xlu0 %v5689_v9, %s6350_s11  ;;  %v7679_v61 = vrot.slane %v3781_v46, 5  ;;  %v3791_v54 = vshll.u32 %v3452_v24, 16  ;;  %v5642_v52 = vrot.slane %v7650_v17, 9  ;;  %v7720_v9 = vpop.permute.xlu0 %2382 }
 0x13e   : > { %v6178_v58 = vld [vmem:[%s8398_s3 + $0xa8] sm:$0xff]   ;;  %4715 = vmatmul.mubr.bf16.gmra.mrb[8].mxu0 %v4253_v49  ;;  %v7683_v56 = vld [vmem:[#allocation2 + $0xc4] sm:$0xf]  ;;  %v6179_v47 = vld [vmem:[%s8398_s3 + $0xf0] sm:$0xff]   ;;  %2245 = vst.msk [vmem:[#allocation3 + $0x80] sm:$0xff] %vm1402_vm15, %v5584_v0  ;;  %v3778_v20 = vor.u32 %v3777_v7, %v3774_v39  ;;  %v3135_v37 = vrot.slane %v2986_v27, 5 }
 0x13f   : > { %2257 = vst.msk [vmem:[#allocation3 + $0x260] sm:$0xff] %vm1402_vm15, %v5596_v51  ;;  %v4314_v1 = vld [vmem:[#allocation3 + $0x238] sm:$0xff]  ;;  %v3138_v42 = vrot.slane %v7654_v41, 5  ;;  %v5569_v4 = vrot.slane %v7656_v38, 9  ;;  %v8428_v43 = vld [vmem:[#allocation10_spill] sm:$0xff]  ;;  %v8429_v29 = vld [vmem:[#allocation9_spill] sm:$0xff]  ;;  %5937 = vmatpush3.bf16.msra.mxu1 %v6178_v58 }
 0x140   : > { %2421 = vst.msk [vmem:[#allocation3 + $0x80] sm:$0xff] %vm1950_vm0, %v8428_v43  ;;  %2433 = vst.msk [vmem:[#allocation3 + $0x260] sm:$0xff] %vm1950_vm0, %v8429_v29  ;;  %4810 = vmatprep.mubr.bf16.mxu1 %v4314_v1  ;;  %v3787_v19 = vrot.slane %v3785_v15, 4  ;;  %v3793_v57 = vrot.slane %v3791_v54, 5  ;;  %v2096_v26 = vrot.slane %v1980_v50, 5  ;;  %v2099_v62 = vrot.slane %v1981_v25, 5  ;;  %5938 = vmatprep.subr.bf16.mxu1 %v6179_v47 }
 0x141   : > { %v3779_v23 = vrot.slane %v3778_v20, 4  ;;  %v3136_v44 = vsel %vm6915_vm14, %v5642_v52, %v3135_v37  ;;  %v3137_v35 = vrot.slane %v3135_v37, 4  ;;  %4811 = vmatmul.mubr.bf16.gmra.mrb[8].mxu1 %v4313_v2  ;;  %v756_v21 = vsel %vm6416_vm5, 0, %v755_v6  ;;  %v2988_v13 = vld [vmem:[#allocation2 + $0xb4] sm:$0xe]  ;;  %v6204_v24 = vld [vmem:[#allocation2 + $0xa8] sm:$0xff]   ;;  %v1915_v29 = vpop.permute.xlu0 %1914 }
 0x142   : > { %v2989_v45 = vld [vmem:[#allocation2 + $0xb8] sm:$0xf]  ;;  %v6181_v36 = vld [vmem:[%s8398_s3 + $0xb0] sm:$0xff]   ;;  %v3788_v17 = vor.u32 %v3787_v19, %v7679_v61  ;;  %v2097_v55 = vsel %vm6915_vm14, %v5569_v4, %v2096_v26  ;;  %v2098_v53 = vrot.slane %v2096_v26, 4  ;;  %757 = vst [vmem:[#allocation2 + $0xc8] sm:$0x1] %v756_v21 }
 0x143   : > { %v3796_v48 = vshrl.u32 %v3453_v34, 16  ;;  %v2990_v8 = vld [vmem:[#allocation2 + $0xbc] sm:$0x1]  ;;  %v3784_v27 = vsel %vm6497_vm8, %v3779_v23, %v7679_v61  ;;  %v3139_v41 = vsel %vm6915_vm14, %v3137_v35, %v3138_v42  ;;  %v3799_v38 = vshll.u32 %v3453_v34, 16  ;;  %v1982_v5 = vld [vmem:[#allocation2 + $0x3c] sm:$0xe]  ;;  %5939 = vmatpush3.bf16.msra.mxu1 %v6181_v36 }
 0x144   : > { %v3805_v30 = vshll.u32 %v7683_v56, 16  ;;  %v1983_v28 = vld [vmem:[#allocation2 + $0x40] sm:$0xf]  ;;  %3407 = vst.msk [vmem:[#allocation3 + $0x1f8] sm:$0xff] %vm1402_vm15, %v6204_v24  ;;  %v3789_v22 = vrot.slane %v3788_v17, 4  ;;  %v5658_v49 = vcombine.low %v3136_v44, %v3139_v41  ;;  %v2100_v3 = vsel %vm6915_vm14, %v2098_v53, %v2099_v62  ;;  %v6184_v11 = vld [vmem:[%s8398_s3 + $0xf8] sm:$0xff]  }
 0x145   : > { %v3798_v14 = vrot.slane %v3796_v48, 4  ;;  %v7715_v50 = vld [vmem:[#allocation2 + $0x44] sm:$0x1]  ;;  %v5585_v31 = vcombine.low %v2097_v55, %v2100_v3  ;;  %v3801_v18 = vrot.slane %v3799_v38, 5  ;;  %v3809_v46 = vshrl.u32 %v7683_v56, 16  ;;  %v6185_v25 = vld [vmem:[%s8398_s3 + $0xb8] sm:$0xff]   ;;  %5940 = vmatprep.subr.bf16.mxu1 %v6184_v11 }
 0x146   : > { %v7722_v12 = vrot.slane %v3805_v30, 5  ;;  %v6205_v6 = vld [vmem:[#allocation2 + $0xb4] sm:$0xff]   ;;  %v3794_v0 = vsel %vm6497_vm8, %v3789_v22, %v3793_v57  ;;  %3228 = vrot.lane.b32.xlu1 %v5658_v49, %s6350_s11  ;;  %v5643_v39 = vrot.slane %v2988_v13, 9  ;;  %v3142_v7 = vrot.slane %v2989_v45, 5  ;;  %v2435_v58 = vld [vmem:[#allocation2 + $0x10] sm:$0xf]  ;;  %v7757_v22 = vpop.permute.xlu1 %3208 }
 0x147   : > { %v4258_v51 = vld [vmem:[#allocation3 + $0x78] sm:$0xff]  ;;  %v3145_v2 = vrot.slane %v2990_v8, 5  ;;  %v5690_v34 = vcombine.low %v3784_v27, %v3794_v0  ;;  %2246 = vst.msk [vmem:[#allocation3 + $0xa8] sm:$0xff] %vm1402_vm15, %v5585_v31  ;;  %v4259_v61 = vld [vmem:[#allocation3 + $0x80] sm:$0xff]  ;;  %v3802_v54 = vor.u32 %v3801_v18, %v3798_v14  ;;  %v3811_v52 = vrot.slane %v3809_v46, 4  ;;  %3408 = vst.msk [vmem:[#allocation3 + $0x220] sm:$0xff] %vm1402_vm15, %v6205_v6  ;;  %5941 = vmatpush3.bf16.msra.mxu1 %v6185_v25  ;;  %v7760_v18 = vpop.permute.xlu0 %2384 }
 0x148   : > { %v4319_v15 = vld [vmem:[#allocation3 + $0x260] sm:$0xff]  ;;  %v5570_v56 = vrot.slane %v1982_v5, 9  ;;  %v4318_v47 = vld [vmem:[#allocation3 + $0x258] sm:$0xff]  ;;  %2422 = vst.msk [vmem:[#allocation3 + $0xa8] sm:$0xff] %vm1950_vm0, %v7456_v10  ;;  %4722 = vmatprep.mubr.bf16.mxu0 %v4259_v61  ;;  %v3143_v1 = vsel %vm6915_vm14, %v5643_v39, %v3142_v7  ;;  %v3144_v20 = vrot.slane %v3142_v7, 4  ;;  %v2103_v37 = vrot.slane %v1983_v28, 5 }
 0x149   : > { %4818 = vmatprep.mubr.bf16.mxu1 %v4319_v15  ;;  %v2106_v42 = vrot.slane %v7715_v50, 5  ;;  %v2436_v4 = vld [vmem:[#allocation2 + $0x14] sm:$0x1]  ;;  %3917 = vrot.lane.b32.xlu0 %v5690_v34, %s6350_s11  ;;  %v1271_v19 = vld [vmem:[#allocation2 + $0xc8] sm:$0x1]  ;;  %v3812_v57 = vor.u32 %v3811_v52, %v7722_v12  ;;  %v2492_v26 = vshll.u32 %v2435_v58, 16 }
 0x14a   : > { %v4246_v43 = vld [vmem:[#allocation3 + $0x18] sm:$0xff]  ;;  %4723 = vmatmul.mubr.bf16.gmra.mrb[12].mxu0 %v4258_v51  ;;  %v2496_v10 = vshrl.u32 %v2435_v58, 16  ;;  %v2434_v62 = vld [vmem:[#allocation2 + $0xc] sm:$0xf]  ;;  %1957 = vst.msk [vmem:[#allocation3 + $0xf0] sm:$0xff] %vm1950_vm0, %v1915_v29  ;;  %v3146_v21 = vsel %vm6915_vm14, %v3144_v20, %v3145_v2  ;;  %v2104_v13 = vsel %vm6915_vm14, %v5570_v56, %v2103_v37  ;;  %v2105_v45 = vrot.slane %v2103_v37, 4  ;;  %4819 = vmatmul.mubr.bf16.gmra.mrb[12].mxu1 %v4318_v47 }
 0x14b   : > { %v8431_v23 = vld [vmem:[#allocation6_spill] sm:$0xff]  ;;  %v3457_v24 = vld [vmem:[#allocation2 + $0xd0] sm:$0xf]  ;;  %v7749_v17 = vrot.slane %v3802_v54, 4  ;;  %v7751_v55 = vrot.slane %v3812_v57, 4  ;;  %v5659_v53 = vcombine.low %v3143_v1, %v3146_v21  ;;  %v7753_v48 = vrot.slane %v2492_v26, 5  ;;  %4859 = vmatprep.mubr.bf16.mxu1 %v4246_v43  ;;  %v3900_v26 = vpop.permute.xlu1 %3899 }
 0x14c   : > { %v8432_v44 = vrot.slane %v8431_v23, 4  ;;  %v3456_v36 = vld [vmem:[#allocation2 + $0xcc] sm:$0xf]  ;;  %v3458_v8 = vld [vmem:[#allocation2 + $0xd4] sm:$0x1]  ;;  %v2107_v41 = vsel %vm6915_vm14, %v2105_v45, %v2106_v42  ;;  %v2498_v38 = vrot.slane %v2496_v10, 4  ;;  %v1917_v42 = vpop.permute.xlu0 %1916 }
 0x14d   : > { %v2991_v27 = vld [vmem:[#allocation2 + $0xc0] sm:$0xe]  ;;  %v2502_v30 = vshll.u32 %v2436_v4, 16  ;;  %v2483_v5 = vshrl.u32 %v2434_v62, 16  ;;  %v2992_v28 = vld [vmem:[#allocation2 + $0xc4] sm:$0xf]  ;;  %3230 = vrot.lane.b32.xlu1 %v5659_v53, %s6350_s11  ;;  %v5586_v3 = vcombine.low %v2104_v13, %v2107_v41  ;;  %v3808_v43 = vsel %vm6497_vm8, %v7749_v17, %v7722_v12 }
 0x14e   : > { %v1272_v60 = vsel %vm6403_vm3, %v8432_v44, %v1271_v19  ;;  %v6206_v49 = vld [vmem:[#allocation2 + $0xc0] sm:$0xff]   ;;  %v2486_v14 = vshll.u32 %v2434_v62, 16  ;;  %v3820_v50 = vshrl.u32 %v3456_v36, 16  ;;  %v3823_v11 = vshll.u32 %v3456_v36, 16  ;;  %v1985_v31 = vld [vmem:[#allocation2 + $0x48] sm:$0xe] }
 0x14f   : > { %1273 = vst [vmem:[#allocation2 + $0xc8] sm:$0x1] %v1272_v60  ;;  %v2499_v46 = vor.u32 %v2498_v38, %v7753_v48  ;;  %v2504_v25 = vrot.slane %v2502_v30, 5  ;;  %v2485_v6 = vrot.slane %v2483_v5, 4  ;;  %v4263_v0 = vld [vmem:[#allocation3 + $0xa0] sm:$0xff]  ;;  %v3829_v51 = vshll.u32 %v3457_v24, 16 }
 0x150   : > { %3409 = vst.msk [vmem:[#allocation3 + $0x248] sm:$0xff] %vm1402_vm15, %v6206_v49  ;;  %2247 = vst.msk [vmem:[#allocation3 + $0xd0] sm:$0xff] %vm1402_vm15, %v5586_v3  ;;  %v2488_v39 = vrot.slane %v2486_v14, 5  ;;  %v4264_v7 = vld [vmem:[#allocation3 + $0xa8] sm:$0xff]  ;;  %v3822_v2 = vrot.slane %v3820_v50, 4  ;;  %v3825_v58 = vrot.slane %v3823_v11, 5 }
 0x151   : > { %v3833_v34 = vshrl.u32 %v3457_v24, 16  ;;  %2423 = vst.msk [vmem:[#allocation3 + $0xd0] sm:$0xff] %vm1950_vm0, %v7635_v32  ;;  %v2500_v61 = vrot.slane %v2499_v46, 4  ;;  %4730 = vmatprep.mubr.bf16.mxu0 %v4264_v7  ;;  %v3831_v15 = vrot.slane %v3829_v51, 5  ;;  %v3839_v54 = vshll.u32 %v3458_v8, 16  ;;  %1958 = vst.msk [vmem:[#allocation3 + $0x118] sm:$0xff] %vm1950_vm0, %v1917_v42 }
 0x152   : > { %v5644_v52 = vrot.slane %v2991_v27, 9  ;;  %v2489_v56 = vor.u32 %v2488_v39, %v2485_v6  ;;  %4731 = vmatmul.mubr.bf16.gmra.mrb[16].mxu0 %v4263_v0  ;;  %v3826_v47 = vor.u32 %v3825_v58, %v3822_v2  ;;  %v3149_v20 = vrot.slane %v2992_v28, 5  ;;  %v1986_v37 = vld [vmem:[#allocation2 + $0x4c] sm:$0xf]  ;;  %3943 = vst.msk [vmem:[#allocation3 + $0xb8] sm:$0xff] %vm1950_vm0, %v3900_v26  ;;  %v4268_v49 = vld [vmem:[#allocation3 + $0xc8] sm:$0xff] }
 0x153   : > { %v3835_v1 = vrot.slane %v3833_v34, 4  ;;  %v2505_v32 = vsel %vm6497_vm8, %v2500_v61, %v2504_v25  ;;  %v3841_v29 = vrot.slane %v3839_v54, 5  ;;  %v5571_v57 = vrot.slane %v1985_v31, 9  ;;  %v1987_v21 = vld [vmem:[#allocation2 + $0x50] sm:$0x1] }
 0x154   : > { %v2490_v62 = vrot.slane %v2489_v56, 4  ;;  %v3827_v23 = vrot.slane %v3826_v47, 4  ;;  %v3150_v35 = vsel %vm6915_vm14, %v5644_v52, %v3149_v20  ;;  %v3151_v60 = vrot.slane %v3149_v20, 4  ;;  %v6207_v45 = vld [vmem:[#allocation2 + $0xcc] sm:$0xff]   ;;  %v2437_v8 = vld [vmem:[#allocation2 + $0x18] sm:$0xf] }
 0x155   : > { %v3836_v44 = vor.u32 %v3835_v1, %v3831_v15  ;;  %v2110_v13 = vrot.slane %v1986_v37, 5  ;;  %v2438_v27 = vld [vmem:[#allocation2 + $0x1c] sm:$0xf]  ;;  %v2439_v28 = vld [vmem:[#allocation2 + $0x20] sm:$0x1]  ;;  %3410 = vst.msk [vmem:[#allocation3 + $0x270] sm:$0xff] %vm1402_vm15, %v6207_v45 }
 0x156   : > { %v3455_v4 = vld [vmem:[#allocation2 + $0xc8] sm:$0x1]  ;;  %v2495_v24 = vsel %vm6497_vm8, %v2490_v62, %v7753_v48  ;;  %v3832_v17 = vsel %vm6497_vm8, %v3827_v23, %v3831_v15  ;;  %v1988_v3 = vld [vmem:[#allocation2 + $0x54] sm:$0xe]  ;;  %v2113_v11 = vrot.slane %v1987_v21, 5  ;;  %v2507_v51 = vshrl.u32 %v2437_v8, 16 }
 0x157   : > { %v2993_v19 = vld [vmem:[#allocation2 + $0xc8] sm:$0x1]  ;;  %v3815_v10 = vshll.u32 %v3455_v4, 16  ;;  %v3837_v53 = vrot.slane %v3836_v44, 4  ;;  %v5613_v41 = vcombine.low %v2495_v24, %v2505_v32  ;;  %v2111_v30 = vsel %vm6915_vm14, %v5571_v57, %v2110_v13  ;;  %v1989_v46 = vld [vmem:[#allocation2 + $0x58] sm:$0xf] }
 0x158   : > { %v3152_v12 = vrot.slane %v2993_v19, 5  ;;  %v2112_v5 = vrot.slane %v2110_v13, 4  ;;  %v4269_v31 = vld [vmem:[#allocation3 + $0xd0] sm:$0xff]  ;;  %v1990_v25 = vld [vmem:[#allocation2 + $0x5c] sm:$0x1]  ;;  %v2510_v39 = vshll.u32 %v2437_v8, 16 }
 0x159   : > { %v3817_v36 = vrot.slane %v3815_v10, 5  ;;  %v3842_v14 = vsel %vm6497_vm8, %v3837_v53, %v3841_v29  ;;  %2930 = vst.msk [vmem:[#allocation3 + $0x10] sm:$0xff] %vm1402_vm15, %v5613_v41  ;;  %4738 = vmatprep.mubr.bf16.mxu0 %v4269_v31  ;;  %v2516_v7 = vshll.u32 %v2438_v27, 16  ;;  %v2520_v2 = vshrl.u32 %v2438_v27, 16  ;;  %v2440_v34 = vld [vmem:[#allocation2 + $0x24] sm:$0xf]  ;;  %v7800_v29 = vpop.permute.xlu1 %3210 }
 0x15a   : > { %v3153_v38 = vsel %vm6915_vm14, %v3151_v60, %v3152_v12  ;;  %v5692_v0 = vcombine.low %v3832_v17, %v3842_v14  ;;  %3250 = vst.msk [vmem:[#allocation3 + $0x10] sm:$0xff] %vm1950_vm0, %v7450_v33  ;;  %v2526_v58 = vshll.u32 %v2439_v28, 16  ;;  %4739 = vmatmul.mubr.bf16.gmra.mrb[20].mxu0 %v4268_v49  ;;  %v2509_v15 = vrot.slane %v2507_v51, 4  ;;  %v2441_v56 = vld [vmem:[#allocation2 + $0x28] sm:$0xf]  ;;  %v4251_v45 = vld [vmem:[#allocation3 + $0x40] sm:$0xff]  ;;  %v7809_v17 = vpop.permute.xlu0 %2386 }
 0x15b   : > { %v3818_v48 = vsel %vm6497_vm8, %v7751_v55, %v3817_v36  ;;  %v5660_v50 = vcombine.low %v3150_v35, %v3153_v38  ;;  %v2114_v55 = vsel %vm6915_vm14, %v2112_v5, %v2113_v11  ;;  %v2512_v54 = vrot.slane %v2510_v39, 5  ;;  %v2442_v4 = vld [vmem:[#allocation2 + $0x2c] sm:$0x1]  ;;  %v1991_v62 = vld [vmem:[#allocation2 + $0x60] sm:$0xe] }
 0x15c   : > { %v5691_v6 = vcombine.low %v3808_v43, %v3818_v48  ;;  %v5587_v61 = vcombine.low %v2111_v30, %v2114_v55  ;;  %v5572_v52 = vrot.slane %v1988_v3, 9  ;;  %v2518_v47 = vrot.slane %v2516_v7, 5  ;;  %v1992_v23 = vld [vmem:[#allocation2 + $0x64] sm:$0xf]  ;;  %v1993_v21 = vld [vmem:[#allocation2 + $0x68] sm:$0x1] }
 0x15d   : > { %3232 = vrot.lane.b32.xlu1 %v5660_v50, %s6350_s11  ;;  %v2522_v1 = vrot.slane %v2520_v2, 4  ;;  %v2528_v33 = vrot.slane %v2526_v58, 5  ;;  %v2117_v20 = vrot.slane %v1989_v46, 5  ;;  %v2513_v37 = vor.u32 %v2512_v54, %v2509_v15  ;;  %v2443_v53 = vld [vmem:[#allocation2 + $0x30] sm:$0xf] }
 0x15e   : > { %3919 = vrot.lane.b32.xlu0 %v5691_v6, %s6350_s11  ;;  %2248 = vst.msk [vmem:[#allocation3 + $0xf8] sm:$0xff] %vm1402_vm15, %v5587_v61  ;;  %v2120_v42 = vrot.slane %v1990_v25, 5  ;;  %v2531_v43 = vshrl.u32 %v2440_v34, 16  ;;  %v2534_v32 = vshll.u32 %v2440_v34, 16  ;;  %v2540_v10 = vshll.u32 %v2441_v56, 16  ;;  %v3902_v6 = vpop.permute.xlu1 %3901  ;;  %v1919_v2 = vpop.permute.xlu0 %1918 }
 0x15f   : > { %2424 = vst.msk [vmem:[#allocation3 + $0xf8] sm:$0xff] %vm1950_vm0, %v7720_v9  ;;  %v2523_v19 = vor.u32 %v2522_v1, %v2518_v47  ;;  %v2118_v57 = vsel %vm6915_vm14, %v5572_v52, %v2117_v20  ;;  %v2119_v26 = vrot.slane %v2117_v20, 4  ;;  %v2514_v44 = vrot.slane %v2513_v37, 4  ;;  %v2444_v5 = vld [vmem:[#allocation2 + $0x34] sm:$0xf]  ;;  %3944 = vst.msk [vmem:[#allocation3 + $0xe0] sm:$0xff] %vm1950_vm0, %v3902_v6 }
 0x160   : > { %v2533_v35 = vrot.slane %v2531_v43, 4  ;;  %v2536_v60 = vrot.slane %v2534_v32, 5  ;;  %v2544_v12 = vshrl.u32 %v2441_v56, 16  ;;  %v2542_v36 = vrot.slane %v2540_v10, 5  ;;  %v2445_v46 = vld [vmem:[#allocation2 + $0x38] sm:$0x1] }
 0x161   : > { %v2524_v13 = vrot.slane %v2523_v19, 4  ;;  %v2121_v9 = vsel %vm6915_vm14, %v2119_v26, %v2120_v42  ;;  %v2550_v24 = vshll.u32 %v2442_v4, 16  ;;  %v2519_v8 = vsel %vm6497_vm8, %v2514_v44, %v2518_v47  ;;  %v4245_v27 = vld [vmem:[#allocation3 + $0x10] sm:$0xff]  ;;  %v1995_v58 = vld [vmem:[#allocation2 + $0x70] sm:$0xf]  ;;  %1959 = vst.msk [vmem:[#allocation3 + $0x140] sm:$0xff] %vm1950_vm0, %v1919_v2 }
 0x162   : > { %3921 = vrot.lane.b32.xlu0 %v5692_v0, %s6350_s11  ;;  %v5588_v41 = vcombine.low %v2118_v57, %v2121_v9  ;;  %v2537_v38 = vor.u32 %v2536_v60, %v2533_v35  ;;  %v2546_v30 = vrot.slane %v2544_v12, 4  ;;  %4860 = vmatmul.mubr.bf16.vlgmr.msra.gmra.mrb[16].mxu1 %v4245_v27  ;;  %v5573_v3 = vrot.slane %v1991_v62, 9  ;;  %v1994_v25 = vld [vmem:[#allocation2 + $0x6c] sm:$0xe]  ;;  %v1996_v52 = vld [vmem:[#allocation2 + $0x74] sm:$0x1] }
 0x163   : > { %v2529_v28 = vsel %vm6497_vm8, %v2524_v13, %v2528_v33  ;;  %v2552_v49 = vrot.slane %v2550_v24, 5  ;;  %v2124_v48 = vrot.slane %v1992_v23, 5  ;;  %4867 = vmatprep.mubr.bf16.mxu1 %v4251_v45  ;;  %v2127_v31 = vrot.slane %v1993_v21, 5  ;;  %v4273_v0 = vld [vmem:[#allocation3 + $0xf0] sm:$0xff]  ;;  %v2446_v20 = vld [vmem:[#allocation2 + $0x3c] sm:$0xf] }
 0x164   : > { %v5614_v14 = vcombine.low %v2519_v8, %v2529_v28  ;;  %2249 = vst.msk [vmem:[#allocation3 + $0x120] sm:$0xff] %vm1402_vm15, %v5588_v41  ;;  %v2538_v50 = vrot.slane %v2537_v38, 4  ;;  %v2547_v11 = vor.u32 %v2546_v30, %v2542_v36  ;;  %v2555_v55 = vshrl.u32 %v2443_v53, 16  ;;  %v2447_v32 = vld [vmem:[#allocation2 + $0x40] sm:$0xf] }
 0x165   : > { %2425 = vst.msk [vmem:[#allocation3 + $0x120] sm:$0xff] %vm1950_vm0, %v7760_v18  ;;  %v2125_v51 = vsel %vm6915_vm14, %v5573_v3, %v2124_v48  ;;  %v2126_v39 = vrot.slane %v2124_v48, 4  ;;  %v2558_v7 = vshll.u32 %v2443_v53, 16  ;;  %v2564_v54 = vshll.u32 %v2444_v5, 16  ;;  %v2448_v10 = vld [vmem:[#allocation2 + $0x44] sm:$0x1]  ;;  %v7841_v48 = vpop.permute.xlu1 %3212 }
 0x166   : > { %2931 = vst.msk [vmem:[#allocation3 + $0x38] sm:$0xff] %vm1402_vm15, %v5614_v14  ;;  %v2543_v34 = vsel %vm6497_vm8, %v2538_v50, %v2542_v36  ;;  %v2548_v61 = vrot.slane %v2547_v11, 4  ;;  %v4274_v15 = vld [vmem:[#allocation3 + $0xf8] sm:$0xff]  ;;  %v2568_v18 = vshrl.u32 %v2444_v5, 16  ;;  %v2557_v47 = vrot.slane %v2555_v55, 4  ;;  %v4256_v12 = vld [vmem:[#allocation3 + $0x68] sm:$0xff] }
 0x167   : > { %3251 = vst.msk [vmem:[#allocation3 + $0x38] sm:$0xff] %vm1950_vm0, %v7482_v40  ;;  %4746 = vmatprep.mubr.bf16.mxu0 %v4274_v15  ;;  %v2128_v56 = vsel %vm6915_vm14, %v2126_v39, %v2127_v31  ;;  %v2560_v1 = vrot.slane %v2558_v7, 5  ;;  %v2574_v33 = vshll.u32 %v2445_v46, 16  ;;  %v2566_v4 = vrot.slane %v2564_v54, 5  ;;  %v1997_v62 = vld [vmem:[#allocation2 + $0x78] sm:$0xe] }
 0x168   : > { %v2553_v37 = vsel %vm6497_vm8, %v2548_v61, %v2552_v49  ;;  %4747 = vmatmul.mubr.bf16.gmra.mrb[24].mxu0 %v4273_v0  ;;  %v5589_v42 = vcombine.low %v2125_v51, %v2128_v56  ;;  %v2570_v43 = vrot.slane %v2568_v18, 4  ;;  %v5574_v40 = vrot.slane %v1994_v25, 9  ;;  %v1998_v36 = vld [vmem:[#allocation2 + $0x7c] sm:$0xf]  ;;  %v1999_v38 = vld [vmem:[#allocation2 + $0x80] sm:$0x1] }
 0x169   : > { %v5615_v19 = vcombine.low %v2543_v34, %v2553_v37  ;;  %v2561_v57 = vor.u32 %v2560_v1, %v2557_v47  ;;  %v2576_v26 = vrot.slane %v2574_v33, 5  ;;  %v2131_v44 = vrot.slane %v1995_v58, 5  ;;  %v2449_v3 = vld [vmem:[#allocation2 + $0x48] sm:$0xf]  ;;  %v2450_v46 = vld [vmem:[#allocation2 + $0x4c] sm:$0xf] }
 0x16a   : > { %2250 = vst.msk [vmem:[#allocation3 + $0x148] sm:$0xff] %vm1402_vm15, %v5589_v42  ;;  %v2571_v23 = vor.u32 %v2570_v43, %v2566_v4  ;;  %v2134_v35 = vrot.slane %v1996_v52, 5  ;;  %v2579_v60 = vshrl.u32 %v2446_v20, 16  ;;  %v2582_v13 = vshll.u32 %v2446_v20, 16  ;;  %v2451_v39 = vld [vmem:[#allocation2 + $0x50] sm:$0x1] }
 0x16b   : > { %2932 = vst.msk [vmem:[#allocation3 + $0x60] sm:$0xff] %vm1402_vm15, %v5615_v19  ;;  %v2562_v21 = vrot.slane %v2561_v57, 4  ;;  %v2588_v45 = vshll.u32 %v2447_v32, 16  ;;  %v2592_v9 = vshrl.u32 %v2447_v32, 16  ;;  %v2132_v8 = vsel %vm6915_vm14, %v5574_v40, %v2131_v44  ;;  %v2000_v34 = vld [vmem:[#allocation2 + $0x84] sm:$0xe]  ;;  %v3904_v57 = vpop.permute.xlu1 %3903 }
 0x16c   : > { %2426 = vst.msk [vmem:[#allocation3 + $0x148] sm:$0xff] %vm1950_vm0, %v7809_v17  ;;  %3252 = vst.msk [vmem:[#allocation3 + $0x60] sm:$0xff] %vm1950_vm0, %v7552_v59  ;;  %v2572_v24 = vrot.slane %v2571_v23, 4  ;;  %v4279_v53 = vld [vmem:[#allocation3 + $0x120] sm:$0xff]  ;;  %v2133_v27 = vrot.slane %v2131_v44, 4  ;;  %v2581_v41 = vrot.slane %v2579_v60, 4 }
 0x16d   : > { %v2567_v30 = vsel %vm6497_vm8, %v2562_v21, %v2566_v4  ;;  %4754 = vmatprep.mubr.bf16.mxu0 %v4279_v53  ;;  %v4278_v17 = vld [vmem:[#allocation3 + $0x118] sm:$0xff]  ;;  %v2584_v5 = vrot.slane %v2582_v13, 5  ;;  %v2590_v28 = vrot.slane %v2588_v45, 5  ;;  %v2594_v49 = vrot.slane %v2592_v9, 4  ;;  %v2001_v52 = vld [vmem:[#allocation2 + $0x88] sm:$0xf] }
 0x16e   : > { %v4250_v59 = vld [vmem:[#allocation3 + $0x38] sm:$0xff]  ;;  %v2577_v14 = vsel %vm6497_vm8, %v2572_v24, %v2576_v26  ;;  %v2135_v50 = vsel %vm6915_vm14, %v2133_v27, %v2134_v35  ;;  %v2598_v11 = vshll.u32 %v2448_v10, 16  ;;  %v5575_v31 = vrot.slane %v1997_v62, 9  ;;  %v2002_v37 = vld [vmem:[#allocation2 + $0x8c] sm:$0x1]  ;;  %3945 = vst.msk [vmem:[#allocation3 + $0x108] sm:$0xff] %vm1950_vm0, %v3904_v57 }
 0x16f   : > { %4868 = vmatmul.mubr.bf16.gmra.mrb[20].mxu1 %v4250_v59  ;;  %v5616_v25 = vcombine.low %v2567_v30, %v2577_v14  ;;  %v5590_v6 = vcombine.low %v2132_v8, %v2135_v50  ;;  %v2585_v0 = vor.u32 %v2584_v5, %v2581_v41  ;;  %v2595_v51 = vor.u32 %v2594_v49, %v2590_v28  ;;  %v4261_v23 = vld [vmem:[#allocation3 + $0x90] sm:$0xff]  ;;  %v4283_v44 = vld [vmem:[#allocation3 + $0x140] sm:$0xff]  ;;  %v2389_v30 = vpop.permute.xlu0 %2388 }
 0x170   : > { %4875 = vmatprep.mubr.bf16.mxu1 %v4256_v12  ;;  %4755 = vmatmul.mubr.bf16.gmra.mrb[28].mxu0 %v4278_v17  ;;  %v2600_v55 = vrot.slane %v2598_v11, 5  ;;  %v2138_v7 = vrot.slane %v1998_v36, 5  ;;  %v2141_v2 = vrot.slane %v1999_v38, 5  ;;  %v2603_v58 = vshrl.u32 %v2449_v3, 16  ;;  %v2453_v13 = vld [vmem:[#allocation2 + $0x58] sm:$0xf] }
 0x171   : > { %2933 = vst.msk [vmem:[#allocation3 + $0x88] sm:$0xff] %vm1402_vm15, %v5616_v25  ;;  %2251 = vst.msk [vmem:[#allocation3 + $0x170] sm:$0xff] %vm1402_vm15, %v5590_v6  ;;  %v2586_v61 = vrot.slane %v2585_v0, 4  ;;  %v2596_v15 = vrot.slane %v2595_v51, 4  ;;  %v2606_v54 = vshll.u32 %v2449_v3, 16  ;;  %v2612_v18 = vshll.u32 %v2450_v46, 16  ;;  %v7873_v0 = vpop.permute.xlu1 %3214 }
 0x172   : > { %3253 = vst.msk [vmem:[#allocation3 + $0x88] sm:$0xff] %vm1950_vm0, %v7757_v22  ;;  %v2139_v47 = vsel %vm6915_vm14, %v5575_v31, %v2138_v7  ;;  %v2140_v1 = vrot.slane %v2138_v7, 4  ;;  %v2605_v33 = vrot.slane %v2603_v58, 4  ;;  %v2616_v20 = vshrl.u32 %v2450_v46, 16  ;;  %v2452_v22 = vld [vmem:[#allocation2 + $0x54] sm:$0xf] }
 0x173   : > { %v4284_v56 = vld [vmem:[#allocation3 + $0x148] sm:$0xff]  ;;  %v4255_v42 = vld [vmem:[#allocation3 + $0x60] sm:$0xff]  ;;  %v2591_v4 = vsel %vm6497_vm8, %v2586_v61, %v2590_v28  ;;  %v2601_v43 = vsel %vm6497_vm8, %v2596_v15, %v2600_v55  ;;  %v2608_v32 = vrot.slane %v2606_v54, 5  ;;  %v2614_v19 = vrot.slane %v2612_v18, 5  ;;  %2427 = vst.msk [vmem:[#allocation3 + $0x170] sm:$0xff] %vm1950_vm0, %v2389_v30  ;;  %v4266_v55 = vld [vmem:[#allocation3 + $0xb8] sm:$0xff]  ;;  %v1921_v54 = vpop.permute.xlu0 %1920 }
 0x174   : > { %4762 = vmatprep.mubr.bf16.mxu0 %v4284_v56  ;;  %v5617_v26 = vcombine.low %v2591_v4, %v2601_v43  ;;  %v2142_v40 = vsel %vm6915_vm14, %v2140_v1, %v2141_v2  ;;  %v2618_v10 = vrot.slane %v2616_v20, 4  ;;  %v2622_v62 = vshll.u32 %v2451_v39, 16  ;;  %v2454_v24 = vld [vmem:[#allocation2 + $0x5c] sm:$0x1]  ;;  %v2455_v3 = vld [vmem:[#allocation2 + $0x60] sm:$0xf] }
 0x175   : > { %v5591_v35 = vcombine.low %v2139_v47, %v2142_v40  ;;  %v2609_v60 = vor.u32 %v2608_v32, %v2605_v33  ;;  %v5576_v12 = vrot.slane %v2000_v34, 9  ;;  %v2145_v21 = vrot.slane %v2001_v52, 5  ;;  %v2456_v11 = vld [vmem:[#allocation2 + $0x64] sm:$0xf]  ;;  %v2457_v51 = vld [vmem:[#allocation2 + $0x68] sm:$0x1] }
 0x176   : > { %2934 = vst.msk [vmem:[#allocation3 + $0xb0] sm:$0xff] %vm1402_vm15, %v5617_v26  ;;  %v2619_v45 = vor.u32 %v2618_v10, %v2614_v19  ;;  %v2624_v9 = vrot.slane %v2622_v62, 5  ;;  %v2148_v36 = vrot.slane %v2002_v37, 5  ;;  %v2627_v53 = vshrl.u32 %v2452_v22, 16  ;;  %v2458_v39 = vld [vmem:[#allocation2 + $0x6c] sm:$0xf] }
 0x177   : > { %4876 = vmatmul.mubr.bf16.gmra.mrb[24].mxu1 %v4255_v42  ;;  %3254 = vst.msk [vmem:[#allocation3 + $0xb0] sm:$0xff] %vm1950_vm0, %v7800_v29  ;;  %v2610_v8 = vrot.slane %v2609_v60, 4  ;;  %v2146_v27 = vsel %vm6915_vm14, %v5576_v12, %v2145_v21  ;;  %v2147_v41 = vrot.slane %v2145_v21, 4  ;;  %v2630_v38 = vshll.u32 %v2452_v22, 16  ;;  %v2459_v61 = vld [vmem:[#allocation2 + $0x70] sm:$0xf] }
 0x178   : > { %2252 = vst.msk [vmem:[#allocation3 + $0x198] sm:$0xff] %vm1402_vm15, %v5591_v35  ;;  %4883 = vmatprep.mubr.bf16.mxu1 %v4261_v23  ;;  %4763 = vmatmul.mubr.bf16.gmra.mrb[32].mxu0 %v4283_v44  ;;  %v2620_v17 = vrot.slane %v2619_v45, 4  ;;  %v2629_v5 = vrot.slane %v2627_v53, 4  ;;  %v2636_v28 = vshll.u32 %v2453_v13, 16  ;;  %v2640_v49 = vshrl.u32 %v2453_v13, 16  ;;  %v3906_v35 = vpop.permute.xlu1 %3905 }
 0x179   : > { %v2615_v29 = vsel %vm6497_vm8, %v2610_v8, %v2614_v19  ;;  %v2149_v59 = vsel %vm6915_vm14, %v2147_v41, %v2148_v36  ;;  %v2632_v14 = vrot.slane %v2630_v38, 5  ;;  %v2646_v50 = vshll.u32 %v2454_v24, 16  ;;  %v4260_v15 = vld [vmem:[#allocation3 + $0x88] sm:$0xff]  ;;  %v2460_v1 = vld [vmem:[#allocation2 + $0x74] sm:$0x1]  ;;  %1960 = vst.msk [vmem:[#allocation3 + $0x168] sm:$0xff] %vm1950_vm0, %v1921_v54 }
 0x17a   : > { %v2625_v31 = vsel %vm6497_vm8, %v2620_v17, %v2624_v9  ;;  %v5592_v46 = vcombine.low %v2146_v27, %v2149_v59  ;;  %v2638_v25 = vrot.slane %v2636_v28, 5  ;;  %v2642_v6 = vrot.slane %v2640_v49, 4  ;;  %v3955_v57 = vld [vmem:[#allocation2 + $0x18] sm:$0xe]  ;;  %v3956_v62 = vld [vmem:[#allocation2 + $0x1c] sm:$0xf] }
 0x17b   : > { %v5618_v7 = vcombine.low %v2615_v29, %v2625_v31  ;;  %v2633_v2 = vor.u32 %v2632_v14, %v2629_v5  ;;  %v2648_v58 = vrot.slane %v2646_v50, 5  ;;  %v2651_v34 = vshrl.u32 %v2455_v3, 16  ;;  %v4289_v23 = vld [vmem:[#allocation3 + $0x170] sm:$0xff]  ;;  %v3957_v21 = vld [vmem:[#allocation2 + $0x20] sm:$0x1]  ;;  %3946 = vst.msk [vmem:[#allocation3 + $0x130] sm:$0xff] %vm1950_vm0, %v3906_v35 }
 0x17c   : > { %2253 = vst.msk [vmem:[#allocation3 + $0x1c0] sm:$0xff] %vm1402_vm15, %v5592_v46  ;;  %v2643_v18 = vor.u32 %v2642_v6, %v2638_v25  ;;  %v2654_v52 = vshll.u32 %v2455_v3, 16  ;;  %v2660_v56 = vshll.u32 %v2456_v11, 16  ;;  %v2664_v47 = vshrl.u32 %v2456_v11, 16  ;;  %v3958_v13 = vld [vmem:[#allocation2 + $0x24] sm:$0xe]  ;;  %4770 = vmatprep.mubr.bf16.mxu0 %v4289_v23 }
 0x17d   : > { %2935 = vst.msk [vmem:[#allocation3 + $0xd8] sm:$0xff] %vm1402_vm15, %v5618_v7  ;;  %v2634_v33 = vrot.slane %v2633_v2, 4  ;;  %v2653_v20 = vrot.slane %v2651_v34, 4  ;;  %v2670_v37 = vshll.u32 %v2457_v51, 16  ;;  %v2675_v42 = vshrl.u32 %v2458_v39, 16  ;;  %v3217_v51 = vpop.permute.xlu1 %3216 }
 0x17e   : > { %3255 = vst.msk [vmem:[#allocation3 + $0xd8] sm:$0xff] %vm1950_vm0, %v7841_v48  ;;  %v2644_v4 = vrot.slane %v2643_v18, 4  ;;  %v2656_v43 = vrot.slane %v2654_v52, 5  ;;  %v2662_v32 = vrot.slane %v2660_v56, 5  ;;  %v2666_v19 = vrot.slane %v2664_v47, 4  ;;  %v4265_v29 = vld [vmem:[#allocation3 + $0xb0] sm:$0xff] }
 0x17f   : > { %4884 = vmatmul.mubr.bf16.gmra.mrb[28].mxu1 %v4260_v15  ;;  %v2639_v22 = vsel %vm6497_vm8, %v2634_v33, %v2638_v25  ;;  %v2672_v26 = vrot.slane %v2670_v37, 5  ;;  %v2677_v40 = vrot.slane %v2675_v42, 4  ;;  %v2678_v10 = vshll.u32 %v2458_v39, 16  ;;  %v3959_v53 = vld [vmem:[#allocation2 + $0x28] sm:$0xf]  ;;  %v4271_v25 = vld [vmem:[#allocation3 + $0xe0] sm:$0xff]  ;;  %v2391_v42 = vpop.permute.xlu0 %2390 }
 0x180   : > { %4891 = vmatprep.mubr.bf16.mxu1 %v4266_v55  ;;  %v2649_v44 = vsel %vm6497_vm8, %v2644_v4, %v2648_v58  ;;  %v2657_v48 = vor.u32 %v2656_v43, %v2653_v20  ;;  %v2667_v60 = vor.u32 %v2666_v19, %v2662_v32  ;;  %v2684_v12 = vshll.u32 %v2459_v61, 16  ;;  %v3960_v30 = vld [vmem:[#allocation2 + $0x2c] sm:$0x1]  ;;  %v2461_v3 = vld [vmem:[#allocation2 + $0x78] sm:$0xf]  ;;  %v4288_v59 = vld [vmem:[#allocation3 + $0x168] sm:$0xff] }
 0x181   : > { %v5619_v45 = vcombine.low %v2639_v22, %v2649_v44  ;;  %v2680_v9 = vrot.slane %v2678_v10, 5  ;;  %v2688_v36 = vshrl.u32 %v2459_v61, 16  ;;  %v2694_v24 = vshll.u32 %v2460_v1, 16  ;;  %v2462_v46 = vld [vmem:[#allocation2 + $0x7c] sm:$0xf]  ;;  %4771 = vmatmul.mubr.bf16.gmra.mrb[36].mxu0 %v4288_v59  ;;  %2428 = vst.msk [vmem:[#allocation3 + $0x198] sm:$0xff] %vm1950_vm0, %v2391_v42 }
 0x182   : > { %v2658_v8 = vrot.slane %v2657_v48, 4  ;;  %v2668_v27 = vrot.slane %v2667_v60, 4  ;;  %v2686_v41 = vrot.slane %v2684_v12, 5  ;;  %v5693_v38 = vrot.slane %v3955_v57, 9  ;;  %v2463_v2 = vld [vmem:[#allocation2 + $0x80] sm:$0x1] }
 0x183   : > { %2936 = vst.msk [vmem:[#allocation3 + $0x100] sm:$0xff] %vm1402_vm15, %v5619_v45  ;;  %v2681_v17 = vor.u32 %v2680_v9, %v2677_v40  ;;  %v2690_v5 = vrot.slane %v2688_v36, 4  ;;  %v2696_v28 = vrot.slane %v2694_v24, 5  ;;  %v4053_v49 = vrot.slane %v3956_v62, 5  ;;  %v3961_v20 = vld [vmem:[#allocation2 + $0x30] sm:$0xe]  ;;  %v3219_v40 = vpop.permute.xlu1 %3218 }
 0x184   : > { %3256 = vst.msk [vmem:[#allocation3 + $0x100] sm:$0xff] %vm1950_vm0, %v7873_v0  ;;  %v2663_v14 = vsel %vm6497_vm8, %v2658_v8, %v2662_v32  ;;  %v2673_v50 = vsel %vm6497_vm8, %v2668_v27, %v2672_v26  ;;  %v4056_v11 = vrot.slane %v3957_v21, 5  ;;  %v5694_v31 = vrot.slane %v3958_v13, 9  ;;  %v3962_v37 = vld [vmem:[#allocation2 + $0x34] sm:$0xf] }
 0x185   : > { %v5620_v6 = vcombine.low %v2663_v14, %v2673_v50  ;;  %v2682_v39 = vrot.slane %v2681_v17, 4  ;;  %v2691_v55 = vor.u32 %v2690_v5, %v2686_v41  ;;  %v4054_v7 = vsel %vm6915_vm14, %v5693_v38, %v4053_v49  ;;  %v3963_v57 = vld [vmem:[#allocation2 + $0x38] sm:$0x1]  ;;  %v3964_v22 = vld [vmem:[#allocation2 + $0x3c] sm:$0xe]  ;;  %v4270_v45 = vld [vmem:[#allocation3 + $0xd8] sm:$0xff] }
 0x186   : > { %v4055_v0 = vrot.slane %v4053_v49, 4  ;;  %v4060_v58 = vrot.slane %v3959_v53, 5  ;;  %v4063_v34 = vrot.slane %v3960_v30, 5  ;;  %v2699_v61 = vshrl.u32 %v2461_v3, 16  ;;  %v3965_v44 = vld [vmem:[#allocation2 + $0x40] sm:$0xf]  ;;  %v1923_v27 = vpop.permute.xlu0 %1922 }
 0x187   : > { %4892 = vmatmul.mubr.bf16.gmra.mrb[32].mxu1 %v4265_v29  ;;  %2937 = vst.msk [vmem:[#allocation3 + $0x128] sm:$0xff] %vm1402_vm15, %v5620_v6  ;;  %v2687_v15 = vsel %vm6497_vm8, %v2682_v39, %v2686_v41  ;;  %v2692_v54 = vrot.slane %v2691_v55, 4  ;;  %v2702_v18 = vshll.u32 %v2461_v3, 16  ;;  %v2708_v52 = vshll.u32 %v2462_v46, 16  ;;  %v3966_v21 = vld [vmem:[#allocation2 + $0x44] sm:$0x1] }
 0x188   : > { %4899 = vmatprep.mubr.bf16.mxu1 %v4271_v25  ;;  %3257 = vst.msk [vmem:[#allocation3 + $0x128] sm:$0xff] %vm1950_vm0, %v3217_v51  ;;  %v4057_v56 = vsel %vm6915_vm14, %v4055_v0, %v4056_v11  ;;  %v4061_v47 = vsel %vm6915_vm14, %v5694_v31, %v4060_v58  ;;  %v4062_v1 = vrot.slane %v4060_v58, 4  ;;  %v2701_v33 = vrot.slane %v2699_v61, 4  ;;  %v2464_v13 = vld [vmem:[#allocation2 + $0x84] sm:$0xf]  ;;  %1961 = vst.msk [vmem:[#allocation3 + $0x190] sm:$0xff] %vm1950_vm0, %v1923_v27 }
 0x189   : > { %v2697_v4 = vsel %vm6497_vm8, %v2692_v54, %v2696_v28  ;;  %v5709_v43 = vcombine.low %v4054_v7, %v4057_v56  ;;  %v2704_v32 = vrot.slane %v2702_v18, 5  ;;  %v7904_v19 = vrot.slane %v2708_v52, 5  ;;  %v2465_v8 = vld [vmem:[#allocation2 + $0x88] sm:$0xf]  ;;  %v4276_v41 = vld [vmem:[#allocation3 + $0x108] sm:$0xff]  ;;  %v4294_v58 = vld [vmem:[#allocation3 + $0x198] sm:$0xff]  ;;  %v3221_v42 = vpop.permute.xlu1 %3220 }
 0x18a   : > { %v5621_v26 = vcombine.low %v2687_v15, %v2697_v4  ;;  %v4064_v10 = vsel %vm6915_vm14, %v4062_v1, %v4063_v34  ;;  %v2712_v62 = vshrl.u32 %v2462_v46, 16  ;;  %v2718_v23 = vshll.u32 %v2463_v2, 16  ;;  %v2466_v28 = vld [vmem:[#allocation2 + $0x8c] sm:$0x1]  ;;  %v3967_v14 = vld [vmem:[#allocation2 + $0x48] sm:$0xe]  ;;  %v2393_v0 = vpop.permute.xlu0 %2392  ;;  %4778 = vmatprep.mubr.bf16.mxu0 %v4294_v58 }
 0x18b   : > { %4227 = vst.msk [vmem:[#allocation3 + $0x20] sm:$0xff] %vm1402_vm15, %v5709_v43  ;;  %v5710_v35 = vcombine.low %v4061_v47, %v4064_v10  ;;  %v2705_v48 = vor.u32 %v2704_v32, %v2701_v33  ;;  %v5695_v60 = vrot.slane %v3961_v20, 9  ;;  %v4067_v12 = vrot.slane %v3962_v37, 5  ;;  %v3968_v25 = vld [vmem:[#allocation2 + $0x4c] sm:$0xf] }
 0x18c   : > { %2938 = vst.msk [vmem:[#allocation3 + $0x150] sm:$0xff] %vm1402_vm15, %v5621_v26  ;;  %v2714_v9 = vrot.slane %v2712_v62, 4  ;;  %v2720_v36 = vrot.slane %v2718_v23, 5  ;;  %v4070_v24 = vrot.slane %v3963_v57, 5  ;;  %v5696_v53 = vrot.slane %v3964_v22, 9  ;;  %v4275_v57 = vld [vmem:[#allocation3 + $0x100] sm:$0xff] }
 0x18d   : > { %3258 = vst.msk [vmem:[#allocation3 + $0x150] sm:$0xff] %vm1950_vm0, %v3219_v40  ;;  %v2706_v38 = vrot.slane %v2705_v48, 4  ;;  %v4068_v30 = vsel %vm6915_vm14, %v5695_v60, %v4067_v12  ;;  %v4069_v17 = vrot.slane %v4067_v12, 4  ;;  %v4074_v5 = vrot.slane %v3965_v44, 5  ;;  %v3969_v6 = vld [vmem:[#allocation2 + $0x50] sm:$0x1] }
 0x18e   : > { %4228 = vst.msk [vmem:[#allocation3 + $0x48] sm:$0xff] %vm1402_vm15, %v5710_v35  ;;  %v2715_v49 = vor.u32 %v2714_v9, %v7904_v19  ;;  %v4077_v3 = vrot.slane %v3966_v21, 5  ;;  %v2723_v29 = vshrl.u32 %v2464_v13, 16  ;;  %v2726_v59 = vshll.u32 %v2464_v13, 16  ;;  %v3970_v2 = vld [vmem:[#allocation2 + $0x54] sm:$0xe] }
 0x18f   : > { %4900 = vmatmul.mubr.bf16.gmra.mrb[36].mxu1 %v4270_v45  ;;  %v2711_v50 = vsel %vm6497_vm8, %v2706_v38, %v7904_v19  ;;  %v4071_v11 = vsel %vm6915_vm14, %v4069_v17, %v4070_v24  ;;  %v4075_v31 = vsel %vm6915_vm14, %v5696_v53, %v4074_v5  ;;  %v4076_v46 = vrot.slane %v4074_v5, 4  ;;  %v3971_v18 = vld [vmem:[#allocation2 + $0x58] sm:$0xf]  ;;  %2429 = vst.msk [vmem:[#allocation3 + $0x1c0] sm:$0xff] %vm1950_vm0, %v2393_v0  ;;  %v3972_v33 = vld [vmem:[#allocation2 + $0x5c] sm:$0x1] }
 0x190   : > { %4907 = vmatprep.mubr.bf16.mxu1 %v4276_v41  ;;  %v2716_v51 = vrot.slane %v2715_v49, 4  ;;  %v5711_v39 = vcombine.low %v4068_v30, %v4071_v11  ;;  %v2725_v55 = vrot.slane %v2723_v29, 4  ;;  %v2728_v7 = vrot.slane %v2726_v59, 5  ;;  %v2467_v20 = vld [vmem:[#allocation2 + $0x90] sm:$0xf]  ;;  %v4293_v23 = vld [vmem:[#allocation3 + $0x190] sm:$0xff] }
 0x191   : > { %v4078_v34 = vsel %vm6915_vm14, %v4076_v46, %v4077_v3  ;;  %v2732_v61 = vshll.u32 %v2465_v8, 16  ;;  %v2736_v15 = vshrl.u32 %v2465_v8, 16  ;;  %v2742_v54 = vshll.u32 %v2466_v28, 16  ;;  %v2468_v19 = vld [vmem:[#allocation2 + $0x94] sm:$0xf]  ;;  %v4281_v44 = vld [vmem:[#allocation3 + $0x130] sm:$0xff]  ;;  %4779 = vmatmul.mubr.bf16.gmra.mrb[40].mxu0 %v4293_v23 }
 0x192   : > { %v2721_v52 = vsel %vm6497_vm8, %v2716_v51, %v2720_v36  ;;  %4229 = vst.msk [vmem:[#allocation3 + $0x70] sm:$0xff] %vm1402_vm15, %v5711_v39  ;;  %v5712_v56 = vcombine.low %v4075_v31, %v4078_v34  ;;  %v2729_v47 = vor.u32 %v2728_v7, %v2725_v55  ;;  %v5697_v1 = vrot.slane %v3967_v14, 9  ;;  %v2469_v9 = vld [vmem:[#allocation2 + $0x98] sm:$0x1]  ;;  %v3973_v24 = vld [vmem:[#allocation2 + $0x60] sm:$0xe] }
 0x193   : > { %v5622_v37 = vcombine.low %v2711_v50, %v2721_v52  ;;  %v2734_v4 = vrot.slane %v2732_v61, 5  ;;  %v2738_v43 = vrot.slane %v2736_v15, 4  ;;  %v2744_v32 = vrot.slane %v2742_v54, 5  ;;  %v1925_v62 = vpop.permute.xlu0 %1924  ;;  %v3974_v38 = vld [vmem:[#allocation2 + $0x64] sm:$0xf]  ;;  %v4247_v54 = vld [vmem:[#allocation3 + $0x20] sm:$0xff] }
 0x194   : > { %4230 = vst.msk [vmem:[#allocation3 + $0x98] sm:$0xff] %vm1402_vm15, %v5712_v56  ;;  %v2730_v22 = vrot.slane %v2729_v47, 4  ;;  %v4081_v26 = vrot.slane %v3968_v25, 5  ;;  %v4084_v40 = vrot.slane %v3969_v6, 5  ;;  %v5698_v10 = vrot.slane %v3970_v2, 9  ;;  %v4280_v15 = vld [vmem:[#allocation3 + $0x128] sm:$0xff] }
 0x195   : > { %2939 = vst.msk [vmem:[#allocation3 + $0x178] sm:$0xff] %vm1402_vm15, %v5622_v37  ;;  %v2739_v35 = vor.u32 %v2738_v43, %v2734_v4  ;;  %v4088_v48 = vrot.slane %v3971_v18, 5  ;;  %v4091_v60 = vrot.slane %v3972_v33, 5  ;;  %v2747_v12 = vshrl.u32 %v2467_v20, 16  ;;  %v3975_v49 = vld [vmem:[#allocation2 + $0x68] sm:$0x1] }
 0x196   : > { %1962 = vst.msk [vmem:[#allocation3 + $0x1b8] sm:$0xff] %vm1950_vm0, %v1925_v62  ;;  %3259 = vst.msk [vmem:[#allocation3 + $0x178] sm:$0xff] %vm1950_vm0, %v3221_v42  ;;  %v2735_v21 = vsel %vm6497_vm8, %v2730_v22, %v2734_v4  ;;  %v4082_v13 = vsel %vm6915_vm14, %v5697_v1, %v4081_v26  ;;  %v4083_v45 = vrot.slane %v4081_v26, 4  ;;  %v2750_v36 = vshll.u32 %v2467_v20, 16  ;;  %v4299_v3 = vld [vmem:[#allocation3 + $0x1c0] sm:$0xff] }
 0x197   : > { %4908 = vmatmul.mubr.bf16.gmra.mrb[40].mxu1 %v4275_v57  ;;  %v2740_v53 = vrot.slane %v2739_v35, 4  ;;  %v4089_v8 = vsel %vm6915_vm14, %v5698_v10, %v4088_v48  ;;  %v4090_v27 = vrot.slane %v4088_v48, 4  ;;  %v2749_v41 = vrot.slane %v2747_v12, 4  ;;  %v3908_v29 = vpop.permute.xlu0 %3907  ;;  %v3976_v31 = vld [vmem:[#allocation2 + $0x6c] sm:$0xe]  ;;  %4786 = vmatprep.mubr.bf16.mxu0 %v4299_v3  ;;  %v3223_v20 = vpop.permute.xlu1 %3222  ;;  %v4252_v3 = vld [vmem:[#allocation3 + $0x48] sm:$0xff] }
 0x198   : > { %4915 = vmatprep.mubr.bf16.mxu1 %v4281_v44  ;;  %v4085_v30 = vsel %vm6915_vm14, %v4083_v45, %v4084_v40  ;;  %v2752_v17 = vrot.slane %v2750_v36, 5  ;;  %v2756_v5 = vshll.u32 %v2468_v19, 16  ;;  %v2760_v28 = vshrl.u32 %v2468_v19, 16  ;;  %v3977_v46 = vld [vmem:[#allocation2 + $0x70] sm:$0xf]  ;;  %3947 = vst.msk [vmem:[#allocation3 + $0x158] sm:$0xff] %vm1950_vm0, %v3908_v29 }
 0x199   : > { %v2745_v59 = vsel %vm6497_vm8, %v2740_v53, %v2744_v32  ;;  %v5713_v14 = vcombine.low %v4082_v13, %v4085_v30  ;;  %v4092_v50 = vsel %vm6915_vm14, %v4090_v27, %v4091_v60  ;;  %v2766_v11 = vshll.u32 %v2469_v9, 16  ;;  %v3978_v55 = vld [vmem:[#allocation2 + $0x74] sm:$0x1]  ;;  %v2470_v7 = vld [vmem:[#allocation2 + $0x9c] sm:$0xf] }
 0x19a   : > { %v5623_v25 = vcombine.low %v2735_v21, %v2745_v59  ;;  %v5714_v6 = vcombine.low %v4089_v8, %v4092_v50  ;;  %v2753_v51 = vor.u32 %v2752_v17, %v2749_v41  ;;  %v2758_v39 = vrot.slane %v2756_v5, 5  ;;  %v2471_v61 = vld [vmem:[#allocation2 + $0xa0] sm:$0xf]  ;;  %v2472_v32 = vld [vmem:[#allocation2 + $0xa4] sm:$0x1] }
 0x19b   : > { %4231 = vst.msk [vmem:[#allocation3 + $0xc0] sm:$0xff] %vm1402_vm15, %v5713_v14  ;;  %v2762_v2 = vrot.slane %v2760_v28, 4  ;;  %v2768_v0 = vrot.slane %v2766_v11, 5  ;;  %v5699_v58 = vrot.slane %v3973_v24, 9  ;;  %v4095_v34 = vrot.slane %v3974_v38, 5  ;;  %v3910_v33 = vpop.permute.xlu0 %3909 }
 0x19c   : > { %2940 = vst.msk [vmem:[#allocation3 + $0x1a0] sm:$0xff] %vm1402_vm15, %v5623_v25  ;;  %4232 = vst.msk [vmem:[#allocation3 + $0xe8] sm:$0xff] %vm1402_vm15, %v5714_v6  ;;  %v2754_v18 = vrot.slane %v2753_v51, 4  ;;  %v4098_v52 = vrot.slane %v3975_v49, 5  ;;  %v5700_v56 = vrot.slane %v3976_v31, 9  ;;  %v4102_v47 = vrot.slane %v3977_v46, 5 }
 0x19d   : > { %v4298_v1 = vld [vmem:[#allocation3 + $0x1b8] sm:$0xff]  ;;  %v2763_v37 = vor.u32 %v2762_v2, %v2758_v39  ;;  %v4096_v42 = vsel %vm6915_vm14, %v5699_v58, %v4095_v34  ;;  %v4097_v4 = vrot.slane %v4095_v34, 4  ;;  %v4105_v43 = vrot.slane %v3978_v55, 5  ;;  %3948 = vst.msk [vmem:[#allocation3 + $0x180] sm:$0xff] %vm1950_vm0, %v3910_v33  ;;  %3260 = vst.msk [vmem:[#allocation3 + $0x1a0] sm:$0xff] %vm1950_vm0, %v3223_v20  ;;  %v4285_v31 = vld [vmem:[#allocation3 + $0x150] sm:$0xff] }
 0x19e   : > { %4787 = vmatmul.mubr.bf16.gmra.mrb[44].mxu0 %v4298_v1  ;;  %v2759_v19 = vsel %vm6497_vm8, %v2754_v18, %v2758_v39  ;;  %v4103_v57 = vsel %vm6915_vm14, %v5700_v56, %v4102_v47  ;;  %v4104_v22 = vrot.slane %v4102_v47, 4  ;;  %v2771_v26 = vshrl.u32 %v2470_v7, 16  ;;  %v3979_v40 = vld [vmem:[#allocation2 + $0x78] sm:$0xe]  ;;  %v3980_v10 = vld [vmem:[#allocation2 + $0x7c] sm:$0xf] }
 0x19f   : > { %4916 = vmatmul.mubr.bf16.gmra.mrb[44].mxu1 %v4280_v15  ;;  %6066 = vmatprep.mubr.msk.bf16.mxu0 %vm1402_vm15, %v4247_v54  ;;  %v2764_v62 = vrot.slane %v2763_v37, 4  ;;  %v4099_v23 = vsel %vm6915_vm14, %v4097_v4, %v4098_v52  ;;  %v2774_v44 = vshll.u32 %v2470_v7, 16  ;;  %v2780_v35 = vshll.u32 %v2471_v61, 16  ;;  %v3981_v48 = vld [vmem:[#allocation2 + $0x80] sm:$0x1]  ;;  %v4286_v36 = vld [vmem:[#allocation3 + $0x158] sm:$0xff]  ;;  %v3912_v24 = vpop.permute.xlu0 %3911 }
 0x1a0   : > { %v5715_v60 = vcombine.low %v4096_v42, %v4099_v23  ;;  %v4106_v12 = vsel %vm6915_vm14, %v4104_v22, %v4105_v43  ;;  %v2773_v21 = vrot.slane %v2771_v26, 4  ;;  %v2784_v13 = vshrl.u32 %v2471_v61, 16  ;;  %v3982_v45 = vld [vmem:[#allocation2 + $0x84] sm:$0xe]  ;;  %v3983_v9 = vld [vmem:[#allocation2 + $0x88] sm:$0xf]  ;;  %4923 = vmatprep.mubr.bf16.mxu1 %v4286_v36 }
 0x1a1   : > { %v2769_v53 = vsel %vm6497_vm8, %v2764_v62, %v2768_v0  ;;  %v5716_v8 = vcombine.low %v4103_v57, %v4106_v12  ;;  %v2776_v27 = vrot.slane %v2774_v44, 5  ;;  %v2782_v41 = vrot.slane %v2780_v35, 5  ;;  %v3984_v38 = vld [vmem:[#allocation2 + $0x8c] sm:$0x1]  ;;  %3949 = vst.msk [vmem:[#allocation3 + $0x1a8] sm:$0xff] %vm1950_vm0, %v3912_v24 }
 0x1a2   : > { %v5624_v30 = vcombine.low %v2759_v19, %v2769_v53  ;;  %4233 = vst.msk [vmem:[#allocation3 + $0x110] sm:$0xff] %vm1402_vm15, %v5715_v60  ;;  %v2786_v17 = vrot.slane %v2784_v13, 4  ;;  %v2790_v5 = vshll.u32 %v2472_v32, 16  ;;  %v5701_v28 = vrot.slane %v3979_v40, 9  ;;  %v2473_v49 = vld [vmem:[#allocation2 + $0xa8] sm:$0xf]  ;;  %v3225_v56 = vpop.permute.xlu1 %3224 }
 0x1a3   : > { %4234 = vst.msk [vmem:[#allocation3 + $0x138] sm:$0xff] %vm1402_vm15, %v5716_v8  ;;  %v2777_v29 = vor.u32 %v2776_v27, %v2773_v21  ;;  %v4109_v59 = vrot.slane %v3980_v10, 5  ;;  %v4112_v14 = vrot.slane %v3981_v48, 5  ;;  %v5702_v50 = vrot.slane %v3982_v45, 9  ;;  %v2474_v11 = vld [vmem:[#allocation2 + $0xac] sm:$0xf] }
 0x1a4   : > { %v4257_v46 = vld [vmem:[#allocation3 + $0x70] sm:$0xff]  ;;  %2941 = vst.msk [vmem:[#allocation3 + $0x1c8] sm:$0xff] %vm1402_vm15, %v5624_v30  ;;  %v2787_v25 = vor.u32 %v2786_v17, %v2782_v41  ;;  %v2792_v6 = vrot.slane %v2790_v5, 5  ;;  %v4116_v51 = vrot.slane %v3983_v9, 5  ;;  %v4119_v39 = vrot.slane %v3984_v38, 5  ;;  %v4291_v55 = vld [vmem:[#allocation3 + $0x180] sm:$0xff] }
 0x1a5   : > { %v2778_v7 = vrot.slane %v2777_v29, 4  ;;  %v4110_v2 = vsel %vm6915_vm14, %v5701_v28, %v4109_v59  ;;  %v4111_v0 = vrot.slane %v4109_v59, 4  ;;  %v2475_v58 = vld [vmem:[#allocation2 + $0xb0] sm:$0x1]  ;;  %v2795_v34 = vshrl.u32 %v2473_v49, 16  ;;  %3261 = vst.msk [vmem:[#allocation3 + $0x1c8] sm:$0xff] %vm1950_vm0, %v3225_v56 }
 0x1a6   : > { %6067 = vmatmul.mubr.msk.bf16.vlgmr.msra.gmra.mrb[48].mxu0 %vm1402_vm15, %v4252_v3  ;;  %v2788_v61 = vrot.slane %v2787_v25, 4  ;;  %v4117_v15 = vsel %vm6915_vm14, %v5702_v50, %v4116_v51  ;;  %v4118_v54 = vrot.slane %v4116_v51, 4  ;;  %v2798_v18 = vshll.u32 %v2473_v49, 16  ;;  %v3985_v52 = vld [vmem:[#allocation2 + $0x90] sm:$0xe]  ;;  %v3914_v26 = vpop.permute.xlu0 %3913  ;;  %v4267_v27 = vld [vmem:[#allocation3 + $0xc0] sm:$0xff] }
 0x1a7   : > { %4924 = vmatmul.mubr.bf16.gmra.mrb[48].mxu1 %v4285_v31  ;;  %6070 = vmatprep.mubr.msk.bf16.mxu0 %vm1402_vm15, %v4257_v46  ;;  %v2783_v47 = vsel %vm6497_vm8, %v2778_v7, %v2782_v41  ;;  %v4113_v1 = vsel %vm6915_vm14, %v4111_v0, %v4112_v14  ;;  %v2797_v33 = vrot.slane %v2795_v34, 4  ;;  %v2804_v20 = vshll.u32 %v2474_v11, 16  ;;  %v3986_v37 = vld [vmem:[#allocation2 + $0x94] sm:$0xf]  ;;  %v3987_v42 = vld [vmem:[#allocation2 + $0x98] sm:$0x1] }
 0x1a8   : > { %4931 = vmatprep.mubr.bf16.mxu1 %v4291_v55  ;;  %v2793_v4 = vsel %vm6497_vm8, %v2788_v61, %v2792_v6  ;;  %v5717_v43 = vcombine.low %v4110_v2, %v4113_v1  ;;  %v4120_v32 = vsel %vm6915_vm14, %v4118_v54, %v4119_v39  ;;  %v2800_v19 = vrot.slane %v2798_v18, 5  ;;  %v3988_v57 = vld [vmem:[#allocation2 + $0x9c] sm:$0xe]  ;;  %v3989_v22 = vld [vmem:[#allocation2 + $0xa0] sm:$0xf]  ;;  %3950 = vst.msk [vmem:[#allocation3 + $0x1d0] sm:$0xff] %vm1950_vm0, %v3914_v26 }
 0x1a9   : > { %v5625_v40 = vcombine.low %v2783_v47, %v2793_v4  ;;  %v5718_v10 = vcombine.low %v4117_v15, %v4120_v32  ;;  %v2806_v62 = vrot.slane %v2804_v20, 5  ;;  %v2808_v23 = vshrl.u32 %v2474_v11, 16  ;;  %v3990_v44 = vld [vmem:[#allocation2 + $0xa4] sm:$0x1]  ;;  %v2476_v35 = vld [vmem:[#allocation2 + $0xb4] sm:$0xf] }
 0x1aa   : > { %4235 = vst.msk [vmem:[#allocation3 + $0x160] sm:$0xff] %vm1402_vm15, %v5717_v43  ;;  %v2801_v48 = vor.u32 %v2800_v19, %v2797_v33  ;;  %v2814_v60 = vshll.u32 %v2475_v58, 16  ;;  %v5703_v12 = vrot.slane %v3985_v52, 9  ;;  %v4123_v21 = vrot.slane %v3986_v37, 5  ;;  %v2477_v13 = vld [vmem:[#allocation2 + $0xb8] sm:$0xf] }
 0x1ab   : > { %v4262_v45 = vld [vmem:[#allocation3 + $0x98] sm:$0xff]  ;;  %2942 = vst.msk [vmem:[#allocation3 + $0x1f0] sm:$0xff] %vm1402_vm15, %v5625_v40  ;;  %4236 = vst.msk [vmem:[#allocation3 + $0x188] sm:$0xff] %vm1402_vm15, %v5718_v10  ;;  %v2810_v9 = vrot.slane %v2808_v23, 4  ;;  %v4126_v36 = vrot.slane %v3987_v42, 5  ;;  %v5704_v24 = vrot.slane %v3988_v57, 9 }
 0x1ac   : > { %v4130_v53 = vrot.slane %v3989_v22, 5  ;;  %v4290_v8 = vld [vmem:[#allocation3 + $0x178] sm:$0xff]  ;;  %v2802_v41 = vrot.slane %v2801_v48, 4  ;;  %v2816_v38 = vrot.slane %v2814_v60, 5  ;;  %v4124_v30 = vsel %vm6915_vm14, %v5703_v12, %v4123_v21  ;;  %v4296_v5 = vld [vmem:[#allocation3 + $0x1a8] sm:$0xff]  ;;  %v3227_v6 = vpop.permute.xlu1 %3226  ;;  %v4295_v40 = vld [vmem:[#allocation3 + $0x1a0] sm:$0xff] }
 0x1ad   : > { %v4125_v17 = vrot.slane %v4123_v21, 4  ;;  %v2811_v28 = vor.u32 %v2810_v9, %v2806_v62  ;;  %v4133_v29 = vrot.slane %v3990_v44, 5  ;;  %v2478_v59 = vld [vmem:[#allocation2 + $0xbc] sm:$0x1]  ;;  %v2819_v11 = vshrl.u32 %v2476_v35, 16  ;;  %3262 = vst.msk [vmem:[#allocation3 + $0x1f0] sm:$0xff] %vm1950_vm0, %v3227_v6 }
 0x1ae   : > { %v4131_v49 = vsel %vm6915_vm14, %v5704_v24, %v4130_v53  ;;  %v4132_v3 = vrot.slane %v4130_v53, 4  ;;  %6071 = vmatmul.mubr.msk.bf16.gmra.mrb[52].mxu0 %vm1402_vm15, %v4262_v45  ;;  %v2807_v14 = vsel %vm6497_vm8, %v2802_v41, %v2806_v62  ;;  %v2822_v31 = vshll.u32 %v2476_v35, 16  ;;  %v3991_v46 = vld [vmem:[#allocation2 + $0xa8] sm:$0xe]  ;;  %v3992_v25 = vld [vmem:[#allocation2 + $0xac] sm:$0xf] }
 0x1af   : > { %v4127_v50 = vsel %vm6915_vm14, %v4125_v17, %v4126_v36  ;;  %4932 = vmatmul.mubr.bf16.gmra.mrb[52].mxu1 %v4290_v8  ;;  %6074 = vmatprep.mubr.msk.bf16.mxu0 %vm1402_vm15, %v4267_v27  ;;  %v2812_v51 = vrot.slane %v2811_v28, 4  ;;  %v2828_v7 = vshll.u32 %v2477_v13, 16  ;;  %v3993_v2 = vld [vmem:[#allocation2 + $0xb0] sm:$0x1]  ;;  %v3994_v0 = vld [vmem:[#allocation2 + $0xb4] sm:$0xe]  ;;  %v3916_v1 = vpop.permute.xlu0 %3915 }
 0x1b0   : > { %v5719_v39 = vcombine.low %v4124_v30, %v4127_v50  ;;  %v4134_v55 = vsel %vm6915_vm14, %v4132_v3, %v4133_v29  ;;  %4939 = vmatprep.mubr.bf16.mxu1 %v4296_v5  ;;  %v2821_v34 = vrot.slane %v2819_v11, 4  ;;  %v2824_v61 = vrot.slane %v2822_v31, 5  ;;  %v3995_v54 = vld [vmem:[#allocation2 + $0xb8] sm:$0xf]  ;;  %v3996_v4 = vld [vmem:[#allocation2 + $0xbc] sm:$0x1] }
 0x1b1   : > { %v5720_v58 = vcombine.low %v4131_v49, %v4134_v55  ;;  %v2832_v15 = vshrl.u32 %v2477_v13, 16  ;;  %v2817_v18 = vsel %vm6497_vm8, %v2812_v51, %v2816_v38  ;;  %v2830_v52 = vrot.slane %v2828_v7, 5  ;;  %v2479_v43 = vld [vmem:[#allocation2 + $0xc0] sm:$0xf]  ;;  %3951 = vst.msk [vmem:[#allocation3 + $0x1f8] sm:$0xff] %vm1950_vm0, %v3916_v1  ;;  %v4277_v10 = vld [vmem:[#allocation3 + $0x110] sm:$0xff] }
 0x1b2   : > { %4237 = vst.msk [vmem:[#allocation3 + $0x1b0] sm:$0xff] %vm1402_vm15, %v5719_v39  ;;  %v2838_v56 = vshll.u32 %v2478_v59, 16  ;;  %v5705_v47 = vrot.slane %v3991_v46, 9  ;;  %v5626_v33 = vcombine.low %v2807_v14, %v2817_v18  ;;  %v2825_v20 = vor.u32 %v2824_v61, %v2821_v34  ;;  %v4272_v32 = vld [vmem:[#allocation3 + $0xe8] sm:$0xff]  ;;  %v4301_v60 = vld [vmem:[#allocation3 + $0x1d0] sm:$0xff]  ;;  %v4287_v18 = vld [vmem:[#allocation3 + $0x160] sm:$0xff] }
 0x1b3   : > { %4238 = vst.msk [vmem:[#allocation3 + $0x1d8] sm:$0xff] %vm1402_vm15, %v5720_v58  ;;  %v2834_v37 = vrot.slane %v2832_v15, 4  ;;  %v4137_v42 = vrot.slane %v3992_v25, 5  ;;  %v4140_v57 = vrot.slane %v3993_v2, 5  ;;  %v5706_v22 = vrot.slane %v3994_v0, 9  ;;  %v4282_v0 = vld [vmem:[#allocation3 + $0x138] sm:$0xff] }
 0x1b4   : > { %v2840_v19 = vrot.slane %v2838_v56, 5  ;;  %v4144_v26 = vrot.slane %v3995_v54, 5  ;;  %2943 = vst.msk [vmem:[#allocation3 + $0x218] sm:$0xff] %vm1402_vm15, %v5626_v33  ;;  %v2826_v62 = vrot.slane %v2825_v20, 4  ;;  %v2480_v48 = vld [vmem:[#allocation2 + $0xc4] sm:$0xf] }
 0x1b5   : > { %v2835_v23 = vor.u32 %v2834_v37, %v2830_v52  ;;  %v4138_v44 = vsel %vm6915_vm14, %v5705_v47, %v4137_v42  ;;  %v4139_v35 = vrot.slane %v4137_v42, 4  ;;  %v4147_v13 = vrot.slane %v3996_v4, 5  ;;  %v2481_v45 = vld [vmem:[#allocation2 + $0xc8] sm:$0x1]  ;;  %v3997_v27 = vld [vmem:[#allocation2 + $0xc0] sm:$0xe] }
 0x1b6   : > { %v4145_v12 = vsel %vm6915_vm14, %v5706_v22, %v4144_v26  ;;  %v4146_v21 = vrot.slane %v4144_v26, 4  ;;  %v2843_v9 = vshrl.u32 %v2479_v43, 16  ;;  %6075 = vmatmul.mubr.msk.bf16.gmra.mrb[56].mxu0 %vm1402_vm15, %v4272_v32  ;;  %v2831_v36 = vsel %vm6497_vm8, %v2826_v62, %v2830_v52  ;;  %v3998_v41 = vld [vmem:[#allocation2 + $0xc4] sm:$0xf]  ;;  %v3999_v28 = vld [vmem:[#allocation2 + $0xc8] sm:$0x1] }
 0x1b7   : > { %v2836_v24 = vrot.slane %v2835_v23, 4  ;;  %v4141_v53 = vsel %vm6915_vm14, %v4139_v35, %v4140_v57  ;;  %v2846_v8 = vshll.u32 %v2479_v43, 16  ;;  %4940 = vmatmul.mubr.bf16.gmra.mrb[56].mxu1 %v4295_v40  ;;  %6078 = vmatprep.mubr.msk.bf16.mxu0 %vm1402_vm15, %v4277_v10  ;;  %v2852_v5 = vshll.u32 %v2480_v48, 16  ;;  %v4000_v49 = vld [vmem:[#allocation2 + $0xcc] sm:$0xe]  ;;  %v4300_v54 = vld [vmem:[#allocation3 + $0x1c8] sm:$0xff] }
 0x1b8   : > { %v5721_v38 = vcombine.low %v4138_v44, %v4141_v53  ;;  %v4148_v30 = vsel %vm6915_vm14, %v4146_v21, %v4147_v13  ;;  %v2845_v17 = vrot.slane %v2843_v9, 4  ;;  %4947 = vmatprep.mubr.bf16.mxu1 %v4301_v60  ;;  %v2856_v14 = vshrl.u32 %v2480_v48, 16  ;;  %v4001_v50 = vld [vmem:[#allocation2 + $0xd0] sm:$0xf]  ;;  %v4002_v11 = vld [vmem:[#allocation2 + $0xd4] sm:$0x1]  ;;  %v3229_v51 = vpop.permute.xlu1 %3228 }
 0x1b9   : > { %v2841_v3 = vsel %vm6497_vm8, %v2836_v24, %v2840_v19  ;;  %v5722_v29 = vcombine.low %v4145_v12, %v4148_v30  ;;  %v2848_v59 = vrot.slane %v2846_v8, 5  ;;  %v2854_v46 = vrot.slane %v2852_v5, 5  ;;  %3263 = vst.msk [vmem:[#allocation3 + $0x218] sm:$0xff] %vm1950_vm0, %v3229_v51  ;;  %v4306_v20 = vld [vmem:[#allocation3 + $0x1f8] sm:$0xff]  ;;  %v4292_v62 = vld [vmem:[#allocation3 + $0x188] sm:$0xff]  ;;  %v4305_v23 = vld [vmem:[#allocation3 + $0x1f0] sm:$0xff] }
 0x1ba   : > { %v5627_v31 = vcombine.low %v2831_v36, %v2841_v3  ;;  %4239 = vst.msk [vmem:[#allocation3 + $0x200] sm:$0xff] %vm1402_vm15, %v5721_v38  ;;  %v2862_v25 = vshll.u32 %v2481_v45, 16  ;;  %v5707_v6 = vrot.slane %v3997_v27, 9  ;;  %v2858_v55 = vrot.slane %v2856_v14, 4  ;;  %v4297_v44 = vld [vmem:[#allocation3 + $0x1b0] sm:$0xff]  ;;  %v4302_v63 = vld [vmem:[#allocation3 + $0x1d8] sm:$0xff] }
 0x1bb   : > { %4240 = vst.msk [vmem:[#allocation3 + $0x228] sm:$0xff] %vm1402_vm15, %v5722_v29  ;;  %v2849_v39 = vor.u32 %v2848_v59, %v2845_v17  ;;  %v4151_v7 = vrot.slane %v3998_v41, 5  ;;  %v4154_v2 = vrot.slane %v3999_v28, 5  ;;  %v5708_v34 = vrot.slane %v4000_v49, 9  ;;  %v3918_v33 = vpop.permute.xlu0 %3917 }
 0x1bc   : > { %2944 = vst.msk [vmem:[#allocation3 + $0x240] sm:$0xff] %vm1402_vm15, %v5627_v31  ;;  %v2864_v58 = vrot.slane %v2862_v25, 5  ;;  %v4158_v61 = vrot.slane %v4001_v50, 5  ;;  %v4161_v15 = vrot.slane %v4002_v11, 5  ;;  %v2859_v56 = vor.u32 %v2858_v55, %v2854_v46 }
 0x1bd   : > { %v2850_v52 = vrot.slane %v2849_v39, 4  ;;  %v4152_v47 = vsel %vm6915_vm14, %v5707_v6, %v4151_v7  ;;  %v4153_v1 = vrot.slane %v4151_v7, 4  ;;  %3952 = vst.msk [vmem:[#allocation3 + $0x220] sm:$0xff] %vm1950_vm0, %v3918_v33 }
 0x1be   : > { %v4159_v37 = vsel %vm6915_vm14, %v5708_v34, %v4158_v61  ;;  %v4160_v42 = vrot.slane %v4158_v61, 4  ;;  %6079 = vmatmul.mubr.msk.bf16.gmra.mrb[60].mxu0 %vm1402_vm15, %v4282_v0  ;;  %v2860_v43 = vrot.slane %v2859_v56, 4 }
 0x1bf   : > { %v2855_v4 = vsel %vm6497_vm8, %v2850_v52, %v2854_v46  ;;  %v4155_v32 = vsel %vm6915_vm14, %v4153_v1, %v4154_v2  ;;  %4948 = vmatmul.mubr.bf16.gmra.mrb[60].mxu1 %v4300_v54  ;;  %6082 = vmatprep.mubr.msk.bf16.mxu0 %vm1402_vm15, %v4287_v18  ;;  %v3231_v40 = vpop.permute.xlu1 %3230 }
 0x1c0   : > { %v5723_v19 = vcombine.low %v4152_v47, %v4155_v32  ;;  %v4162_v57 = vsel %vm6915_vm14, %v4160_v42, %v4161_v15  ;;  %4955 = vmatprep.mubr.bf16.mxu1 %v4306_v20  ;;  %v2865_v22 = vsel %vm6497_vm8, %v2860_v43, %v2864_v58  ;;  %3264 = vst.msk [vmem:[#allocation3 + $0x240] sm:$0xff] %vm1950_vm0, %v3231_v40  ;;  %v4310_v35 = vld [vmem:[#allocation3 + $0x218] sm:$0xff] }
 0x1c1   : > { %v5724_v26 = vcombine.low %v4159_v37, %v4162_v57  ;;  %v5628_v10 = vcombine.low %v2855_v4, %v2865_v22  ;;  %v4307_v48 = vld [vmem:[#allocation3 + $0x200] sm:$0xff] }
 0x1c2   : > { %4241 = vst.msk [vmem:[#allocation3 + $0x250] sm:$0xff] %vm1402_vm15, %v5723_v19  ;;  %v4312_v13 = vld [vmem:[#allocation3 + $0x228] sm:$0xff] }
 0x1c3   : > { %4242 = vst.msk [vmem:[#allocation3 + $0x278] sm:$0xff] %vm1402_vm15, %v5724_v26  ;;  %2945 = vst.msk [vmem:[#allocation3 + $0x268] sm:$0xff] %vm1402_vm15, %v5628_v10 }
 0x1c4   : > { %v4311_v16 = vld [vmem:[#allocation3 + $0x220] sm:$0xff] }
 0x1c6   : > { %6083 = vmatmul.mubr.msk.bf16.gmra.mrb[64].mxu0 %vm1402_vm15, %v4292_v62 }
 0x1c7   : > { %4956 = vmatmul.mubr.bf16.gmra.mrb[64].mxu1 %v4305_v23  ;;  %6086 = vmatprep.mubr.msk.bf16.mxu0 %vm1402_vm15, %v4297_v44  ;;  %v4315_v9 = vld [vmem:[#allocation3 + $0x240] sm:$0xff] }
 0x1c8   : > { %4963 = vmatprep.mubr.bf16.mxu1 %v4311_v16 }
 0x1c9   : > { %v4317_v45 = vld [vmem:[#allocation3 + $0x250] sm:$0xff] }
 0x1ca   : > { %v4322_v53 = vld [vmem:[#allocation3 + $0x278] sm:$0xff] }
 0x1ce   : > { %6087 = vmatmul.mubr.msk.bf16.gmra.mrb[68].mxu0 %vm1402_vm15, %v4302_v63 }
 0x1cf   : > { %v3233_v60 = vpop.permute.xlu1 %3232  ;;  %4964 = vmatmul.mubr.bf16.gmra.mrb[68].mxu1 %v4310_v35  ;;  %6090 = vmatprep.mubr.msk.bf16.mxu0 %vm1402_vm15, %v4307_v48 }
 0x1d0   : > { %v3920_v12 = vpop.permute.xlu0 %3919  ;;  %3265 = vst.msk [vmem:[#allocation3 + $0x268] sm:$0xff] %vm1950_vm0, %v3233_v60 }
 0x1d1   : > { %3953 = vst.msk [vmem:[#allocation3 + $0x248] sm:$0xff] %vm1950_vm0, %v3920_v12 }
 0x1d4   : > { %v3922_v21 = vpop.permute.xlu0 %3921 }
 0x1d5   : > { %3954 = vst.msk [vmem:[#allocation3 + $0x270] sm:$0xff] %vm1950_vm0, %v3922_v21 }
 0x1d6   : > { %6091 = vmatmul.mubr.msk.bf16.gmra.mrb[72].mxu0 %vm1402_vm15, %v4312_v13 }
 0x1d7   : > { %6094 = vmatprep.mubr.msk.bf16.mxu0 %vm1402_vm15, %v4317_v45  ;;  %v4320_v8 = vld [vmem:[#allocation3 + $0x268] sm:$0xff] }
 0x1d8   : > { %v4316_v36 = vld [vmem:[#allocation3 + $0x248] sm:$0xff] }
 0x1d9   : > { %4971 = vmatprep.mubr.bf16.mxu1 %v4316_v36  ;;  %v8093_v36 = vld [vmem:[%s8399_s4] ss:$0 sm:$0xff] }
 0x1da   : > { %4972 = vmatmul.mubr.bf16.gmra.mrb[72].mxu1 %v4315_v9 }
 0x1dc   : > { %v4321_v24 = vld [vmem:[#allocation3 + $0x270] sm:$0xff] }
 0x1dd   : > { %4979 = vmatprep.mubr.bf16.mxu1 %v4321_v24 }
 0x1de   : > { %6095 = vmatmul.mubr.msk.bf16.gmra.mrb[76].mxu0 %vm1402_vm15, %v4322_v53 }
 0x1e2   : > { %4980 = vmatmul.mubr.bf16.gmra.mrb[76].mxu1 %v4320_v8 }
 0x1fa   : > { %v5830_v27 = vpop.f32.mrb[0].mxu0 }
 0x1fb   : > { %v5831_v41 = vpop.f32.mrb[1].mxu0  ;;  %v5902_v17 = vpop.f32.mrb[0].mxu1 }
 0x1fc   : > { %v5832_v38 = vadd.f32 %v5831_v41, %v5830_v27  ;;  %v5833_v30 = vpop.f32.mrb[2].mxu0  ;;  %v5903_v28 = vpop.f32.mrb[1].mxu1 }
 0x1fd   : > { %v5834_v5 = vpop.f32.mrb[3].mxu0  ;;  %v8054_v3 = vadd.f32 %v5903_v28, %v5902_v17  ;;  %v5905_v29 = vpop.f32.mrb[2].mxu1 }
 0x1fe   : > { %v5835_v49 = vadd.f32 %v5834_v5, %v5833_v30  ;;  %v5906_v59 = vpop.f32.mrb[3].mxu1  ;;  %v4701_v8 = vadd.f32 %v5832_v38, %v8093_v36 }
 0x1ff   : > { %v8056_v14 = vadd.f32 %v5906_v59, %v5905_v29 }
 0x200   : > { %v4704_v17 = vadd.f32 %v5835_v49, %v8093_v36 }
 0x204   : > { %v5836_v50 = vpop.f32.mrb[4].mxu0 }
 0x205   : > { %v5837_v11 = vpop.f32.mrb[5].mxu0 }
 0x206   : > { %v8058_v31 = vadd.f32 %v5837_v11, %v5836_v50  ;;  %v5839_v46 = vpop.f32.mrb[6].mxu0 }
 0x207   : > { %v5840_v25 = vpop.f32.mrb[7].mxu0 }
 0x208   : > { %v5908_v6 = vpop.f32.mrb[4].mxu1  ;;  %v8060_v51 = vadd.f32 %v5840_v25, %v5839_v46 }
 0x209   : > { %v5909_v39 = vpop.f32.mrb[5].mxu1 }
 0x20a   : > { %v8062_v55 = vadd.f32 %v5909_v39, %v5908_v6  ;;  %v5911_v7 = vpop.f32.mrb[6].mxu1 }
 0x20b   : > { %v5912_v2 = vpop.f32.mrb[7].mxu1 }
 0x20c   : > { %v8064_v0 = vadd.f32 %v5912_v2, %v5911_v7  ;;  %v4709_v2 = vadd.f32 %v8058_v31, %v8093_v36 }
 0x211   : > { %v5842_v58 = vpop.f32.mrb[8].mxu0 }
 0x212   : > { %v5843_v34 = vpop.f32.mrb[9].mxu0 }
 0x213   : > { %v8066_v61 = vadd.f32 %v5843_v34, %v5842_v58  ;;  %v5845_v15 = vpop.f32.mrb[10].mxu0 }
 0x214   : > { %v5846_v54 = vpop.f32.mrb[11].mxu0  ;;  %v5914_v18 = vpop.f32.mrb[8].mxu1 }
 0x215   : > { %v8068_v52 = vadd.f32 %v5846_v54, %v5845_v15  ;;  %v5915_v56 = vpop.f32.mrb[9].mxu1 }
 0x216   : > { %v8070_v47 = vadd.f32 %v5915_v56, %v5914_v18  ;;  %v5917_v1 = vpop.f32.mrb[10].mxu1  ;;  %v4712_v56 = vadd.f32 %v8060_v51, %v8093_v36 }
 0x217   : > { %v5918_v33 = vpop.f32.mrb[11].mxu1 }
 0x218   : > { %v8072_v20 = vadd.f32 %v5918_v33, %v5917_v1 }
 0x21d   : > { %v5848_v37 = vpop.f32.mrb[12].mxu0  ;;  %v5920_v4 = vpop.f32.mrb[12].mxu1 }
 0x21e   : > { %v5849_v42 = vpop.f32.mrb[13].mxu0  ;;  %v5921_v19 = vpop.f32.mrb[13].mxu1 }
 0x21f   : > { %v8074_v43 = vadd.f32 %v5849_v42, %v5848_v37  ;;  %v5851_v32 = vpop.f32.mrb[14].mxu0  ;;  %v8076_v22 = vadd.f32 %v5921_v19, %v5920_v4  ;;  %v5923_v26 = vpop.f32.mrb[14].mxu1 }
 0x220   : > { %v5852_v57 = vpop.f32.mrb[15].mxu0  ;;  %v5924_v10 = vpop.f32.mrb[15].mxu1 }
 0x221   : > { %v8078_v40 = vadd.f32 %v5852_v57, %v5851_v32  ;;  %v8080_v62 = vadd.f32 %v5924_v10, %v5923_v26  ;;  %v4717_v57 = vadd.f32 %v8066_v61, %v8093_v36 }
 0x225   : > { %v5854_v23 = vpop.f32.mrb[16].mxu0 }
 0x226   : > { %v5855_v44 = vpop.f32.mrb[17].mxu0 }
 0x227   : > { %v8082_v16 = vadd.f32 %v5855_v44, %v5854_v23  ;;  %v5857_v63 = vpop.f32.mrb[18].mxu0 }
 0x228   : > { %v5858_v35 = vpop.f32.mrb[19].mxu0 }
 0x229   : > { %v8084_v48 = vadd.f32 %v5858_v35, %v5857_v63  ;;  %v4720_v35 = vadd.f32 %v8068_v52, %v8093_v36 }
 0x22d   : > { %v5860_v60 = vpop.f32.mrb[20].mxu0 }
 0x22e   : > { %v5861_v12 = vpop.f32.mrb[21].mxu0 }
 0x22f   : > { %v8086_v21 = vadd.f32 %v5861_v12, %v5860_v60  ;;  %v5863_v13 = vpop.f32.mrb[22].mxu0 }
 0x230   : > { %v5864_v45 = vpop.f32.mrb[23].mxu0 }
 0x231   : > { %v8088_v9 = vadd.f32 %v5864_v45, %v5863_v13 }
 0x235   : > { %v5942_v24 = vpop.f32.mrb[16].mxu1 }
 0x236   : > { %v5943_v53 = vpop.f32.mrb[17].mxu1 }
 0x237   : > { %v5944_v27 = vadd.f32 %v5943_v53, %v5942_v24  ;;  %v5945_v41 = vpop.f32.mrb[18].mxu1 }
 0x238   : > { %v5946_v30 = vpop.f32.mrb[19].mxu1 }
 0x239   : > { %v5947_v5 = vadd.f32 %v5946_v30, %v5945_v41  ;;  %v8097_v28 = vadd.f32 %v5944_v27, %v4701_v8  ;;  %v4725_v8 = vadd.f32 %v8074_v43, %v8093_v36  ;;  %v4733_v43 = vadd.f32 %v8082_v16, %v8093_v36 }
 0x23b   : > { %v5866_v29 = vpop.f32.mrb[24].mxu0  ;;  %v8099_v50 = vadd.f32 %v5947_v5, %v4704_v17  ;;  %v4728_v17 = vadd.f32 %v8078_v40, %v8093_v36 }
 0x23c   : > { %v5867_v59 = vpop.f32.mrb[25].mxu0 }
 0x23d   : > { %v8101_v11 = vadd.f32 %v5867_v59, %v5866_v29  ;;  %v5869_v46 = vpop.f32.mrb[26].mxu0 }
 0x23e   : > { %v5870_v25 = vpop.f32.mrb[27].mxu0 }
 0x23f   : > { %v8103_v6 = vadd.f32 %v5870_v25, %v5869_v46 }
 0x242   : > { %v5948_v39 = vpop.f32.mrb[20].mxu1 }
 0x243   : > { %v5949_v38 = vpop.f32.mrb[21].mxu1  ;;  %v5872_v7 = vpop.f32.mrb[28].mxu0 }
 0x244   : > { %v5950_v49 = vadd.f32 %v5949_v38, %v5948_v39  ;;  %v5951_v58 = vpop.f32.mrb[22].mxu1  ;;  %v5873_v34 = vpop.f32.mrb[29].mxu0 }
 0x245   : > { %v5952_v15 = vpop.f32.mrb[23].mxu1  ;;  %v8107_v54 = vadd.f32 %v5873_v34, %v5872_v7  ;;  %v5875_v18 = vpop.f32.mrb[30].mxu0 }
 0x246   : > { %v5953_v1 = vadd.f32 %v5952_v15, %v5951_v58  ;;  %v5876_v33 = vpop.f32.mrb[31].mxu0  ;;  %v8111_v37 = vadd.f32 %v5950_v49, %v4709_v2  ;;  %v4736_v15 = vadd.f32 %v8084_v48, %v8093_v36 }
 0x247   : > { %v8113_v42 = vadd.f32 %v5876_v33, %v5875_v18 }
 0x248   : > { %v8115_v4 = vadd.f32 %v5953_v1, %v4712_v56 }
 0x24a   : > { %v5954_v32 = vpop.f32.mrb[24].mxu1 }
 0x24b   : > { %v5955_v31 = vpop.f32.mrb[25].mxu1  ;;  %v5878_v19 = vpop.f32.mrb[32].mxu0 }
 0x24c   : > { %v5956_v26 = vadd.f32 %v5955_v31, %v5954_v32  ;;  %v5957_v10 = vpop.f32.mrb[26].mxu1  ;;  %v5879_v23 = vpop.f32.mrb[33].mxu0  ;;  %v4741_v31 = vadd.f32 %v8086_v21, %v8093_v36  ;;  %v4749_v21 = vadd.f32 %v8101_v11, %v8093_v36 }
 0x24d   : > { %v5958_v44 = vpop.f32.mrb[27].mxu1  ;;  %v8119_v63 = vadd.f32 %v5879_v23, %v5878_v19  ;;  %v5881_v51 = vpop.f32.mrb[34].mxu0 }
 0x24e   : > { %v5959_v60 = vadd.f32 %v5958_v44, %v5957_v10  ;;  %v5882_v12 = vpop.f32.mrb[35].mxu0  ;;  %v8123_v13 = vadd.f32 %v5956_v26, %v4717_v57  ;;  %v4744_v26 = vadd.f32 %v8088_v9, %v8093_v36 }
 0x24f   : > { %v8125_v45 = vadd.f32 %v5882_v12, %v5881_v51 }
 0x250   : > { %v8127_v24 = vadd.f32 %v5959_v60, %v4720_v35 }
 0x252   : > { %v5960_v53 = vpop.f32.mrb[28].mxu1 }
 0x253   : > { %v5961_v61 = vpop.f32.mrb[29].mxu1 }
 0x254   : > { %v5962_v27 = vadd.f32 %v5961_v61, %v5960_v53  ;;  %v5963_v41 = vpop.f32.mrb[30].mxu1  ;;  %v5884_v29 = vpop.f32.mrb[36].mxu0 }
 0x255   : > { %v5964_v30 = vpop.f32.mrb[31].mxu1  ;;  %v5885_v46 = vpop.f32.mrb[37].mxu0 }
 0x256   : > { %v5965_v52 = vadd.f32 %v5964_v30, %v5963_v41  ;;  %v8133_v5 = vadd.f32 %v5962_v27, %v4725_v8  ;;  %v8137_v39 = vadd.f32 %v5885_v46, %v5884_v29  ;;  %v5887_v38 = vpop.f32.mrb[38].mxu0  ;;  %v4752_v30 = vadd.f32 %v8103_v6, %v8093_v36 }
 0x257   : > { %v5888_v2 = vpop.f32.mrb[39].mxu0 }
 0x258   : > { %v8135_v59 = vadd.f32 %v5965_v52, %v4728_v17  ;;  %v8141_v34 = vadd.f32 %v5888_v2, %v5887_v38 }
 0x25a   : > { %v5966_v25 = vpop.f32.mrb[32].mxu1 }
 0x25b   : > { %v5967_v7 = vpop.f32.mrb[33].mxu1 }
 0x25c   : > { %v5968_v49 = vadd.f32 %v5967_v7, %v5966_v25  ;;  %v5969_v58 = vpop.f32.mrb[34].mxu1 }
 0x25d   : > { %v5970_v40 = vpop.f32.mrb[35].mxu1 }
 0x25e   : > { %v5971_v18 = vadd.f32 %v5970_v40, %v5969_v58  ;;  %v8145_v56 = vadd.f32 %v5968_v49, %v4733_v43  ;;  %v4757_v43 = vadd.f32 %v8107_v54, %v8093_v36 }
 0x260   : > { %v8147_v1 = vadd.f32 %v5971_v18, %v4736_v15  ;;  %v4760_v18 = vadd.f32 %v8113_v42, %v8093_v36 }
 0x262   : > { %v5972_v33 = vpop.f32.mrb[36].mxu1 }
 0x263   : > { %v5973_v32 = vpop.f32.mrb[37].mxu1 }
 0x264   : > { %v5974_v19 = vadd.f32 %v5973_v32, %v5972_v33  ;;  %v5975_v16 = vpop.f32.mrb[38].mxu1  ;;  %v5890_v44 = vpop.f32.mrb[40].mxu0 }
 0x265   : > { %v5976_v57 = vpop.f32.mrb[39].mxu1  ;;  %v5891_v51 = vpop.f32.mrb[41].mxu0 }
 0x266   : > { %v5977_v10 = vadd.f32 %v5976_v57, %v5975_v16  ;;  %v8153_v23 = vadd.f32 %v5974_v19, %v4741_v31  ;;  %v8157_v60 = vadd.f32 %v5891_v51, %v5890_v44  ;;  %v5893_v12 = vpop.f32.mrb[42].mxu0 }
 0x267   : > { %v5894_v61 = vpop.f32.mrb[43].mxu0 }
 0x268   : > { %v8155_v48 = vadd.f32 %v5977_v10, %v4744_v26  ;;  %v8161_v41 = vadd.f32 %v5894_v61, %v5893_v12 }
 0x26a   : > { %v5978_v35 = vpop.f32.mrb[40].mxu1 }
 0x26b   : > { %v5979_v53 = vpop.f32.mrb[41].mxu1 }
 0x26c   : > { %v5980_v8 = vadd.f32 %v5979_v53, %v5978_v35  ;;  %v5981_v27 = vpop.f32.mrb[42].mxu1  ;;  %v4765_v53 = vadd.f32 %v8119_v63, %v8093_v36 }
 0x26d   : > { %v5982_v9 = vpop.f32.mrb[43].mxu1 }
 0x26e   : > { %v5983_v17 = vadd.f32 %v5982_v9, %v5981_v27  ;;  %v8165_v52 = vadd.f32 %v5980_v8, %v4749_v21 }
 0x270   : > { %v8167_v29 = vadd.f32 %v5983_v17, %v4752_v30 }
 0x271   : > { %v5896_v46 = vpop.f32.mrb[44].mxu0 }
 0x272   : > { %v5897_v25 = vpop.f32.mrb[45].mxu0  ;;  %v5984_v38 = vpop.f32.mrb[44].mxu1 }
 0x273   : > { %v8169_v7 = vadd.f32 %v5897_v25, %v5896_v46  ;;  %v5899_v11 = vpop.f32.mrb[46].mxu0  ;;  %v5985_v2 = vpop.f32.mrb[45].mxu1 }
 0x274   : > { %v5900_v49 = vpop.f32.mrb[47].mxu0  ;;  %v5986_v58 = vadd.f32 %v5985_v2, %v5984_v38  ;;  %v5987_v40 = vpop.f32.mrb[46].mxu1 }
 0x275   : > { %v8173_v6 = vadd.f32 %v5900_v49, %v5899_v11  ;;  %v5988_v15 = vpop.f32.mrb[47].mxu1 }
 0x276   : > { %v5989_v33 = vadd.f32 %v5988_v15, %v5987_v40  ;;  %v8177_v32 = vadd.f32 %v5986_v58, %v4757_v43 }
 0x278   : > { %v8179_v31 = vadd.f32 %v5989_v33, %v4760_v18 }
 0x279   : > { %v6068_v54 = vpop.f32.mrb[48].mxu0 }
 0x27a   : > { %v5031_v19 = vadd.f32 %v6068_v54, %v8111_v37  ;;  %v5022_v16 = vpop.f32.mrb[49].mxu0  ;;  %v5990_v57 = vpop.f32.mrb[48].mxu1 }
 0x27b   : > { %v5023_v42 = vadd.f32 %v5022_v16, %v8097_v28  ;;  %v6069_v26 = vpop.f32.mrb[50].mxu0  ;;  %v5991_v10 = vpop.f32.mrb[49].mxu1  ;;  %v4768_v28 = vadd.f32 %v8125_v45, %v8093_v36 }
 0x27c   : > { %5151 = vst.msk [vmem:[%s8186_s22 + $0x10] sm:$0xff] %vm1402_vm15, %v5031_v19  ;;  %v5034_v44 = vadd.f32 %v6069_v26, %v8115_v4  ;;  %v5025_v51 = vpop.f32.mrb[51].mxu0  ;;  %v5992_v35 = vadd.f32 %v5991_v10, %v5990_v57  ;;  %v5993_v12 = vpop.f32.mrb[50].mxu1  ;;  %v5253_v8 = vmul.f32 %v5031_v19, %v5031_v19  ;;  %v5184_v25 = vsel %vm1402_vm15, %v5031_v19, 0.0 }
 0x27d   : > { %5149 = vst.msk [vmem:[%s8186_s22] sm:$0xff] %vm1402_vm15, %v5023_v42  ;;  %v5251_v37 = vmul.f32 %v5023_v42, %v5023_v42  ;;  %v5026_v21 = vadd.f32 %v5025_v51, %v8099_v50  ;;  %v5994_v61 = vpop.f32.mrb[51].mxu1  ;;  %v5181_v4 = vsel %vm1402_vm15, %v5023_v42, 0.0 }
 0x27e   : > { %5152 = vst.msk [vmem:[%s8186_s22 + $0x18] sm:$0xff] %vm1402_vm15, %v5034_v44  ;;  %v5995_v27 = vadd.f32 %v5994_v61, %v5993_v12  ;;  %v8206_v30 = vadd.f32 %v5992_v35, %v4765_v53  ;;  %v5254_v17 = vmul.f32 %v5034_v44, %v5034_v44  ;;  %v5286_v15 = vsel %vm1402_vm15, %v5253_v8, 0.0 }
 0x27f   : > { %5150 = vst.msk [vmem:[%s8186_s22 + $0x8] sm:$0xff] %vm1402_vm15, %v5026_v21  ;;  %v5182_v9 = vsel %vm1402_vm15, %v5026_v21, 0.0  ;;  %v5252_v63 = vmul.f32 %v5026_v21, %v5026_v21  ;;  %v5283_v45 = vsel %vm1402_vm15, %v5251_v37, 0.0  ;;  %v5186_v18 = vsel %vm1402_vm15, %v5034_v44, 0.0 }
 0x280   : > { %v5183_v46 = vadd.f32 %v5182_v9, %v5181_v4  ;;  %v8208_v50 = vadd.f32 %v5995_v27, %v4768_v28  ;;  %v5288_v16 = vsel %vm1402_vm15, %v5254_v17, 0.0  ;;  %v4773_v12 = vadd.f32 %v8137_v39, %v8093_v36 }
 0x281   : > { %v5284_v38 = vsel %vm1402_vm15, %v5252_v63, 0.0  ;;  %v6072_v11 = vpop.f32.mrb[52].mxu0  ;;  %v4776_v61 = vadd.f32 %v8141_v34, %v8093_v36 }
 0x282   : > { %v5185_v2 = vadd.f32 %v5184_v25, %v5183_v46  ;;  %v5285_v43 = vadd.f32 %v5284_v38, %v5283_v45  ;;  %v5047_v49 = vadd.f32 %v6072_v11, %v8133_v5  ;;  %v5038_v58 = vpop.f32.mrb[53].mxu0  ;;  %v5996_v40 = vpop.f32.mrb[52].mxu1 }
 0x283   : > { %v5039_v33 = vadd.f32 %v5038_v58, %v8123_v13  ;;  %v6073_v54 = vpop.f32.mrb[54].mxu0  ;;  %v5997_v19 = vpop.f32.mrb[53].mxu1 }
 0x284   : > { %v5287_v57 = vadd.f32 %v5286_v15, %v5285_v43  ;;  %5155 = vst.msk [vmem:[%s8186_s22 + $0x30] sm:$0xff] %vm1402_vm15, %v5047_v49  ;;  %v5187_v42 = vadd.f32 %v5186_v18, %v5185_v2  ;;  %v5041_v26 = vpop.f32.mrb[55].mxu0  ;;  %v5999_v5 = vpop.f32.mrb[54].mxu1  ;;  %v5050_v44 = vadd.f32 %v6073_v54, %v8135_v59  ;;  %v5998_v21 = vadd.f32 %v5997_v19, %v5996_v40 }
 0x285   : > { %5153 = vst.msk [vmem:[%s8186_s22 + $0x20] sm:$0xff] %vm1402_vm15, %v5039_v33  ;;  %v5188_v10 = vsel %vm1402_vm15, %v5039_v33, 0.0  ;;  %v5255_v51 = vmul.f32 %v5039_v33, %v5039_v33  ;;  %v5042_v13 = vadd.f32 %v5041_v26, %v8127_v24  ;;  %v6000_v35 = vpop.f32.mrb[55].mxu1  ;;  %v5257_v28 = vmul.f32 %v5047_v49, %v5047_v49 }
 0x286   : > { %v5189_v53 = vadd.f32 %v5188_v10, %v5187_v42  ;;  %v5289_v37 = vadd.f32 %v5288_v16, %v5287_v57  ;;  %5156 = vst.msk [vmem:[%s8186_s22 + $0x38] sm:$0xff] %vm1402_vm15, %v5050_v44  ;;  %v6001_v9 = vadd.f32 %v6000_v35, %v5999_v5  ;;  %v5192_v39 = vsel %vm1402_vm15, %v5047_v49, 0.0 }
 0x287   : > { %v5290_v8 = vsel %vm1402_vm15, %v5255_v51, 0.0  ;;  %5154 = vst.msk [vmem:[%s8186_s22 + $0x28] sm:$0xff] %vm1402_vm15, %v5042_v13  ;;  %v5190_v59 = vsel %vm1402_vm15, %v5042_v13, 0.0  ;;  %v5256_v4 = vmul.f32 %v5042_v13, %v5042_v13  ;;  %v5258_v63 = vmul.f32 %v5050_v44, %v5050_v44 }
 0x288   : > { %v5291_v24 = vadd.f32 %v5290_v8, %v5289_v37  ;;  %v5191_v27 = vadd.f32 %v5190_v59, %v5189_v53  ;;  %v8236_v46 = vadd.f32 %v5998_v21, %v4773_v12  ;;  %v8240_v2 = vadd.f32 %v6001_v9, %v4776_v61 }
 0x289   : > { %v6076_v17 = vpop.f32.mrb[56].mxu0  ;;  %v5292_v25 = vsel %vm1402_vm15, %v5256_v4, 0.0  ;;  %v5194_v43 = vsel %vm1402_vm15, %v5050_v44, 0.0  ;;  %v5294_v18 = vsel %vm1402_vm15, %v5257_v28, 0.0  ;;  %v4781_v5 = vadd.f32 %v8157_v60, %v8093_v36 }
 0x28a   : > { %v5193_v34 = vadd.f32 %v5192_v39, %v5191_v27  ;;  %v5063_v45 = vadd.f32 %v6076_v17, %v8153_v23  ;;  %v5054_v38 = vpop.f32.mrb[57].mxu0  ;;  %v6002_v11 = vpop.f32.mrb[56].mxu1  ;;  %v5293_v58 = vadd.f32 %v5292_v25, %v5291_v24  ;;  %v4784_v10 = vadd.f32 %v8161_v41, %v8093_v36 }
 0x28b   : > { %v5055_v49 = vadd.f32 %v5054_v38, %v8145_v56  ;;  %v6077_v40 = vpop.f32.mrb[58].mxu0  ;;  %v6003_v15 = vpop.f32.mrb[57].mxu1 }
 0x28c   : > { %5159 = vst.msk [vmem:[%s8186_s22 + $0x50] sm:$0xff] %vm1402_vm15, %v5063_v45  ;;  %v5195_v33 = vadd.f32 %v5194_v43, %v5193_v34  ;;  %v5066_v23 = vadd.f32 %v6077_v40, %v8155_v48  ;;  %v5057_v54 = vpop.f32.mrb[59].mxu0  ;;  %v6005_v19 = vpop.f32.mrb[58].mxu1  ;;  %v5295_v16 = vadd.f32 %v5294_v18, %v5293_v58  ;;  %v5296_v48 = vsel %vm1402_vm15, %v5258_v63, 0.0 }
 0x28d   : > { %5157 = vst.msk [vmem:[%s8186_s22 + $0x40] sm:$0xff] %vm1402_vm15, %v5055_v49  ;;  %v5196_v57 = vsel %vm1402_vm15, %v5055_v49, 0.0  ;;  %v5259_v42 = vmul.f32 %v5055_v49, %v5055_v49  ;;  %v5058_v56 = vadd.f32 %v5057_v54, %v8147_v1  ;;  %v6006_v26 = vpop.f32.mrb[59].mxu1  ;;  %v5261_v12 = vmul.f32 %v5063_v45, %v5063_v45 }
 0x28e   : > { %v5197_v51 = vadd.f32 %v5196_v57, %v5195_v33  ;;  %5160 = vst.msk [vmem:[%s8186_s22 + $0x58] sm:$0xff] %vm1402_vm15, %v5066_v23  ;;  %v5297_v44 = vadd.f32 %v5296_v48, %v5295_v16  ;;  %v6004_v37 = vadd.f32 %v6003_v15, %v6002_v11  ;;  %v6007_v60 = vadd.f32 %v6006_v26, %v6005_v19 }
 0x28f   : > { %v5298_v13 = vsel %vm1402_vm15, %v5259_v42, 0.0  ;;  %5158 = vst.msk [vmem:[%s8186_s22 + $0x48] sm:$0xff] %vm1402_vm15, %v5058_v56  ;;  %v5198_v35 = vsel %vm1402_vm15, %v5058_v56, 0.0  ;;  %v5260_v1 = vmul.f32 %v5058_v56, %v5058_v56  ;;  %v5200_v21 = vsel %vm1402_vm15, %v5063_v45, 0.0 }
 0x290   : > { %v5199_v53 = vadd.f32 %v5198_v35, %v5197_v51  ;;  %v5299_v41 = vadd.f32 %v5298_v13, %v5297_v44  ;;  %v5262_v61 = vmul.f32 %v5066_v23, %v5066_v23  ;;  %v8266_v9 = vadd.f32 %v6004_v37, %v4781_v5 }
 0x291   : > { %v5300_v28 = vsel %vm1402_vm15, %v5260_v1, 0.0  ;;  %v6080_v8 = vpop.f32.mrb[60].mxu0  ;;  %v8268_v39 = vadd.f32 %v6007_v60, %v4784_v10  ;;  %v5202_v63 = vsel %vm1402_vm15, %v5066_v23, 0.0  ;;  %v5302_v38 = vsel %vm1402_vm15, %v5261_v12, 0.0 }
 0x292   : > { %v5201_v59 = vadd.f32 %v5200_v21, %v5199_v53  ;;  %v5079_v24 = vadd.f32 %v6080_v8, %v8177_v32  ;;  %v5070_v27 = vpop.f32.mrb[61].mxu0  ;;  %v6008_v4 = vpop.f32.mrb[60].mxu1  ;;  %v5301_v17 = vadd.f32 %v5300_v28, %v5299_v41  ;;  %v4789_v33 = vadd.f32 %v8169_v7, %v8093_v36 }
 0x293   : > { %v5071_v34 = vadd.f32 %v5070_v27, %v8165_v52  ;;  %v6081_v25 = vpop.f32.mrb[62].mxu0  ;;  %v6009_v45 = vpop.f32.mrb[61].mxu1  ;;  %v4792_v23 = vadd.f32 %v8173_v6, %v8093_v36 }
 0x294   : > { %5163 = vst.msk [vmem:[%s8186_s22 + $0x70] sm:$0xff] %vm1402_vm15, %v5079_v24  ;;  %v5203_v32 = vadd.f32 %v5202_v63, %v5201_v59  ;;  %v5082_v11 = vadd.f32 %v6081_v25, %v8179_v31  ;;  %v5073_v43 = vpop.f32.mrb[63].mxu0  ;;  %v6011_v58 = vpop.f32.mrb[62].mxu1  ;;  %v5303_v49 = vadd.f32 %v5302_v38, %v5301_v17  ;;  %v5304_v31 = vsel %vm1402_vm15, %v5262_v61, 0.0 }
 0x295   : > { %5161 = vst.msk [vmem:[%s8186_s22 + $0x60] sm:$0xff] %vm1402_vm15, %v5071_v34  ;;  %v5204_v40 = vsel %vm1402_vm15, %v5071_v34, 0.0  ;;  %v5263_v15 = vmul.f32 %v5071_v34, %v5071_v34  ;;  %v5074_v52 = vadd.f32 %v5073_v43, %v8167_v29  ;;  %v6012_v18 = vpop.f32.mrb[63].mxu1  ;;  %v5265_v42 = vmul.f32 %v5079_v24, %v5079_v24 }
 0x296   : > { %v5205_v54 = vadd.f32 %v5204_v40, %v5203_v32  ;;  %5164 = vst.msk [vmem:[%s8186_s22 + $0x78] sm:$0xff] %vm1402_vm15, %v5082_v11  ;;  %v5305_v19 = vadd.f32 %v5304_v31, %v5303_v49  ;;  %v6010_v26 = vadd.f32 %v6009_v45, %v6008_v4  ;;  %v6013_v7 = vadd.f32 %v6012_v18, %v6011_v58 }
 0x297   : > { %v5306_v16 = vsel %vm1402_vm15, %v5263_v15, 0.0  ;;  %5162 = vst.msk [vmem:[%s8186_s22 + $0x68] sm:$0xff] %vm1402_vm15, %v5074_v52  ;;  %v5206_v57 = vsel %vm1402_vm15, %v5074_v52, 0.0  ;;  %v5264_v29 = vmul.f32 %v5074_v52, %v5074_v52  ;;  %v5208_v5 = vsel %vm1402_vm15, %v5079_v24, 0.0 }
 0x298   : > { %v5207_v56 = vadd.f32 %v5206_v57, %v5205_v54  ;;  %v5307_v6 = vadd.f32 %v5306_v16, %v5305_v19  ;;  %v5266_v10 = vmul.f32 %v5082_v11, %v5082_v11  ;;  %v4950_v12 = vadd.f32 %v6010_v26, %v4789_v33 }
 0x299   : > { %v5308_v48 = vsel %vm1402_vm15, %v5264_v29, 0.0  ;;  %v6084_v51 = vpop.f32.mrb[64].mxu0  ;;  %v4953_v53 = vadd.f32 %v6013_v7, %v4792_v23  ;;  %v5210_v37 = vsel %vm1402_vm15, %v5082_v11, 0.0  ;;  %v5310_v28 = vsel %vm1402_vm15, %v5265_v42, 0.0 }
 0x29a   : > { %v5209_v44 = vadd.f32 %v5208_v5, %v5207_v56  ;;  %v5095_v13 = vadd.f32 %v6084_v51, %v8236_v46  ;;  %v5086_v35 = vpop.f32.mrb[65].mxu0  ;;  %v6014_v1 = vpop.f32.mrb[64].mxu1  ;;  %v5309_v60 = vadd.f32 %v5308_v48, %v5307_v6  ;;  %v4797_v34 = vadd.f32 %v8054_v3, %v8093_v36 }
 0x29b   : > { %v5087_v21 = vadd.f32 %v5086_v35, %v8206_v30  ;;  %v6085_v41 = vpop.f32.mrb[66].mxu0  ;;  %v6015_v61 = vpop.f32.mrb[65].mxu1  ;;  %v4800_v25 = vadd.f32 %v8056_v14, %v8093_v36 }
 0x29c   : > { %5167 = vst.msk [vmem:[%s8186_s22 + $0x90] sm:$0xff] %vm1402_vm15, %v5095_v13  ;;  %v5211_v8 = vadd.f32 %v5210_v37, %v5209_v44  ;;  %v5098_v46 = vadd.f32 %v6085_v41, %v8240_v2  ;;  %v5089_v59 = vpop.f32.mrb[67].mxu0  ;;  %v6017_v24 = vpop.f32.mrb[66].mxu1  ;;  %v5311_v27 = vadd.f32 %v5310_v28, %v5309_v60  ;;  %v5312_v2 = vsel %vm1402_vm15, %v5266_v10, 0.0 }
 0x29d   : > { %5165 = vst.msk [vmem:[%s8186_s22 + $0x80] sm:$0xff] %vm1402_vm15, %v5087_v21  ;;  %v5212_v4 = vsel %vm1402_vm15, %v5087_v21, 0.0  ;;  %v5267_v63 = vmul.f32 %v5087_v21, %v5087_v21  ;;  %v5090_v30 = vadd.f32 %v5089_v59, %v8208_v50  ;;  %v6018_v17 = vpop.f32.mrb[67].mxu1  ;;  %v5269_v43 = vmul.f32 %v5095_v13, %v5095_v13 }
 0x29e   : > { %v5213_v45 = vadd.f32 %v5212_v4, %v5211_v8  ;;  %5168 = vst.msk [vmem:[%s8186_s22 + $0x98] sm:$0xff] %vm1402_vm15, %v5098_v46  ;;  %v5313_v38 = vadd.f32 %v5312_v2, %v5311_v27  ;;  %v6016_v49 = vadd.f32 %v6015_v61, %v6014_v1  ;;  %v6019_v3 = vadd.f32 %v6018_v17, %v6017_v24 }
 0x29f   : > { %v5314_v32 = vsel %vm1402_vm15, %v5267_v63, 0.0  ;;  %5166 = vst.msk [vmem:[%s8186_s22 + $0x88] sm:$0xff] %vm1402_vm15, %v5090_v30  ;;  %v5214_v11 = vsel %vm1402_vm15, %v5090_v30, 0.0  ;;  %v5268_v50 = vmul.f32 %v5090_v30, %v5090_v30  ;;  %v5216_v40 = vsel %vm1402_vm15, %v5095_v13, 0.0 }
 0x2a0   : > { %v5215_v58 = vadd.f32 %v5214_v11, %v5213_v45  ;;  %v5315_v14 = vadd.f32 %v5314_v32, %v5313_v38  ;;  %v5270_v15 = vmul.f32 %v5098_v46, %v5098_v46  ;;  %v4958_v19 = vadd.f32 %v6016_v49, %v4797_v34 }
 0x2a1   : > { %v5316_v52 = vsel %vm1402_vm15, %v5268_v50, 0.0  ;;  %v6088_v18 = vpop.f32.mrb[68].mxu0  ;;  %v4961_v16 = vadd.f32 %v6019_v3, %v4800_v25  ;;  %v5218_v57 = vsel %vm1402_vm15, %v5098_v46, 0.0  ;;  %v5318_v7 = vsel %vm1402_vm15, %v5269_v43, 0.0 }
 0x2a2   : > { %v5217_v33 = vadd.f32 %v5216_v40, %v5215_v58  ;;  %v5111_v23 = vadd.f32 %v6088_v18, %v4950_v12  ;;  %v5102_v31 = vpop.f32.mrb[69].mxu0  ;;  %v6020_v54 = vpop.f32.mrb[68].mxu1  ;;  %v5317_v29 = vadd.f32 %v5316_v52, %v5315_v14  ;;  %v4805_v1 = vadd.f32 %v8062_v55, %v8093_v36 }
 0x2a3   : > { %v5103_v42 = vadd.f32 %v5102_v31, %v8266_v9  ;;  %v6089_v56 = vpop.f32.mrb[70].mxu0  ;;  %v6021_v26 = vpop.f32.mrb[69].mxu1  ;;  %v4808_v12 = vadd.f32 %v8064_v0, %v8093_v36  ;;  %v4813_v31 = vadd.f32 %v8070_v47, %v8093_v36 }
 0x2a4   : > { %5171 = vst.msk [vmem:[%s8186_s22 + $0xb0] sm:$0xff] %vm1402_vm15, %v5111_v23  ;;  %v5219_v5 = vadd.f32 %v5218_v57, %v5217_v33  ;;  %v5114_v6 = vadd.f32 %v6089_v56, %v4953_v53  ;;  %v5105_v10 = vpop.f32.mrb[71].mxu0  ;;  %v6023_v48 = vpop.f32.mrb[70].mxu1  ;;  %v5319_v51 = vadd.f32 %v5318_v7, %v5317_v29  ;;  %v5320_v53 = vsel %vm1402_vm15, %v5270_v15, 0.0 }
 0x2a5   : > { %5169 = vst.msk [vmem:[%s8186_s22 + $0xa0] sm:$0xff] %vm1402_vm15, %v5103_v42  ;;  %v5220_v44 = vsel %vm1402_vm15, %v5103_v42, 0.0  ;;  %v5271_v13 = vmul.f32 %v5103_v42, %v5103_v42  ;;  %v5106_v9 = vadd.f32 %v5105_v10, %v8268_v39  ;;  %v6024_v35 = vpop.f32.mrb[71].mxu1  ;;  %v5273_v61 = vmul.f32 %v5111_v23, %v5111_v23 }
 0x2a6   : > { %v5221_v37 = vadd.f32 %v5220_v44, %v5219_v5  ;;  %5172 = vst.msk [vmem:[%s8186_s22 + $0xb8] sm:$0xff] %vm1402_vm15, %v5114_v6  ;;  %v5321_v60 = vadd.f32 %v5320_v53, %v5319_v51  ;;  %v6022_v8 = vadd.f32 %v6021_v26, %v6020_v54  ;;  %v6025_v55 = vadd.f32 %v6024_v35, %v6023_v48 }
 0x2a7   : > { %v5322_v21 = vsel %vm1402_vm15, %v5271_v13, 0.0  ;;  %5170 = vst.msk [vmem:[%s8186_s22 + $0xa8] sm:$0xff] %vm1402_vm15, %v5106_v9  ;;  %v5222_v41 = vsel %vm1402_vm15, %v5106_v9, 0.0  ;;  %v5272_v39 = vmul.f32 %v5106_v9, %v5106_v9  ;;  %v5224_v46 = vsel %vm1402_vm15, %v5111_v23, 0.0 }
 0x2a8   : > { %v5223_v28 = vadd.f32 %v5222_v41, %v5221_v37  ;;  %v5323_v0 = vadd.f32 %v5322_v21, %v5321_v60  ;;  %v5274_v27 = vmul.f32 %v5114_v6, %v5114_v6  ;;  %v4966_v63 = vadd.f32 %v6022_v8, %v4805_v1 }
 0x2a9   : > { %v5324_v59 = vsel %vm1402_vm15, %v5272_v39, 0.0  ;;  %v6092_v24 = vpop.f32.mrb[72].mxu0  ;;  %v4969_v17 = vadd.f32 %v6025_v55, %v4808_v12  ;;  %v5226_v34 = vsel %vm1402_vm15, %v5114_v6, 0.0  ;;  %v5326_v32 = vsel %vm1402_vm15, %v5273_v61, 0.0 }
 0x2aa   : > { %v5225_v4 = vadd.f32 %v5224_v46, %v5223_v28  ;;  %v5118_v30 = vpop.f32.mrb[73].mxu0  ;;  %v5325_v25 = vadd.f32 %v5324_v59, %v5323_v0  ;;  %v5127_v11 = vadd.f32 %v6092_v24, %v4966_v63  ;;  %v5328_v18 = vsel %vm1402_vm15, %v5274_v27, 0.0 }
 0x2ab   : > { %v5119_v2 = vadd.f32 %v5118_v30, %v4958_v19  ;;  %v6093_v45 = vpop.f32.mrb[74].mxu0  ;;  %v4816_v26 = vadd.f32 %v8072_v20, %v8093_v36  ;;  %v4821_v55 = vadd.f32 %v8076_v22, %v8093_v36 }
 0x2ac   : > { %v5227_v50 = vadd.f32 %v5226_v34, %v5225_v4  ;;  %v5130_v43 = vadd.f32 %v6093_v45, %v4969_v17  ;;  %v5121_v58 = vpop.f32.mrb[75].mxu0  ;;  %v5327_v3 = vadd.f32 %v5326_v32, %v5325_v25  ;;  %5175 = vst.msk [vmem:[%s8186_s22 + $0xd0] sm:$0xff] %vm1402_vm15, %v5127_v11  ;;  %v5232_v7 = vsel %vm1402_vm15, %v5127_v11, 0.0 }
 0x2ad   : > { %v6026_v38 = vpop.f32.mrb[72].mxu1  ;;  %5173 = vst.msk [vmem:[%s8186_s22 + $0xc0] sm:$0xff] %vm1402_vm15, %v5119_v2  ;;  %v5228_v40 = vsel %vm1402_vm15, %v5119_v2, 0.0  ;;  %v5275_v14 = vmul.f32 %v5119_v2, %v5119_v2  ;;  %v5122_v15 = vadd.f32 %v5121_v58, %v4961_v16  ;;  %v5277_v16 = vmul.f32 %v5127_v11, %v5127_v11 }
 0x2ae   : > { %v6027_v49 = vpop.f32.mrb[73].mxu1  ;;  %v5229_v33 = vadd.f32 %v5228_v40, %v5227_v50  ;;  %5176 = vst.msk [vmem:[%s8186_s22 + $0xd8] sm:$0xff] %vm1402_vm15, %v5130_v43  ;;  %v5329_v54 = vadd.f32 %v5328_v18, %v5327_v3  ;;  %v5278_v47 = vmul.f32 %v5130_v43, %v5130_v43  ;;  %v5234_v9 = vsel %vm1402_vm15, %v5130_v43, 0.0 }
 0x2af   : > { %v6029_v52 = vpop.f32.mrb[74].mxu1  ;;  %v5330_v19 = vsel %vm1402_vm15, %v5275_v14, 0.0  ;;  %5174 = vst.msk [vmem:[%s8186_s22 + $0xc8] sm:$0xff] %vm1402_vm15, %v5122_v15  ;;  %v5230_v57 = vsel %vm1402_vm15, %v5122_v15, 0.0  ;;  %v5276_v42 = vmul.f32 %v5122_v15, %v5122_v15  ;;  %v6028_v56 = vadd.f32 %v6027_v49, %v6026_v38 }
 0x2b0   : > { %v6030_v23 = vpop.f32.mrb[75].mxu1  ;;  %v5231_v29 = vadd.f32 %v5230_v57, %v5229_v33  ;;  %v5331_v5 = vadd.f32 %v5330_v19, %v5329_v54  ;;  %v5334_v20 = vsel %vm1402_vm15, %v5277_v16, 0.0  ;;  %v5336_v46 = vsel %vm1402_vm15, %v5278_v47, 0.0 }
 0x2b1   : > { %v6031_v6 = vadd.f32 %v6030_v23, %v6029_v52  ;;  %v6096_v10 = vpop.f32.mrb[76].mxu0  ;;  %v5332_v51 = vsel %vm1402_vm15, %v5276_v42, 0.0  ;;  %v4974_v44 = vadd.f32 %v6028_v56, %v4813_v31  ;;  %v4824_v17 = vadd.f32 %v8080_v62, %v8093_v36 }
 0x2b2   : > { %v5233_v48 = vadd.f32 %v5232_v7, %v5231_v29  ;;  %v5134_v13 = vpop.f32.mrb[77].mxu0  ;;  %v5333_v35 = vadd.f32 %v5332_v51, %v5331_v5 }
 0x2b3   : > { %v6097_v1 = vpop.f32.mrb[78].mxu0  ;;  %v4977_v12 = vadd.f32 %v6031_v6, %v4816_v26  ;;  %v5135_v37 = vadd.f32 %v5134_v13, %v4974_v44 }
 0x2b4   : > { %v5235_v60 = vadd.f32 %v5234_v9, %v5233_v48  ;;  %v5137_v21 = vpop.f32.mrb[79].mxu0  ;;  %v5335_v39 = vadd.f32 %v5334_v20, %v5333_v35 }
 0x2b5   : > { %v6032_v53 = vpop.f32.mrb[76].mxu1  ;;  %v5138_v61 = vadd.f32 %v5137_v21, %v4977_v12  ;;  %5177 = vst.msk [vmem:[%s8186_s22 + $0xe0] sm:$0xff] %vm1402_vm15, %v5135_v37  ;;  %v5236_v0 = vsel %vm1402_vm15, %v5135_v37, 0.0  ;;  %v5279_v59 = vmul.f32 %v5135_v37, %v5135_v37 }
 0x2b6   : > { %v6033_v41 = vpop.f32.mrb[77].mxu1  ;;  %v5237_v27 = vadd.f32 %v5236_v0, %v5235_v60  ;;  %v5337_v4 = vadd.f32 %v5336_v46, %v5335_v39 }
 0x2b7   : > { %v6034_v28 = vadd.f32 %v6033_v41, %v6032_v53  ;;  %v6035_v8 = vpop.f32.mrb[78].mxu1  ;;  %5178 = vst.msk [vmem:[%s8186_s22 + $0xe8] sm:$0xff] %vm1402_vm15, %v5138_v61  ;;  %v5238_v63 = vsel %vm1402_vm15, %v5138_v61, 0.0  ;;  %v5280_v30 = vmul.f32 %v5138_v61, %v5138_v61  ;;  %v5338_v22 = vsel %vm1402_vm15, %v5279_v59, 0.0 }
 0x2b8   : > { %v6036_v24 = vpop.f32.mrb[79].mxu1  ;;  %v5339_v2 = vadd.f32 %v5338_v22, %v5337_v4  ;;  %v5239_v45 = vadd.f32 %v5238_v63, %v5237_v27 }
 0x2b9   : > { %v4982_v34 = vadd.f32 %v6034_v28, %v4821_v55  ;;  %v6037_v25 = vadd.f32 %v6036_v24, %v6035_v8  ;;  %v5340_v38 = vsel %vm1402_vm15, %v5280_v30, 0.0 }
 0x2ba   : > { %v5341_v50 = vadd.f32 %v5340_v38, %v5339_v2 }
 0x2bb   : > { %v5143_v32 = vadd.f32 %v6096_v10, %v4982_v34  ;;  %v4985_v11 = vadd.f32 %v6037_v25, %v4824_v17 }
 0x2bd   : > { %5179 = vst.msk [vmem:[%s8186_s22 + $0xf0] sm:$0xff] %vm1402_vm15, %v5143_v32  ;;  %v5240_v43 = vsel %vm1402_vm15, %v5143_v32, 0.0  ;;  %v5281_v58 = vmul.f32 %v5143_v32, %v5143_v32  ;;  %v5146_v49 = vadd.f32 %v6097_v1, %v4985_v11 }
 0x2be   : > { %v5241_v3 = vadd.f32 %v5240_v43, %v5239_v45 }
 0x2bf   : > { %v5342_v62 = vsel %vm1402_vm15, %v5281_v58, 0.0  ;;  %5180 = vst.msk [vmem:[%s8186_s22 + $0xf8] sm:$0xff] %vm1402_vm15, %v5146_v49  ;;  %v5242_v36 = vsel %vm1402_vm15, %v5146_v49, 0.0  ;;  %v5282_v40 = vmul.f32 %v5146_v49, %v5146_v49 }
 0x2c0   : > { %v5343_v14 = vadd.f32 %v5342_v62, %v5341_v50  ;;  %v5243_v15 = vadd.f32 %v5242_v36, %v5241_v3 }
 0x2c1   : > { %v5344_v52 = vsel %vm1402_vm15, %v5282_v40, 0.0 }
 0x2c2   : > { %v5244_v18 = vrot.slane %v5243_v15, 4  ;;  %v5345_v33 = vadd.f32 %v5344_v52, %v5343_v14 }
 0x2c4   : > { %v5245_v23 = vadd.f32 %v5244_v18, %v5243_v15  ;;  %v5346_v31 = vrot.slane %v5345_v33, 4 }
 0x2c6   : > { %v5246_v54 = vrot.slane %v5245_v23, 2  ;;  %v5347_v19 = vadd.f32 %v5346_v31, %v5345_v33 }
 0x2c8   : > { %v5247_v57 = vadd.f32 %v5246_v54, %v5245_v23  ;;  %v5348_v16 = vrot.slane %v5347_v19, 2 }
 0x2ca   : > { %v5248_v29 = vrot.slane %v5247_v57, 1  ;;  %v5349_v42 = vadd.f32 %v5348_v16, %v5347_v19 }
 0x2cc   : > { %v5249_v56 = vadd.f32 %v5248_v29, %v5247_v57  ;;  %v5350_v26 = vrot.slane %v5349_v42, 1 }
 0x2ce   : > { %5250 = vst.msk [vmem:[%s292_s26] sm:$0x1] %vm650_vm1, %v5249_v56  ;;  %v5351_v7 = vadd.f32 %v5350_v26, %v5349_v42 }
 0x2d0   : > { %5352 = vst.msk [vmem:[%s295_s30] sm:$0x1] %vm650_vm1, %v5351_v7 }
 0x2d1 PF: > { %s18_s24 = sadd.s32 1, %s6347_s24  }
 0x2d2   : > { %p15_p4 = scmp.ge.s32.totalorder %s18_s24, 4  }
 0x2d4   :  { %17 = sbr.rel (!%p15_p4) target bundleno = 1 (0x1), region = 97 }

// kernel: encoder_res_block_forward.5
= control target key start
LH: loop header
LB: loop body
LE: loop exit
PB: predicated region body
PF: predicated region fallthrough
CT: control target
= control target key end

     0   :  { %s6412_s27 = smov 0   ;;  %s8634_s0 = inlined_call_operand.vmem [shape: f32[2,16,16,64], index: 0, kind: input, shape index: {}]   ;;  %s8635_s1 = inlined_call_operand.vmem [shape: f32[2,256,64], index: 1, kind: input, shape index: {}, may-alias: {1,8}]   ;;  %s8636_s2 = inlined_call_operand.vmem [shape: f32[1,64], index: 2, kind: input, shape index: {}]   ;;  %s8637_s3 = inlined_call_operand.vmem [shape: f32[1,64], index: 3, kind: input, shape index: {}]   ;;  %s8638_s4 = inlined_call_operand.vmem [shape: bf16[576,64], index: 4, kind: input, shape index: {}]   ;;  %s8639_s5 = inlined_call_operand.vmem [shape: f32[1,64], index: 5, kind: input, shape index: {}]   ;;  %s8640_s6 = inlined_call_operand.vmem [shape: f32[8,64], index: 6, kind: input, shape index: {}]   ;;  %s8641_s7 = inlined_call_operand.vmem [shape: f32[8,64], index: 7, kind: input, shape index: {}]   ;;  %s8642_s8 = inlined_call_operand.vmem [shape: f32[2,256,64], index: 8, kind: output, shape index: {}, may-alias: {1,8}]  }
   0x1 LB: > { %s5466_s28 = sadd.s32 4294967295, %s6363_s27   ;;  %p5470_p0 = scmp.ge.s32.totalorder %s6363_s27, 1  ;;  %s6363_s27 = sphi %s6412_s27, %s18_s27  }
   0x2   : > { %p272_p1 = scmp.lt.s32.totalorder %s6363_s27, 3 }
   0x4   : > { %p273_p2 = pnand %p5470_p0, %p272_p1 }
   0x6   : > { %276 = sbr.rel (%p273_p2) target bundleno = 938 (0x3aa), region = 52 }
   0xd   : > { %p311_p3 = scmp.lt.s32.totalorder %s5466_s28, 1  ;;  %vm677_vm0 = vcmask 519168   ;;  %vm680_vm1 = vcmask 516096   ;;  %vm688_vm2 = vsmask.f32 256  ;;  %v6365_v5 = vmov 0  }
   0xe   : > { %v690_v0 = vld [vmem:[#allocation2 + $0xc] sm:$0x1]  ;;  %vm6421_vm3 = vmand %vm680_vm1, %vm688_vm2  ;;  %vm738_vm4 = vsmask.f32 7938  ;;  %v6428_v2 = vld [vmem:[%s8636_s2] ss:$0 sm:$0xff] }
   0xf   : > { %s8672_s28 = smov (!%p311_p3, %s5466_s28), 1  ;;  %v691_v3 = vsel %vm6421_vm3, 0, %v690_v0  ;;  %vm6433_vm5 = vmand %vm680_vm1, %vm738_vm4  ;;  %678 = vst.msk [vmem:[#allocation2] sm:$0xf] %vm677_vm0, %v6365_v5  ;;  %v726_v6 = vld [vmem:[#allocation2 + $0x9c] sm:$0x1] }
  0x10   : > { %679 = vst.msk [vmem:[#allocation2 + $0x4] sm:$0xf] %vm677_vm0, %v6365_v5  ;;  %683 = vst.msk [vmem:[#allocation2 + $0xcc] sm:$0xf] %vm677_vm0, %v6365_v5  ;;  %s6441_s9 = sshll.u32 %s8672_s28, 8  ;;  %v727_v8 = vsel %vm6421_vm3, 0, %v726_v6 }
  0x11   : > { %681 = vst.msk [vmem:[#allocation2 + $0x8] sm:$0x1] %vm680_vm1, %v6365_v5  ;;  %685 = vst.msk [vmem:[#allocation2 + $0xd4] sm:$0x1] %vm680_vm1, %v6365_v5  ;;  %v693_v7 = vld [vmem:[#allocation2 + $0x18] sm:$0x1]  ;;  %s6447_s12 = scalar_lea.vmem %s8634_s0, %s6441_s9  ;;  %s8423_s10 = scalar_lea.vmem %s8635_s1, %s6441_s9 }
  0x12   : > { %684 = vst.msk [vmem:[#allocation2 + $0xd0] sm:$0xf] %vm677_vm0, %v6365_v5  ;;  %692 = vst [vmem:[#allocation2 + $0xc] sm:$0x1] %v691_v3  ;;  %v694_v9 = vsel %vm6421_vm3, 0, %v693_v7  ;;  %v327_v12 = vld [vmem:[%s6447_s12] sm:$0xff]  ;;  %s8521_s14 = scalar_lea.vmem %s8642_s8, %s6441_s9 }
  0x13   : > { %v723_v10 = vld [vmem:[#allocation2 + $0x90] sm:$0x1]  ;;  %v773_v11 = vld [vmem:[#allocation2 + $0x98] sm:$0x1]  ;;  %v328_v13 = vld [vmem:[%s6447_s12 + $0x8] sm:$0xff]  ;;  %v366_v17 = vmul.f32 %v6428_v2, %v327_v12  ;;  %s6366_s15 = smov 64  }
  0x14   : > { %v6458_v14 = vld [vmem:[%s8637_s3] ss:$0 sm:$0xff]  ;;  %728 = vst [vmem:[#allocation2 + $0x9c] sm:$0x1] %v727_v8  ;;  %695 = vst [vmem:[#allocation2 + $0x18] sm:$0x1] %v694_v9  ;;  %v367_v18 = vmul.f32 %v6428_v2, %v328_v13 }
  0x15   : > { %v724_v15 = vsel %vm6421_vm3, 0, %v723_v10  ;;  %v774_v16 = vsel %vm6433_vm5, 0, %v773_v11  ;;  %v6467_v19 = vadd.f32 %v6458_v14, %v366_v17  ;;  %vm1497_vm6 = vsmask.f32 3328  ;;  %v351_v31 = vld [vmem:[%s6447_s12 + $0xc0] sm:$0xff]  ;;  %v352_v32 = vld [vmem:[%s6447_s12 + $0xc8] sm:$0xff]  ;;  %vm6589_vm10 = vmand %vm677_vm0, %vm738_vm4 }
  0x16   : > { %725 = vst [vmem:[#allocation2 + $0x90] sm:$0x1] %v724_v15  ;;  %775 = vst [vmem:[#allocation2 + $0x98] sm:$0x1] %v774_v16  ;;  %v6470_v20 = vadd.f32 %v6458_v14, %v367_v18  ;;  %v1449_v23 = vld [vmem:[#allocation2] sm:$0xf]  ;;  %v390_v40 = vmul.f32 %v6428_v2, %v351_v31  ;;  %v391_v41 = vmul.f32 %v6428_v2, %v352_v32 }
  0x17   : > { %v5479_v21 = vmul.f32 -1.442695, %v6467_v19  ;;  %v1450_v24 = vld [vmem:[#allocation2 + $0x4] sm:$0xf]  ;;  %v1501_v26 = vshrl.u32 %v1449_v23, 16  ;;  %v1504_v27 = vshll.u32 %v1449_v23, 16 }
  0x18   : > { %v5480_v22 = vmul.f32 -1.442695, %v6470_v20  ;;  %v1451_v25 = vld [vmem:[#allocation2 + $0x8] sm:$0x1]  ;;  %v1510_v28 = vshll.u32 %v1450_v24, 16  ;;  %v1514_v29 = vshrl.u32 %v1450_v24, 16  ;;  %v6491_v52 = vadd.f32 %v6458_v14, %v390_v40 }
  0x19   : > { %6220 = vpow2.f32 %v5479_v21  ;;  %vm1498_vm7 = vsmask.f32 7440  ;;  %v1520_v30 = vshll.u32 %v1451_v25, 16  ;;  %v1503_v33 = vrot.slane %v1501_v26, 4  ;;  %v329_v37 = vld [vmem:[%s6447_s12 + $0x10] sm:$0xff]  ;;  %v330_v38 = vld [vmem:[%s6447_s12 + $0x18] sm:$0xff] }
  0x1a   : > { %6222 = vpow2.f32 %v5480_v22  ;;  %v1506_v34 = vrot.slane %v1504_v27, 5  ;;  %v1512_v35 = vrot.slane %v1510_v28, 5  ;;  %v1516_v36 = vrot.slane %v1514_v29, 4  ;;  %v349_v43 = vld [vmem:[%s6447_s12 + $0xb0] sm:$0xff]  ;;  %vm6486_vm8 = vmor %vm1497_vm6, %vm1498_vm7  ;;  %v350_v60 = vld [vmem:[%s6447_s12 + $0xb8] sm:$0xff] }
  0x1b   : > { %v1522_v39 = vrot.slane %v1520_v30, 5  ;;  %v368_v42 = vmul.f32 %v6428_v2, %v329_v37  ;;  %v369_v47 = vmul.f32 %v6428_v2, %v330_v38  ;;  %v388_v48 = vmul.f32 %v6428_v2, %v349_v43  ;;  %v740_v55 = vld [vmem:[#allocation2 + $0x14] sm:$0x1]  ;;  %v354_v62 = vld [vmem:[%s6447_s12 + $0xd8] sm:$0xff]  ;;  %v729_v8 = vld [vmem:[#allocation2 + $0xa8] sm:$0x1] }
  0x1c   : > { %v1507_v45 = vor.u32 %v1506_v34, %v1503_v33  ;;  %v1517_v46 = vor.u32 %v1516_v36, %v1512_v35  ;;  %v6494_v53 = vadd.f32 %v6458_v14, %v391_v41  ;;  %v353_v61 = vld [vmem:[%s6447_s12 + $0xd0] sm:$0xff]  ;;  %v5503_v63 = vmul.f32 -1.442695, %v6491_v52  ;;  %v331_v12 = vld [vmem:[%s6447_s12 + $0x20] sm:$0xff]  ;;  %v332_v17 = vld [vmem:[%s6447_s12 + $0x28] sm:$0xff] }
  0x1d   : > { %v6497_v54 = vadd.f32 %v6458_v14, %v368_v42  ;;  %v6500_v59 = vadd.f32 %v6458_v14, %v369_v47  ;;  %v389_v10 = vmul.f32 %v6428_v2, %v350_v60  ;;  %v6515_v11 = vadd.f32 %v6458_v14, %v388_v48  ;;  %v696_v18 = vld [vmem:[#allocation2 + $0x24] sm:$0x1]  ;;  %v743_v28 = vld [vmem:[#allocation2 + $0x20] sm:$0x1]  ;;  %v356_v33 = vld [vmem:[%s6447_s12 + $0xe8] sm:$0xff] }
  0x1e   : > { %v1508_v57 = vrot.slane %v1507_v45, 4  ;;  %v1518_v58 = vrot.slane %v1517_v46, 4  ;;  %v5504_v0 = vmul.f32 -1.442695, %v6494_v53  ;;  %v741_v13 = vsel %vm6433_vm5, 0, %v740_v55  ;;  %v355_v29 = vld [vmem:[%s6447_s12 + $0xe0] sm:$0xff] }
  0x1f   : > { %v5481_v3 = vmul.f32 -1.442695, %v6497_v54  ;;  %v5482_v7 = vmul.f32 -1.442695, %v6500_v59  ;;  %v392_v15 = vmul.f32 %v6428_v2, %v353_v61  ;;  %v393_v16 = vmul.f32 %v6428_v2, %v354_v62  ;;  %742 = vst [vmem:[#allocation2 + $0x14] sm:$0x1] %v741_v13 }
  0x20   : > { %v1513_v5 = vsel %vm6486_vm8, %v1508_v57, %v1512_v35  ;;  %v1523_v6 = vsel %vm6486_vm8, %v1518_v58, %v1522_v39  ;;  %v6525_v21 = vadd.f32 %v6458_v14, %v389_v10  ;;  %v5501_v22 = vmul.f32 -1.442695, %v6515_v11  ;;  %v776_v24 = vld [vmem:[#allocation2 + $0xa4] sm:$0x1]  ;;  %v732_v34 = vld [vmem:[#allocation2 + $0xb4] sm:$0x1] }
  0x21   : > { %v5559_v9 = vcombine.low %v1513_v5, %v1523_v6  ;;  %v730_v23 = vsel %vm6421_vm3, 0, %v729_v8  ;;  %v6531_v25 = vadd.f32 %v6458_v14, %v392_v15  ;;  %v6534_v26 = vadd.f32 %v6458_v14, %v393_v16  ;;  %v333_v39 = vld [vmem:[%s6447_s12 + $0x30] sm:$0xff]  ;;  %v334_v43 = vld [vmem:[%s6447_s12 + $0x38] sm:$0xff] }
  0x22   : > { %731 = vst [vmem:[#allocation2 + $0xa8] sm:$0x1] %v730_v23  ;;  %v370_v27 = vmul.f32 %v6428_v2, %v331_v12  ;;  %v5502_v30 = vmul.f32 -1.442695, %v6525_v21  ;;  %v371_v31 = vmul.f32 %v6428_v2, %v332_v17  ;;  %v697_v32 = vsel %vm6421_vm3, 0, %v696_v18  ;;  %v6193_v4 = vld [vmem:[%s8638_s4 + $0xb0] sm:$0xff]  }
  0x23   : > { %v6221_v44 = vpop.eup %6220  ;;  %1932 = vrot.lane.b32.xlu1 %v5559_v9, %s6366_s15  ;;  %v5505_v35 = vmul.f32 -1.442695, %v6531_v25  ;;  %v5506_v36 = vmul.f32 -1.442695, %v6534_v26  ;;  %698 = vst [vmem:[#allocation2 + $0x24] sm:$0x1] %v697_v32  ;;  %v394_v42 = vmul.f32 %v6428_v2, %v355_v29  ;;  %v395_v45 = vmul.f32 %v6428_v2, %v356_v33 }
  0x24   : > { %v6223_v49 = vpop.eup %6222  ;;  %v533_v50 = vadd.f32 1.0, %v6221_v44  ;;  %v6546_v37 = vadd.f32 %v6458_v14, %v370_v27  ;;  %v777_v38 = vsel %vm6433_vm5, 0, %v776_v24  ;;  %vm868_vm9 = vsmask.f32 4368  ;;  %v699_v10 = vld [vmem:[#allocation2 + $0x30] sm:$0x1] }
  0x25   : > { %v534_v56 = vadd.f32 1.0, %v6223_v49  ;;  %v6552_v40 = vadd.f32 %v6458_v14, %v371_v31  ;;  %778 = vst [vmem:[#allocation2 + $0xa4] sm:$0x1] %v777_v38  ;;  %v744_v41 = vsel %vm6433_vm5, 0, %v743_v28  ;;  %v733_v46 = vsel %vm6421_vm3, 0, %v732_v34  ;;  %vm6601_vm11 = vmor %vm688_vm2, %vm868_vm9 }
  0x26   : > { %6224 = vrcp.f32 %v533_v50  ;;  %v5483_v44 = vmul.f32 -1.442695, %v6546_v37  ;;  %745 = vst [vmem:[#allocation2 + $0x20] sm:$0x1] %v744_v41  ;;  %v6564_v49 = vadd.f32 %v6458_v14, %v394_v42  ;;  %734 = vst [vmem:[#allocation2 + $0xb4] sm:$0x1] %v733_v46  ;;  %v372_v50 = vmul.f32 %v6428_v2, %v333_v39 }
  0x27   : > { %6226 = vrcp.f32 %v534_v56  ;;  %v5484_v48 = vmul.f32 -1.442695, %v6552_v40  ;;  %v6569_v57 = vadd.f32 %v6458_v14, %v395_v45  ;;  %v373_v58 = vmul.f32 %v6428_v2, %v334_v43  ;;  %v779_v17 = vld [vmem:[#allocation2 + $0xb0] sm:$0x1]  ;;  %v1192_v24 = vld [vmem:[#allocation2 + $0xc] sm:$0xf] }
  0x28   : > { %6228 = vpow2.f32 %v5503_v63  ;;  %v5507_v62 = vmul.f32 -1.442695, %v6564_v49  ;;  %v6575_v63 = vadd.f32 %v6458_v14, %v372_v50  ;;  %v746_v31 = vld [vmem:[#allocation2 + $0x2c] sm:$0x1]  ;;  %v780_v38 = vsel %vm6433_vm5, 0, %v779_v17  ;;  %v357_v39 = vld [vmem:[%s6447_s12 + $0xf0] sm:$0xff] }
  0x29   : > { %6230 = vpow2.f32 %v5504_v0  ;;  %v6579_v6 = vadd.f32 %v6458_v14, %v373_v58  ;;  %v358_v41 = vld [vmem:[%s6447_s12 + $0xf8] sm:$0xff]  ;;  %781 = vst [vmem:[#allocation2 + $0xb0] sm:$0x1] %v780_v38  ;;  %v335_v58 = vld [vmem:[%s6447_s12 + $0x40] sm:$0xff]  ;;  %vm2093_vm12 = vcmask 1042432   ;;  %vm2094_vm13 = vcmask 1046532  }
  0x2a   : > { %6232 = vpow2.f32 %v5481_v3  ;;  %vm6902_vm14 = vmor %vm2093_vm12, %vm2094_vm13  ;;  %vm1432_vm15 = vcmask 523264   ;;  %vm1980_vm1 = vcmask 1048064   ;;  %v1998_v43 = vld [vmem:[#allocation2 + $0x4] sm:$0xf] }
  0x2b   : > { %6234 = vpow2.f32 %v5482_v7 }
  0x2c   : > { %6236 = vpow2.f32 %v5501_v22 }
  0x2d   : > { %6238 = vpow2.f32 %v5502_v30  ;;  %v6585_v30 = vmul.f32 -1.442695, %v6579_v6 }
  0x2e   : > { %6240 = vpow2.f32 %v5505_v35  ;;  %v1196_v35 = vld [vmem:[#allocation2 + $0x14] sm:$0x1] }
  0x2f   : > { %6242 = vpow2.f32 %v5506_v36  ;;  %v700_v36 = vsel %vm6421_vm3, 0, %v699_v10  ;;  %v396_v10 = vmul.f32 %v6428_v2, %v357_v39 }
  0x30   : > { %v6225_v47 = vpop.eup %6224  ;;  %6244 = vpow2.f32 %v5483_v44  ;;  %701 = vst [vmem:[#allocation2 + $0x30] sm:$0x1] %v700_v36 }
  0x31   : > { %v6227_v55 = vpop.eup %6226  ;;  %v629_v56 = vmul.f32 %v6225_v47, %v6467_v19  ;;  %6246 = vpow2.f32 %v5484_v48  ;;  %v5508_v19 = vmul.f32 -1.442695, %v6569_v57  ;;  %v735_v47 = vld [vmem:[#allocation2 + $0xc0] sm:$0x1] }
  0x32   : > { %v6229_v60 = vpop.eup %6228  ;;  %v630_v61 = vmul.f32 %v6227_v55, %v6470_v20  ;;  %6248 = vpow2.f32 %v5507_v62  ;;  %v6582_v20 = vmul.f32 -1.442695, %v6575_v63 }
  0x33   : > { %v6231_v0 = vpop.eup %6230  ;;  %v5794_v3 = vpack.c.bf16 %v629_v56, %v629_v56  ;;  %v557_v5 = vadd.f32 1.0, %v6229_v60  ;;  %v336_v60 = vld [vmem:[%s6447_s12 + $0x48] sm:$0xff] }
  0x34   : > { %v6233_v7 = vpop.eup %6232  ;;  %v5795_v8 = vpack.c.bf16 %v630_v61, %v630_v61  ;;  %v558_v9 = vadd.f32 1.0, %v6231_v0  ;;  %v375_v17 = vmul.f32 %v6428_v2, %v336_v60 }
  0x35   : > { %v6235_v12 = vpop.eup %6234  ;;  %v871_v13 = vshrl.u32 %v5794_v3, 16  ;;  %v874_v15 = vshll.u32 %v5794_v3, 16  ;;  %6250 = vrcp.f32 %v557_v5  ;;  %v535_v16 = vadd.f32 1.0, %v6233_v7 }
  0x36   : > { %v6237_v18 = vpop.eup %6236  ;;  %v879_v22 = vshrl.u32 %v5795_v8, 16  ;;  %v882_v23 = vshll.u32 %v5795_v8, 16  ;;  %6252 = vrcp.f32 %v558_v9  ;;  %v536_v27 = vadd.f32 1.0, %v6235_v12 }
  0x37   : > { %v873_v28 = vrot.slane %v871_v13, 7  ;;  %6254 = vrcp.f32 %v535_v16  ;;  %v555_v29 = vadd.f32 1.0, %v6237_v18  ;;  %v6239_v32 = vpop.eup %6238  ;;  %v747_v3 = vsel %vm6433_vm5, 0, %v746_v31 }
  0x38   : > { %v881_v33 = vrot.slane %v879_v22, 7  ;;  %6256 = vrcp.f32 %v536_v27  ;;  %v6241_v42 = vpop.eup %6240  ;;  %v556_v46 = vadd.f32 1.0, %v6239_v32  ;;  %748 = vst [vmem:[#allocation2 + $0x2c] sm:$0x1] %v747_v3  ;;  %v397_v12 = vmul.f32 %v6428_v2, %v358_v41 }
  0x39   : > { %v876_v44 = vor.u32 %v874_v15, %v873_v28  ;;  %v877_v45 = vrot.slane %v873_v28, 4  ;;  %6258 = vrcp.f32 %v555_v29  ;;  %v6243_v48 = vpop.eup %6242  ;;  %v559_v56 = vadd.f32 1.0, %v6241_v42 }
  0x3a   : > { %v884_v50 = vor.u32 %v882_v23, %v881_v33  ;;  %v886_v55 = vrot.slane %v881_v33, 4  ;;  %6260 = vpow2.f32 %v5508_v19  ;;  %v6245_v61 = vpop.eup %6244  ;;  %v560_v0 = vadd.f32 1.0, %v6243_v48 }
  0x3b   : > { %v1193_v62 = vsel %vm6589_vm10, %v876_v44, %v1192_v24  ;;  %6262 = vrcp.f32 %v556_v46  ;;  %v6247_v5 = vpop.eup %6246  ;;  %v537_v19 = vadd.f32 1.0, %v6245_v61  ;;  %v736_v15 = vsel %vm6421_vm3, 0, %v735_v47 }
  0x3c   : > { %v885_v7 = vsel %vm6601_vm11, %v877_v45, %v884_v50  ;;  %1194 = vst [vmem:[#allocation2 + $0xc] sm:$0xf] %v1193_v62  ;;  %v1197_v8 = vsel %vm6421_vm3, %v886_v55, %v1196_v35  ;;  %6264 = vrcp.f32 %v559_v56  ;;  %v538_v9 = vadd.f32 1.0, %v6247_v5  ;;  %v6249_v13 = vpop.eup %6248  ;;  %737 = vst [vmem:[#allocation2 + $0xc0] sm:$0x1] %v736_v15 }
  0x3d   : > { %1195 = vst.msk [vmem:[#allocation2 + $0x10] sm:$0xf] %vm677_vm0, %v885_v7  ;;  %1198 = vst [vmem:[#allocation2 + $0x14] sm:$0x1] %v1197_v8  ;;  %6266 = vrcp.f32 %v560_v0  ;;  %v374_v16 = vmul.f32 %v6428_v2, %v335_v58  ;;  %v561_v22 = vadd.f32 1.0, %v6249_v13  ;;  %v6623_v23 = vadd.f32 %v6458_v14, %v396_v10 }
  0x3e   : > { %6268 = vrcp.f32 %v537_v19  ;;  %v6626_v24 = vadd.f32 %v6458_v14, %v397_v12  ;;  %v1276_v62 = vld [vmem:[#allocation2 + $0x9c] sm:$0xf] }
  0x3f   : > { %v6251_v18 = vpop.eup %6250  ;;  %6270 = vrcp.f32 %v538_v9  ;;  %v5509_v2 = vmul.f32 -1.442695, %v6623_v23  ;;  %v6636_v38 = vadd.f32 %v6458_v14, %v374_v16  ;;  %v1199_v9 = vld [vmem:[#allocation2 + $0x18] sm:$0xf] }
  0x40   : > { %v6253_v27 = vpop.eup %6252  ;;  %v653_v28 = vmul.f32 %v6251_v18, %v6491_v52  ;;  %6272 = vpow2.f32 %v6582_v20  ;;  %v5510_v32 = vmul.f32 -1.442695, %v6626_v24 }
  0x41   : > { %v6255_v29 = vpop.eup %6254  ;;  %v654_v31 = vmul.f32 %v6253_v27, %v6494_v53  ;;  %6274 = vrcp.f32 %v561_v22  ;;  %v6640_v53 = vadd.f32 %v6458_v14, %v375_v17 }
  0x42   : > { %v6257_v33 = vpop.eup %6256  ;;  %v5818_v35 = vpack.c.bf16 %v653_v28, %v653_v28  ;;  %v631_v36 = vmul.f32 %v6255_v29, %v6497_v54  ;;  %6276 = vpow2.f32 %v6585_v30 }
  0x43   : > { %v6259_v52 = vpop.eup %6258  ;;  %v5819_v39 = vpack.c.bf16 %v654_v31, %v654_v31  ;;  %v632_v20 = vmul.f32 %v6257_v33, %v6500_v59  ;;  %6278 = vpow2.f32 %v5509_v2  ;;  %v1452_v12 = vld [vmem:[#allocation2 + $0xc] sm:$0xf]  ;;  %v1269_v31 = vld [vmem:[#allocation2 + $0x90] sm:$0xf] }
  0x44   : > { %v6642_v41 = vpop.eup %6260  ;;  %v6136_v42 = vld [vmem:[#allocation2 + $0xc] sm:$0xff]   ;;  %v1075_v44 = vshrl.u32 %v5818_v35, 16  ;;  %v1078_v45 = vshll.u32 %v5818_v35, 16  ;;  %v5796_v46 = vpack.c.bf16 %v631_v36, %v631_v36  ;;  %v651_v54 = vmul.f32 %v6259_v52, %v6515_v11 }
  0x45   : > { %v6263_v30 = vpop.eup %6262  ;;  %v1083_v47 = vshrl.u32 %v5819_v39, 16  ;;  %v1086_v48 = vshll.u32 %v5819_v39, 16  ;;  %v5797_v50 = vpack.c.bf16 %v632_v20, %v632_v20  ;;  %6280 = vpow2.f32 %v5510_v32  ;;  %2400 = vrot.lane.b32.xlu0 %v6136_v42, %s6366_s15  ;;  %v1453_v2 = vld [vmem:[#allocation2 + $0x10] sm:$0xf] }
  0x46   : > { %v6265_v55 = vpop.eup %6264  ;;  %v1077_v59 = vrot.slane %v1075_v44, 7  ;;  %v888_v56 = vshrl.u32 %v5796_v46, 16  ;;  %v891_v14 = vshll.u32 %v5796_v46, 16  ;;  %v652_v58 = vmul.f32 %v6263_v30, %v6525_v21 }
  0x47   : > { %v6647_v60 = vpop.eup %6266  ;;  %v6649_v61 = vrot.slane %v1083_v47, 7  ;;  %v896_v0 = vshrl.u32 %v5797_v50, 16  ;;  %v899_v11 = vshll.u32 %v5797_v50, 16  ;;  %v5816_v3 = vpack.c.bf16 %v651_v54, %v651_v54  ;;  %v1273_v50 = vld [vmem:[#allocation2 + $0x98] sm:$0x1] }
  0x48   : > { %v6269_v5 = vpop.eup %6268  ;;  %v1080_v7 = vor.u32 %v1078_v45, %v1077_v59  ;;  %v1081_v8 = vrot.slane %v1077_v59, 4  ;;  %v890_v19 = vrot.slane %v888_v56, 7  ;;  %v5817_v10 = vpack.c.bf16 %v652_v58, %v652_v58  ;;  %v1454_v45 = vld [vmem:[#allocation2 + $0x14] sm:$0x1] }
  0x49   : > { %v6651_v13 = vpop.eup %6270  ;;  %v1088_v15 = vor.u32 %v1086_v48, %v6649_v61  ;;  %v1090_v21 = vrot.slane %v6649_v61, 4  ;;  %v6655_v16 = vrot.slane %v896_v0, 7  ;;  %v1058_v17 = vshrl.u32 %v5816_v3, 16 }
  0x4a   : > { %v6657_v18 = vpop.eup %6272  ;;  %v1277_v22 = vsel %vm6589_vm10, %v1080_v7, %v1276_v62  ;;  %v893_v27 = vor.u32 %v891_v14, %v890_v19  ;;  %v894_v28 = vrot.slane %v890_v19, 4  ;;  %v1061_v29 = vshll.u32 %v5816_v3, 16  ;;  %v1280_v19 = vld [vmem:[#allocation2 + $0xa4] sm:$0x1] }
  0x4b   : > { %v6661_v32 = vpop.eup %6274  ;;  %v1089_v33 = vsel %vm6601_vm11, %v1081_v8, %v1088_v15  ;;  %1278 = vst [vmem:[#allocation2 + $0x9c] sm:$0xf] %v1277_v22  ;;  %v901_v35 = vor.u32 %v899_v11, %v6655_v16  ;;  %v903_v36 = vrot.slane %v6655_v16, 4  ;;  %v1060_v52 = vrot.slane %v1058_v17, 7 }
  0x4c   : > { %v6667_v39 = vpop.eup %6276  ;;  %1279 = vst.msk [vmem:[#allocation2 + $0xa0] sm:$0xf] %vm677_vm0, %v1089_v33  ;;  %v1200_v20 = vsel %vm6589_vm10, %v893_v27, %v1199_v9  ;;  %v1066_v42 = vshrl.u32 %v5817_v10, 16  ;;  %v1069_v44 = vshll.u32 %v5817_v10, 16  ;;  %v1525_v46 = vshrl.u32 %v1452_v12, 16 }
  0x4d   : > { %v6672_v54 = vpop.eup %6278  ;;  %v902_v30 = vsel %vm6601_vm11, %v894_v28, %v901_v35  ;;  %1201 = vst [vmem:[#allocation2 + $0x18] sm:$0xf] %v1200_v20  ;;  %v1063_v47 = vor.u32 %v1061_v29, %v1060_v52  ;;  %v1064_v48 = vrot.slane %v1060_v52, 4  ;;  %v1528_v59 = vshll.u32 %v1452_v12, 16 }
  0x4e   : > { %1202 = vst.msk [vmem:[#allocation2 + $0x1c] sm:$0xf] %vm677_vm0, %v902_v30  ;;  %v1068_v56 = vrot.slane %v1066_v42, 7  ;;  %v1527_v14 = vrot.slane %v1525_v46, 4  ;;  %v1534_v58 = vshll.u32 %v1453_v2, 16  ;;  %v1538_v62 = vshrl.u32 %v1453_v2, 16 }
  0x4f   : > { %v6677_v0 = vpop.eup %6280  ;;  %v1270_v11 = vsel %vm6589_vm10, %v1063_v47, %v1269_v31  ;;  %v1530_v3 = vrot.slane %v1528_v59, 5  ;;  %v1544_v7 = vshll.u32 %v1454_v45, 16  ;;  %v655_v8 = vmul.f32 %v6265_v55, %v6531_v25 }
  0x50   : > { %v1071_v9 = vor.u32 %v1069_v44, %v1068_v56  ;;  %v1073_v10 = vrot.slane %v1068_v56, 4  ;;  %1271 = vst [vmem:[#allocation2 + $0x90] sm:$0xf] %v1270_v11  ;;  %v1536_v12 = vrot.slane %v1534_v58, 5  ;;  %v1540_v15 = vrot.slane %v1538_v62, 4 }
  0x51   : > { %v1531_v17 = vor.u32 %v1530_v3, %v1527_v14  ;;  %v1546_v22 = vrot.slane %v1544_v7, 5  ;;  %v656_v27 = vmul.f32 %v6647_v60, %v6534_v26  ;;  %v5820_v28 = vpack.c.bf16 %v655_v8, %v655_v8  ;;  %v1203_v58 = vld [vmem:[#allocation2 + $0x20] sm:$0x1] }
  0x52   : > { %v1072_v29 = vsel %vm6601_vm11, %v1064_v48, %v1071_v9  ;;  %v1274_v31 = vsel %vm6421_vm3, %v1073_v10, %v1273_v50  ;;  %v1541_v2 = vor.u32 %v1540_v15, %v1536_v12  ;;  %v633_v25 = vmul.f32 %v6269_v5, %v6546_v37  ;;  %v1488_v15 = vld [vmem:[#allocation2 + $0x9c] sm:$0xf] }
  0x53   : > { %v6137_v55 = vld [vmem:[#allocation2 + $0x9c] sm:$0xff]   ;;  %1272 = vst.msk [vmem:[#allocation2 + $0x94] sm:$0xf] %vm677_vm0, %v1072_v29  ;;  %1275 = vst [vmem:[#allocation2 + $0x98] sm:$0x1] %v1274_v31  ;;  %v1532_v33 = vrot.slane %v1531_v17, 4  ;;  %v5821_v35 = vpack.c.bf16 %v656_v27, %v656_v27  ;;  %v634_v26 = vmul.f32 %v6651_v13, %v6552_v40  ;;  %v1281_v44 = vsel %vm6421_vm3, %v1090_v21, %v1280_v19 }
  0x54   : > { %v1092_v52 = vshrl.u32 %v5820_v28, 16  ;;  %v1095_v20 = vshll.u32 %v5820_v28, 16  ;;  %v1542_v42 = vrot.slane %v1541_v2, 4  ;;  %v5798_v60 = vpack.c.bf16 %v633_v25, %v633_v25  ;;  %2424 = vrot.lane.b32.xlu0 %v6137_v55, %s6366_s15  ;;  %1282 = vst [vmem:[#allocation2 + $0xa4] sm:$0x1] %v1281_v44 }
  0x55   : > { %v6138_v37 = vld [vmem:[#allocation2 + $0x18] sm:$0xff]   ;;  %v1537_v5 = vsel %vm6486_vm8, %v1532_v33, %v1536_v12  ;;  %v1100_v46 = vshrl.u32 %v5821_v35, 16  ;;  %v1103_v30 = vshll.u32 %v5821_v35, 16  ;;  %v1283_v40 = vld [vmem:[#allocation2 + $0xa8] sm:$0xf]  ;;  %v5799_v13 = vpack.c.bf16 %v634_v26, %v634_v26 }
  0x56   : > { %v1094_v45 = vrot.slane %v1092_v52, 7  ;;  %v1547_v47 = vsel %vm6486_vm8, %v1542_v42, %v1546_v22  ;;  %v905_v48 = vshrl.u32 %v5798_v60, 16  ;;  %v908_v61 = vshll.u32 %v5798_v60, 16  ;;  %v1206_v12 = vld [vmem:[#allocation2 + $0x24] sm:$0xf] }
  0x57   : > { %v1485_v50 = vld [vmem:[#allocation2 + $0x90] sm:$0xf]  ;;  %v5560_v59 = vcombine.low %v1537_v5, %v1547_v47  ;;  %v6701_v14 = vrot.slane %v1100_v46, 7  ;;  %v913_v7 = vshrl.u32 %v5799_v13, 16  ;;  %v916_v10 = vshll.u32 %v5799_v13, 16 }
  0x58   : > { %v1097_v21 = vor.u32 %v1095_v20, %v1094_v45  ;;  %v1098_v56 = vrot.slane %v1094_v45, 4  ;;  %v1789_v62 = vshrl.u32 %v1485_v50, 16  ;;  %v1792_v11 = vshll.u32 %v1485_v50, 16  ;;  %2402 = vrot.lane.b32.xlu0 %v6138_v37, %s6366_s15  ;;  %v1489_v35 = vld [vmem:[#allocation2 + $0xa0] sm:$0xf] }
  0x59   : > { %v907_v3 = vrot.slane %v905_v48, 7  ;;  %v1105_v8 = vor.u32 %v1103_v30, %v6701_v14  ;;  %v1107_v19 = vrot.slane %v6701_v14, 4  ;;  %v1204_v31 = vsel %vm6421_vm3, %v903_v36, %v1203_v58  ;;  %v1455_v60 = vld [vmem:[#allocation2 + $0x18] sm:$0xf]  ;;  %v1456_v45 = vld [vmem:[#allocation2 + $0x1c] sm:$0xf] }
  0x5a   : > { %v1284_v9 = vsel %vm6589_vm10, %v1097_v21, %v1283_v40  ;;  %v1486_v17 = vld [vmem:[#allocation2 + $0x94] sm:$0xf]  ;;  %v1487_v22 = vld [vmem:[#allocation2 + $0x98] sm:$0x1]  ;;  %v1791_v27 = vrot.slane %v1789_v62, 4  ;;  %v1794_v28 = vrot.slane %v1792_v11, 5 }
  0x5b   : > { %1285 = vst [vmem:[#allocation2 + $0xa8] sm:$0xf] %v1284_v9  ;;  %v910_v29 = vor.u32 %v908_v61, %v907_v3  ;;  %v1798_v2 = vshll.u32 %v1486_v17, 16  ;;  %v1802_v25 = vshrl.u32 %v1486_v17, 16  ;;  %v1808_v55 = vshll.u32 %v1487_v22, 16 }
  0x5c   : > { %v1106_v33 = vsel %vm6601_vm11, %v1098_v56, %v1105_v8  ;;  %1205 = vst [vmem:[#allocation2 + $0x20] sm:$0x1] %v1204_v31  ;;  %v1795_v52 = vor.u32 %v1794_v28, %v1791_v27  ;;  %v911_v20 = vrot.slane %v907_v3, 4  ;;  %v6715_v42 = vrot.slane %v913_v7, 7  ;;  %v1490_v26 = vld [vmem:[#allocation2 + $0xa4] sm:$0x1]  ;;  %1934 = vrot.lane.b32.xlu0 %v5560_v59, %s6366_s15 }
  0x5d   : > { %1286 = vst.msk [vmem:[#allocation2 + $0xac] sm:$0xf] %vm677_vm0, %v1106_v33  ;;  %v1207_v16 = vsel %vm6589_vm10, %v910_v29, %v1206_v12  ;;  %v1800_v36 = vrot.slane %v1798_v2, 5  ;;  %v1804_v44 = vrot.slane %v1802_v25, 4  ;;  %v1810_v37 = vrot.slane %v1808_v55, 5 }
  0x5e   : > { %1208 = vst [vmem:[#allocation2 + $0x24] sm:$0xf] %v1207_v16  ;;  %v1813_v5 = vshrl.u32 %v1488_v15, 16  ;;  %v1796_v46 = vrot.slane %v1795_v52, 4  ;;  %v918_v30 = vor.u32 %v916_v10, %v6715_v42  ;;  %v920_v47 = vrot.slane %v6715_v42, 4 }
  0x5f   : > { %v1816_v40 = vshll.u32 %v1488_v15, 16  ;;  %v1805_v13 = vor.u32 %v1804_v44, %v1800_v36  ;;  %v1822_v61 = vshll.u32 %v1489_v35, 16  ;;  %v1826_v50 = vshrl.u32 %v1489_v35, 16  ;;  %v1287_v44 = vld [vmem:[#allocation2 + $0xb0] sm:$0x1] }
  0x60   : > { %v1815_v48 = vrot.slane %v1813_v5, 4  ;;  %v1801_v21 = vsel %vm6486_vm8, %v1796_v46, %v1800_v36  ;;  %v919_v56 = vsel %vm6601_vm11, %v911_v20, %v918_v30  ;;  %v1832_v58 = vshll.u32 %v1490_v26, 16 }
  0x61   : > { %v1818_v59 = vrot.slane %v1816_v40, 5  ;;  %v1806_v62 = vrot.slane %v1805_v13, 4  ;;  %1209 = vst.msk [vmem:[#allocation2 + $0x28] sm:$0xf] %vm677_vm0, %v919_v56  ;;  %v1824_v11 = vrot.slane %v1822_v61, 5  ;;  %v1828_v3 = vrot.slane %v1826_v50, 4 }
  0x62   : > { %v1549_v7 = vshrl.u32 %v1455_v60, 16  ;;  %v1834_v9 = vrot.slane %v1832_v58, 5  ;;  %v1552_v12 = vshll.u32 %v1455_v60, 16  ;;  %v1558_v15 = vshll.u32 %v1456_v45, 16  ;;  %v1290_v58 = vld [vmem:[#allocation2 + $0xb4] sm:$0xf] }
  0x63   : > { %v1819_v8 = vor.u32 %v1818_v59, %v1815_v48  ;;  %v1457_v10 = vld [vmem:[#allocation2 + $0x20] sm:$0x1]  ;;  %v1811_v17 = vsel %vm6486_vm8, %v1806_v62, %v1810_v37  ;;  %v1829_v22 = vor.u32 %v1828_v3, %v1824_v11  ;;  %v1562_v28 = vshrl.u32 %v1456_v45, 16  ;;  %v1491_v37 = vld [vmem:[#allocation2 + $0xa8] sm:$0xf] }
  0x64   : > { %v1551_v27 = vrot.slane %v1549_v7, 4  ;;  %v5571_v29 = vcombine.low %v1801_v21, %v1811_v17  ;;  %v1554_v2 = vrot.slane %v1552_v12, 5  ;;  %v1560_v25 = vrot.slane %v1558_v15, 5  ;;  %v6139_v20 = vld [vmem:[#allocation2 + $0xa8] sm:$0xff]   ;;  %v337_v12 = vld [vmem:[%s6447_s12 + $0x50] sm:$0xff] }
  0x65   : > { %v1820_v31 = vrot.slane %v1819_v8, 4  ;;  %v1830_v55 = vrot.slane %v1829_v22, 4  ;;  %v1564_v33 = vrot.slane %v1562_v28, 4  ;;  %v1568_v35 = vshll.u32 %v1457_v10, 16 }
  0x66   : > { %v562_v52 = vadd.f32 1.0, %v6642_v41  ;;  %1956 = vrot.lane.b32.xlu1 %v5571_v29, %s6366_s15  ;;  %v1555_v26 = vor.u32 %v1554_v2, %v1551_v27  ;;  %v657_v60 = vmul.f32 %v6661_v32, %v6564_v49  ;;  %v539_v36 = vadd.f32 1.0, %v6657_v18  ;;  %v1492_v41 = vld [vmem:[#allocation2 + $0xac] sm:$0xf] }
  0x67   : > { %v1825_v16 = vsel %vm6486_vm8, %v1820_v31, %v1824_v11  ;;  %v1835_v5 = vsel %vm6486_vm8, %v1830_v55, %v1834_v9  ;;  %v1565_v45 = vor.u32 %v1564_v33, %v1560_v25  ;;  %v1570_v46 = vrot.slane %v1568_v35, 5  ;;  %v1210_v32 = vld [vmem:[#allocation2 + $0x2c] sm:$0x1] }
  0x68   : > { %6282 = vrcp.f32 %v562_v52  ;;  %v6140_v30 = vld [vmem:[#allocation2 + $0x24] sm:$0xff]   ;;  %v5572_v40 = vcombine.low %v1825_v16, %v1835_v5  ;;  %v1556_v13 = vrot.slane %v1555_v26, 4  ;;  %v5822_v48 = vpack.c.bf16 %v657_v60, %v657_v60 }
  0x69   : > { %v540_v61 = vadd.f32 1.0, %v6667_v39  ;;  %v1566_v50 = vrot.slane %v1565_v45, 4  ;;  %6284 = vrcp.f32 %v539_v36  ;;  %v1288_v49 = vsel %vm6421_vm3, %v1107_v19, %v1287_v44  ;;  %2404 = vrot.lane.b32.xlu0 %v6140_v30, %s6366_s15  ;;  %v1458_v39 = vld [vmem:[#allocation2 + $0x24] sm:$0xf]  ;;  %v1459_v3 = vld [vmem:[#allocation2 + $0x28] sm:$0xf] }
  0x6a   : > { %v1837_v18 = vshrl.u32 %v1491_v37, 16  ;;  %2426 = vrot.lane.b32.xlu1 %v6139_v20, %s6366_s15  ;;  %v1561_v21 = vsel %vm6486_vm8, %v1556_v13, %v1560_v25  ;;  %v1109_v56 = vshrl.u32 %v5822_v48, 16  ;;  %v1112_v59 = vshll.u32 %v5822_v48, 16  ;;  %1289 = vst [vmem:[#allocation2 + $0xb0] sm:$0x1] %v1288_v49 }
  0x6b   : > { %6286 = vrcp.f32 %v540_v61  ;;  %v1571_v14 = vsel %vm6486_vm8, %v1566_v50, %v1570_v46  ;;  %v1840_v62 = vshll.u32 %v1491_v37, 16  ;;  %v1846_v11 = vshll.u32 %v1492_v41, 16  ;;  %v6772_v37 = vld [vmem:[%s8636_s2] ss:$0 sm:$0xff] }
  0x6c   : > { %v1839_v19 = vrot.slane %v1837_v18, 4  ;;  %v5561_v7 = vcombine.low %v1561_v21, %v1571_v14  ;;  %v6749_v8 = vrot.slane %v1109_v56, 7  ;;  %v1850_v9 = vshrl.u32 %v1492_v41, 16  ;;  %v702_v18 = vld [vmem:[#allocation2 + $0x3c] sm:$0x1] }
  0x6d   : > { %v1211_v10 = vsel %vm6421_vm3, %v920_v47, %v1210_v32  ;;  %v1842_v15 = vrot.slane %v1840_v62, 5  ;;  %v6756_v17 = vrot.slane %v1846_v11, 5  ;;  %v1573_v22 = vshrl.u32 %v1458_v39, 16 }
  0x6e   : > { %1212 = vst [vmem:[#allocation2 + $0x2c] sm:$0x1] %v1211_v10  ;;  %v1576_v27 = vshll.u32 %v1458_v39, 16  ;;  %1958 = vrot.lane.b32.xlu1 %v5572_v40, %s6366_s15  ;;  %1936 = vrot.lane.b32.xlu0 %v5561_v7, %s6366_s15  ;;  %v1114_v28 = vor.u32 %v1112_v59, %v6749_v8  ;;  %v1852_v29 = vrot.slane %v1850_v9, 4  ;;  %v1582_v31 = vshll.u32 %v1459_v3, 16 }
  0x6f   : > { %v5487_v42 = vmul.f32 -1.442695, %v6636_v38  ;;  %v1843_v2 = vor.u32 %v1842_v15, %v1839_v19  ;;  %v1575_v25 = vrot.slane %v1573_v22, 4  ;;  %v1586_v55 = vshrl.u32 %v1459_v3, 16  ;;  %v782_v19 = vld [vmem:[#allocation2 + $0xbc] sm:$0x1] }
  0x70   : > { %v1578_v47 = vrot.slane %v1576_v27, 5  ;;  %v1291_v33 = vsel %vm6589_vm10, %v1114_v28, %v1290_v58  ;;  %v1853_v35 = vor.u32 %v1852_v29, %v6756_v17  ;;  %v6765_v52 = vrot.slane %v1582_v31, 5  ;;  %v749_v3 = vld [vmem:[#allocation2 + $0x38] sm:$0x1]  ;;  %v1213_v22 = vld [vmem:[#allocation2 + $0x30] sm:$0xf] }
  0x71   : > { %v563_v20 = vadd.f32 1.0, %v6672_v54  ;;  %1292 = vst [vmem:[#allocation2 + $0xb4] sm:$0xf] %v1291_v33  ;;  %v1493_v26 = vld [vmem:[#allocation2 + $0xb0] sm:$0x1]  ;;  %v1588_v36 = vrot.slane %v1586_v55, 4  ;;  %v6775_v5 = vmul.f32 %v6772_v37, %v337_v12 }
  0x72   : > { %v6283_v16 = vpop.eup %6282  ;;  %v1579_v60 = vor.u32 %v1578_v47, %v1575_v25  ;;  %v564_v44 = vadd.f32 1.0, %v6677_v0  ;;  %v1844_v46 = vrot.slane %v1843_v2, 4  ;;  %v1856_v41 = vshll.u32 %v1493_v26, 16  ;;  %v3441_v28 = vld [vmem:[#allocation2 + $0x18] sm:$0xf] }
  0x73   : > { %v658_v45 = vmul.f32 %v6283_v16, %v6569_v57  ;;  %6288 = vrcp.f32 %v563_v20  ;;  %v6285_v54 = vpop.eup %6284  ;;  %v1115_v30 = vrot.slane %v6749_v8, 4  ;;  %v1854_v40 = vrot.slane %v1853_v35, 4  ;;  %v6810_v35 = vld [vmem:[#allocation2 + $0x1c] sm:$0xf] }
  0x74   : > { %v1589_v13 = vor.u32 %v1588_v36, %v6765_v52  ;;  %6290 = vrcp.f32 %v564_v44  ;;  %v635_v61 = vmul.f32 %v6285_v54, %v6575_v63  ;;  %v1858_v50 = vrot.slane %v1856_v41, 5 }
  0x75   : > { %v6287_v0 = vpop.eup %6286  ;;  %v5823_v48 = vpack.c.bf16 %v658_v45, %v658_v45  ;;  %v1460_v49 = vld [vmem:[#allocation2 + $0x2c] sm:$0x1]  ;;  %6292 = vpow2.f32 %v5487_v42  ;;  %v6782_v32 = vrot.slane %v1579_v60, 4  ;;  %v1849_v58 = vsel %vm6486_vm8, %v1844_v46, %v6756_v17 }
  0x76   : > { %v636_v57 = vmul.f32 %v6287_v0, %v6579_v6  ;;  %v6784_v21 = vrot.slane %v1589_v13, 4  ;;  %v1592_v56 = vshll.u32 %v1460_v49, 16  ;;  %v5800_v14 = vpack.c.bf16 %v635_v61, %v635_v61 }
  0x77   : > { %v1117_v59 = vshrl.u32 %v5823_v48, 16  ;;  %v1120_v39 = vshll.u32 %v5823_v48, 16  ;;  %v1859_v62 = vsel %vm6486_vm8, %v1854_v40, %v1858_v50  ;;  %v5488_v6 = vmul.f32 -1.442695, %v6640_v53 }
  0x78   : > { %v5801_v63 = vpack.c.bf16 %v636_v57, %v636_v57  ;;  %v1594_v11 = vrot.slane %v1592_v56, 5  ;;  %v922_v8 = vshrl.u32 %v5800_v14, 16  ;;  %v925_v9 = vshll.u32 %v5800_v14, 16  ;;  %v1494_v27 = vld [vmem:[#allocation2 + $0xb4] sm:$0xf] }
  0x79   : > { %v6792_v7 = vrot.slane %v1117_v59, 7  ;;  %v703_v10 = vsel %vm6421_vm3, 0, %v702_v18  ;;  %v1585_v17 = vsel %vm6486_vm8, %v6782_v32, %v6765_v52  ;;  %6294 = vpow2.f32 %v5488_v6 }
  0x7a   : > { %v930_v12 = vshrl.u32 %v5801_v63, 16  ;;  %v933_v15 = vshll.u32 %v5801_v63, 16  ;;  %704 = vst [vmem:[#allocation2 + $0x3c] sm:$0x1] %v703_v10  ;;  %v924_v31 = vrot.slane %v922_v8, 7  ;;  %v6801_v42 = vcombine.low %v1849_v58, %v1859_v62  ;;  %v338_v62 = vld [vmem:[%s6447_s12 + $0x58] sm:$0xff] }
  0x7b   : > { %v1122_v29 = vor.u32 %v1120_v39, %v6792_v7  ;;  %v1595_v2 = vsel %vm6486_vm8, %v6784_v21, %v1594_v11  ;;  %v783_v47 = vsel %vm6433_vm5, 0, %v782_v19  ;;  %v1861_v55 = vshrl.u32 %v1494_v27, 16  ;;  %v1297_v63 = vld [vmem:[#allocation2 + $0xc0] sm:$0xf] }
  0x7c   : > { %v6806_v25 = vrot.slane %v930_v12, 7  ;;  %v1864_v33 = vshll.u32 %v1494_v27, 16  ;;  %v927_v16 = vor.u32 %v925_v9, %v924_v31  ;;  %v928_v26 = vrot.slane %v924_v31, 4  ;;  %784 = vst [vmem:[#allocation2 + $0xbc] sm:$0x1] %v783_v47 }
  0x7d   : > { %v6289_v52 = vpop.eup %6288  ;;  %v1123_v20 = vsel %vm6601_vm11, %v1115_v30, %v1122_v29  ;;  %v750_v60 = vsel %vm6433_vm5, 0, %v749_v3  ;;  %v1124_v44 = vrot.slane %v6792_v7, 4  ;;  %v1863_v41 = vrot.slane %v1861_v55, 4 }
  0x7e   : > { %v6291_v36 = vpop.eup %6290  ;;  %1293 = vst.msk [vmem:[#allocation2 + $0xb8] sm:$0xf] %vm677_vm0, %v1123_v20  ;;  %v935_v45 = vor.u32 %v933_v15, %v6806_v25  ;;  %v659_v46 = vmul.f32 %v6289_v52, %v6623_v23  ;;  %751 = vst [vmem:[#allocation2 + $0x38] sm:$0x1] %v750_v60  ;;  %v1214_v30 = vsel %vm6589_vm10, %v927_v16, %v1213_v22  ;;  %v1866_v13 = vrot.slane %v1864_v33, 5 }
  0x7f   : > { %v6293_v54 = vpop.eup %6292  ;;  %v660_v40 = vmul.f32 %v6291_v36, %v6626_v24  ;;  %v3490_v0 = vshrl.u32 %v3441_v28, 16  ;;  %1215 = vst [vmem:[#allocation2 + $0x30] sm:$0xf] %v1214_v30  ;;  %v3493_v49 = vshll.u32 %v3441_v28, 16  ;;  %v3499_v32 = vshll.u32 %v6810_v35, 16 }
  0x80   : > { %v936_v48 = vsel %vm6601_vm11, %v928_v26, %v935_v45  ;;  %v5824_v61 = vpack.c.bf16 %v659_v46, %v659_v46  ;;  %v541_v50 = vadd.f32 1.0, %v6293_v54  ;;  %v1867_v18 = vor.u32 %v1866_v13, %v1863_v41  ;;  %v3443_v24 = vld [vmem:[#allocation2 + $0x20] sm:$0x1] }
  0x81   : > { %1216 = vst.msk [vmem:[#allocation2 + $0x34] sm:$0xf] %vm677_vm0, %v936_v48  ;;  %v5825_v23 = vpack.c.bf16 %v660_v40, %v660_v40  ;;  %v3492_v57 = vrot.slane %v3490_v0, 4  ;;  %v3495_v59 = vrot.slane %v3493_v49, 5  ;;  %v937_v39 = vrot.slane %v6806_v25, 4 }
  0x82   : > { %v1126_v21 = vshrl.u32 %v5824_v61, 16  ;;  %v1129_v56 = vshll.u32 %v5824_v61, 16  ;;  %6296 = vrcp.f32 %v541_v50  ;;  %v5562_v14 = vcombine.low %v1585_v17, %v1595_v2  ;;  %v6850_v36 = vld [vmem:[%s8637_s3] ss:$0 sm:$0xff] }
  0x83   : > { %v1134_v58 = vshrl.u32 %v5825_v23, 16  ;;  %v1137_v19 = vshll.u32 %v5825_v23, 16  ;;  %v6295_v11 = vpop.eup %6294  ;;  %v1294_v3 = vld [vmem:[#allocation2 + $0xbc] sm:$0x1]  ;;  %v6829_v7 = vrot.slane %v1867_v18, 4  ;;  %v3496_v8 = vor.u32 %v3495_v59, %v3492_v57 }
  0x84   : > { %v1128_v6 = vrot.slane %v1126_v21, 7  ;;  %v6831_v9 = vrot.slane %v3499_v32, 5  ;;  %v542_v15 = vadd.f32 1.0, %v6295_v11  ;;  %v1295_v22 = vsel %vm6421_vm3, %v1124_v44, %v1294_v3  ;;  %v339_v11 = vld [vmem:[%s6447_s12 + $0x60] sm:$0xff] }
  0x85   : > { %v6141_v10 = vld [vmem:[#allocation2 + $0xb4] sm:$0xff]   ;;  %v6833_v12 = vrot.slane %v1134_v58, 7  ;;  %v3503_v17 = vshrl.u32 %v6810_v35, 16  ;;  %1296 = vst [vmem:[#allocation2 + $0xbc] sm:$0x1] %v1295_v22  ;;  %v3509_v2 = vshll.u32 %v3443_v24, 16  ;;  %v377_v25 = vmul.f32 %v6772_v37, %v338_v62 }
  0x86   : > { %v1131_v27 = vor.u32 %v1129_v56, %v1128_v6  ;;  %v1132_v28 = vrot.slane %v1128_v6, 4  ;;  %v1495_v29 = vld [vmem:[#allocation2 + $0xb8] sm:$0xf]  ;;  %2428 = vrot.lane.b32.xlu1 %v6141_v10, %s6366_s15  ;;  %6298 = vrcp.f32 %v542_v15  ;;  %v1461_v33 = vld [vmem:[#allocation2 + $0x30] sm:$0xf]  ;;  %v6841_v52 = vrot.slane %v3496_v8, 4 }
  0x87   : > { %v1217_v31 = vld [vmem:[#allocation2 + $0x38] sm:$0x1]  ;;  %v1139_v47 = vor.u32 %v1137_v19, %v6833_v12  ;;  %v1870_v55 = vshll.u32 %v1495_v29, 16  ;;  %v1874_v16 = vshrl.u32 %v1495_v29, 16  ;;  %v6854_v44 = vadd.f32 %v6850_v36, %v6775_v5  ;;  %v705_v62 = vld [vmem:[#allocation2 + $0x48] sm:$0x1] }
  0x88   : > { %v6142_v20 = vld [vmem:[#allocation2 + $0x30] sm:$0xff]   ;;  %v1298_v35 = vsel %vm6589_vm10, %v1131_v27, %v1297_v63  ;;  %v1218_v26 = vsel %vm6421_vm3, %v937_v39, %v1217_v31  ;;  %v1597_v41 = vshrl.u32 %v1461_v33, 16  ;;  %v1600_v54 = vshll.u32 %v1461_v33, 16  ;;  %v2976_v8 = vld [vmem:[#allocation2 + $0xc] sm:$0xe] }
  0x89   : > { %v1462_v60 = vld [vmem:[#allocation2 + $0x34] sm:$0xf]  ;;  %v1140_v45 = vsel %vm6601_vm11, %v1132_v28, %v1139_v47  ;;  %1299 = vst [vmem:[#allocation2 + $0xc0] sm:$0xf] %v1298_v35  ;;  %v1872_v46 = vrot.slane %v1870_v55, 5  ;;  %2406 = vrot.lane.b32.xlu0 %v6142_v20, %s6366_s15  ;;  %v1876_v30 = vrot.slane %v1874_v16, 4  ;;  %v3502_v61 = vsel %vm6486_vm8, %v6841_v52, %v6831_v9 }
  0x8a   : > { %1219 = vst [vmem:[#allocation2 + $0x38] sm:$0x1] %v1218_v26  ;;  %1300 = vst.msk [vmem:[#allocation2 + $0xc4] sm:$0xf] %vm677_vm0, %v1140_v45  ;;  %v1606_v40 = vshll.u32 %v1462_v60, 16  ;;  %v1610_v13 = vshrl.u32 %v1462_v60, 16  ;;  %1960 = vrot.lane.b32.xlu1 %v6801_v42, %s6366_s15  ;;  %v6871_v24 = vadd.f32 %v6850_v36, %v377_v25  ;;  %v6888_v25 = vmul.f32 %v6772_v37, %v339_v11 }
  0x8b   : > { %v3505_v0 = vrot.slane %v3503_v17, 4  ;;  %v1599_v5 = vrot.slane %v1597_v41, 4  ;;  %v1602_v48 = vrot.slane %v1600_v54, 5  ;;  %v3511_v50 = vrot.slane %v3509_v2, 5  ;;  %v2977_v17 = vld [vmem:[#allocation2 + $0x10] sm:$0xf] }
  0x8c   : > { %v6297_v49 = vpop.eup %6296  ;;  %v1877_v23 = vor.u32 %v1876_v30, %v1872_v46  ;;  %v6866_v18 = vrot.slane %v1606_v40, 5  ;;  %v1612_v57 = vrot.slane %v1610_v13, 4  ;;  %v1496_v56 = vld [vmem:[#allocation2 + $0xbc] sm:$0x1]  ;;  %v5489_v59 = vmul.f32 -1.442695, %v6854_v44 }
  0x8d   : > { %v3506_v32 = vor.u32 %v3505_v0, %v6831_v9  ;;  %v637_v21 = vmul.f32 %v6297_v49, %v6636_v38  ;;  %v1603_v42 = vor.u32 %v1602_v48, %v1599_v5  ;;  %1938 = vrot.lane.b32.xlu0 %v5562_v14, %s6366_s15  ;;  %v1880_v58 = vshll.u32 %v1496_v56, 16  ;;  %v1220_v55 = vld [vmem:[#allocation2 + $0x3c] sm:$0xf]  ;;  %v2978_v52 = vld [vmem:[#allocation2 + $0x14] sm:$0x1] }
  0x8e   : > { %v1878_v39 = vrot.slane %v1877_v23, 4  ;;  %v1613_v19 = vor.u32 %v1612_v57, %v6866_v18  ;;  %6300 = vpow2.f32 %v5489_v59  ;;  %v5490_v38 = vmul.f32 -1.442695, %v6871_v24  ;;  %v752_v20 = vld [vmem:[#allocation2 + $0x44] sm:$0x1]  ;;  %v340_v57 = vld [vmem:[%s6447_s12 + $0x68] sm:$0xff] }
  0x8f   : > { %v3507_v63 = vrot.slane %v3506_v32, 4  ;;  %v5802_v6 = vpack.c.bf16 %v637_v21, %v637_v21  ;;  %v6877_v3 = vrot.slane %v1603_v42, 4  ;;  %v1873_v9 = vsel %vm6486_vm8, %v6829_v7, %v1872_v46  ;;  %v3444_v60 = vld [vmem:[#allocation2 + $0x24] sm:$0xf]  ;;  %v3445_v45 = vld [vmem:[#allocation2 + $0x28] sm:$0xf] }
  0x90   : > { %v1882_v10 = vrot.slane %v1880_v58, 5  ;;  %v6883_v15 = vrot.slane %v1613_v19, 4  ;;  %v6299_v27 = vpop.eup %6298  ;;  %6302 = vpow2.f32 %v5490_v38  ;;  %v5639_v41 = vrot.slane %v2976_v8, 9  ;;  %v3446_v54 = vld [vmem:[#allocation2 + $0x2c] sm:$0x1] }
  0x91   : > { %v1463_v14 = vld [vmem:[#allocation2 + $0x38] sm:$0x1]  ;;  %v3512_v22 = vsel %vm6486_vm8, %v3507_v63, %v3511_v50  ;;  %v6143_v28 = vld [vmem:[#allocation2 + $0xc0] sm:$0xff]   ;;  %v939_v29 = vshrl.u32 %v5802_v6, 16  ;;  %v942_v31 = vshll.u32 %v5802_v6, 16  ;;  %v638_v47 = vmul.f32 %v6299_v27, %v6640_v53 }
  0x92   : > { %v1616_v2 = vshll.u32 %v1463_v14, 16  ;;  %v1883_v7 = vsel %vm6486_vm8, %v1878_v39, %v1882_v10  ;;  %v1609_v33 = vsel %vm6486_vm8, %v6877_v3, %v6866_v18  ;;  %2430 = vrot.lane.b32.xlu1 %v6143_v28, %s6366_s15  ;;  %v706_v53 = vsel %vm6421_vm3, 0, %v705_v62  ;;  %v708_v38 = vld [vmem:[#allocation2 + $0x54] sm:$0x1]  ;;  %v2979_v8 = vld [vmem:[#allocation2 + $0x18] sm:$0xe] }
  0x93   : > { %v941_v35 = vrot.slane %v939_v29, 7  ;;  %v5574_v16 = vcombine.low %v1873_v9, %v1883_v7  ;;  %v5803_v46 = vpack.c.bf16 %v638_v47, %v638_v47  ;;  %707 = vst [vmem:[#allocation2 + $0x48] sm:$0x1] %v706_v53  ;;  %v5687_v13 = vcombine.low %v3502_v61, %v3512_v22  ;;  %v341_v22 = vld [vmem:[%s6447_s12 + $0x70] sm:$0xff] }
  0x94   : > { %v6898_v26 = vrot.slane %v1616_v2, 5  ;;  %v3074_v5 = vrot.slane %v2977_v17, 5  ;;  %v3077_v23 = vrot.slane %v2978_v52, 5  ;;  %v753_v56 = vsel %vm6433_vm5, 0, %v752_v20  ;;  %v342_v52 = vld [vmem:[%s6447_s12 + $0x78] sm:$0xff] }
  0x95   : > { %v944_v30 = vor.u32 %v942_v31, %v941_v35  ;;  %v945_v40 = vrot.slane %v941_v35, 4  ;;  %v947_v48 = vshrl.u32 %v5803_v46, 16  ;;  %v950_v50 = vshll.u32 %v5803_v46, 16  ;;  %754 = vst [vmem:[#allocation2 + $0x44] sm:$0x1] %v753_v56 }
  0x96   : > { %v1619_v49 = vsel %vm6486_vm8, %v6883_v15, %v6898_v26  ;;  %1962 = vrot.lane.b32.xlu1 %v5574_v16, %s6366_s15  ;;  %v3075_v61 = vsel %vm6902_vm14, %v5639_v41, %v3074_v5  ;;  %v3076_v21 = vrot.slane %v3074_v5, 4  ;;  %v3514_v59 = vshrl.u32 %v3444_v60, 16  ;;  %v2980_v31 = vld [vmem:[#allocation2 + $0x1c] sm:$0xf]  ;;  %v3447_v18 = vld [vmem:[#allocation2 + $0x30] sm:$0xf] }
  0x97   : > { %v1221_v32 = vsel %vm6589_vm10, %v944_v30, %v1220_v55  ;;  %v949_v42 = vrot.slane %v947_v48, 7  ;;  %v3517_v39 = vshll.u32 %v3444_v60, 16  ;;  %v3523_v58 = vshll.u32 %v3445_v45, 16 }
  0x98   : > { %1222 = vst [vmem:[#allocation2 + $0x3c] sm:$0xf] %v1221_v32  ;;  %v6301_v19 = vpop.eup %6300  ;;  %v3078_v63 = vsel %vm6902_vm14, %v3076_v21, %v3077_v23  ;;  %v3527_v62 = vshrl.u32 %v3445_v45, 16  ;;  %v3533_v11 = vshll.u32 %v3446_v54, 16  ;;  %v379_v6 = vmul.f32 %v6772_v37, %v340_v57  ;;  %v2981_v45 = vld [vmem:[#allocation2 + $0x20] sm:$0x1] }
  0x99   : > { %v952_v9 = vor.u32 %v950_v50, %v949_v42  ;;  %v954_v10 = vrot.slane %v949_v42, 4  ;;  %v543_v14 = vadd.f32 1.0, %v6301_v19  ;;  %v5655_v15 = vcombine.low %v3075_v61, %v3078_v63  ;;  %v755_v54 = vld [vmem:[#allocation2 + $0x50] sm:$0x1]  ;;  %v3448_v32 = vld [vmem:[#allocation2 + $0x34] sm:$0xf] }
  0x9a   : > { %3921 = vrot.lane.b32.xlu1 %v5687_v13, %s6366_s15  ;;  %v3516_v17 = vrot.slane %v3514_v59, 4  ;;  %v3519_v27 = vrot.slane %v3517_v39, 5  ;;  %v3525_v28 = vrot.slane %v3523_v58, 5  ;;  %v3529_v29 = vrot.slane %v3527_v62, 4  ;;  %v6303_v2 = vpop.eup %6302  ;;  %v343_v61 = vld [vmem:[%s6447_s12 + $0x80] sm:$0xff] }
  0x9b   : > { %v953_v47 = vsel %vm6601_vm11, %v945_v40, %v952_v9  ;;  %6304 = vrcp.f32 %v543_v14  ;;  %v3535_v55 = vrot.slane %v3533_v11, 5  ;;  %v6927_v7 = vadd.f32 %v6850_v36, %v6888_v25 }
  0x9c   : > { %1223 = vst.msk [vmem:[#allocation2 + $0x40] sm:$0xf] %vm677_vm0, %v953_v47  ;;  %v544_v20 = vadd.f32 1.0, %v6303_v2  ;;  %v3520_v35 = vor.u32 %v3519_v27, %v3516_v17  ;;  %v3530_v16 = vor.u32 %v3529_v29, %v3525_v28  ;;  %v6932_v26 = vadd.f32 %v6850_v36, %v379_v6  ;;  %v1224_v30 = vld [vmem:[#allocation2 + $0x44] sm:$0x1] }
  0x9d   : > { %v5491_v53 = vmul.f32 -1.442695, %v6927_v7  ;;  %v709_v60 = vsel %vm6421_vm3, 0, %v708_v38  ;;  %v5640_v46 = vrot.slane %v2979_v8, 9  ;;  %v3081_v41 = vrot.slane %v2980_v31, 5  ;;  %v6152_v17 = vld [vmem:[%s8638_s4 + $0x40] sm:$0xff]  }
  0x9e   : > { %v6942_v25 = vcombine.low %v1609_v33, %v1619_v49  ;;  %6306 = vrcp.f32 %v544_v20  ;;  %3232 = vrot.lane.b32.xlu1 %v5655_v15, %s6366_s15  ;;  %710 = vst [vmem:[#allocation2 + $0x54] sm:$0x1] %v709_v60  ;;  %v380_v13 = vmul.f32 %v6772_v37, %v341_v22  ;;  %v381_v5 = vmul.f32 %v6772_v37, %v342_v52  ;;  %v3449_v15 = vld [vmem:[#allocation2 + $0x38] sm:$0x1]  ;;  %v6153_v47 = vld [vmem:[%s8638_s4] sm:$0xff]  }
  0x9f   : > { %v1464_v40 = vld [vmem:[#allocation2 + $0x3c] sm:$0xf]  ;;  %v1225_v48 = vsel %vm6421_vm3, %v954_v10, %v1224_v30  ;;  %v3521_v57 = vrot.slane %v3520_v35, 4  ;;  %v3531_v3 = vrot.slane %v3530_v16, 4  ;;  %6308 = vpow2.f32 %v5491_v53  ;;  %5826 = vmatprep.subr.bf16.mxu0 %v6152_v17  ;;  %v6154_v16 = vld [vmem:[%s8638_s4 + $0x48] sm:$0xff]   ;;  %6110 = vmatprep.subr.bf16.mxu1 %v6152_v17 }
  0xa0   : > { %v1621_v50 = vshrl.u32 %v1464_v40, 16  ;;  %v1624_v23 = vshll.u32 %v1464_v40, 16  ;;  %1226 = vst [vmem:[#allocation2 + $0x44] sm:$0x1] %v1225_v48  ;;  %v5492_v33 = vmul.f32 -1.442695, %v6932_v26  ;;  %v3082_v49 = vsel %vm6902_vm14, %v5640_v46, %v3081_v41  ;;  %5827 = vmatpush3.bf16.msra.mxu0 %v6153_v47  ;;  %6118 = vmatpush3.bf16.msra.mxu1 %v6153_v47 }
  0xa1   : > { %v3526_v42 = vsel %vm6486_vm8, %v3521_v57, %v3525_v28  ;;  %v3083_v59 = vrot.slane %v3081_v41, 4  ;;  %v3536_v39 = vsel %vm6486_vm8, %v3531_v3, %v3535_v55  ;;  %v3084_v58 = vrot.slane %v2981_v45, 5  ;;  %5828 = vmatprep.subr.bf16.mxu0 %v6154_v16  ;;  %6111 = vmatprep.subr.bf16.mxu1 %v6154_v16  ;;  %v6159_v16 = vld [vmem:[%s8638_s4 + $0x18] sm:$0xff]  }
  0xa2   : > { %v1623_v21 = vrot.slane %v1621_v50, 4  ;;  %v1626_v56 = vrot.slane %v1624_v23, 5  ;;  %6310 = vpow2.f32 %v5492_v33  ;;  %v756_v19 = vsel %vm6433_vm5, 0, %v755_v54 }
  0xa3   : > { %v6144_v63 = vld [vmem:[#allocation2 + $0x3c] sm:$0xff]   ;;  %v5688_v6 = vcombine.low %v3526_v42, %v3536_v39  ;;  %757 = vst [vmem:[#allocation2 + $0x50] sm:$0x1] %v756_v19  ;;  %v3538_v38 = vshrl.u32 %v3447_v18, 16  ;;  %v6960_v8 = vmul.f32 %v6772_v37, %v343_v61  ;;  %v3085_v14 = vsel %vm6902_vm14, %v3083_v59, %v3084_v58  ;;  %v2982_v39 = vld [vmem:[#allocation2 + $0x24] sm:$0xe] }
  0xa4   : > { %v1465_v62 = vld [vmem:[#allocation2 + $0x40] sm:$0xf]  ;;  %v1627_v11 = vor.u32 %v1626_v56, %v1623_v21  ;;  %v3541_v22 = vshll.u32 %v3447_v18, 16  ;;  %2408 = vrot.lane.b32.xlu0 %v6144_v63, %s6366_s15  ;;  %v5656_v29 = vcombine.low %v3082_v49, %v3085_v14  ;;  %v3547_v2 = vshll.u32 %v3448_v32, 16  ;;  %v1227_v56 = vld [vmem:[#allocation2 + $0x48] sm:$0xf] }
  0xa5   : > { %v1630_v9 = vshll.u32 %v1465_v62, 16  ;;  %v1634_v10 = vshrl.u32 %v1465_v62, 16  ;;  %v6305_v27 = vpop.eup %6304  ;;  %3923 = vrot.lane.b32.xlu1 %v5688_v6, %s6366_s15  ;;  %v3540_v31 = vrot.slane %v3538_v38, 4  ;;  %v3551_v45 = vshrl.u32 %v3448_v32, 16  ;;  %v711_v21 = vld [vmem:[#allocation2 + $0x60] sm:$0x1] }
  0xa6   : > { %v6968_v28 = vrot.slane %v1627_v11, 4  ;;  %v639_v55 = vmul.f32 %v6305_v27, %v6854_v44  ;;  %v3543_v35 = vrot.slane %v3541_v22, 5  ;;  %v6980_v60 = vrot.slane %v3547_v2, 5  ;;  %v6155_v44 = vld [vmem:[%s8638_s4 + $0x8] sm:$0xff]   ;;  %v6157_v19 = vld [vmem:[%s8638_s4 + $0x10] sm:$0xff]  }
  0xa7   : > { %v6975_v52 = vrot.slane %v1630_v9, 5  ;;  %v1636_v20 = vrot.slane %v1634_v10, 4  ;;  %v1466_v53 = vld [vmem:[#allocation2 + $0x44] sm:$0x1]  ;;  %v3557_v46 = vshll.u32 %v3449_v15, 16  ;;  %v6983_v41 = vadd.f32 %v6850_v36, %v380_v13  ;;  %v6156_v13 = vld [vmem:[%s8638_s4 + $0x50] sm:$0xff]   ;;  %5829 = vmatpush3.bf16.msra.mxu0 %v6155_v44  ;;  %6119 = vmatpush3.bf16.msra.mxu1 %v6155_v44 }
  0xa8   : > { %v6307_v54 = vpop.eup %6306  ;;  %v5804_v30 = vpack.c.bf16 %v639_v55, %v639_v55  ;;  %v1640_v48 = vshll.u32 %v1466_v53, 16  ;;  %v6990_v50 = vadd.f32 %v6850_v36, %v381_v5  ;;  %1940 = vrot.lane.b32.xlu0 %v6942_v25, %s6366_s15  ;;  %v3544_v5 = vor.u32 %v3543_v35, %v3540_v31  ;;  %v2983_v58 = vld [vmem:[#allocation2 + $0x28] sm:$0xf]  ;;  %5830 = vmatprep.subr.bf16.mxu0 %v6156_v13  ;;  %v6158_v9 = vld [vmem:[%s8638_s4 + $0x58] sm:$0xff]   ;;  %v2984_v31 = vld [vmem:[#allocation2 + $0x2c] sm:$0x1] }
  0xa9   : > { %v1637_v40 = vor.u32 %v1636_v20, %v6975_v52  ;;  %v640_v23 = vmul.f32 %v6307_v54, %v6871_v24  ;;  %v1633_v57 = vsel %vm6486_vm8, %v6968_v28, %v6975_v52  ;;  %3234 = vrot.lane.b32.xlu1 %v5656_v29, %s6366_s15  ;;  %v3553_v18 = vrot.slane %v3551_v45, 4  ;;  %v6309_v3 = vpop.eup %6308  ;;  %6112 = vmatprep.subr.bf16.mxu1 %v6156_v13  ;;  %v758_v2 = vld [vmem:[#allocation2 + $0x5c] sm:$0x1]  ;;  %v6160_v44 = vld [vmem:[%s8638_s4 + $0x60] sm:$0xff]  }
  0xaa   : > { %v956_v33 = vshrl.u32 %v5804_v30, 16  ;;  %v959_v49 = vshll.u32 %v5804_v30, 16  ;;  %v7005_v61 = vrot.slane %v1640_v48, 5  ;;  %v545_v24 = vadd.f32 1.0, %v6309_v3  ;;  %v3450_v35 = vld [vmem:[#allocation2 + $0x3c] sm:$0xf] }
  0xab   : > { %v7003_v32 = vrot.slane %v1637_v40, 4  ;;  %v5805_v25 = vpack.c.bf16 %v640_v23, %v640_v23  ;;  %v3545_v42 = vrot.slane %v3544_v5, 4  ;;  %v3554_v59 = vor.u32 %v3553_v18, %v6980_v60  ;;  %5831 = vmatpush3.bf16.msra.mxu0 %v6157_v19  ;;  %6120 = vmatpush3.bf16.msra.mxu1 %v6157_v19  ;;  %v1231_v45 = vld [vmem:[#allocation2 + $0x50] sm:$0x1]  ;;  %v3451_v48 = vld [vmem:[#allocation2 + $0x40] sm:$0xf] }
  0xac   : > { %v6311_v63 = vpop.eup %6310  ;;  %v958_v62 = vrot.slane %v956_v33, 7  ;;  %v3559_v6 = vrot.slane %v3557_v46, 5  ;;  %v5493_v38 = vmul.f32 -1.442695, %v6983_v41  ;;  %v5494_v22 = vmul.f32 -1.442695, %v6990_v50  ;;  %5832 = vmatprep.subr.bf16.mxu0 %v6158_v9  ;;  %6113 = vmatprep.subr.bf16.mxu1 %v6158_v9 }
  0xad   : > { %v1643_v11 = vsel %vm6486_vm8, %v7003_v32, %v7005_v61  ;;  %v964_v10 = vshrl.u32 %v5805_v25, 16  ;;  %v967_v14 = vshll.u32 %v5805_v25, 16  ;;  %v546_v15 = vadd.f32 1.0, %v6311_v63  ;;  %v3452_v3 = vld [vmem:[#allocation2 + $0x44] sm:$0x1]  ;;  %v344_v33 = vld [vmem:[%s6447_s12 + $0x88] sm:$0xff] }
  0xae   : > { %v961_v17 = vor.u32 %v959_v49, %v958_v62  ;;  %v962_v27 = vrot.slane %v958_v62, 4  ;;  %6312 = vrcp.f32 %v545_v24  ;;  %v3550_v29 = vsel %vm6486_vm8, %v3545_v42, %v6980_v60  ;;  %v714_v24 = vld [vmem:[#allocation2 + $0x6c] sm:$0x1]  ;;  %v6161_v42 = vld [vmem:[%s8638_s4 + $0x20] sm:$0xff]   ;;  %v7051_v63 = vld [vmem:[#allocation2 + $0x30] sm:$0xe] }
  0xaf   : > { %v966_v47 = vrot.slane %v964_v10, 7  ;;  %6314 = vrcp.f32 %v546_v15  ;;  %v3555_v55 = vrot.slane %v3554_v59, 4  ;;  %v712_v20 = vsel %vm6421_vm3, 0, %v711_v21  ;;  %5833 = vmatpush3.bf16.msra.mxu0 %v6159_v16  ;;  %6121 = vmatpush3.bf16.msra.mxu1 %v6159_v16  ;;  %v6162_v62 = vld [vmem:[%s8638_s4 + $0x68] sm:$0xff]  }
  0xb0   : > { %v1228_v53 = vsel %vm6589_vm10, %v961_v17, %v1227_v56  ;;  %6316 = vpow2.f32 %v5493_v38  ;;  %713 = vst [vmem:[#allocation2 + $0x60] sm:$0x1] %v712_v20  ;;  %v5641_v60 = vrot.slane %v2982_v39, 9  ;;  %v3088_v46 = vrot.slane %v2983_v58, 5  ;;  %5834 = vmatprep.subr.bf16.mxu0 %v6160_v44  ;;  %6114 = vmatprep.subr.bf16.mxu1 %v6160_v44 }
  0xb1   : > { %v969_v54 = vor.u32 %v967_v14, %v966_v47  ;;  %v971_v30 = vrot.slane %v966_v47, 4  ;;  %1229 = vst [vmem:[#allocation2 + $0x48] sm:$0xf] %v1228_v53  ;;  %v3560_v40 = vsel %vm6486_vm8, %v3555_v55, %v3559_v6  ;;  %6318 = vpow2.f32 %v5494_v22  ;;  %v345_v47 = vld [vmem:[%s6447_s12 + $0x90] sm:$0xff]  ;;  %v6163_v55 = vld [vmem:[%s8638_s4 + $0x28] sm:$0xff]  }
  0xb2   : > { %v5689_v13 = vcombine.low %v3550_v29, %v3560_v40  ;;  %v3089_v23 = vsel %vm6902_vm14, %v5641_v60, %v3088_v46  ;;  %v3090_v5 = vrot.slane %v3088_v46, 4  ;;  %v3091_v18 = vrot.slane %v2984_v31, 5  ;;  %v6166_v40 = vld [vmem:[%s8638_s4 + $0x30] sm:$0xff]  }
  0xb3   : > { %v970_v49 = vsel %vm6601_vm11, %v962_v27, %v969_v54  ;;  %v1232_v21 = vsel %vm6421_vm3, %v971_v30, %v1231_v45  ;;  %v759_v25 = vsel %vm6433_vm5, 0, %v758_v2  ;;  %v3562_v56 = vshrl.u32 %v3450_v35, 16  ;;  %5835 = vmatpush3.bf16.msra.mxu0 %v6161_v42  ;;  %6122 = vmatpush3.bf16.msra.mxu1 %v6161_v42  ;;  %v346_v30 = vld [vmem:[%s6447_s12 + $0x98] sm:$0xff] }
  0xb4   : > { %1230 = vst.msk [vmem:[#allocation2 + $0x4c] sm:$0xf] %vm677_vm0, %v970_v49  ;;  %1233 = vst [vmem:[#allocation2 + $0x50] sm:$0x1] %v1232_v21  ;;  %3925 = vrot.lane.b32.xlu1 %v5689_v13, %s6366_s15  ;;  %v3092_v59 = vsel %vm6902_vm14, %v3090_v5, %v3091_v18  ;;  %v3565_v39 = vshll.u32 %v3450_v35, 16  ;;  %v3571_v58 = vshll.u32 %v3451_v48, 16  ;;  %v383_v10 = vmul.f32 %v6772_v37, %v344_v33 }
  0xb5   : > { %760 = vst [vmem:[#allocation2 + $0x5c] sm:$0x1] %v759_v25  ;;  %v3575_v19 = vshrl.u32 %v3451_v48, 16  ;;  %v5657_v6 = vcombine.low %v3089_v23, %v3092_v59  ;;  %v3564_v38 = vrot.slane %v3562_v56, 4  ;;  %v3581_v9 = vshll.u32 %v3452_v3, 16  ;;  %5836 = vmatprep.subr.bf16.mxu0 %v6162_v62  ;;  %6115 = vmatprep.subr.bf16.mxu1 %v6162_v62  ;;  %v6167_v25 = vld [vmem:[%s8638_s4 + $0x78] sm:$0xff]  }
  0xb6   : > { %v3567_v14 = vrot.slane %v3565_v39, 5  ;;  %v7057_v15 = vrot.slane %v3571_v58, 5  ;;  %v7061_v17 = vadd.f32 %v6850_v36, %v6960_v8  ;;  %v7066_v29 = vadd.f32 %v6850_v36, %v383_v10  ;;  %v6165_v8 = vld [vmem:[%s8638_s4 + $0x70] sm:$0xff]   ;;  %v761_v10 = vld [vmem:[#allocation2 + $0x68] sm:$0x1] }
  0xb7   : > { %v3577_v22 = vrot.slane %v3575_v19, 4  ;;  %v7063_v27 = vrot.slane %v3581_v9, 5  ;;  %v715_v31 = vsel %vm6421_vm3, 0, %v714_v24  ;;  %v5642_v2 = vrot.slane %v7051_v63, 9  ;;  %5837 = vmatpush3.bf16.msra.mxu0 %v6163_v55  ;;  %6123 = vmatpush3.bf16.msra.mxu1 %v6163_v55  ;;  %v2986_v9 = vld [vmem:[#allocation2 + $0x34] sm:$0xf] }
  0xb8   : > { %v6313_v20 = vpop.eup %6312  ;;  %v7088_v35 = vcombine.low %v1633_v57, %v1643_v11  ;;  %v1467_v16 = vld [vmem:[#allocation2 + $0x48] sm:$0xf]  ;;  %3236 = vrot.lane.b32.xlu1 %v5657_v6, %s6366_s15  ;;  %v3568_v53 = vor.u32 %v3567_v14, %v3564_v38  ;;  %v5495_v60 = vmul.f32 -1.442695, %v7061_v17  ;;  %716 = vst [vmem:[#allocation2 + $0x6c] sm:$0x1] %v715_v31  ;;  %v7105_v18 = vmul.f32 %v6772_v37, %v345_v47 }
  0xb9   : > { %v3578_v45 = vor.u32 %v3577_v22, %v7057_v15  ;;  %v6315_v46 = vpop.eup %6314  ;;  %v641_v32 = vmul.f32 %v6313_v20, %v6927_v7  ;;  %v1645_v61 = vshrl.u32 %v1467_v16, 16  ;;  %v1648_v44 = vshll.u32 %v1467_v16, 16  ;;  %5838 = vmatprep.subr.bf16.mxu0 %v6165_v8  ;;  %6116 = vmatprep.subr.bf16.mxu1 %v6165_v8  ;;  %v7116_v14 = vld [vmem:[%s8636_s2] ss:$0 sm:$0xff]  ;;  %v6168_v31 = vld [vmem:[%s8638_s4 + $0x38] sm:$0xff]  }
  0xba   : > { %v5496_v28 = vmul.f32 -1.442695, %v7066_v29  ;;  %v6317_v52 = vpop.eup %6316  ;;  %v642_v57 = vmul.f32 %v6315_v46, %v6932_v26  ;;  %v7096_v11 = vrot.slane %v3568_v53, 4  ;;  %6320 = vpow2.f32 %v5495_v60  ;;  %v1234_v55 = vld [vmem:[#allocation2 + $0x54] sm:$0xf]  ;;  %v6171_v16 = vld [vmem:[%s8638_s4 + $0xc0] sm:$0xff]  }
  0xbb   : > { %v7098_v54 = vrot.slane %v3578_v45, 4  ;;  %v6319_v48 = vpop.eup %6318  ;;  %v6145_v7 = vld [vmem:[#allocation2 + $0x48] sm:$0xff]   ;;  %v5806_v13 = vpack.c.bf16 %v641_v32, %v641_v32  ;;  %v1647_v5 = vrot.slane %v1645_v61, 4  ;;  %v1469_v3 = vld [vmem:[#allocation2 + $0x50] sm:$0x1]  ;;  %v1650_v33 = vrot.slane %v1648_v44, 5  ;;  %5839 = vmatpush3.bf16.msra.mxu0 %v6166_v40  ;;  %6124 = vmatpush3.bf16.msra.mxu1 %v6166_v40 }
  0xbc   : > { %v1468_v23 = vld [vmem:[#allocation2 + $0x4c] sm:$0xf]  ;;  %6322 = vpow2.f32 %v5496_v28  ;;  %v5807_v26 = vpack.c.bf16 %v642_v57, %v642_v57  ;;  %2410 = vrot.lane.b32.xlu0 %v6145_v7, %s6366_s15  ;;  %v1664_v42 = vshll.u32 %v1469_v3, 16  ;;  %v547_v37 = vadd.f32 1.0, %v6317_v52  ;;  %5840 = vmatprep.subr.bf16.mxu0 %v6167_v25  ;;  %v6172_v53 = vld [vmem:[%s8638_s4 + $0x100] sm:$0xff]  }
  0xbd   : > { %v1654_v49 = vshll.u32 %v1468_v23, 16  ;;  %v1658_v21 = vshrl.u32 %v1468_v23, 16  ;;  %v973_v56 = vshrl.u32 %v5806_v13, 16  ;;  %v976_v24 = vshll.u32 %v5806_v13, 16  ;;  %6117 = vmatprep.subr.bf16.mxu1 %v6167_v25  ;;  %v1238_v32 = vld [vmem:[#allocation2 + $0x5c] sm:$0x1] }
  0xbe   : > { %v981_v59 = vshrl.u32 %v5807_v26, 16  ;;  %v984_v39 = vshll.u32 %v5807_v26, 16  ;;  %v1651_v58 = vor.u32 %v1650_v33, %v1647_v5  ;;  %v548_v38 = vadd.f32 1.0, %v6319_v48  ;;  %v3453_v40 = vld [vmem:[#allocation2 + $0x48] sm:$0xf] }
  0xbf   : > { %v7111_v19 = vrot.slane %v1654_v49, 5  ;;  %v975_v62 = vrot.slane %v973_v56, 7  ;;  %v1660_v6 = vrot.slane %v1658_v21, 4  ;;  %v7119_v22 = vmul.f32 %v7116_v14, %v346_v30  ;;  %5841 = vmatpush3.bf16.msra.mxu0 %v6168_v31  ;;  %6125 = vmatpush3.bf16.msra.mxu1 %v6168_v31  ;;  %v3455_v56 = vld [vmem:[#allocation2 + $0x50] sm:$0x1] }
  0xc0   : > { %v983_v47 = vrot.slane %v981_v59, 7  ;;  %v7124_v8 = vrot.slane %v1651_v58, 4  ;;  %6324 = vrcp.f32 %v547_v37  ;;  %v3574_v20 = vsel %vm6486_vm8, %v7096_v11, %v7057_v15  ;;  %1942 = vrot.lane.b32.xlu0 %v7088_v35, %s6366_s15  ;;  %v2987_v15 = vld [vmem:[#allocation2 + $0x38] sm:$0x1]  ;;  %5938 = vmatprep.subr.bf16.mxu1 %v6171_v16  ;;  %v7165_v63 = vld [vmem:[#allocation2 + $0x3c] sm:$0xe] }
  0xc1   : > { %v978_v45 = vor.u32 %v976_v24, %v975_v62  ;;  %v979_v60 = vrot.slane %v975_v62, 4  ;;  %v1661_v46 = vor.u32 %v1660_v6, %v7111_v19  ;;  %6326 = vrcp.f32 %v548_v38  ;;  %6070 = vmatprep.subr.bf16.mxu0 %v6172_v53  ;;  %v717_v58 = vld [vmem:[#allocation2 + $0x78] sm:$0x1]  ;;  %v7167_v6 = vld [vmem:[#allocation2 + $0x40] sm:$0xf] }
  0xc2   : > { %v986_v61 = vor.u32 %v984_v39, %v983_v47  ;;  %v988_v44 = vrot.slane %v983_v47, 4  ;;  %v1666_v28 = vrot.slane %v1664_v42, 5  ;;  %v3584_v52 = vsel %vm6486_vm8, %v7098_v54, %v7063_v27  ;;  %v3454_v54 = vld [vmem:[#allocation2 + $0x4c] sm:$0xf]  ;;  %v347_v16 = vld [vmem:[%s6447_s12 + $0xa0] sm:$0xff] }
  0xc3   : > { %v1235_v57 = vsel %vm6589_vm10, %v978_v45, %v1234_v55  ;;  %v1662_v11 = vrot.slane %v1661_v46, 4  ;;  %v5690_v35 = vcombine.low %v3574_v20, %v3584_v52  ;;  %v3095_v30 = vrot.slane %v2986_v9, 5 }
  0xc4   : > { %v6321_v48 = vpop.eup %6320  ;;  %v987_v7 = vsel %vm6601_vm11, %v979_v60, %v986_v61  ;;  %1236 = vst [vmem:[#allocation2 + $0x54] sm:$0xf] %v1235_v57  ;;  %v1239_v13 = vsel %vm6421_vm3, %v988_v44, %v1238_v32  ;;  %v3098_v23 = vrot.slane %v2987_v15, 5  ;;  %v762_v27 = vsel %vm6433_vm5, 0, %v761_v10 }
  0xc5   : > { %1237 = vst.msk [vmem:[#allocation2 + $0x58] sm:$0xf] %vm677_vm0, %v987_v7  ;;  %v1657_v26 = vsel %vm6486_vm8, %v7124_v8, %v7111_v19  ;;  %1240 = vst [vmem:[#allocation2 + $0x5c] sm:$0x1] %v1239_v13  ;;  %3927 = vrot.lane.b32.xlu1 %v5690_v35, %s6366_s15  ;;  %v549_v3 = vadd.f32 1.0, %v6321_v48  ;;  %v3096_v33 = vsel %vm6902_vm14, %v5642_v2, %v3095_v30  ;;  %v3097_v49 = vrot.slane %v3095_v30, 4 }
  0xc6   : > { %v6323_v5 = vpop.eup %6322  ;;  %763 = vst [vmem:[#allocation2 + $0x68] sm:$0x1] %v762_v27  ;;  %v1667_v21 = vsel %vm6486_vm8, %v1662_v11, %v1666_v28  ;;  %v3586_v24 = vshrl.u32 %v3453_v40, 16  ;;  %v3589_v42 = vshll.u32 %v3453_v40, 16  ;;  %v3595_v59 = vshll.u32 %v3454_v54, 16 }
  0xc7   : > { %v550_v25 = vadd.f32 1.0, %v6323_v5  ;;  %6328 = vrcp.f32 %v549_v3  ;;  %v3099_v37 = vsel %vm6902_vm14, %v3097_v49, %v3098_v23  ;;  %v3599_v39 = vshrl.u32 %v3454_v54, 16 }
  0xc8   : > { %v5658_v2 = vcombine.low %v3096_v33, %v3099_v37  ;;  %v3588_v19 = vrot.slane %v3586_v24, 4  ;;  %v3591_v62 = vrot.slane %v3589_v42, 5  ;;  %v7169_v38 = vrot.slane %v3595_v59, 5  ;;  %v1241_v37 = vld [vmem:[#allocation2 + $0x60] sm:$0xf] }
  0xc9   : > { %6330 = vrcp.f32 %v550_v25  ;;  %v3601_v9 = vrot.slane %v3599_v39, 4  ;;  %v3605_v10 = vshll.u32 %v3455_v56, 16  ;;  %v5565_v47 = vcombine.low %v1657_v26, %v1667_v21 }
  0xca   : > { %v6325_v31 = vpop.eup %6324  ;;  %3238 = vrot.lane.b32.xlu1 %v5658_v2, %s6366_s15  ;;  %v7174_v55 = vadd.f32 %v6850_v36, %v7105_v18  ;;  %v718_v8 = vsel %vm6421_vm3, 0, %v717_v58  ;;  %v5643_v20 = vrot.slane %v7165_v63, 9  ;;  %v3592_v46 = vor.u32 %v3591_v62, %v3588_v19 }
  0xcb   : > { %v6327_v53 = vpop.eup %6326  ;;  %v643_v45 = vmul.f32 %v6325_v31, %v6983_v41  ;;  %v1470_v60 = vld [vmem:[#allocation2 + $0x54] sm:$0xf]  ;;  %v7181_v32 = vrot.slane %v3605_v10, 5  ;;  %719 = vst [vmem:[#allocation2 + $0x78] sm:$0x1] %v718_v8  ;;  %v3102_v15 = vrot.slane %v7167_v6, 5  ;;  %v3602_v52 = vor.u32 %v3601_v9, %v7169_v38 }
  0xcc   : > { %v6146_v61 = vld [vmem:[#allocation2 + $0x54] sm:$0xff]   ;;  %v644_v18 = vmul.f32 %v6327_v53, %v6990_v50  ;;  %v1669_v28 = vshrl.u32 %v1470_v60, 16  ;;  %v7188_v57 = vadd.f32 %v6850_v36, %v7119_v22  ;;  %v1472_v41 = vld [vmem:[#allocation2 + $0x5c] sm:$0x1]  ;;  %v1672_v35 = vshll.u32 %v1470_v60, 16 }
  0xcd   : > { %v1471_v44 = vld [vmem:[#allocation2 + $0x58] sm:$0xf]  ;;  %v5808_v11 = vpack.c.bf16 %v643_v45, %v643_v45  ;;  %2412 = vrot.lane.b32.xlu0 %v6146_v61, %s6366_s15  ;;  %v1688_v13 = vshll.u32 %v1472_v41, 16  ;;  %v7192_v50 = vmul.f32 %v7116_v14, %v347_v16  ;;  %v3593_v3 = vrot.slane %v3592_v46, 4  ;;  %v1245_v53 = vld [vmem:[#allocation2 + $0x68] sm:$0x1] }
  0xce   : > { %v1678_v30 = vshll.u32 %v1471_v44, 16  ;;  %v1682_v40 = vshrl.u32 %v1471_v44, 16  ;;  %v5809_v48 = vpack.c.bf16 %v644_v18, %v644_v18  ;;  %v1671_v7 = vrot.slane %v1669_v28, 4  ;;  %v2990_v44 = vld [vmem:[#allocation2 + $0x44] sm:$0x1] }
  0xcf   : > { %v990_v23 = vshrl.u32 %v5808_v11, 16  ;;  %v993_v27 = vshll.u32 %v5808_v11, 16  ;;  %v1674_v54 = vrot.slane %v1672_v35, 5  ;;  %v7196_v25 = vrot.slane %v1688_v13, 5  ;;  %v764_v41 = vld [vmem:[#allocation2 + $0x74] sm:$0x1]  ;;  %v7222_v35 = vpop.permute.xlu0 %2400 }
  0xd0   : > { %v7194_v5 = vrot.slane %v1678_v30, 5  ;;  %v998_v36 = vshrl.u32 %v5809_v48, 16  ;;  %v1001_v22 = vshll.u32 %v5809_v48, 16  ;;  %v1684_v26 = vrot.slane %v1682_v40, 4 }
  0xd1   : > { %v6329_v33 = vpop.eup %6328  ;;  %v992_v49 = vrot.slane %v990_v23, 7  ;;  %v1675_v21 = vor.u32 %v1674_v54, %v1671_v7  ;;  %v3603_v56 = vrot.slane %v3602_v52, 4  ;;  %1944 = vrot.lane.b32.xlu0 %v5565_v47, %s6366_s15  ;;  %v5497_v58 = vmul.f32 -1.442695, %v7174_v55  ;;  %v3456_v7 = vld [vmem:[#allocation2 + $0x54] sm:$0xf] }
  0xd2   : > { %v1000_v42 = vrot.slane %v998_v36, 7  ;;  %v1685_v59 = vor.u32 %v1684_v26, %v7194_v5  ;;  %v645_v39 = vmul.f32 %v6329_v33, %v7061_v17  ;;  %v3598_v17 = vsel %vm6486_vm8, %v3593_v3, %v7169_v38 }
  0xd3   : > { %v6331_v24 = vpop.eup %6330  ;;  %v995_v2 = vor.u32 %v993_v27, %v992_v49  ;;  %v996_v19 = vrot.slane %v992_v49, 4  ;;  %v1676_v62 = vrot.slane %v1675_v21, 4  ;;  %v3608_v60 = vsel %vm6486_vm8, %v3603_v56, %v7181_v32  ;;  %v1248_v32 = vld [vmem:[#allocation2 + $0x6c] sm:$0xf] }
  0xd4   : > { %v646_v9 = vmul.f32 %v6331_v24, %v7066_v29  ;;  %v1003_v10 = vor.u32 %v1001_v22, %v1000_v42  ;;  %v1005_v31 = vrot.slane %v1000_v42, 4  ;;  %v1686_v8 = vrot.slane %v1685_v59, 4  ;;  %v348_v49 = vld [vmem:[%s6447_s12 + $0xa8] sm:$0xff]  ;;  %v3458_v42 = vld [vmem:[#allocation2 + $0x5c] sm:$0x1] }
  0xd5   : > { %v5810_v16 = vpack.c.bf16 %v645_v39, %v645_v39  ;;  %v1242_v47 = vsel %vm6589_vm10, %v995_v2, %v1241_v37  ;;  %v1681_v46 = vsel %vm6486_vm8, %v1676_v62, %v7194_v5  ;;  %v5691_v40 = vcombine.low %v3598_v17, %v3608_v60  ;;  %v3457_v5 = vld [vmem:[#allocation2 + $0x58] sm:$0xf]  ;;  %v7243_v39 = vpop.permute.xlu0 %2424 }
  0xd6   : > { %v5811_v45 = vpack.c.bf16 %v646_v9, %v646_v9  ;;  %v1004_v29 = vsel %vm6601_vm11, %v996_v19, %v1003_v10  ;;  %1243 = vst [vmem:[#allocation2 + $0x60] sm:$0xf] %v1242_v47  ;;  %v1691_v38 = vsel %vm6486_vm8, %v1686_v8, %v7196_v25  ;;  %v1246_v11 = vsel %vm6421_vm3, %v1005_v31, %v1245_v53  ;;  %v6355_v10 = vld [vmem:[%s8637_s3] ss:$0 sm:$0xff] }
  0xd7   : > { %v1007_v61 = vshrl.u32 %v5810_v16, 16  ;;  %v1010_v18 = vshll.u32 %v5810_v16, 16  ;;  %1244 = vst.msk [vmem:[#allocation2 + $0x64] sm:$0xf] %vm677_vm0, %v1004_v29  ;;  %1247 = vst [vmem:[#allocation2 + $0x68] sm:$0x1] %v1246_v11  ;;  %6332 = vpow2.f32 %v5497_v58  ;;  %v3103_v23 = vsel %vm6902_vm14, %v5643_v20, %v3102_v15  ;;  %3929 = vrot.lane.b32.xlu1 %v5691_v40, %s6366_s15 }
  0xd8   : > { %v1015_v28 = vshrl.u32 %v5811_v45, 16  ;;  %v1018_v52 = vshll.u32 %v5811_v45, 16  ;;  %v5498_v48 = vmul.f32 -1.442695, %v7188_v57  ;;  %v3104_v27 = vrot.slane %v3102_v15, 4 }
  0xd9   : > { %v1009_v30 = vrot.slane %v1007_v61, 7  ;;  %v3105_v54 = vrot.slane %v2990_v44, 5  ;;  %v765_v26 = vsel %vm6433_vm5, 0, %v764_v41  ;;  %v3610_v20 = vshrl.u32 %v3456_v7, 16  ;;  %v7256_v41 = vpop.permute.xlu1 %1932 }
  0xda   : > { %v1017_v13 = vrot.slane %v1015_v28, 7  ;;  %6334 = vpow2.f32 %v5498_v48  ;;  %766 = vst [vmem:[#allocation2 + $0x74] sm:$0x1] %v765_v26  ;;  %v3613_v21 = vshll.u32 %v3456_v7, 16  ;;  %v3619_v25 = vshll.u32 %v3457_v5, 16 }
  0xdb   : > { %v1012_v36 = vor.u32 %v1010_v18, %v1009_v30  ;;  %v1013_v22 = vrot.slane %v1009_v30, 4  ;;  %v3106_v63 = vsel %vm6902_vm14, %v3104_v27, %v3105_v54  ;;  %v3612_v37 = vrot.slane %v3610_v20, 4 }
  0xdc   : > { %v1020_v3 = vor.u32 %v1018_v52, %v1017_v13  ;;  %v1022_v33 = vrot.slane %v1017_v13, 4  ;;  %v5659_v15 = vcombine.low %v3103_v23, %v3106_v63  ;;  %v3623_v59 = vshrl.u32 %v3457_v5, 16  ;;  %v7260_v13 = vpop.permute.xlu0 %2402 }
  0xdd   : > { %v1249_v6 = vsel %vm6589_vm10, %v1012_v36, %v1248_v32  ;;  %v1473_v24 = vld [vmem:[#allocation2 + $0x60] sm:$0xf]  ;;  %v5566_v2 = vcombine.low %v1681_v46, %v1691_v38  ;;  %v387_v9 = vmul.f32 %v7116_v14, %v348_v49  ;;  %v7252_v31 = vadd.f32 %v6355_v10, %v7192_v50 }
  0xde   : > { %v1021_v56 = vsel %vm6601_vm11, %v1013_v22, %v1020_v3  ;;  %1250 = vst [vmem:[#allocation2 + $0x6c] sm:$0xf] %v1249_v6  ;;  %v6147_v58 = vld [vmem:[#allocation2 + $0x60] sm:$0xff]   ;;  %v1693_v62 = vshrl.u32 %v1473_v24, 16  ;;  %3240 = vrot.lane.b32.xlu1 %v5659_v15, %s6366_s15  ;;  %v1475_v8 = vld [vmem:[#allocation2 + $0x68] sm:$0x1] }
  0xdf   : > { %1251 = vst.msk [vmem:[#allocation2 + $0x70] sm:$0xf] %vm677_vm0, %v1021_v56  ;;  %v1474_v19 = vld [vmem:[#allocation2 + $0x64] sm:$0xf]  ;;  %v1696_v16 = vshll.u32 %v1473_v24, 16  ;;  %v3615_v45 = vrot.slane %v3613_v21, 5  ;;  %2414 = vrot.lane.b32.xlu0 %v6147_v58, %s6366_s15  ;;  %v7263_v36 = vadd.f32 %v6355_v10, %v387_v9  ;;  %v7267_v56 = vpop.permute.xlu1 %1956 }
  0xe0   : > { %v1702_v53 = vshll.u32 %v1474_v19, 16  ;;  %v1706_v47 = vshrl.u32 %v1474_v19, 16  ;;  %v1695_v17 = vrot.slane %v1693_v62, 4  ;;  %v1712_v60 = vshll.u32 %v1475_v8, 16  ;;  %v720_v22 = vld [vmem:[#allocation2 + $0x84] sm:$0x1] }
  0xe1   : > { %v3621_v29 = vrot.slane %v3619_v25, 5  ;;  %v3625_v46 = vrot.slane %v3623_v59, 4  ;;  %v1698_v61 = vrot.slane %v1696_v16, 5  ;;  %v3616_v44 = vor.u32 %v3615_v45, %v3612_v37  ;;  %v6333_v38 = vpop.eup %6332  ;;  %v1252_v52 = vld [vmem:[#allocation2 + $0x74] sm:$0x1] }
  0xe2   : > { %v1704_v14 = vrot.slane %v1702_v53, 5  ;;  %v1708_v18 = vrot.slane %v1706_v47, 4  ;;  %v1714_v28 = vrot.slane %v1712_v60, 5  ;;  %v3629_v32 = vshll.u32 %v3458_v42, 16  ;;  %v767_v25 = vld [vmem:[#allocation2 + $0x80] sm:$0x1] }
  0xe3   : > { %v3626_v50 = vor.u32 %v3625_v46, %v3621_v29  ;;  %v5499_v11 = vmul.f32 -1.442695, %v7252_v31  ;;  %v1699_v30 = vor.u32 %v1698_v61, %v1695_v17  ;;  %v551_v48 = vadd.f32 1.0, %v6333_v38  ;;  %1946 = vrot.lane.b32.xlu0 %v5566_v2, %s6366_s15  ;;  %v2991_v59 = vld [vmem:[#allocation2 + $0x48] sm:$0xe]  ;;  %v7281_v17 = vpop.permute.xlu0 %1934 }
  0xe4   : > { %v1709_v40 = vor.u32 %v1708_v18, %v1704_v14  ;;  %v1253_v7 = vsel %vm6421_vm3, %v1022_v33, %v1252_v52  ;;  %v6335_v23 = vpop.eup %6334  ;;  %v3617_v54 = vrot.slane %v3616_v44, 4  ;;  %v3631_v21 = vrot.slane %v3629_v32, 5  ;;  %v2992_v58 = vld [vmem:[#allocation2 + $0x4c] sm:$0xf]  ;;  %v2993_v10 = vld [vmem:[#allocation2 + $0x50] sm:$0x1] }
  0xe5   : > { %1254 = vst [vmem:[#allocation2 + $0x74] sm:$0x1] %v1253_v7  ;;  %v1476_v27 = vld [vmem:[#allocation2 + $0x6c] sm:$0xf]  ;;  %v3627_v5 = vrot.slane %v3626_v50, 4  ;;  %6336 = vpow2.f32 %v5499_v11  ;;  %v1700_v3 = vrot.slane %v1699_v30, 4  ;;  %v7290_v30 = vpop.permute.xlu1 %2426 }
  0xe6   : > { %v6148_v26 = vld [vmem:[#allocation2 + $0x6c] sm:$0xff]   ;;  %v1710_v63 = vrot.slane %v1709_v40, 4  ;;  %v552_v20 = vadd.f32 1.0, %v6335_v23  ;;  %6338 = vrcp.f32 %v551_v48  ;;  %v1717_v33 = vshrl.u32 %v1476_v27, 16  ;;  %v3459_v45 = vld [vmem:[#allocation2 + $0x60] sm:$0xf] }
  0xe7   : > { %v1477_v49 = vld [vmem:[#allocation2 + $0x70] sm:$0xf]  ;;  %v1720_v6 = vshll.u32 %v1476_v27, 16  ;;  %v3622_v15 = vsel %vm6486_vm8, %v3617_v54, %v3621_v29  ;;  %v1705_v24 = vsel %vm6486_vm8, %v1700_v3, %v1704_v14  ;;  %2416 = vrot.lane.b32.xlu0 %v6148_v26, %s6366_s15  ;;  %v3632_v16 = vsel %vm6486_vm8, %v3627_v5, %v3631_v21  ;;  %v3460_v14 = vld [vmem:[#allocation2 + $0x64] sm:$0xf] }
  0xe8   : > { %v1715_v42 = vsel %vm6486_vm8, %v1710_v63, %v1714_v28  ;;  %6340 = vrcp.f32 %v552_v20  ;;  %v1726_v37 = vshll.u32 %v1477_v49, 16  ;;  %v1719_v19 = vrot.slane %v1717_v33, 4 }
  0xe9   : > { %v5567_v2 = vcombine.low %v1705_v24, %v1715_v42  ;;  %v1722_v62 = vrot.slane %v1720_v6, 5  ;;  %v1730_v9 = vshrl.u32 %v1477_v49, 16  ;;  %v5500_v53 = vmul.f32 -1.442695, %v7263_v36  ;;  %v7301_v6 = vpop.permute.xlu0 %2404  ;;  %v2994_v42 = vld [vmem:[#allocation2 + $0x54] sm:$0xe] }
  0xea   : > { %v7274_v8 = vrot.slane %v1726_v37, 5  ;;  %v721_v47 = vsel %vm6421_vm3, 0, %v720_v22  ;;  %v5692_v46 = vcombine.low %v3622_v15, %v3632_v16  ;;  %v5644_v61 = vrot.slane %v2991_v59, 9  ;;  %v3461_v22 = vld [vmem:[#allocation2 + $0x68] sm:$0x1] }
  0xeb   : > { %v1723_v60 = vor.u32 %v1722_v62, %v1719_v19  ;;  %v1732_v29 = vrot.slane %v1730_v9, 4  ;;  %722 = vst [vmem:[#allocation2 + $0x84] sm:$0x1] %v721_v47  ;;  %6342 = vpow2.f32 %v5500_v53  ;;  %v3109_v44 = vrot.slane %v2992_v58, 5  ;;  %1948 = vrot.lane.b32.xlu0 %v5567_v2, %s6366_s15  ;;  %v2995_v37 = vld [vmem:[#allocation2 + $0x58] sm:$0xf]  ;;  %v7314_v47 = vpop.permute.xlu1 %1958 }
  0xec   : > { %v1478_v18 = vld [vmem:[#allocation2 + $0x74] sm:$0x1]  ;;  %v3112_v38 = vrot.slane %v2993_v10, 5  ;;  %v768_v28 = vsel %vm6433_vm5, 0, %v767_v25  ;;  %3931 = vrot.lane.b32.xlu1 %v5692_v46, %s6366_s15  ;;  %v3634_v11 = vshrl.u32 %v3459_v45, 16  ;;  %v3637_v7 = vshll.u32 %v3459_v45, 16 }
  0xed   : > { %v7286_v52 = vrot.slane %v1723_v60, 4  ;;  %v1733_v50 = vor.u32 %v1732_v29, %v7274_v8  ;;  %v1736_v32 = vshll.u32 %v1478_v18, 16  ;;  %769 = vst [vmem:[#allocation2 + $0x80] sm:$0x1] %v768_v28  ;;  %v3110_v40 = vsel %vm6902_vm14, %v5644_v61, %v3109_v44  ;;  %v2996_v16 = vld [vmem:[#allocation2 + $0x5c] sm:$0x1] }
  0xee   : > { %v3111_v48 = vrot.slane %v3109_v44, 4  ;;  %v3643_v23 = vshll.u32 %v3460_v14, 16  ;;  %v3636_v26 = vrot.slane %v3634_v11, 4  ;;  %v1141_v63 = vrot.slane %v6833_v12, 4  ;;  %v770_v53 = vld [vmem:[#allocation2 + $0x8c] sm:$0x1] }
  0xef   : > { %v6337_v27 = vpop.eup %6336  ;;  %v7294_v54 = vrot.slane %v1733_v50, 4  ;;  %v7296_v5 = vrot.slane %v1736_v32, 5  ;;  %v3639_v33 = vrot.slane %v3637_v7, 5  ;;  %v3647_v24 = vshrl.u32 %v3460_v14, 16  ;;  %v3462_v44 = vld [vmem:[#allocation2 + $0x6c] sm:$0xf] }
  0xf0   : > { %v6339_v3 = vpop.eup %6338  ;;  %v553_v20 = vadd.f32 1.0, %v6337_v27  ;;  %v3113_v49 = vsel %vm6902_vm14, %v3111_v48, %v3112_v38  ;;  %v3645_v25 = vrot.slane %v3643_v23, 5  ;;  %v1729_v58 = vsel %vm6486_vm8, %v7286_v52, %v7274_v8  ;;  %v1255_v28 = vld [vmem:[#allocation2 + $0x78] sm:$0xf]  ;;  %v7320_v48 = vpop.permute.xlu0 %1936 }
  0xf1   : > { %v647_v15 = vmul.f32 %v6339_v3, %v7174_v55  ;;  %v5660_v21 = vcombine.low %v3110_v40, %v3113_v49  ;;  %v3640_v2 = vor.u32 %v3639_v33, %v3636_v26  ;;  %v3653_v19 = vshll.u32 %v3461_v22, 16  ;;  %v3463_v26 = vld [vmem:[#allocation2 + $0x70] sm:$0xf]  ;;  %v7322_v3 = vld [vmem:[#allocation2 + $0x74] sm:$0x1] }
  0xf2   : > { %v6341_v59 = vpop.eup %6340  ;;  %6344 = vrcp.f32 %v553_v20  ;;  %v1739_v55 = vsel %vm6486_vm8, %v7294_v54, %v7296_v5  ;;  %v3649_v10 = vrot.slane %v3647_v24, 4  ;;  %v5645_v29 = vrot.slane %v2994_v42, 9  ;;  %v6200_v52 = vld [vmem:[#allocation2 + $0x54] sm:$0xff]  }
  0xf3   : > { %v648_v62 = vmul.f32 %v6341_v59, %v7188_v57  ;;  %v5812_v9 = vpack.c.bf16 %v647_v15, %v647_v15  ;;  %3242 = vrot.lane.b32.xlu1 %v5660_v21, %s6366_s15  ;;  %v3641_v45 = vrot.slane %v3640_v2, 4  ;;  %v3655_v60 = vrot.slane %v3653_v19, 5  ;;  %1440 = vst.msk [vmem:[#allocation3 + $0x118] sm:$0xff] %vm1432_vm15, %v6200_v52 }
  0xf4   : > { %v3116_v46 = vrot.slane %v2995_v37, 5  ;;  %v3650_v18 = vor.u32 %v3649_v10, %v3645_v25  ;;  %v3119_v11 = vrot.slane %v2996_v16, 5  ;;  %v771_v40 = vsel %vm6433_vm5, 0, %v770_v53  ;;  %v1259_v20 = vld [vmem:[#allocation2 + $0x80] sm:$0x1] }
  0xf5   : > { %v5813_v61 = vpack.c.bf16 %v648_v62, %v648_v62  ;;  %v1024_v14 = vshrl.u32 %v5812_v9, 16  ;;  %v1027_v57 = vshll.u32 %v5812_v9, 16  ;;  %v6343_v38 = vpop.eup %6342  ;;  %v3646_v50 = vsel %vm6486_vm8, %v3641_v45, %v3645_v25  ;;  %772 = vst [vmem:[#allocation2 + $0x8c] sm:$0x1] %v771_v40  ;;  %v7334_v9 = vld [vmem:[#allocation2 + $0x60] sm:$0xe] }
  0xf6   : > { %v3118_v32 = vrot.slane %v3116_v46, 4  ;;  %v554_v22 = vadd.f32 1.0, %v6343_v38  ;;  %v3651_v49 = vrot.slane %v3650_v18, 4  ;;  %v7326_v33 = vsel %vm6902_vm14, %v5645_v29, %v3116_v46  ;;  %v7336_v10 = vld [vmem:[#allocation2 + $0x64] sm:$0xf] }
  0xf7   : > { %v1026_v7 = vrot.slane %v1024_v14, 7  ;;  %v1032_v23 = vshrl.u32 %v5813_v61, 16  ;;  %v1035_v27 = vshll.u32 %v5813_v61, 16  ;;  %v3658_v15 = vshrl.u32 %v3462_v44, 16  ;;  %v7338_v16 = vld [vmem:[#allocation2 + $0x68] sm:$0x1] }
  0xf8   : > { %v3661_v21 = vshll.u32 %v3462_v44, 16  ;;  %6346 = vrcp.f32 %v554_v22  ;;  %v7328_v37 = vpop.permute.xlu1 %2428  ;;  %v3656_v59 = vsel %vm6486_vm8, %v3651_v49, %v3655_v60  ;;  %v3120_v2 = vsel %vm6902_vm14, %v3118_v32, %v3119_v11  ;;  %v7342_v61 = vld [vmem:[#allocation2 + $0x6c] sm:$0xe]  ;;  %v7344_v60 = vld [vmem:[#allocation2 + $0x70] sm:$0xf] }
  0xf9   : > { %v1029_v25 = vor.u32 %v1027_v57, %v1026_v7  ;;  %v1030_v24 = vrot.slane %v1026_v7, 4  ;;  %v1034_v42 = vrot.slane %v1032_v23, 7  ;;  %v3660_v19 = vrot.slane %v3658_v15, 4  ;;  %v7356_v7 = vld [vmem:[#allocation2 + $0x74] sm:$0x1]  ;;  %v6164_v23 = vld [vmem:[#allocation2] sm:$0xff]  }
  0xfa   : > { %v3663_v62 = vrot.slane %v3661_v21, 5  ;;  %v5693_v46 = vcombine.low %v3646_v50, %v3656_v59  ;;  %v3667_v18 = vshll.u32 %v3463_v26, 16  ;;  %v3671_v44 = vshrl.u32 %v3463_v26, 16  ;;  %v6170_v22 = vld [vmem:[#allocation2 + $0xc] sm:$0xff]   ;;  %v6173_v26 = vld [vmem:[#allocation2 + $0x9c] sm:$0xff]   ;;  %v6181_v15 = vld [vmem:[#allocation2 + $0x24] sm:$0xff]  }
  0xfb   : > { %v1037_v53 = vor.u32 %v1035_v27, %v1034_v42  ;;  %v1039_v45 = vrot.slane %v1034_v42, 4  ;;  %v1256_v29 = vsel %vm6589_vm10, %v1029_v25, %v1255_v28  ;;  %v3677_v38 = vshll.u32 %v7322_v3, 16  ;;  %v7347_v32 = vpop.permute.xlu0 %2406  ;;  %v6169_v27 = vld [vmem:[#allocation2 + $0x90] sm:$0xff]   ;;  %v6175_v3 = vld [vmem:[#allocation2 + $0x18] sm:$0xff]   ;;  %v6178_v49 = vld [vmem:[#allocation2 + $0xa8] sm:$0xff]   ;;  %1433 = vst.msk [vmem:[#allocation3] sm:$0xff] %vm1432_vm15, %v6164_v23 }
  0xfc   : > { %v6345_v14 = vpop.eup %6344  ;;  %1257 = vst [vmem:[#allocation2 + $0x78] sm:$0xf] %v1256_v29  ;;  %v3664_v57 = vor.u32 %v3663_v62, %v3660_v19  ;;  %3933 = vrot.lane.b32.xlu1 %v5693_v46, %s6366_s15  ;;  %v5661_v50 = vcombine.low %v7326_v33, %v3120_v2  ;;  %v6184_v21 = vld [vmem:[#allocation2 + $0xb4] sm:$0xff]   ;;  %v7373_v42 = vrot.slane %v3667_v18, 5  ;;  %v3673_v59 = vrot.slane %v3671_v44, 4  ;;  %v6195_v2 = vld [vmem:[#allocation2 + $0x24] sm:$0xff]   ;;  %v1961_v8 = vpop.permute.xlu1 %1960 }
  0xfd   : > { %v1038_v11 = vsel %vm6601_vm11, %v1030_v24, %v1037_v53  ;;  %v649_v40 = vmul.f32 %v6345_v14, %v7252_v31  ;;  %v1260_v28 = vsel %vm6421_vm3, %v1039_v45, %v1259_v20  ;;  %v6187_v25 = vld [vmem:[#allocation2 + $0x30] sm:$0xff]   ;;  %v6188_v24 = vld [vmem:[#allocation2 + $0x18] sm:$0xff]   ;;  %v7369_v20 = vcombine.low %v1729_v58, %v1739_v55  ;;  %v6198_v19 = vld [vmem:[#allocation2 + $0x48] sm:$0xff]   ;;  %1445 = vst.msk [vmem:[#allocation3 + $0x1e0] sm:$0xff] %vm1432_vm15, %v6169_v27 }
  0xfe   : > { %v6194_v31 = vld [vmem:[#allocation2 + $0x3c] sm:$0xff]   ;;  %1258 = vst.msk [vmem:[#allocation2 + $0x7c] sm:$0xf] %vm677_vm0, %v1038_v11  ;;  %1261 = vst [vmem:[#allocation2 + $0x80] sm:$0x1] %v1260_v28  ;;  %v7371_v33 = vrot.slane %v3664_v57, 4  ;;  %v3674_v29 = vor.u32 %v3673_v59, %v7373_v42 }
  0xff   : > { %v6199_v62 = vld [vmem:[#allocation2 + $0x30] sm:$0xff]   ;;  %v7375_v53 = vpack.c.bf16 %v649_v40, %v649_v40  ;;  %v5646_v54 = vrot.slane %v7334_v9, 9  ;;  %v3123_v5 = vrot.slane %v7336_v10, 5  ;;  %v3126_v45 = vrot.slane %v7338_v16, 5  ;;  %v6201_v58 = vld [vmem:[#allocation2 + $0x3c] sm:$0xff]   ;;  %v1939_v16 = vpop.permute.xlu0 %1938  ;;  %v6204_v11 = vld [vmem:[#allocation2 + $0x48] sm:$0xff]  }
 0x100   : > { %v6203_v55 = vld [vmem:[#allocation2 + $0x60] sm:$0xff]   ;;  %v3679_v46 = vrot.slane %v3677_v38, 5  ;;  %v5647_v14 = vrot.slane %v7342_v61, 9  ;;  %v3130_v57 = vrot.slane %v7344_v60, 5  ;;  %3244 = vrot.lane.b32.xlu1 %v5661_v50, %s6366_s15  ;;  %v3670_v9 = vsel %vm6486_vm8, %v7371_v33, %v7373_v42  ;;  %v6205_v60 = vld [vmem:[#allocation2 + $0x6c] sm:$0xff]   ;;  %1434 = vst.msk [vmem:[#allocation3 + $0x28] sm:$0xff] %vm1432_vm15, %v6170_v22 }
 0x101   : > { %v1041_v18 = vshrl.u32 %v7375_v53, 16  ;;  %v1044_v44 = vshll.u32 %v7375_v53, 16  ;;  %v3125_v10 = vrot.slane %v3123_v5, 4  ;;  %v3675_v40 = vrot.slane %v3674_v29, 4  ;;  %1446 = vst.msk [vmem:[#allocation3 + $0x208] sm:$0xff] %vm1432_vm15, %v6173_v26  ;;  %1435 = vst.msk [vmem:[#allocation3 + $0x50] sm:$0xff] %vm1432_vm15, %v6175_v3 }
 0x102   : > { %v7390_v38 = vrot.slane %v3130_v57, 4  ;;  %v3133_v61 = vrot.slane %v7356_v7, 5  ;;  %v6347_v28 = vpop.eup %6346  ;;  %v7397_v50 = vsel %vm6902_vm14, %v5646_v54, %v3123_v5  ;;  %1447 = vst.msk [vmem:[#allocation3 + $0x230] sm:$0xff] %vm1432_vm15, %v6178_v49  ;;  %1436 = vst.msk [vmem:[#allocation3 + $0x78] sm:$0xff] %vm1432_vm15, %v6181_v15  ;;  %v1262_v27 = vld [vmem:[#allocation2 + $0x84] sm:$0xf] }
 0x103   : > { %v7393_v59 = vrot.slane %v1041_v18, 7  ;;  %v1479_v53 = vld [vmem:[#allocation2 + $0x78] sm:$0xf]  ;;  %v7401_v33 = vsel %vm6902_vm14, %v3125_v10, %v3126_v45  ;;  %1448 = vst.msk [vmem:[#allocation3 + $0x258] sm:$0xff] %vm1432_vm15, %v6184_v21  ;;  %1437 = vst.msk [vmem:[#allocation3 + $0xa0] sm:$0xff] %vm1432_vm15, %v6187_v25  ;;  %v650_v23 = vmul.f32 %v6347_v28, %v7263_v36  ;;  %v3680_v3 = vsel %vm6486_vm8, %v3675_v40, %v3679_v46 }
 0x104   : > { %3425 = vst.msk [vmem:[#allocation3 + $0x18] sm:$0xff] %vm1432_vm15, %v6188_v24  ;;  %1438 = vst.msk [vmem:[#allocation3 + $0xc8] sm:$0xff] %vm1432_vm15, %v6194_v31  ;;  %v1741_v22 = vshrl.u32 %v1479_v53, 16  ;;  %v1744_v26 = vshll.u32 %v1479_v53, 16  ;;  %v3465_v49 = vld [vmem:[#allocation2 + $0x78] sm:$0xf]  ;;  %v5694_v21 = vcombine.low %v3670_v9, %v3680_v3  ;;  %v5662_v5 = vcombine.low %v7397_v50, %v7401_v33 }
 0x105   : > { %3426 = vst.msk [vmem:[#allocation3 + $0x40] sm:$0xff] %vm1432_vm15, %v6195_v2  ;;  %1439 = vst.msk [vmem:[#allocation3 + $0xf0] sm:$0xff] %vm1432_vm15, %v6198_v19  ;;  %v6149_v36 = vld [vmem:[#allocation2 + $0x78] sm:$0xff]   ;;  %v1481_v25 = vld [vmem:[#allocation2 + $0x80] sm:$0x1]  ;;  %v3682_v34 = vshrl.u32 %v3465_v49, 16 }
 0x106   : > { %3427 = vst.msk [vmem:[#allocation3 + $0x68] sm:$0xff] %vm1432_vm15, %v6199_v62  ;;  %3428 = vst.msk [vmem:[#allocation3 + $0x90] sm:$0xff] %vm1432_vm15, %v6201_v58  ;;  %v1480_v15 = vld [vmem:[#allocation2 + $0x7c] sm:$0xf]  ;;  %v1743_v24 = vrot.slane %v1741_v22, 4  ;;  %v1746_v31 = vrot.slane %v1744_v26, 5  ;;  %2418 = vrot.lane.b32.xlu0 %v6149_v36, %s6366_s15  ;;  %3935 = vrot.lane.b32.xlu1 %v5694_v21, %s6366_s15 }
 0x107   : > { %1441 = vst.msk [vmem:[#allocation3 + $0x140] sm:$0xff] %vm1432_vm15, %v6203_v55  ;;  %3429 = vst.msk [vmem:[#allocation3 + $0xb8] sm:$0xff] %vm1432_vm15, %v6204_v11  ;;  %v1750_v42 = vshll.u32 %v1480_v15, 16  ;;  %v6206_v2 = vld [vmem:[#allocation2 + $0x54] sm:$0xff]   ;;  %v1754_v62 = vshrl.u32 %v1480_v15, 16  ;;  %v1760_v54 = vshll.u32 %v1481_v25, 16 }
 0x108   : > { %1981 = vst.msk [vmem:[#allocation3] sm:$0xff] %vm1980_vm1, %v7256_v41  ;;  %1993 = vst.msk [vmem:[#allocation3 + $0x1e0] sm:$0xff] %vm1980_vm1, %v7267_v56  ;;  %v1046_v41 = vor.u32 %v1044_v44, %v7393_v59  ;;  %v1047_v56 = vrot.slane %v7393_v59, 4  ;;  %v3466_v45 = vld [vmem:[#allocation2 + $0x7c] sm:$0xf]  ;;  %v1747_v58 = vor.u32 %v1746_v31, %v1743_v24  ;;  %v3684_v7 = vrot.slane %v3682_v34, 4 }
 0x109   : > { %1982 = vst.msk [vmem:[#allocation3 + $0x28] sm:$0xff] %vm1980_vm1, %v7281_v17  ;;  %1994 = vst.msk [vmem:[#allocation3 + $0x208] sm:$0xff] %vm1980_vm1, %v7314_v47  ;;  %v7441_v17 = vsel %vm6902_vm14, %v5647_v14, %v3130_v57  ;;  %v7443_v47 = vpop.permute.xlu1 %2430  ;;  %v7451_v55 = vrot.slane %v1750_v42, 5  ;;  %v3467_v29 = vld [vmem:[#allocation2 + $0x80] sm:$0x1]  ;;  %v1756_v46 = vrot.slane %v1754_v62, 4  ;;  %v3134_v57 = vsel %vm6902_vm14, %v7390_v38, %v3133_v61 }
 0x10a   : > { %1983 = vst.msk [vmem:[#allocation3 + $0x50] sm:$0xff] %vm1980_vm1, %v7320_v48  ;;  %1995 = vst.msk [vmem:[#allocation3 + $0x230] sm:$0xff] %vm1980_vm1, %v1961_v8  ;;  %v5815_v48 = vpack.c.bf16 %v650_v23, %v650_v23  ;;  %v1263_v19 = vsel %vm6589_vm10, %v1046_v41, %v1262_v27  ;;  %v3685_v14 = vshll.u32 %v3465_v49, 16  ;;  %v7459_v9 = vrot.slane %v1760_v54, 5  ;;  %v1266_v10 = vld [vmem:[#allocation2 + $0x8c] sm:$0x1]  ;;  %1950 = vrot.lane.b32.xlu0 %v7369_v20, %s6366_s15 }
 0x10b   : > { %1984 = vst.msk [vmem:[#allocation3 + $0x78] sm:$0xff] %vm1980_vm1, %v1939_v16  ;;  %1264 = vst [vmem:[#allocation2 + $0x84] sm:$0xf] %v1263_v19  ;;  %v3691_v16 = vshll.u32 %v3466_v45, 16  ;;  %v3695_v11 = vshrl.u32 %v3466_v45, 16  ;;  %v1757_v40 = vor.u32 %v1756_v46, %v7451_v55  ;;  %3246 = vrot.lane.b32.xlu1 %v5662_v5, %s6366_s15  ;;  %v3701_v28 = vshll.u32 %v3467_v29, 16 }
 0x10c   : > { %1442 = vst.msk [vmem:[#allocation3 + $0x168] sm:$0xff] %vm1432_vm15, %v6205_v60  ;;  %v1049_v8 = vshrl.u32 %v5815_v48, 16  ;;  %v1052_v52 = vshll.u32 %v5815_v48, 16  ;;  %3430 = vst.msk [vmem:[#allocation3 + $0xe0] sm:$0xff] %vm1432_vm15, %v6206_v2  ;;  %v3687_v60 = vrot.slane %v3685_v14, 5  ;;  %v1748_v53 = vrot.slane %v1747_v58, 4 }
 0x10d   : > { %v1963_v18 = vpop.permute.xlu1 %1962  ;;  %v3003_v38 = vld [vmem:[#allocation2 + $0x78] sm:$0xe]  ;;  %v7466_v50 = vrot.slane %v3691_v16, 5  ;;  %v3004_v33 = vld [vmem:[#allocation2 + $0x7c] sm:$0xf]  ;;  %v1758_v23 = vrot.slane %v1757_v40, 4  ;;  %v5663_v41 = vcombine.low %v7441_v17, %v3134_v57 }
 0x10e   : > { %v1051_v44 = vrot.slane %v1049_v8, 7  ;;  %1996 = vst.msk [vmem:[#allocation3 + $0x258] sm:$0xff] %vm1980_vm1, %v1963_v18  ;;  %v3688_v27 = vor.u32 %v3687_v60, %v3684_v7  ;;  %v3697_v22 = vrot.slane %v3695_v11, 4  ;;  %v3703_v26 = vrot.slane %v3701_v28, 5  ;;  %v3005_v3 = vld [vmem:[#allocation2 + $0x80] sm:$0x1] }
 0x10f   : > { %v5648_v15 = vrot.slane %v3003_v38, 9  ;;  %v1997_v21 = vld [vmem:[#allocation2] sm:$0xe]  ;;  %v6207_v48 = vld [vmem:[#allocation2 + $0x78] sm:$0xff]   ;;  %v3137_v42 = vrot.slane %v3004_v33, 5  ;;  %3248 = vrot.lane.b32.xlu1 %v5663_v41, %s6366_s15  ;;  %v3140_v62 = vrot.slane %v3005_v3, 5  ;;  %v1763_v5 = vsel %vm6486_vm8, %v1758_v23, %v7459_v9 }
 0x110   : > { %v1054_v61 = vor.u32 %v1052_v52, %v1051_v44  ;;  %v1056_v59 = vrot.slane %v1051_v44, 4  ;;  %v3689_v24 = vrot.slane %v3688_v27, 4  ;;  %v3698_v31 = vor.u32 %v3697_v22, %v7466_v50  ;;  %1443 = vst.msk [vmem:[#allocation3 + $0x190] sm:$0xff] %vm1432_vm15, %v6207_v48  ;;  %v6208_v54 = vld [vmem:[#allocation2 + $0x60] sm:$0xff]   ;;  %v1999_v58 = vld [vmem:[#allocation2 + $0x8] sm:$0x1] }
 0x111   : > { %v3922_v20 = vpop.permute.xlu1 %3921  ;;  %v3139_v34 = vrot.slane %v3137_v42, 4  ;;  %v2033_v14 = vld [vmem:[#allocation2 + $0x90] sm:$0xe]  ;;  %3431 = vst.msk [vmem:[#allocation3 + $0x108] sm:$0xff] %vm1432_vm15, %v6208_v54  ;;  %v2098_v7 = vrot.slane %v1998_v43, 5  ;;  %v2101_v38 = vrot.slane %v1999_v58, 5 }
 0x112   : > { %v1055_v49 = vsel %vm6601_vm11, %v1047_v56, %v1054_v61  ;;  %v1267_v36 = vsel %vm6421_vm3, %v1056_v59, %v1266_v10  ;;  %3969 = vst.msk [vmem:[#allocation3 + $0x18] sm:$0xff] %vm1980_vm1, %v3922_v20  ;;  %v1482_v25 = vld [vmem:[#allocation2 + $0x84] sm:$0xf]  ;;  %v1753_v56 = vsel %vm6486_vm8, %v1748_v53, %v7451_v55  ;;  %v3699_v45 = vrot.slane %v3698_v31, 4  ;;  %v2034_v61 = vld [vmem:[#allocation2 + $0x94] sm:$0xf] }
 0x113   : > { %1265 = vst.msk [vmem:[#allocation2 + $0x88] sm:$0xf] %vm677_vm0, %v1055_v49  ;;  %1268 = vst [vmem:[#allocation2 + $0x8c] sm:$0x1] %v1267_v36  ;;  %v1765_v2 = vshrl.u32 %v1482_v25, 16  ;;  %v1768_v17 = vshll.u32 %v1482_v25, 16  ;;  %v3138_v55 = vsel %vm6902_vm14, %v5648_v15, %v3137_v42  ;;  %v3694_v18 = vsel %vm6486_vm8, %v3689_v24, %v7466_v50 }
 0x114   : > { %v3468_v19 = vld [vmem:[#allocation2 + $0x84] sm:$0xf]  ;;  %v5575_v10 = vrot.slane %v1997_v21, 9  ;;  %v3704_v11 = vsel %vm6486_vm8, %v3699_v45, %v3703_v26  ;;  %v3141_v40 = vsel %vm6902_vm14, %v3139_v34, %v3140_v62  ;;  %v5587_v59 = vrot.slane %v2033_v14, 9 }
 0x115   : > { %v3706_v8 = vshrl.u32 %v3468_v19, 16  ;;  %v3709_v52 = vshll.u32 %v3468_v19, 16  ;;  %v1767_v29 = vrot.slane %v1765_v2, 4  ;;  %v1770_v46 = vrot.slane %v1768_v17, 5  ;;  %v7486_v57 = vpop.permute.xlu1 %3232  ;;  %v2035_v2 = vld [vmem:[#allocation2 + $0x98] sm:$0x1] }
 0x116   : > { %v5664_v28 = vcombine.low %v3138_v55, %v3141_v40  ;;  %v5569_v33 = vcombine.low %v1753_v56, %v1763_v5  ;;  %v7498_v20 = vcombine.low %v3694_v18, %v3704_v11  ;;  %v2099_v49 = vsel %vm6902_vm14, %v5575_v10, %v2098_v7  ;;  %v7504_v25 = vpop.permute.xlu0 %2408  ;;  %v3471_v5 = vld [vmem:[#allocation2 + $0x90] sm:$0xf] }
 0x117   : > { %v3708_v44 = vrot.slane %v3706_v8, 4  ;;  %v3711_v9 = vrot.slane %v3709_v52, 5  ;;  %v1771_v16 = vor.u32 %v1770_v46, %v1767_v29  ;;  %v2100_v56 = vrot.slane %v2098_v7, 4  ;;  %v3472_v29 = vld [vmem:[#allocation2 + $0x94] sm:$0xf] }
 0x118   : > { %3250 = vrot.lane.b32.xlu1 %v5664_v28, %s6366_s15  ;;  %v2182_v54 = vrot.slane %v2034_v61, 5  ;;  %v6151_v55 = vld [vmem:[#allocation2 + $0x90] sm:$0xff]   ;;  %v2185_v40 = vrot.slane %v2035_v2, 5  ;;  %v3730_v7 = vshrl.u32 %v3471_v5, 16 }
 0x119   : > { %v3712_v60 = vor.u32 %v3711_v9, %v3708_v44  ;;  %v7496_v50 = vrot.slane %v1771_v16, 4  ;;  %v3924_v24 = vpop.permute.xlu1 %3923  ;;  %v2102_v58 = vsel %vm6902_vm14, %v2100_v56, %v2101_v38  ;;  %v3473_v9 = vld [vmem:[#allocation2 + $0x98] sm:$0x1]  ;;  %v6211_v2 = vld [vmem:[#allocation2 + $0x6c] sm:$0xff]  }
 0x11a   : > { %v6150_v53 = vld [vmem:[#allocation2 + $0x84] sm:$0xff]   ;;  %v1484_v27 = vld [vmem:[#allocation2 + $0x8c] sm:$0x1]  ;;  %3970 = vst.msk [vmem:[#allocation3 + $0x40] sm:$0xff] %vm1980_vm1, %v3924_v24  ;;  %v5591_v18 = vcombine.low %v2099_v49, %v2102_v58  ;;  %v2183_v44 = vsel %vm6902_vm14, %v5587_v59, %v2182_v54  ;;  %v1941_v10 = vpop.permute.xlu0 %1940  ;;  %v2184_v11 = vrot.slane %v2182_v54, 4  ;;  %v3749_v49 = vshll.u32 %v3473_v9, 16 }
 0x11b   : > { %v1483_v23 = vld [vmem:[#allocation2 + $0x88] sm:$0xf]  ;;  %2420 = vrot.lane.b32.xlu0 %v6150_v53, %s6366_s15  ;;  %v1784_v36 = vshll.u32 %v1484_v27, 16  ;;  %v3470_v41 = vld [vmem:[#allocation2 + $0x8c] sm:$0x1]  ;;  %v3713_v15 = vrot.slane %v3712_v60, 4 }
 0x11c   : > { %v1774_v22 = vshll.u32 %v1483_v23, 16  ;;  %v1778_v3 = vshrl.u32 %v1483_v23, 16  ;;  %v3469_v26 = vld [vmem:[#allocation2 + $0x88] sm:$0xf]  ;;  %v3725_v43 = vshll.u32 %v3470_v41, 16  ;;  %1985 = vst.msk [vmem:[#allocation3 + $0xa0] sm:$0xff] %vm1980_vm1, %v1941_v10 }
 0x11d   : > { %v3715_v21 = vshll.u32 %v3469_v26, 16  ;;  %v3719_v48 = vshrl.u32 %v3469_v26, 16  ;;  %v1786_v17 = vrot.slane %v1784_v36, 5  ;;  %v6210_v46 = vld [vmem:[#allocation2 + $0x84] sm:$0xff]   ;;  %v3008_v38 = vld [vmem:[#allocation2 + $0x8c] sm:$0x1]  ;;  %v7531_v56 = vpop.permute.xlu1 %3234 }
 0x11e   : > { %v1776_v31 = vrot.slane %v1774_v22, 5  ;;  %v1780_v42 = vrot.slane %v1778_v3, 4  ;;  %v3727_v52 = vrot.slane %v3725_v43, 5  ;;  %v3006_v60 = vld [vmem:[#allocation2 + $0x84] sm:$0xe]  ;;  %1444 = vst.msk [vmem:[#allocation3 + $0x1b8] sm:$0xff] %vm1432_vm15, %v6210_v46  ;;  %v2186_v3 = vsel %vm6902_vm14, %v2184_v11, %v2185_v40 }
 0x11f   : > { %v3717_v19 = vrot.slane %v3715_v21, 5  ;;  %v3721_v62 = vrot.slane %v3719_v48, 4  ;;  %1952 = vrot.lane.b32.xlu0 %v5569_v33, %s6366_s15  ;;  %v3007_v28 = vld [vmem:[#allocation2 + $0x88] sm:$0xf]  ;;  %2272 = vst.msk [vmem:[#allocation3 + $0x8] sm:$0xff] %vm1432_vm15, %v5591_v18  ;;  %v3733_v53 = vshll.u32 %v3471_v5, 16 }
 0x120   : > { %v1777_v45 = vsel %vm6486_vm8, %v7496_v50, %v1776_v31  ;;  %v1781_v8 = vor.u32 %v1780_v42, %v1776_v31  ;;  %v3739_v33 = vshll.u32 %v3472_v29, 16  ;;  %v3743_v23 = vshrl.u32 %v3472_v29, 16  ;;  %v2001_v59 = vld [vmem:[#allocation2 + $0x10] sm:$0xf]  ;;  %v2002_v50 = vld [vmem:[#allocation2 + $0x14] sm:$0x1] }
 0x121   : > { %v3718_v34 = vsel %vm6486_vm8, %v3713_v15, %v3717_v19  ;;  %v3722_v14 = vor.u32 %v3721_v62, %v3717_v19  ;;  %v2000_v27 = vld [vmem:[#allocation2 + $0xc] sm:$0xe]  ;;  %2448 = vst.msk [vmem:[#allocation3 + $0x8] sm:$0xff] %vm1980_vm1, %v7222_v35  ;;  %v3732_v26 = vrot.slane %v3730_v7, 4  ;;  %v5603_v15 = vcombine.low %v2183_v44, %v2186_v3  ;;  %v2036_v48 = vld [vmem:[#allocation2 + $0x9c] sm:$0xe] }
 0x122   : > { %v1782_v16 = vrot.slane %v1781_v8, 4  ;;  %v3735_v21 = vrot.slane %v3733_v53, 5  ;;  %v3741_v31 = vrot.slane %v3739_v33, 5  ;;  %v3745_v42 = vrot.slane %v3743_v23, 4  ;;  %v2037_v35 = vld [vmem:[#allocation2 + $0xa0] sm:$0xf] }
 0x123   : > { %v3723_v61 = vrot.slane %v3722_v14, 4  ;;  %2422 = vrot.lane.b32.xlu0 %v6151_v55, %s6366_s15  ;;  %v3751_v43 = vrot.slane %v3749_v49, 5  ;;  %2284 = vst.msk [vmem:[#allocation3 + $0x1e8] sm:$0xff] %vm1432_vm15, %v5603_v15  ;;  %v5649_v19 = vrot.slane %v3006_v60, 9  ;;  %v3144_v62 = vrot.slane %v3007_v28, 5  ;;  %3432 = vst.msk [vmem:[#allocation3 + $0x130] sm:$0xff] %vm1432_vm15, %v6211_v2 }
 0x124   : > { %v1787_v22 = vsel %vm6486_vm8, %v1782_v16, %v1786_v17  ;;  %v3736_v17 = vor.u32 %v3735_v21, %v3732_v26  ;;  %v3147_v54 = vrot.slane %v3008_v38, 5  ;;  %v2038_v5 = vld [vmem:[#allocation2 + $0xa4] sm:$0x1]  ;;  %2460 = vst.msk [vmem:[#allocation3 + $0x1e8] sm:$0xff] %vm1980_vm1, %v7243_v39  ;;  %v3746_v8 = vor.u32 %v3745_v42, %v3741_v31  ;;  %v3474_v46 = vld [vmem:[#allocation2 + $0x9c] sm:$0xf] }
 0x125   : > { %v5570_v36 = vcombine.low %v1777_v45, %v1787_v22  ;;  %v3728_v41 = vsel %vm6486_vm8, %v3723_v61, %v3727_v52  ;;  %v6212_v45 = vld [vmem:[#allocation2 + $0x78] sm:$0xff]   ;;  %v2105_v52 = vrot.slane %v2001_v59, 5  ;;  %v2108_v58 = vrot.slane %v2002_v50, 5  ;;  %v3475_v44 = vld [vmem:[#allocation2 + $0xa0] sm:$0xf]  ;;  %v6192_v59 = vld [vmem:[%s8638_s4 + $0x108] sm:$0xff]  }
 0x126   : > { %v7529_v24 = vcombine.low %v3718_v34, %v3728_v41  ;;  %v5576_v29 = vrot.slane %v2000_v27, 9  ;;  %v3737_v55 = vrot.slane %v3736_v17, 4  ;;  %v3145_v34 = vsel %vm6902_vm14, %v5649_v19, %v3144_v62  ;;  %v3476_v9 = vld [vmem:[#allocation2 + $0xa4] sm:$0x1]  ;;  %3433 = vst.msk [vmem:[#allocation3 + $0x158] sm:$0xff] %vm1432_vm15, %v6212_v45  ;;  %v4273_v11 = vld [vmem:[#allocation3] sm:$0xff]  ;;  %v3926_v49 = vpop.permute.xlu1 %3925 }
 0x127   : > { %1954 = vrot.lane.b32.xlu0 %v5570_v36, %s6366_s15  ;;  %v3146_v14 = vrot.slane %v3144_v62, 4  ;;  %v5588_v18 = vrot.slane %v2036_v48, 9  ;;  %v3747_v39 = vrot.slane %v3746_v8, 4  ;;  %v2107_v10 = vrot.slane %v2105_v52, 4  ;;  %v3009_v7 = vld [vmem:[#allocation2 + $0x90] sm:$0xe] }
 0x128   : > { %v2106_v16 = vsel %vm6902_vm14, %v5576_v29, %v2105_v52  ;;  %v2189_v40 = vrot.slane %v2037_v35, 5  ;;  %v3010_v60 = vld [vmem:[#allocation2 + $0x94] sm:$0xf]  ;;  %v7543_v28 = vld [vmem:[#allocation2 + $0x98] sm:$0x1]  ;;  %v3742_v38 = vsel %vm6486_vm8, %v3737_v55, %v3741_v31  ;;  %v4274_v53 = vld [vmem:[#allocation3 + $0x8] sm:$0xff] }
 0x129   : > { %v3148_v61 = vsel %vm6902_vm14, %v3146_v14, %v3147_v54  ;;  %v2192_v33 = vrot.slane %v2038_v5, 5  ;;  %v3754_v23 = vshrl.u32 %v3474_v46, 16  ;;  %v3752_v50 = vsel %vm6486_vm8, %v3747_v39, %v3751_v43  ;;  %4728 = vmatprep.mubr.bf16.mxu0 %v4274_v53  ;;  %v7558_v26 = vld [vmem:[#allocation2 + $0x18] sm:$0xe]  ;;  %v7564_v48 = vld [vmem:[#allocation2 + $0x1c] sm:$0xf] }
 0x12a   : > { %v5665_v27 = vcombine.low %v3145_v34, %v3148_v61  ;;  %v2109_v22 = vsel %vm6902_vm14, %v2107_v10, %v2108_v58  ;;  %v2190_v3 = vsel %vm6902_vm14, %v5588_v18, %v2189_v40  ;;  %v7562_v36 = vcombine.low %v3742_v38, %v3752_v50  ;;  %4729 = vmatmul.mubr.bf16.vlgmr.msra.gmra.mrb[0].mxu0 %v4273_v11  ;;  %v7566_v31 = vld [vmem:[#allocation2 + $0x20] sm:$0x1]  ;;  %v4333_v17 = vld [vmem:[#allocation3 + $0x1e0] sm:$0xff]  ;;  %v2039_v62 = vld [vmem:[#allocation2 + $0xa8] sm:$0xe] }
 0x12b   : > { %3937 = vrot.lane.b32.xlu0 %v7498_v20, %s6366_s15  ;;  %v5592_v41 = vcombine.low %v2106_v16, %v2109_v22  ;;  %v2191_v15 = vrot.slane %v2189_v40, 4  ;;  %v3756_v21 = vrot.slane %v3754_v23, 4  ;;  %3971 = vst.msk [vmem:[#allocation3 + $0x68] sm:$0xff] %vm1980_vm1, %v3926_v49  ;;  %v3757_v42 = vshll.u32 %v3474_v46, 16  ;;  %v6174_v20 = vld [vmem:[%s8638_s4 + $0x80] sm:$0xff]   ;;  %v6176_v29 = vld [vmem:[%s8638_s4 + $0xc8] sm:$0xff]  }
 0x12c   : > { %3252 = vrot.lane.b32.xlu1 %v5665_v27, %s6366_s15  ;;  %v3763_v43 = vshll.u32 %v3475_v44, 16  ;;  %v3767_v35 = vshrl.u32 %v3475_v44, 16  ;;  %v3773_v2 = vshll.u32 %v3476_v9, 16  ;;  %v6356_v19 = vld [vmem:[%s8638_s4 + $0x100] sm:$0xff]   ;;  %v2040_v54 = vld [vmem:[#allocation2 + $0xac] sm:$0xf] }
 0x12d   : > { %6071 = vmatpush3.bf16.msra.mxu0 %v6356_v19  ;;  %2273 = vst.msk [vmem:[#allocation3 + $0x30] sm:$0xff] %vm1432_vm15, %v5592_v41  ;;  %v2193_v5 = vsel %vm6902_vm14, %v2191_v15, %v2192_v33  ;;  %v5650_v45 = vrot.slane %v3009_v7, 9  ;;  %v3151_v8 = vrot.slane %v3010_v60, 5  ;;  %v3154_v52 = vrot.slane %v7543_v28, 5  ;;  %v4334_v58 = vld [vmem:[#allocation3 + $0x1e8] sm:$0xff]  ;;  %v7586_v46 = vld [vmem:[%s8638_s4 + $0x110] sm:$0xff]  }
 0x12e   : > { %6072 = vmatprep.subr.bf16.mxu0 %v6192_v59  ;;  %2449 = vst.msk [vmem:[#allocation3 + $0x30] sm:$0xff] %vm1980_vm1, %v7260_v13  ;;  %v5604_v55 = vcombine.low %v2190_v3, %v2193_v5  ;;  %v3759_v34 = vrot.slane %v3757_v42, 5  ;;  %v3765_v14 = vrot.slane %v3763_v43, 5  ;;  %v3769_v18 = vrot.slane %v3767_v35, 4  ;;  %4824 = vmatprep.mubr.bf16.mxu1 %v4334_v58  ;;  %v2041_v44 = vld [vmem:[#allocation2 + $0xb0] sm:$0x1] }
 0x12f   : > { %v6213_v9 = vld [vmem:[#allocation2 + $0x84] sm:$0xff]   ;;  %3939 = vrot.lane.b32.xlu0 %v7529_v24, %s6366_s15  ;;  %v3775_v39 = vrot.slane %v3773_v2, 5  ;;  %v3152_v10 = vsel %vm6902_vm14, %v5650_v45, %v3151_v8  ;;  %v3153_v16 = vrot.slane %v3151_v8, 4  ;;  %v5577_v11 = vrot.slane %v7558_v26, 9  ;;  %4825 = vmatmul.mubr.bf16.vlgmr.msra.gmra.mrb[0].mxu1 %v4333_v17  ;;  %v7601_v38 = vld [vmem:[#allocation2 + $0xac] sm:$0xf]  ;;  %v7636_v17 = vpop.permute.xlu0 %2410 }
 0x130   : > { %v6177_v13 = vld [vmem:[%s8638_s4 + $0x88] sm:$0xff]   ;;  %2285 = vst.msk [vmem:[#allocation3 + $0x210] sm:$0xff] %vm1432_vm15, %v5604_v55  ;;  %v3760_v40 = vor.u32 %v3759_v34, %v3756_v21  ;;  %v3770_v7 = vor.u32 %v3769_v18, %v3765_v14  ;;  %v2112_v60 = vrot.slane %v7564_v48, 5  ;;  %v2115_v24 = vrot.slane %v7566_v31, 5  ;;  %5939 = vmatpush3.bf16.msra.mxu1 %v6174_v20  ;;  %3434 = vst.msk [vmem:[#allocation3 + $0x180] sm:$0xff] %vm1432_vm15, %v6213_v9  ;;  %v6179_v50 = vld [vmem:[%s8638_s4 + $0xd0] sm:$0xff]  }
 0x131   : > { %v3477_v28 = vld [vmem:[#allocation2 + $0xa8] sm:$0xf]  ;;  %6073 = vmatpush3.bf16.msra.mxu0 %v6192_v59  ;;  %2461 = vst.msk [vmem:[#allocation3 + $0x210] sm:$0xff] %vm1980_vm1, %v7290_v30  ;;  %v3155_v61 = vsel %vm6902_vm14, %v3153_v16, %v3154_v52  ;;  %v5589_v53 = vrot.slane %v2039_v62, 9  ;;  %v2196_v33 = vrot.slane %v2040_v54, 5  ;;  %v2199_v23 = vrot.slane %v2041_v44, 5  ;;  %5940 = vmatprep.subr.bf16.mxu1 %v6176_v29 }
 0x132   : > { %6074 = vmatprep.subr.bf16.mxu0 %v7586_v46  ;;  %v3761_v27 = vrot.slane %v3760_v40, 4  ;;  %v3771_v59 = vrot.slane %v3770_v7, 4  ;;  %v5666_v22 = vcombine.low %v3152_v10, %v3155_v61  ;;  %v2113_v3 = vsel %vm6902_vm14, %v5577_v11, %v2112_v60  ;;  %v7614_v30 = vld [vmem:[#allocation2 + $0xb0] sm:$0x1]  ;;  %v7616_v26 = vld [vmem:[#allocation2 + $0x9c] sm:$0xe] }
 0x133   : > { %v7618_v49 = vld [vmem:[#allocation2 + $0xa0] sm:$0xf]  ;;  %v7623_v41 = vld [vmem:[%s8638_s4 + $0x118] sm:$0xff]   ;;  %v6214_v15 = vld [vmem:[#allocation2 + $0x90] sm:$0xff]   ;;  %3941 = vrot.lane.b32.xlu0 %v7562_v36, %s6366_s15  ;;  %v2114_v21 = vrot.slane %v2112_v60, 4  ;;  %v2197_v48 = vsel %vm6902_vm14, %v5589_v53, %v2196_v33  ;;  %v2198_v31 = vrot.slane %v2196_v33, 4 }
 0x134   : > { %v3778_v42 = vshrl.u32 %v3477_v28, 16  ;;  %v7629_v43 = vld [vmem:[#allocation2 + $0xa4] sm:$0x1]  ;;  %v7631_v35 = vld [vmem:[#allocation2 + $0x24] sm:$0xe]  ;;  %v6180_v2 = vld [vmem:[%s8638_s4 + $0x90] sm:$0xff]   ;;  %v3766_v20 = vsel %vm6486_vm8, %v3761_v27, %v3765_v14  ;;  %v3776_v36 = vsel %vm6486_vm8, %v3771_v59, %v3775_v39  ;;  %3254 = vrot.lane.b32.xlu1 %v5666_v22, %s6366_s15  ;;  %5941 = vmatpush3.bf16.msra.mxu1 %v6177_v13  ;;  %v7652_v14 = vpop.permute.xlu1 %3236 }
 0x135   : > { %v4278_v19 = vld [vmem:[#allocation3 + $0x28] sm:$0xff]  ;;  %v3781_v62 = vshll.u32 %v3477_v28, 16  ;;  %v3787_v54 = vshll.u32 %v7601_v38, 16  ;;  %v6182_v5 = vld [vmem:[%s8638_s4 + $0xd8] sm:$0xff]   ;;  %3435 = vst.msk [vmem:[#allocation3 + $0x1a8] sm:$0xff] %vm1432_vm15, %v6214_v15  ;;  %v5698_v45 = vcombine.low %v3766_v20, %v3776_v36  ;;  %v2116_v8 = vsel %vm6902_vm14, %v2114_v21, %v2115_v24  ;;  %v4279_v52 = vld [vmem:[#allocation3 + $0x30] sm:$0xff]  ;;  %5942 = vmatprep.subr.bf16.mxu1 %v6179_v50  ;;  %6075 = vmatpush3.bf16.msra.mxu0 %v7586_v46  ;;  %v1943_v28 = vpop.permute.xlu0 %1942 }
 0x136   : > { %v2200_v58 = vsel %vm6902_vm14, %v2198_v31, %v2199_v23  ;;  %v3780_v29 = vrot.slane %v3778_v42, 4  ;;  %v2007_v55 = vld [vmem:[#allocation2 + $0x28] sm:$0xf]  ;;  %v2008_v34 = vld [vmem:[#allocation2 + $0x2c] sm:$0x1]  ;;  %v5593_v18 = vcombine.low %v2113_v3, %v2116_v8  ;;  %4736 = vmatprep.mubr.bf16.mxu0 %v4279_v52  ;;  %6076 = vmatprep.subr.bf16.mxu0 %v7623_v41  ;;  %v3791_v11 = vshrl.u32 %v7601_v38, 16 }
 0x137   : > { %v5605_v44 = vcombine.low %v2197_v48, %v2200_v58  ;;  %v3783_v9 = vrot.slane %v3781_v62, 5  ;;  %v7655_v39 = vrot.slane %v3787_v54, 5  ;;  %v2042_v10 = vld [vmem:[#allocation2 + $0xb4] sm:$0xe]  ;;  %v2043_v16 = vld [vmem:[#allocation2 + $0xb8] sm:$0xf]  ;;  %3943 = vrot.lane.b32.xlu0 %v5698_v45, %s6366_s15  ;;  %4737 = vmatmul.mubr.bf16.gmra.mrb[4].mxu0 %v4278_v19 }
 0x138   : > { %v3797_v13 = vshll.u32 %v7614_v30, 16  ;;  %v5651_v40 = vrot.slane %v7616_v26, 9  ;;  %v3158_v46 = vrot.slane %v7618_v49, 5  ;;  %v4338_v7 = vld [vmem:[#allocation3 + $0x208] sm:$0xff]  ;;  %v7663_v60 = vld [vmem:[#allocation2 + $0xbc] sm:$0x1]  ;;  %5943 = vmatpush3.bf16.msra.mxu1 %v6180_v2  ;;  %v3928_v2 = vpop.permute.xlu1 %3927 }
 0x139   : > { %v6183_v24 = vld [vmem:[%s8638_s4 + $0x98] sm:$0xff]   ;;  %2274 = vst.msk [vmem:[#allocation3 + $0x58] sm:$0xff] %vm1432_vm15, %v5593_v18  ;;  %2286 = vst.msk [vmem:[#allocation3 + $0x238] sm:$0xff] %vm1432_vm15, %v5605_v44  ;;  %v4339_v61 = vld [vmem:[#allocation3 + $0x210] sm:$0xff]  ;;  %v3784_v38 = vor.u32 %v3783_v9, %v3780_v29  ;;  %v3161_v53 = vrot.slane %v7629_v43, 5  ;;  %v5578_v33 = vrot.slane %v7631_v35, 9  ;;  %5944 = vmatprep.subr.bf16.mxu1 %v6182_v5  ;;  %6077 = vmatpush3.bf16.msra.mxu0 %v7623_v41 }
 0x13a   : > { %v2119_v23 = vrot.slane %v2007_v55, 5  ;;  %1986 = vst.msk [vmem:[#allocation3 + $0xc8] sm:$0xff] %vm1980_vm1, %v1943_v28  ;;  %2450 = vst.msk [vmem:[#allocation3 + $0x58] sm:$0xff] %vm1980_vm1, %v7301_v6  ;;  %4832 = vmatprep.mubr.bf16.mxu1 %v4339_v61  ;;  %v3793_v50 = vrot.slane %v3791_v11, 4  ;;  %v3799_v27 = vrot.slane %v3797_v13, 5  ;;  %v3159_v59 = vsel %vm6902_vm14, %v5651_v40, %v3158_v46  ;;  %v6185_v26 = vld [vmem:[%s8638_s4 + $0xe0] sm:$0xff]  }
 0x13b   : > { %2462 = vst.msk [vmem:[#allocation3 + $0x238] sm:$0xff] %vm1980_vm1, %v7328_v37  ;;  %v3160_v22 = vrot.slane %v3158_v46, 4  ;;  %v3480_v3 = vld [vmem:[#allocation2 + $0xb4] sm:$0xf]  ;;  %v3481_v30 = vld [vmem:[#allocation2 + $0xb8] sm:$0xf]  ;;  %4833 = vmatmul.mubr.bf16.gmra.mrb[4].mxu1 %v4338_v7 }
 0x13c   : > { %v3785_v49 = vrot.slane %v3784_v38, 4  ;;  %v2120_v6 = vsel %vm6902_vm14, %v5578_v33, %v2119_v23  ;;  %v2121_v15 = vrot.slane %v2119_v23, 4  ;;  %v2122_v37 = vrot.slane %v2008_v34, 5  ;;  %v6215_v21 = vld [vmem:[#allocation2 + $0x9c] sm:$0xff]   ;;  %5945 = vmatpush3.bf16.msra.mxu1 %v6183_v24  ;;  %v3015_v62 = vld [vmem:[#allocation2 + $0xa8] sm:$0xe] }
 0x13d   : > { %v3794_v48 = vor.u32 %v3793_v50, %v7655_v39  ;;  %v3162_v31 = vsel %vm6902_vm14, %v3160_v22, %v3161_v53  ;;  %v5590_v42 = vrot.slane %v2042_v10, 9  ;;  %v2203_v43 = vrot.slane %v2043_v16, 5  ;;  %v3482_v35 = vld [vmem:[#allocation2 + $0xbc] sm:$0x1]  ;;  %v3016_v54 = vld [vmem:[#allocation2 + $0xac] sm:$0xf]  ;;  %5946 = vmatprep.subr.bf16.mxu1 %v6185_v26 }
 0x13e   : > { %v3790_v20 = vsel %vm6486_vm8, %v3785_v49, %v7655_v39  ;;  %v5667_v36 = vcombine.low %v3159_v59, %v3162_v31  ;;  %v2123_v19 = vsel %vm6902_vm14, %v2121_v15, %v2122_v37  ;;  %v2206_v41 = vrot.slane %v7663_v60, 5  ;;  %v6186_v5 = vld [vmem:[%s8638_s4 + $0xa0] sm:$0xff]   ;;  %3972 = vst.msk [vmem:[#allocation3 + $0x90] sm:$0xff] %vm1980_vm1, %v3928_v2  ;;  %v7701_v29 = vld [vmem:[#allocation2 + $0xb0] sm:$0x1]  ;;  %v6189_v16 = vld [vmem:[%s8638_s4 + $0xe8] sm:$0xff]  }
 0x13f   : > { %3436 = vst.msk [vmem:[#allocation3 + $0x1d0] sm:$0xff] %vm1432_vm15, %v6215_v21  ;;  %v3795_v45 = vrot.slane %v3794_v48, 4  ;;  %v5594_v8 = vcombine.low %v2120_v6, %v2123_v19  ;;  %v2204_v52 = vsel %vm6902_vm14, %v5590_v42, %v2203_v43  ;;  %v2205_v58 = vrot.slane %v2203_v43, 4  ;;  %v2009_v55 = vld [vmem:[#allocation2 + $0x30] sm:$0xe]  ;;  %v6190_v11 = vld [vmem:[%s8638_s4 + $0xa8] sm:$0xff]  }
 0x140   : > { %v2010_v34 = vld [vmem:[#allocation2 + $0x34] sm:$0xf]  ;;  %3256 = vrot.lane.b32.xlu1 %v5667_v36, %s6366_s15  ;;  %v3802_v18 = vshrl.u32 %v3480_v3, 16  ;;  %v3805_v44 = vshll.u32 %v3480_v3, 16  ;;  %v3811_v9 = vshll.u32 %v3481_v30, 16  ;;  %v3815_v39 = vshrl.u32 %v3481_v30, 16  ;;  %5947 = vmatpush3.bf16.msra.mxu1 %v6186_v5 }
 0x141   : > { %v7704_v10 = vld [vmem:[#allocation2 + $0x38] sm:$0x1]  ;;  %v3800_v13 = vsel %vm6486_vm8, %v3795_v45, %v3799_v27  ;;  %2275 = vst.msk [vmem:[#allocation3 + $0x80] sm:$0xff] %vm1432_vm15, %v5594_v8  ;;  %v2207_v40 = vsel %vm6902_vm14, %v2205_v58, %v2206_v41  ;;  %v4283_v46 = vld [vmem:[#allocation3 + $0x50] sm:$0xff]  ;;  %v3821_v7 = vshll.u32 %v3482_v35, 16  ;;  %v5652_v60 = vrot.slane %v3015_v62, 9  ;;  %5948 = vmatprep.subr.bf16.mxu1 %v6189_v16 }
 0x142   : > { %v4343_v24 = vld [vmem:[#allocation3 + $0x230] sm:$0xff]  ;;  %v6191_v61 = vld [vmem:[%s8638_s4 + $0xf0] sm:$0xff]   ;;  %v5699_v38 = vcombine.low %v3790_v20, %v3800_v13  ;;  %2451 = vst.msk [vmem:[#allocation3 + $0x80] sm:$0xff] %vm1980_vm1, %v7347_v32  ;;  %v5606_v33 = vcombine.low %v2204_v52, %v2207_v40  ;;  %v3804_v50 = vrot.slane %v3802_v18, 4  ;;  %v3807_v27 = vrot.slane %v3805_v44, 5 }
 0x143   : > { %v785_v28 = vld [vmem:[#allocation2 + $0xc8] sm:$0x1]  ;;  %v4284_v53 = vld [vmem:[#allocation3 + $0x58] sm:$0xff]  ;;  %v3483_v59 = vld [vmem:[#allocation2 + $0xc0] sm:$0xf]  ;;  %v3813_v22 = vrot.slane %v3811_v9, 5 }
 0x144   : > { %v4344_v23 = vld [vmem:[#allocation3 + $0x238] sm:$0xff]  ;;  %4744 = vmatprep.mubr.bf16.mxu0 %v4284_v53  ;;  %v3817_v3 = vrot.slane %v3815_v39, 4  ;;  %v3823_v30 = vrot.slane %v3821_v7, 5  ;;  %v3165_v26 = vrot.slane %v3016_v54, 5  ;;  %v7722_v49 = vld [vmem:[#allocation2 + $0xc4] sm:$0xf]  ;;  %3945 = vrot.lane.b32.xlu0 %v5699_v38, %s6366_s15  ;;  %v3808_v32 = vor.u32 %v3807_v27, %v3804_v50  ;;  %v7740_v54 = vpop.permute.xlu0 %2412 }
 0x145   : > { %4840 = vmatprep.mubr.bf16.mxu1 %v4344_v23  ;;  %2287 = vst.msk [vmem:[#allocation3 + $0x260] sm:$0xff] %vm1432_vm15, %v5606_v33  ;;  %4745 = vmatmul.mubr.bf16.gmra.mrb[8].mxu0 %v4283_v46  ;;  %v3168_v6 = vrot.slane %v7701_v29, 5  ;;  %v5579_v15 = vrot.slane %v2009_v55, 9  ;;  %v2126_v37 = vrot.slane %v2010_v34, 5  ;;  %v6216_v21 = vld [vmem:[#allocation2 + $0xa8] sm:$0xff]   ;;  %v2129_v43 = vrot.slane %v7704_v10, 5 }
 0x146   : > { %2463 = vst.msk [vmem:[#allocation3 + $0x260] sm:$0xff] %vm1980_vm1, %v7443_v47  ;;  %v3818_v48 = vor.u32 %v3817_v3, %v3813_v22  ;;  %v3166_v31 = vsel %vm6902_vm14, %v5652_v60, %v3165_v26  ;;  %v3167_v42 = vrot.slane %v3165_v26, 4  ;;  %4841 = vmatmul.mubr.bf16.gmra.mrb[8].mxu1 %v4343_v24  ;;  %v7732_v35 = vld [vmem:[#allocation2 + $0xb4] sm:$0xe]  ;;  %v3809_v2 = vrot.slane %v3808_v32, 4  ;;  %v6196_v39 = vld [vmem:[%s8638_s4 + $0xf8] sm:$0xff]   ;;  %v7775_v32 = vpop.permute.xlu1 %3238 }
 0x147   : > { %v2127_v20 = vsel %vm6902_vm14, %v5579_v15, %v2126_v37  ;;  %v2128_v36 = vrot.slane %v2126_v37, 4  ;;  %5949 = vmatpush3.bf16.msra.mxu1 %v6190_v11  ;;  %v786_v47 = vsel %vm6433_vm5, 0, %v785_v28  ;;  %v3019_v19 = vld [vmem:[#allocation2 + $0xb8] sm:$0xf]  ;;  %v7738_v41 = vld [vmem:[#allocation2 + $0xbc] sm:$0x1] }
 0x148   : > { %v2012_v62 = vld [vmem:[#allocation2 + $0x3c] sm:$0xe]  ;;  %3437 = vst.msk [vmem:[#allocation3 + $0x1f8] sm:$0xff] %vm1432_vm15, %v6216_v21  ;;  %v3819_v5 = vrot.slane %v3818_v48, 4  ;;  %v3169_v45 = vsel %vm6902_vm14, %v3167_v42, %v3168_v6  ;;  %787 = vst [vmem:[#allocation2 + $0xc8] sm:$0x1] %v786_v47  ;;  %5950 = vmatprep.subr.bf16.mxu1 %v6191_v61  ;;  %v3814_v29 = vsel %vm6486_vm8, %v3809_v2, %v3813_v22  ;;  %v1945_v61 = vpop.permute.xlu0 %1944 }
 0x149   : > { %v3826_v8 = vshrl.u32 %v3483_v59, 16  ;;  %v3829_v52 = vshll.u32 %v3483_v59, 16  ;;  %v2013_v58 = vld [vmem:[#allocation2 + $0x40] sm:$0xf]  ;;  %v5668_v55 = vcombine.low %v3166_v31, %v3169_v45  ;;  %v2130_v34 = vsel %vm6902_vm14, %v2128_v36, %v2129_v43  ;;  %v7753_v44 = vld [vmem:[#allocation2 + $0x44] sm:$0x1] }
 0x14a   : > { %v3835_v18 = vshll.u32 %v7722_v49, 16  ;;  %v2465_v9 = vld [vmem:[#allocation2 + $0x10] sm:$0xf]  ;;  %v3824_v10 = vsel %vm6486_vm8, %v3819_v5, %v3823_v30  ;;  %v5595_v16 = vcombine.low %v2127_v20, %v2130_v34  ;;  %v4289_v11 = vld [vmem:[#allocation3 + $0x80] sm:$0xff]  ;;  %v3839_v24 = vshrl.u32 %v7722_v49, 16  ;;  %1987 = vst.msk [vmem:[#allocation3 + $0xf0] sm:$0xff] %vm1980_vm1, %v1945_v61 }
 0x14b   : > { %v4288_v13 = vld [vmem:[#allocation3 + $0x78] sm:$0xff]  ;;  %v3828_v40 = vrot.slane %v3826_v8, 4  ;;  %v3831_v46 = vrot.slane %v3829_v52, 5  ;;  %v5700_v7 = vcombine.low %v3814_v29, %v3824_v10  ;;  %3258 = vrot.lane.b32.xlu1 %v5668_v55, %s6366_s15  ;;  %4752 = vmatprep.mubr.bf16.mxu0 %v4289_v11  ;;  %v5653_v28 = vrot.slane %v7732_v35, 9  ;;  %v6197_v27 = vld [vmem:[%s8638_s4 + $0xb8] sm:$0xff]   ;;  %v3930_v11 = vpop.permute.xlu1 %3929 }
 0x14c   : > { %v7761_v60 = vrot.slane %v3835_v18, 5  ;;  %2276 = vst.msk [vmem:[#allocation3 + $0xa8] sm:$0xff] %vm1432_vm15, %v5595_v16  ;;  %v3172_v53 = vrot.slane %v3019_v19, 5  ;;  %v3175_v33 = vrot.slane %v7738_v41, 5  ;;  %v5580_v23 = vrot.slane %v2012_v62, 9  ;;  %v4348_v50 = vld [vmem:[#allocation3 + $0x258] sm:$0xff]  ;;  %5951 = vmatpush3.bf16.msra.mxu1 %v6193_v4 }
 0x14d   : > { %v3832_v38 = vor.u32 %v3831_v46, %v3828_v40  ;;  %v4276_v59 = vld [vmem:[#allocation3 + $0x18] sm:$0xff]  ;;  %3947 = vrot.lane.b32.xlu0 %v5700_v7, %s6366_s15  ;;  %2452 = vst.msk [vmem:[#allocation3 + $0xa8] sm:$0xff] %vm1980_vm1, %v7504_v25  ;;  %4753 = vmatmul.mubr.bf16.gmra.mrb[12].mxu0 %v4288_v13  ;;  %v4349_v22 = vld [vmem:[#allocation3 + $0x260] sm:$0xff]  ;;  %v3841_v3 = vrot.slane %v3839_v24, 4  ;;  %v2133_v30 = vrot.slane %v2013_v58, 5  ;;  %v2136_v26 = vrot.slane %v7753_v44, 5 }
 0x14e   : > { %v2522_v49 = vshll.u32 %v2465_v9, 16  ;;  %v6217_v6 = vld [vmem:[#allocation2 + $0xb4] sm:$0xff]   ;;  %4848 = vmatprep.mubr.bf16.mxu1 %v4349_v22  ;;  %v3173_v37 = vsel %vm6902_vm14, %v5653_v28, %v3172_v53  ;;  %v3174_v21 = vrot.slane %v3172_v53, 4  ;;  %v2526_v31 = vshrl.u32 %v2465_v9, 16  ;;  %5952 = vmatprep.subr.bf16.mxu1 %v6196_v39  ;;  %v2464_v2 = vld [vmem:[#allocation2 + $0xc] sm:$0xf] }
 0x14f   : > { %v7777_v15 = vrot.slane %v3832_v38, 4  ;;  %v2466_v48 = vld [vmem:[#allocation2 + $0x14] sm:$0x1]  ;;  %v1301_v25 = vld [vmem:[#allocation2 + $0xc8] sm:$0x1]  ;;  %v2134_v42 = vsel %vm6902_vm14, %v5580_v23, %v2133_v30  ;;  %v2135_v43 = vrot.slane %v2133_v30, 4  ;;  %4849 = vmatmul.mubr.bf16.gmra.mrb[12].mxu1 %v4348_v50  ;;  %v3842_v36 = vor.u32 %v3841_v3, %v7761_v60 }
 0x150   : > { %v7783_v35 = vrot.slane %v2522_v49, 5  ;;  %3438 = vst.msk [vmem:[#allocation3 + $0x220] sm:$0xff] %vm1432_vm15, %v6217_v6  ;;  %v1302_v20 = vsel %vm6421_vm3, %v1141_v63, %v1301_v25  ;;  %v3176_v47 = vsel %vm6902_vm14, %v3174_v21, %v3175_v33  ;;  %v2528_v19 = vrot.slane %v2526_v31, 4  ;;  %5953 = vmatpush3.bf16.msra.mxu1 %v6197_v27  ;;  %4889 = vmatprep.mubr.bf16.mxu1 %v4276_v59  ;;  %v3486_v41 = vld [vmem:[#allocation2 + $0xcc] sm:$0xf]  ;;  %v4293_v44 = vld [vmem:[#allocation3 + $0xa0] sm:$0xff] }
 0x151   : > { %v3487_v62 = vld [vmem:[#allocation2 + $0xd0] sm:$0xf]  ;;  %1303 = vst [vmem:[#allocation2 + $0xc8] sm:$0x1] %v1302_v20  ;;  %v3838_v5 = vsel %vm6486_vm8, %v7777_v15, %v7761_v60  ;;  %v5669_v12 = vcombine.low %v3173_v37, %v3176_v47  ;;  %v2137_v1 = vsel %vm6902_vm14, %v2135_v43, %v2136_v26  ;;  %v2532_v63 = vshll.u32 %v2466_v48, 16  ;;  %3973 = vst.msk [vmem:[#allocation3 + $0xb8] sm:$0xff] %vm1980_vm1, %v3930_v11  ;;  %v7837_v60 = vpop.permute.xlu1 %3240 }
 0x152   : > { %v3488_v45 = vld [vmem:[#allocation2 + $0xd4] sm:$0x1]  ;;  %v3021_v8 = vld [vmem:[#allocation2 + $0xc0] sm:$0xe]  ;;  %v5596_v52 = vcombine.low %v2134_v42, %v2137_v1  ;;  %v2529_v58 = vor.u32 %v2528_v19, %v7783_v35  ;;  %v2513_v4 = vshrl.u32 %v2464_v2, 16  ;;  %v2516_v29 = vshll.u32 %v2464_v2, 16 }
 0x153   : > { %v3022_v55 = vld [vmem:[#allocation2 + $0xc4] sm:$0xf]  ;;  %v2015_v34 = vld [vmem:[#allocation2 + $0x48] sm:$0xe]  ;;  %3260 = vrot.lane.b32.xlu1 %v5669_v12, %s6366_s15  ;;  %v2534_v18 = vrot.slane %v2532_v63, 5  ;;  %v3850_v9 = vshrl.u32 %v3486_v41, 16 }
 0x154   : > { %v3853_v39 = vshll.u32 %v3486_v41, 16  ;;  %v3859_v10 = vshll.u32 %v3487_v62, 16  ;;  %v2016_v16 = vld [vmem:[#allocation2 + $0x4c] sm:$0xf]  ;;  %2277 = vst.msk [vmem:[#allocation3 + $0xd0] sm:$0xff] %vm1432_vm15, %v5596_v52  ;;  %v2530_v13 = vrot.slane %v2529_v58, 4 }
 0x155   : > { %v2515_v40 = vrot.slane %v2513_v4, 4  ;;  %v2518_v46 = vrot.slane %v2516_v29, 5  ;;  %v4294_v7 = vld [vmem:[#allocation3 + $0xa8] sm:$0xff]  ;;  %v3863_v24 = vshrl.u32 %v3487_v62, 16  ;;  %2453 = vst.msk [vmem:[#allocation3 + $0xd0] sm:$0xff] %vm1980_vm1, %v7636_v17  ;;  %v3852_v28 = vrot.slane %v3850_v9, 4 }
 0x156   : > { %4760 = vmatprep.mubr.bf16.mxu0 %v4294_v7  ;;  %v3855_v61 = vrot.slane %v3853_v39, 5  ;;  %v3861_v38 = vrot.slane %v3859_v10, 5  ;;  %v3869_v53 = vshll.u32 %v3488_v45, 16  ;;  %v3843_v33 = vrot.slane %v3842_v36, 4  ;;  %v2017_v30 = vld [vmem:[#allocation2 + $0x50] sm:$0x1]  ;;  %v7809_v36 = vpop.permute.xlu0 %2414 }
 0x157   : > { %v2519_v23 = vor.u32 %v2518_v46, %v2515_v40  ;;  %4761 = vmatmul.mubr.bf16.gmra.mrb[16].mxu0 %v4293_v44  ;;  %v3865_v50 = vrot.slane %v3863_v24, 4  ;;  %v5654_v27 = vrot.slane %v3021_v8, 9  ;;  %v3179_v3 = vrot.slane %v3022_v55, 5  ;;  %v6218_v49 = vld [vmem:[#allocation2 + $0xc0] sm:$0xff]   ;;  %v2467_v20 = vld [vmem:[#allocation2 + $0x18] sm:$0xf] }
 0x158   : > { %v3856_v59 = vor.u32 %v3855_v61, %v3852_v28  ;;  %v3871_v22 = vrot.slane %v3869_v53, 5  ;;  %v5581_v26 = vrot.slane %v2015_v34, 9  ;;  %v3485_v6 = vld [vmem:[#allocation2 + $0xc8] sm:$0x1]  ;;  %v2535_v17 = vsel %vm6486_vm8, %v2530_v13, %v2534_v18  ;;  %3439 = vst.msk [vmem:[#allocation3 + $0x248] sm:$0xff] %vm1432_vm15, %v6218_v49  ;;  %v4298_v58 = vld [vmem:[#allocation3 + $0xc8] sm:$0xff] }
 0x159   : > { %v2520_v37 = vrot.slane %v2519_v23, 4  ;;  %v3866_v21 = vor.u32 %v3865_v50, %v3861_v38  ;;  %v3023_v48 = vld [vmem:[#allocation2 + $0xc8] sm:$0x1]  ;;  %v2140_v31 = vrot.slane %v2016_v16, 5  ;;  %v3845_v25 = vshll.u32 %v3485_v6, 16  ;;  %v6219_v46 = vld [vmem:[#allocation2 + $0xcc] sm:$0xff]  }
 0x15a   : > { %v3857_v42 = vrot.slane %v3856_v59, 4  ;;  %v3180_v43 = vsel %vm6902_vm14, %v5654_v27, %v3179_v3  ;;  %v3181_v2 = vrot.slane %v3179_v3, 4  ;;  %v3182_v41 = vrot.slane %v3023_v48, 5  ;;  %v2468_v12 = vld [vmem:[#allocation2 + $0x1c] sm:$0xf]  ;;  %v1947_v40 = vpop.permute.xlu0 %1946  ;;  %3440 = vst.msk [vmem:[#allocation3 + $0x270] sm:$0xff] %vm1432_vm15, %v6219_v46 }
 0x15b   : > { %v2525_v47 = vsel %vm6486_vm8, %v2520_v37, %v7783_v35  ;;  %v3867_v19 = vrot.slane %v3866_v21, 4  ;;  %v2141_v62 = vsel %vm6902_vm14, %v5581_v26, %v2140_v31  ;;  %v2469_v1 = vld [vmem:[#allocation2 + $0x20] sm:$0x1]  ;;  %v3847_v63 = vrot.slane %v3845_v25, 5  ;;  %v2018_v4 = vld [vmem:[#allocation2 + $0x54] sm:$0xe] }
 0x15c   : > { %v5623_v45 = vcombine.low %v2525_v47, %v2535_v17  ;;  %v3862_v8 = vsel %vm6486_vm8, %v3857_v42, %v3861_v38  ;;  %v2142_v52 = vrot.slane %v2140_v31, 4  ;;  %v3183_v35 = vsel %vm6902_vm14, %v3181_v2, %v3182_v41  ;;  %v4299_v18 = vld [vmem:[#allocation3 + $0xd0] sm:$0xff]  ;;  %v2019_v44 = vld [vmem:[#allocation2 + $0x58] sm:$0xf]  ;;  %v2020_v11 = vld [vmem:[#allocation2 + $0x5c] sm:$0x1] }
 0x15d   : > { %v3872_v29 = vsel %vm6486_vm8, %v3867_v19, %v3871_v22  ;;  %v2143_v55 = vrot.slane %v2017_v30, 5  ;;  %v2537_v34 = vshrl.u32 %v2467_v20, 16  ;;  %v3848_v9 = vsel %vm6486_vm8, %v3843_v33, %v3847_v63  ;;  %4768 = vmatprep.mubr.bf16.mxu0 %v4299_v18  ;;  %v2470_v13 = vld [vmem:[#allocation2 + $0x24] sm:$0xf]  ;;  %1988 = vst.msk [vmem:[#allocation3 + $0x118] sm:$0xff] %vm1980_vm1, %v1947_v40  ;;  %v4281_v47 = vld [vmem:[#allocation3 + $0x40] sm:$0xff] }
 0x15e   : > { %2960 = vst.msk [vmem:[#allocation3 + $0x10] sm:$0xff] %vm1432_vm15, %v5623_v45  ;;  %v5702_v39 = vcombine.low %v3862_v8, %v3872_v29  ;;  %v5670_v10 = vcombine.low %v3180_v43, %v3183_v35  ;;  %v2540_v16 = vshll.u32 %v2467_v20, 16  ;;  %v5701_v7 = vcombine.low %v3838_v5, %v3848_v9  ;;  %v2471_v50 = vld [vmem:[#allocation2 + $0x28] sm:$0xf]  ;;  %v2472_v59 = vld [vmem:[#allocation2 + $0x2c] sm:$0x1]  ;;  %v7842_v6 = vpop.permute.xlu0 %2416  ;;  %v3932_v29 = vpop.permute.xlu1 %3931 }
 0x15f   : > { %3280 = vst.msk [vmem:[#allocation3 + $0x10] sm:$0xff] %vm1980_vm1, %v7486_v57  ;;  %v2144_v24 = vsel %vm6902_vm14, %v2142_v52, %v2143_v55  ;;  %v2539_v28 = vrot.slane %v2537_v34, 4  ;;  %v2546_v61 = vshll.u32 %v2468_v12, 16  ;;  %4769 = vmatmul.mubr.bf16.gmra.mrb[20].mxu0 %v4298_v58  ;;  %v2550_v33 = vshrl.u32 %v2468_v12, 16  ;;  %v2021_v49 = vld [vmem:[#allocation2 + $0x60] sm:$0xe] }
 0x160   : > { %3262 = vrot.lane.b32.xlu1 %v5670_v10, %s6366_s15  ;;  %v5597_v38 = vcombine.low %v2141_v62, %v2144_v24  ;;  %v2542_v53 = vrot.slane %v2540_v16, 5  ;;  %v2556_v23 = vshll.u32 %v2469_v1, 16  ;;  %3949 = vrot.lane.b32.xlu0 %v5701_v7, %s6366_s15  ;;  %v5582_v15 = vrot.slane %v2018_v4, 9  ;;  %v2022_v31 = vld [vmem:[#allocation2 + $0x64] sm:$0xf]  ;;  %3974 = vst.msk [vmem:[#allocation3 + $0xe0] sm:$0xff] %vm1980_vm1, %v3932_v29 }
 0x161   : > { %v2548_v57 = vrot.slane %v2546_v61, 5  ;;  %v2147_v5 = vrot.slane %v2019_v44, 5  ;;  %v2150_v27 = vrot.slane %v2020_v11, 5  ;;  %v2552_v3 = vrot.slane %v2550_v33, 4  ;;  %v2023_v20 = vld [vmem:[#allocation2 + $0x68] sm:$0x1] }
 0x162   : > { %2278 = vst.msk [vmem:[#allocation3 + $0xf8] sm:$0xff] %vm1432_vm15, %v5597_v38  ;;  %v2543_v22 = vor.u32 %v2542_v53, %v2539_v28  ;;  %v2558_v30 = vrot.slane %v2556_v23, 5  ;;  %v2561_v26 = vshrl.u32 %v2470_v13, 16  ;;  %v2564_v21 = vshll.u32 %v2470_v13, 16  ;;  %v2473_v12 = vld [vmem:[#allocation2 + $0x30] sm:$0xf]  ;;  %v1949_v4 = vpop.permute.xlu0 %1948 }
 0x163   : > { %2454 = vst.msk [vmem:[#allocation3 + $0xf8] sm:$0xff] %vm1980_vm1, %v7740_v54  ;;  %v2148_v17 = vsel %vm6902_vm14, %v5582_v15, %v2147_v5  ;;  %v2149_v37 = vrot.slane %v2147_v5, 4  ;;  %v2570_v48 = vshll.u32 %v2471_v50, 16  ;;  %v2553_v42 = vor.u32 %v2552_v3, %v2548_v57  ;;  %v2474_v58 = vld [vmem:[#allocation2 + $0x34] sm:$0xf]  ;;  %1989 = vst.msk [vmem:[#allocation3 + $0x140] sm:$0xff] %vm1980_vm1, %v1949_v4 }
 0x164   : > { %v2544_v25 = vrot.slane %v2543_v22, 4  ;;  %v2563_v43 = vrot.slane %v2561_v26, 4  ;;  %v2574_v2 = vshrl.u32 %v2471_v50, 16  ;;  %3951 = vrot.lane.b32.xlu0 %v5702_v39, %s6366_s15  ;;  %v2566_v41 = vrot.slane %v2564_v21, 5  ;;  %v2475_v44 = vld [vmem:[#allocation2 + $0x38] sm:$0x1] }
 0x165   : > { %v2151_v19 = vsel %vm6902_vm14, %v2149_v37, %v2150_v27  ;;  %v2572_v54 = vrot.slane %v2570_v48, 5  ;;  %v2580_v62 = vshll.u32 %v2472_v59, 16  ;;  %v2554_v63 = vrot.slane %v2553_v42, 4  ;;  %v2024_v11 = vld [vmem:[#allocation2 + $0x6c] sm:$0xe]  ;;  %v4308_v4 = vld [vmem:[#allocation3 + $0x118] sm:$0xff] }
 0x166   : > { %v2549_v1 = vsel %vm6486_vm8, %v2544_v25, %v2548_v57  ;;  %v4275_v45 = vld [vmem:[#allocation3 + $0x10] sm:$0xff]  ;;  %v5598_v8 = vcombine.low %v2148_v17, %v2151_v19  ;;  %v2576_v52 = vrot.slane %v2574_v2, 4  ;;  %v2567_v35 = vor.u32 %v2566_v41, %v2563_v43  ;;  %v2025_v28 = vld [vmem:[#allocation2 + $0x70] sm:$0xf]  ;;  %v2026_v5 = vld [vmem:[#allocation2 + $0x74] sm:$0x1] }
 0x167   : > { %4890 = vmatmul.mubr.bf16.vlgmr.msra.gmra.mrb[16].mxu1 %v4275_v45  ;;  %v2582_v55 = vrot.slane %v2580_v62, 5  ;;  %v5583_v34 = vrot.slane %v2021_v49, 9  ;;  %v2154_v18 = vrot.slane %v2022_v31, 5  ;;  %v2559_v9 = vsel %vm6486_vm8, %v2554_v63, %v2558_v30  ;;  %v4303_v46 = vld [vmem:[#allocation3 + $0xf0] sm:$0xff]  ;;  %v2476_v27 = vld [vmem:[#allocation2 + $0x3c] sm:$0xf] }
 0x168   : > { %4897 = vmatprep.mubr.bf16.mxu1 %v4281_v47  ;;  %2279 = vst.msk [vmem:[#allocation3 + $0x120] sm:$0xff] %vm1432_vm15, %v5598_v8  ;;  %v2577_v39 = vor.u32 %v2576_v52, %v2572_v54  ;;  %v2157_v10 = vrot.slane %v2023_v20, 5  ;;  %v2585_v16 = vshrl.u32 %v2473_v12, 16  ;;  %v5624_v13 = vcombine.low %v2549_v1, %v2559_v9  ;;  %v2477_v26 = vld [vmem:[#allocation2 + $0x40] sm:$0xf]  ;;  %v7879_v52 = vpop.permute.xlu1 %3242 }
 0x169   : > { %2455 = vst.msk [vmem:[#allocation3 + $0x120] sm:$0xff] %vm1980_vm1, %v7809_v36  ;;  %v2568_v40 = vrot.slane %v2567_v35, 4  ;;  %v2155_v7 = vsel %vm6902_vm14, %v5583_v34, %v2154_v18  ;;  %v2156_v24 = vrot.slane %v2154_v18, 4  ;;  %v2588_v33 = vshll.u32 %v2473_v12, 16  ;;  %v2478_v48 = vld [vmem:[#allocation2 + $0x44] sm:$0x1] }
 0x16a   : > { %v2578_v61 = vrot.slane %v2577_v39, 4  ;;  %v4304_v38 = vld [vmem:[#allocation3 + $0xf8] sm:$0xff]  ;;  %v2587_v53 = vrot.slane %v2585_v16, 4  ;;  %v2594_v23 = vshll.u32 %v2474_v58, 16  ;;  %2961 = vst.msk [vmem:[#allocation3 + $0x38] sm:$0xff] %vm1432_vm15, %v5624_v13  ;;  %v2598_v57 = vshrl.u32 %v2474_v58, 16 }
 0x16b   : > { %v2573_v50 = vsel %vm6486_vm8, %v2568_v40, %v2572_v54  ;;  %4776 = vmatprep.mubr.bf16.mxu0 %v4304_v38  ;;  %v2158_v36 = vsel %vm6902_vm14, %v2156_v24, %v2157_v10  ;;  %v2604_v15 = vshll.u32 %v2475_v44, 16  ;;  %3281 = vst.msk [vmem:[#allocation3 + $0x38] sm:$0xff] %vm1980_vm1, %v7531_v56  ;;  %v2590_v3 = vrot.slane %v2588_v33, 5  ;;  %v2027_v56 = vld [vmem:[#allocation2 + $0x78] sm:$0xe] }
 0x16c   : > { %v2583_v59 = vsel %vm6486_vm8, %v2578_v61, %v2582_v55  ;;  %4777 = vmatmul.mubr.bf16.gmra.mrb[24].mxu0 %v4303_v46  ;;  %v5599_v22 = vcombine.low %v2155_v7, %v2158_v36  ;;  %v2596_v30 = vrot.slane %v2594_v23, 5  ;;  %v2600_v17 = vrot.slane %v2598_v57, 4  ;;  %v2028_v41 = vld [vmem:[#allocation2 + $0x7c] sm:$0xf]  ;;  %v2029_v54 = vld [vmem:[#allocation2 + $0x80] sm:$0x1] }
 0x16d   : > { %v5625_v49 = vcombine.low %v2573_v50, %v2583_v59  ;;  %v2606_v37 = vrot.slane %v2604_v15, 5  ;;  %v5584_v21 = vrot.slane %v2024_v11, 9  ;;  %v2591_v31 = vor.u32 %v2590_v3, %v2587_v53  ;;  %v2479_v8 = vld [vmem:[#allocation2 + $0x48] sm:$0xf]  ;;  %v2480_v13 = vld [vmem:[#allocation2 + $0x4c] sm:$0xf] }
 0x16e   : > { %2280 = vst.msk [vmem:[#allocation3 + $0x148] sm:$0xff] %vm1432_vm15, %v5599_v22  ;;  %v2161_v25 = vrot.slane %v2025_v28, 5  ;;  %v2164_v42 = vrot.slane %v2026_v5, 5  ;;  %v2609_v43 = vshrl.u32 %v2476_v27, 16  ;;  %v2601_v2 = vor.u32 %v2600_v17, %v2596_v30  ;;  %v2481_v28 = vld [vmem:[#allocation2 + $0x50] sm:$0x1] }
 0x16f   : > { %2962 = vst.msk [vmem:[#allocation3 + $0x60] sm:$0xff] %vm1432_vm15, %v5625_v49  ;;  %v2612_v20 = vshll.u32 %v2476_v27, 16  ;;  %v2618_v47 = vshll.u32 %v2477_v26, 16  ;;  %v2622_v19 = vshrl.u32 %v2477_v26, 16  ;;  %v2592_v62 = vrot.slane %v2591_v31, 4  ;;  %v3934_v27 = vpop.permute.xlu1 %3933 }
 0x170   : > { %2456 = vst.msk [vmem:[#allocation3 + $0x148] sm:$0xff] %vm1980_vm1, %v7842_v6  ;;  %3282 = vst.msk [vmem:[#allocation3 + $0x60] sm:$0xff] %vm1980_vm1, %v7652_v14  ;;  %v4309_v12 = vld [vmem:[#allocation3 + $0x120] sm:$0xff]  ;;  %v2162_v1 = vsel %vm6902_vm14, %v5584_v21, %v2161_v25  ;;  %v2163_v63 = vrot.slane %v2161_v25, 4  ;;  %v2611_v45 = vrot.slane %v2609_v43, 4  ;;  %v4286_v6 = vld [vmem:[#allocation3 + $0x68] sm:$0xff] }
 0x171   : > { %v2602_v58 = vrot.slane %v2601_v2, 4  ;;  %4784 = vmatprep.mubr.bf16.mxu0 %v4309_v12  ;;  %v2614_v29 = vrot.slane %v2612_v20, 5  ;;  %v2620_v35 = vrot.slane %v2618_v47, 5  ;;  %v2624_v55 = vrot.slane %v2622_v19, 4  ;;  %v2030_v23 = vld [vmem:[#allocation2 + $0x84] sm:$0xe] }
 0x172   : > { %v2597_v14 = vsel %vm6486_vm8, %v2592_v62, %v2596_v30  ;;  %v2165_v34 = vsel %vm6902_vm14, %v2163_v63, %v2164_v42  ;;  %v2628_v18 = vshll.u32 %v2478_v48, 16  ;;  %v5585_v44 = vrot.slane %v2027_v56, 9  ;;  %v4280_v9 = vld [vmem:[#allocation3 + $0x38] sm:$0xff]  ;;  %v2031_v59 = vld [vmem:[#allocation2 + $0x88] sm:$0xf]  ;;  %3975 = vst.msk [vmem:[#allocation3 + $0x108] sm:$0xff] %vm1980_vm1, %v3934_v27 }
 0x173   : > { %v2607_v39 = vsel %vm6486_vm8, %v2602_v58, %v2606_v37  ;;  %v5600_v10 = vcombine.low %v2162_v1, %v2165_v34  ;;  %v2615_v16 = vor.u32 %v2614_v29, %v2611_v45  ;;  %v2625_v11 = vor.u32 %v2624_v55, %v2620_v35  ;;  %4898 = vmatmul.mubr.bf16.gmra.mrb[20].mxu1 %v4280_v9  ;;  %v2032_v49 = vld [vmem:[#allocation2 + $0x8c] sm:$0x1]  ;;  %v2482_v17 = vld [vmem:[#allocation2 + $0x54] sm:$0xf]  ;;  %v4313_v42 = vld [vmem:[#allocation3 + $0x140] sm:$0xff]  ;;  %v7901_v1 = vpop.permute.xlu1 %3244 }
 0x174   : > { %v5626_v40 = vcombine.low %v2597_v14, %v2607_v39  ;;  %4785 = vmatmul.mubr.bf16.gmra.mrb[28].mxu0 %v4308_v4  ;;  %v2630_v46 = vrot.slane %v2628_v18, 5  ;;  %v2168_v7 = vrot.slane %v2028_v41, 5  ;;  %v2171_v24 = vrot.slane %v2029_v54, 5  ;;  %4905 = vmatprep.mubr.bf16.mxu1 %v4286_v6  ;;  %v2484_v47 = vld [vmem:[#allocation2 + $0x5c] sm:$0x1]  ;;  %v4291_v19 = vld [vmem:[#allocation3 + $0x90] sm:$0xff] }
 0x175   : > { %2281 = vst.msk [vmem:[#allocation3 + $0x170] sm:$0xff] %vm1432_vm15, %v5600_v10  ;;  %v2616_v61 = vrot.slane %v2615_v16, 4  ;;  %v2626_v38 = vrot.slane %v2625_v11, 4  ;;  %v2633_v53 = vshrl.u32 %v2479_v8, 16  ;;  %v2636_v33 = vshll.u32 %v2479_v8, 16 }
 0x176   : > { %2963 = vst.msk [vmem:[#allocation3 + $0x88] sm:$0xff] %vm1432_vm15, %v5626_v40  ;;  %v2169_v36 = vsel %vm6902_vm14, %v5585_v44, %v2168_v7  ;;  %v2170_v57 = vrot.slane %v2168_v7, 4  ;;  %v2642_v15 = vshll.u32 %v2480_v13, 16  ;;  %v2646_v5 = vshrl.u32 %v2480_v13, 16  ;;  %v2485_v58 = vld [vmem:[#allocation2 + $0x60] sm:$0xf] }
 0x177   : > { %v4314_v50 = vld [vmem:[#allocation3 + $0x148] sm:$0xff]  ;;  %3283 = vst.msk [vmem:[#allocation3 + $0x88] sm:$0xff] %vm1980_vm1, %v7775_v32  ;;  %v2621_v22 = vsel %vm6486_vm8, %v2616_v61, %v2620_v35  ;;  %v2631_v3 = vsel %vm6486_vm8, %v2626_v38, %v2630_v46  ;;  %v2635_v30 = vrot.slane %v2633_v53, 4  ;;  %v2638_v26 = vrot.slane %v2636_v33, 5  ;;  %v2483_v32 = vld [vmem:[#allocation2 + $0x58] sm:$0xf] }
 0x178   : > { %4792 = vmatprep.mubr.bf16.mxu0 %v4314_v50  ;;  %v5627_v37 = vcombine.low %v2621_v22, %v2631_v3  ;;  %v2172_v21 = vsel %vm6902_vm14, %v2170_v57, %v2171_v24  ;;  %v2644_v48 = vrot.slane %v2642_v15, 5  ;;  %v2648_v31 = vrot.slane %v2646_v5, 4  ;;  %v4285_v25 = vld [vmem:[#allocation3 + $0x60] sm:$0xff]  ;;  %v2486_v44 = vld [vmem:[#allocation2 + $0x64] sm:$0xf]  ;;  %v3936_v38 = vpop.permute.xlu1 %3935  ;;  %v4296_v22 = vld [vmem:[#allocation3 + $0xb8] sm:$0xff] }
 0x179   : > { %v5601_v43 = vcombine.low %v2169_v36, %v2172_v21  ;;  %v2639_v56 = vor.u32 %v2638_v26, %v2635_v30  ;;  %v2652_v2 = vshll.u32 %v2481_v28, 16  ;;  %v5586_v20 = vrot.slane %v2030_v23, 9  ;;  %v2487_v16 = vld [vmem:[#allocation2 + $0x68] sm:$0x1]  ;;  %v2488_v24 = vld [vmem:[#allocation2 + $0x6c] sm:$0xf]  ;;  %v2419_v28 = vpop.permute.xlu0 %2418 }
 0x17a   : > { %2964 = vst.msk [vmem:[#allocation3 + $0xb0] sm:$0xff] %vm1432_vm15, %v5627_v37  ;;  %v2649_v41 = vor.u32 %v2648_v31, %v2644_v48  ;;  %v2175_v54 = vrot.slane %v2031_v59, 5  ;;  %v2178_v62 = vrot.slane %v2032_v49, 5  ;;  %v2657_v12 = vshrl.u32 %v2482_v17, 16  ;;  %v2489_v50 = vld [vmem:[#allocation2 + $0x70] sm:$0xf] }
 0x17b   : > { %3284 = vst.msk [vmem:[#allocation3 + $0xb0] sm:$0xff] %vm1980_vm1, %v7837_v60  ;;  %v2640_v63 = vrot.slane %v2639_v56, 4  ;;  %v2654_v45 = vrot.slane %v2652_v2, 5  ;;  %v2660_v8 = vshll.u32 %v2482_v17, 16  ;;  %v2666_v6 = vshll.u32 %v2483_v32, 16  ;;  %4906 = vmatmul.mubr.bf16.gmra.mrb[24].mxu1 %v4285_v25  ;;  %2457 = vst.msk [vmem:[#allocation3 + $0x170] sm:$0xff] %vm1980_vm1, %v2419_v28 }
 0x17c   : > { %2282 = vst.msk [vmem:[#allocation3 + $0x198] sm:$0xff] %vm1432_vm15, %v5601_v43  ;;  %4793 = vmatmul.mubr.bf16.gmra.mrb[32].mxu0 %v4313_v42  ;;  %v2650_v4 = vrot.slane %v2649_v41, 4  ;;  %v2176_v29 = vsel %vm6902_vm14, %v5586_v20, %v2175_v54  ;;  %v2177_v35 = vrot.slane %v2175_v54, 4  ;;  %v2659_v55 = vrot.slane %v2657_v12, 4  ;;  %4913 = vmatprep.mubr.bf16.mxu1 %v4291_v19  ;;  %v2490_v59 = vld [vmem:[#allocation2 + $0x74] sm:$0x1] }
 0x17d   : > { %v2645_v14 = vsel %vm6486_vm8, %v2640_v63, %v2644_v48  ;;  %v2662_v60 = vrot.slane %v2660_v8, 5  ;;  %v2668_v34 = vrot.slane %v2666_v6, 5  ;;  %v2670_v18 = vshrl.u32 %v2483_v32, 16  ;;  %3976 = vst.msk [vmem:[#allocation3 + $0x130] sm:$0xff] %vm1980_vm1, %v3936_v38  ;;  %v3985_v17 = vld [vmem:[#allocation2 + $0x18] sm:$0xe]  ;;  %v1951_v25 = vpop.permute.xlu0 %1950 }
 0x17e   : > { %v2655_v9 = vsel %vm6486_vm8, %v2650_v4, %v2654_v45  ;;  %v2179_v39 = vsel %vm6902_vm14, %v2177_v35, %v2178_v62  ;;  %v2676_v10 = vshll.u32 %v2484_v47, 16  ;;  %v2681_v11 = vshrl.u32 %v2485_v58, 16  ;;  %v4290_v36 = vld [vmem:[#allocation3 + $0x88] sm:$0xff]  ;;  %v3986_v32 = vld [vmem:[#allocation2 + $0x1c] sm:$0xf]  ;;  %1990 = vst.msk [vmem:[#allocation3 + $0x168] sm:$0xff] %vm1980_vm1, %v1951_v25 }
 0x17f   : > { %v5628_v13 = vcombine.low %v2645_v14, %v2655_v9  ;;  %v5602_v40 = vcombine.low %v2176_v29, %v2179_v39  ;;  %v2663_v46 = vor.u32 %v2662_v60, %v2659_v55  ;;  %v2672_v7 = vrot.slane %v2670_v18, 4  ;;  %v3987_v41 = vld [vmem:[#allocation2 + $0x20] sm:$0x1]  ;;  %v3988_v45 = vld [vmem:[#allocation2 + $0x24] sm:$0xe] }
 0x180   : > { %v2678_v61 = vrot.slane %v2676_v10, 5  ;;  %v2683_v53 = vrot.slane %v2681_v11, 4  ;;  %v2684_v33 = vshll.u32 %v2485_v58, 16  ;;  %v2690_v23 = vshll.u32 %v2486_v44, 16  ;;  %v3989_v8 = vld [vmem:[#allocation2 + $0x28] sm:$0xf] }
 0x181   : > { %2965 = vst.msk [vmem:[#allocation3 + $0xd8] sm:$0xff] %vm1432_vm15, %v5628_v13  ;;  %2283 = vst.msk [vmem:[#allocation3 + $0x1c0] sm:$0xff] %vm1432_vm15, %v5602_v40  ;;  %v2664_v57 = vrot.slane %v2663_v46, 4  ;;  %v2673_v15 = vor.u32 %v2672_v7, %v2668_v34  ;;  %v2694_v5 = vshrl.u32 %v2486_v44, 16  ;;  %v2700_v27 = vshll.u32 %v2487_v16, 16  ;;  %v4301_v40 = vld [vmem:[#allocation3 + $0xe0] sm:$0xff]  ;;  %v3247_v7 = vpop.permute.xlu1 %3246 }
 0x182   : > { %3285 = vst.msk [vmem:[#allocation3 + $0xd8] sm:$0xff] %vm1980_vm1, %v7879_v52  ;;  %v2686_v3 = vrot.slane %v2684_v33, 5  ;;  %v2692_v30 = vrot.slane %v2690_v23, 5  ;;  %v2705_v26 = vshrl.u32 %v2488_v24, 16  ;;  %v2708_v49 = vshll.u32 %v2488_v24, 16  ;;  %v4319_v55 = vld [vmem:[#allocation3 + $0x170] sm:$0xff] }
 0x183   : > { %v2669_v37 = vsel %vm6486_vm8, %v2664_v57, %v2668_v34  ;;  %v2674_v21 = vrot.slane %v2673_v15, 4  ;;  %v2696_v48 = vrot.slane %v2694_v5, 4  ;;  %v2702_v31 = vrot.slane %v2700_v27, 5  ;;  %4914 = vmatmul.mubr.bf16.gmra.mrb[28].mxu1 %v4290_v36  ;;  %v3990_v35 = vld [vmem:[#allocation2 + $0x2c] sm:$0x1]  ;;  %4800 = vmatprep.mubr.bf16.mxu0 %v4319_v55 }
 0x184   : > { %v2687_v42 = vor.u32 %v2686_v3, %v2683_v53  ;;  %v2707_v43 = vrot.slane %v2705_v26, 4  ;;  %v2710_v56 = vrot.slane %v2708_v49, 5  ;;  %v2714_v2 = vshll.u32 %v2489_v50, 16  ;;  %4921 = vmatprep.mubr.bf16.mxu1 %v4296_v22  ;;  %v2491_v44 = vld [vmem:[#allocation2 + $0x78] sm:$0xf]  ;;  %v4295_v9 = vld [vmem:[#allocation3 + $0xb0] sm:$0xff] }
 0x185   : > { %v2679_v52 = vsel %vm6486_vm8, %v2674_v21, %v2678_v61  ;;  %v2697_v20 = vor.u32 %v2696_v48, %v2692_v30  ;;  %v2718_v47 = vshrl.u32 %v2489_v50, 16  ;;  %v2724_v19 = vshll.u32 %v2490_v59, 16  ;;  %v2492_v13 = vld [vmem:[#allocation2 + $0x7c] sm:$0xf]  ;;  %v2493_v38 = vld [vmem:[#allocation2 + $0x80] sm:$0x1]  ;;  %v3249_v21 = vpop.permute.xlu1 %3248 }
 0x186   : > { %v5629_v54 = vcombine.low %v2669_v37, %v2679_v52  ;;  %v2688_v62 = vrot.slane %v2687_v42, 4  ;;  %v2711_v12 = vor.u32 %v2710_v56, %v2707_v43  ;;  %v2716_v63 = vrot.slane %v2714_v2, 5  ;;  %v3991_v53 = vld [vmem:[#allocation2 + $0x30] sm:$0xe]  ;;  %v3992_v36 = vld [vmem:[#allocation2 + $0x34] sm:$0xf] }
 0x187   : > { %v2698_v6 = vrot.slane %v2697_v20, 4  ;;  %v2720_v58 = vrot.slane %v2718_v47, 4  ;;  %v2726_v4 = vrot.slane %v2724_v19, 5  ;;  %v5703_v29 = vrot.slane %v3985_v17, 9  ;;  %v3993_v57 = vld [vmem:[#allocation2 + $0x38] sm:$0x1] }
 0x188   : > { %2966 = vst.msk [vmem:[#allocation3 + $0x100] sm:$0xff] %vm1432_vm15, %v5629_v54  ;;  %v2693_v14 = vsel %vm6486_vm8, %v2688_v62, %v2692_v30  ;;  %v2712_v60 = vrot.slane %v2711_v12, 4  ;;  %v4083_v34 = vrot.slane %v3986_v32, 5  ;;  %v4086_v18 = vrot.slane %v3987_v41, 5  ;;  %v4318_v15 = vld [vmem:[#allocation3 + $0x168] sm:$0xff] }
 0x189   : > { %3286 = vst.msk [vmem:[#allocation3 + $0x100] sm:$0xff] %vm1980_vm1, %v7901_v1  ;;  %v2703_v39 = vsel %vm6486_vm8, %v2698_v6, %v2702_v31  ;;  %v2721_v10 = vor.u32 %v2720_v58, %v2716_v63  ;;  %v5704_v16 = vrot.slane %v3988_v45, 9  ;;  %v4090_v11 = vrot.slane %v3989_v8, 5  ;;  %v3994_v3 = vld [vmem:[#allocation2 + $0x3c] sm:$0xe]  ;;  %4801 = vmatmul.mubr.bf16.gmra.mrb[36].mxu0 %v4318_v15  ;;  %v4300_v12 = vld [vmem:[#allocation3 + $0xd8] sm:$0xff] }
 0x18a   : > { %v5630_v46 = vcombine.low %v2693_v14, %v2703_v39  ;;  %v2717_v24 = vsel %vm6486_vm8, %v2712_v60, %v2716_v63  ;;  %v4084_v28 = vsel %vm6902_vm14, %v5703_v29, %v4083_v34  ;;  %v4085_v61 = vrot.slane %v4083_v34, 4  ;;  %v3995_v25 = vld [vmem:[#allocation2 + $0x40] sm:$0xf]  ;;  %v3996_v42 = vld [vmem:[#allocation2 + $0x44] sm:$0x1] }
 0x18b   : > { %v2722_v1 = vrot.slane %v2721_v10, 4  ;;  %v4091_v33 = vsel %vm6902_vm14, %v5704_v16, %v4090_v11  ;;  %v4092_v23 = vrot.slane %v4090_v11, 4  ;;  %v4093_v50 = vrot.slane %v3990_v35, 5  ;;  %4922 = vmatmul.mubr.bf16.gmra.mrb[32].mxu1 %v4295_v9  ;;  %v2494_v20 = vld [vmem:[#allocation2 + $0x84] sm:$0xf] }
 0x18c   : > { %2967 = vst.msk [vmem:[#allocation3 + $0x128] sm:$0xff] %vm1432_vm15, %v5630_v46  ;;  %v4087_v5 = vsel %vm6902_vm14, %v4085_v61, %v4086_v18  ;;  %v2729_v27 = vshrl.u32 %v2491_v44, 16  ;;  %v2732_v59 = vshll.u32 %v2491_v44, 16  ;;  %v2738_v22 = vshll.u32 %v2492_v13, 16  ;;  %4929 = vmatprep.mubr.bf16.mxu1 %v4301_v40  ;;  %v2495_v58 = vld [vmem:[#allocation2 + $0x88] sm:$0xf] }
 0x18d   : > { %3287 = vst.msk [vmem:[#allocation3 + $0x128] sm:$0xff] %vm1980_vm1, %v3247_v7  ;;  %v2727_v30 = vsel %vm6486_vm8, %v2722_v1, %v2726_v4  ;;  %v5719_v26 = vcombine.low %v4084_v28, %v4087_v5  ;;  %v4094_v49 = vsel %vm6902_vm14, %v4092_v23, %v4093_v50  ;;  %v2742_v17 = vshrl.u32 %v2492_v13, 16  ;;  %v2421_v62 = vpop.permute.xlu0 %2420  ;;  %v4306_v4 = vld [vmem:[#allocation3 + $0x108] sm:$0xff]  ;;  %v2496_v14 = vld [vmem:[#allocation2 + $0x8c] sm:$0x1]  ;;  %v3251_v23 = vpop.permute.xlu1 %3250 }
 0x18e   : > { %v5631_v37 = vcombine.low %v2717_v24, %v2727_v30  ;;  %v5720_v48 = vcombine.low %v4091_v33, %v4094_v49  ;;  %v2731_v31 = vrot.slane %v2729_v27, 4  ;;  %v2734_v32 = vrot.slane %v2732_v59, 5  ;;  %2458 = vst.msk [vmem:[#allocation3 + $0x198] sm:$0xff] %vm1980_vm1, %v2421_v62  ;;  %v3997_v39 = vld [vmem:[#allocation2 + $0x48] sm:$0xe] }
 0x18f   : > { %4257 = vst.msk [vmem:[#allocation3 + $0x20] sm:$0xff] %vm1432_vm15, %v5719_v26  ;;  %v2740_v43 = vrot.slane %v2738_v22, 5  ;;  %v2744_v56 = vrot.slane %v2742_v17, 4  ;;  %v2748_v2 = vshll.u32 %v2493_v38, 16  ;;  %v5705_v52 = vrot.slane %v3991_v53, 9 }
 0x190   : > { %2968 = vst.msk [vmem:[#allocation3 + $0x150] sm:$0xff] %vm1432_vm15, %v5631_v37  ;;  %4258 = vst.msk [vmem:[#allocation3 + $0x48] sm:$0xff] %vm1432_vm15, %v5720_v48  ;;  %v2735_v47 = vor.u32 %v2734_v32, %v2731_v31  ;;  %v4097_v19 = vrot.slane %v3992_v36, 5  ;;  %v4100_v41 = vrot.slane %v3993_v57, 5  ;;  %v5706_v54 = vrot.slane %v3994_v3, 9  ;;  %v4305_v31 = vld [vmem:[#allocation3 + $0x100] sm:$0xff] }
 0x191   : > { %3288 = vst.msk [vmem:[#allocation3 + $0x150] sm:$0xff] %vm1980_vm1, %v3249_v21  ;;  %v2745_v63 = vor.u32 %v2744_v56, %v2740_v43  ;;  %v2750_v45 = vrot.slane %v2748_v2, 5  ;;  %v4104_v8 = vrot.slane %v3995_v25, 5  ;;  %v4107_v6 = vrot.slane %v3996_v42, 5  ;;  %v3998_v40 = vld [vmem:[#allocation2 + $0x4c] sm:$0xf]  ;;  %v1953_v7 = vpop.permute.xlu0 %1952 }
 0x192   : > { %v2736_v29 = vrot.slane %v2735_v47, 4  ;;  %v4098_v35 = vsel %vm6902_vm14, %v5705_v52, %v4097_v19  ;;  %v4099_v55 = vrot.slane %v4097_v19, 4  ;;  %v2753_v60 = vshrl.u32 %v2494_v20, 16  ;;  %v3999_v46 = vld [vmem:[#allocation2 + $0x50] sm:$0x1]  ;;  %1991 = vst.msk [vmem:[#allocation3 + $0x190] sm:$0xff] %vm1980_vm1, %v1953_v7 }
 0x193   : > { %v2746_v34 = vrot.slane %v2745_v63, 4  ;;  %v4105_v18 = vsel %vm6902_vm14, %v5706_v54, %v4104_v8  ;;  %v4106_v44 = vrot.slane %v4104_v8, 4  ;;  %v2756_v9 = vshll.u32 %v2494_v20, 16  ;;  %4930 = vmatmul.mubr.bf16.gmra.mrb[36].mxu1 %v4300_v12  ;;  %v4000_v53 = vld [vmem:[#allocation2 + $0x54] sm:$0xe]  ;;  %v4311_v56 = vld [vmem:[#allocation3 + $0x130] sm:$0xff] }
 0x194   : > { %v2741_v10 = vsel %vm6486_vm8, %v2736_v29, %v2740_v43  ;;  %v4101_v16 = vsel %vm6902_vm14, %v4099_v55, %v4100_v41  ;;  %v2755_v11 = vrot.slane %v2753_v60, 4  ;;  %v2762_v13 = vshll.u32 %v2495_v58, 16  ;;  %4937 = vmatprep.mubr.bf16.mxu1 %v4306_v4  ;;  %v4001_v1 = vld [vmem:[#allocation2 + $0x58] sm:$0xf]  ;;  %v4002_v15 = vld [vmem:[#allocation2 + $0x5c] sm:$0x1] }
 0x195   : > { %v2751_v24 = vsel %vm6486_vm8, %v2746_v34, %v2750_v45  ;;  %v5721_v28 = vcombine.low %v4098_v35, %v4101_v16  ;;  %v4108_v61 = vsel %vm6902_vm14, %v4106_v44, %v4107_v6  ;;  %v2758_v38 = vrot.slane %v2756_v9, 5  ;;  %v2497_v3 = vld [vmem:[#allocation2 + $0x90] sm:$0xf]  ;;  %v2498_v37 = vld [vmem:[#allocation2 + $0x94] sm:$0xf]  ;;  %v2423_v21 = vpop.permute.xlu0 %2422 }
 0x196   : > { %v5632_v33 = vcombine.low %v2741_v10, %v2751_v24  ;;  %v5722_v50 = vcombine.low %v4105_v18, %v4108_v61  ;;  %v2764_v36 = vrot.slane %v2762_v13, 5  ;;  %v2766_v57 = vshrl.u32 %v2495_v58, 16  ;;  %v4324_v48 = vld [vmem:[#allocation3 + $0x198] sm:$0xff]  ;;  %2459 = vst.msk [vmem:[#allocation3 + $0x1c0] sm:$0xff] %vm1980_vm1, %v2423_v21  ;;  %v2499_v19 = vld [vmem:[#allocation2 + $0x98] sm:$0x1] }
 0x197   : > { %4259 = vst.msk [vmem:[#allocation3 + $0x70] sm:$0xff] %vm1432_vm15, %v5721_v28  ;;  %v2759_v5 = vor.u32 %v2758_v38, %v2755_v11  ;;  %v2772_v27 = vshll.u32 %v2496_v14, 16  ;;  %v5707_v59 = vrot.slane %v3997_v39, 9  ;;  %v4111_v22 = vrot.slane %v3998_v40, 5  ;;  %4808 = vmatprep.mubr.bf16.mxu0 %v4324_v48  ;;  %v4003_v63 = vld [vmem:[#allocation2 + $0x60] sm:$0xe] }
 0x198   : > { %2969 = vst.msk [vmem:[#allocation3 + $0x178] sm:$0xff] %vm1432_vm15, %v5632_v33  ;;  %4260 = vst.msk [vmem:[#allocation3 + $0x98] sm:$0xff] %vm1432_vm15, %v5722_v50  ;;  %v2768_v30 = vrot.slane %v2766_v57, 4  ;;  %v4114_v26 = vrot.slane %v3999_v46, 5  ;;  %v5708_v49 = vrot.slane %v4000_v53, 9  ;;  %v4118_v17 = vrot.slane %v4001_v1, 5 }
 0x199   : > { %3289 = vst.msk [vmem:[#allocation3 + $0x178] sm:$0xff] %vm1980_vm1, %v3251_v23  ;;  %v2760_v32 = vrot.slane %v2759_v5, 4  ;;  %v2774_v25 = vrot.slane %v2772_v27, 5  ;;  %v4112_v42 = vsel %vm6902_vm14, %v5707_v59, %v4111_v22  ;;  %v4113_v43 = vrot.slane %v4111_v22, 4  ;;  %v4004_v45 = vld [vmem:[#allocation2 + $0x64] sm:$0xf]  ;;  %v1955_v55 = vpop.permute.xlu0 %1954 }
 0x19a   : > { %v2769_v2 = vor.u32 %v2768_v30, %v2764_v36  ;;  %v4119_v52 = vsel %vm6902_vm14, %v5708_v49, %v4118_v17  ;;  %v4120_v20 = vrot.slane %v4118_v17, 4  ;;  %v4121_v47 = vrot.slane %v4002_v15, 5  ;;  %v4005_v29 = vld [vmem:[#allocation2 + $0x68] sm:$0x1]  ;;  %v4006_v35 = vld [vmem:[#allocation2 + $0x6c] sm:$0xe] }
 0x19b   : > { %v2765_v41 = vsel %vm6486_vm8, %v2760_v32, %v2764_v36  ;;  %v4115_v54 = vsel %vm6902_vm14, %v4113_v43, %v4114_v26  ;;  %v2777_v62 = vshrl.u32 %v2497_v3, 16  ;;  %v2780_v12 = vshll.u32 %v2497_v3, 16  ;;  %4938 = vmatmul.mubr.bf16.gmra.mrb[40].mxu1 %v4305_v31  ;;  %v4323_v14 = vld [vmem:[#allocation3 + $0x190] sm:$0xff]  ;;  %v4007_v9 = vld [vmem:[#allocation2 + $0x70] sm:$0xf]  ;;  %1992 = vst.msk [vmem:[#allocation3 + $0x1b8] sm:$0xff] %vm1980_vm1, %v1955_v55 }
 0x19c   : > { %v2770_v8 = vrot.slane %v2769_v2, 4  ;;  %v5723_v6 = vcombine.low %v4112_v42, %v4115_v54  ;;  %v4122_v58 = vsel %vm6902_vm14, %v4120_v20, %v4121_v47  ;;  %v2786_v4 = vshll.u32 %v2498_v37, 16  ;;  %4945 = vmatprep.mubr.bf16.mxu1 %v4311_v56  ;;  %4809 = vmatmul.mubr.bf16.gmra.mrb[40].mxu0 %v4323_v14  ;;  %v4008_v24 = vld [vmem:[#allocation2 + $0x74] sm:$0x1]  ;;  %v2500_v28 = vld [vmem:[#allocation2 + $0x9c] sm:$0xf] }
 0x19d   : > { %v5724_v60 = vcombine.low %v4119_v52, %v4122_v58  ;;  %v2779_v34 = vrot.slane %v2777_v62, 4  ;;  %v2782_v18 = vrot.slane %v2780_v12, 5  ;;  %v2790_v44 = vshrl.u32 %v2498_v37, 16  ;;  %v2501_v33 = vld [vmem:[#allocation2 + $0xa0] sm:$0xf]  ;;  %v4329_v23 = vld [vmem:[#allocation3 + $0x1c0] sm:$0xff]  ;;  %v3938_v50 = vpop.permute.xlu0 %3937 }
 0x19e   : > { %v2775_v39 = vsel %vm6486_vm8, %v2770_v8, %v2774_v25  ;;  %4261 = vst.msk [vmem:[#allocation3 + $0xc0] sm:$0xff] %vm1432_vm15, %v5723_v6  ;;  %v2788_v10 = vrot.slane %v2786_v4, 5  ;;  %v2796_v16 = vshll.u32 %v2499_v19, 16  ;;  %v5709_v11 = vrot.slane %v4003_v63, 9  ;;  %v4310_v36 = vld [vmem:[#allocation3 + $0x128] sm:$0xff]  ;;  %4816 = vmatprep.mubr.bf16.mxu0 %v4329_v23  ;;  %v3253_v3 = vpop.permute.xlu1 %3252  ;;  %v4277_v43 = vld [vmem:[#allocation3 + $0x20] sm:$0xff] }
 0x19f   : > { %v5633_v13 = vcombine.low %v2765_v41, %v2775_v39  ;;  %4262 = vst.msk [vmem:[#allocation3 + $0xe8] sm:$0xff] %vm1432_vm15, %v5724_v60  ;;  %v2783_v40 = vor.u32 %v2782_v18, %v2779_v34  ;;  %v2792_v46 = vrot.slane %v2790_v44, 4  ;;  %v4125_v7 = vrot.slane %v4004_v45, 5  ;;  %v2502_v59 = vld [vmem:[#allocation2 + $0xa4] sm:$0x1] }
 0x1a0   : > { %v2798_v61 = vrot.slane %v2796_v16, 5  ;;  %v4128_v38 = vrot.slane %v4005_v29, 5  ;;  %v5710_v53 = vrot.slane %v4006_v35, 9  ;;  %v4132_v1 = vrot.slane %v4007_v9, 5  ;;  %v4009_v22 = vld [vmem:[#allocation2 + $0x78] sm:$0xe] }
 0x1a1   : > { %2970 = vst.msk [vmem:[#allocation3 + $0x1a0] sm:$0xff] %vm1432_vm15, %v5633_v13  ;;  %v2784_v57 = vrot.slane %v2783_v40, 4  ;;  %v2793_v15 = vor.u32 %v2792_v46, %v2788_v10  ;;  %v4126_v5 = vsel %vm6902_vm14, %v5709_v11, %v4125_v7  ;;  %v4127_v27 = vrot.slane %v4125_v7, 4  ;;  %v4010_v37 = vld [vmem:[#allocation2 + $0x7c] sm:$0xf]  ;;  %v3940_v41 = vpop.permute.xlu0 %3939  ;;  %v4315_v16 = vld [vmem:[#allocation3 + $0x150] sm:$0xff] }
 0x1a2   : > { %3977 = vst.msk [vmem:[#allocation3 + $0x158] sm:$0xff] %vm1980_vm1, %v3938_v50  ;;  %v4133_v30 = vsel %vm6902_vm14, %v5710_v53, %v4132_v1  ;;  %v4134_v26 = vrot.slane %v4132_v1, 4  ;;  %v4135_v49 = vrot.slane %v4008_v24, 5  ;;  %v2801_v17 = vshrl.u32 %v2500_v28, 16  ;;  %3290 = vst.msk [vmem:[#allocation3 + $0x1a0] sm:$0xff] %vm1980_vm1, %v3253_v3  ;;  %v4328_v19 = vld [vmem:[#allocation3 + $0x1b8] sm:$0xff] }
 0x1a3   : > { %v2789_v21 = vsel %vm6486_vm8, %v2784_v57, %v2788_v10  ;;  %v2794_v48 = vrot.slane %v2793_v15, 4  ;;  %v4129_v31 = vsel %vm6902_vm14, %v4127_v27, %v4128_v38  ;;  %v2804_v32 = vshll.u32 %v2500_v28, 16  ;;  %v4011_v25 = vld [vmem:[#allocation2 + $0x80] sm:$0x1]  ;;  %v4012_v42 = vld [vmem:[#allocation2 + $0x84] sm:$0xe]  ;;  %4946 = vmatmul.mubr.bf16.gmra.mrb[44].mxu1 %v4310_v36 }
 0x1a4   : > { %v5725_v56 = vcombine.low %v4126_v5, %v4129_v31  ;;  %v4136_v2 = vsel %vm6902_vm14, %v4134_v26, %v4135_v49  ;;  %v2803_v52 = vrot.slane %v2801_v17, 4  ;;  %v2810_v20 = vshll.u32 %v2501_v33, 16  ;;  %v4013_v47 = vld [vmem:[#allocation2 + $0x88] sm:$0xf]  ;;  %v4014_v45 = vld [vmem:[#allocation2 + $0x8c] sm:$0x1]  ;;  %4817 = vmatmul.mubr.bf16.gmra.mrb[44].mxu0 %v4328_v19 }
 0x1a5   : > { %v2799_v54 = vsel %vm6486_vm8, %v2794_v48, %v2798_v61  ;;  %v5726_v62 = vcombine.low %v4133_v30, %v4136_v2  ;;  %v2806_v12 = vrot.slane %v2804_v32, 5  ;;  %v2814_v63 = vshrl.u32 %v2501_v33, 16  ;;  %3978 = vst.msk [vmem:[#allocation3 + $0x180] sm:$0xff] %vm1980_vm1, %v3940_v41  ;;  %6078 = vmatprep.mubr.msk.bf16.mxu0 %vm1432_vm15, %v4277_v43  ;;  %v2503_v60 = vld [vmem:[#allocation2 + $0xa8] sm:$0xf]  ;;  %v3942_v11 = vpop.permute.xlu0 %3941  ;;  %v4282_v36 = vld [vmem:[#allocation3 + $0x48] sm:$0xff] }
 0x1a6   : > { %v5634_v8 = vcombine.low %v2789_v21, %v2799_v54  ;;  %4263 = vst.msk [vmem:[#allocation3 + $0x110] sm:$0xff] %vm1432_vm15, %v5725_v56  ;;  %v2812_v6 = vrot.slane %v2810_v20, 5  ;;  %v2820_v58 = vshll.u32 %v2502_v59, 16  ;;  %v5711_v4 = vrot.slane %v4009_v22, 9  ;;  %v2504_v39 = vld [vmem:[#allocation2 + $0xac] sm:$0xf]  ;;  %v3255_v61 = vpop.permute.xlu1 %3254 }
 0x1a7   : > { %4264 = vst.msk [vmem:[#allocation3 + $0x138] sm:$0xff] %vm1432_vm15, %v5726_v62  ;;  %v2807_v29 = vor.u32 %v2806_v12, %v2803_v52  ;;  %v2816_v35 = vrot.slane %v2814_v63, 4  ;;  %v4139_v55 = vrot.slane %v4010_v37, 5  ;;  %v4142_v14 = vrot.slane %v4011_v25, 5  ;;  %v2505_v24 = vld [vmem:[#allocation2 + $0xb0] sm:$0x1] }
 0x1a8   : > { %2971 = vst.msk [vmem:[#allocation3 + $0x1c8] sm:$0xff] %vm1432_vm15, %v5634_v8  ;;  %v2822_v34 = vrot.slane %v2820_v58, 5  ;;  %v5712_v18 = vrot.slane %v4012_v42, 9  ;;  %v4146_v44 = vrot.slane %v4013_v47, 5  ;;  %v4149_v9 = vrot.slane %v4014_v45, 5  ;;  %v4287_v22 = vld [vmem:[#allocation3 + $0x70] sm:$0xff] }
 0x1a9   : > { %v4316_v10 = vld [vmem:[#allocation3 + $0x158] sm:$0xff]  ;;  %v2808_v13 = vrot.slane %v2807_v29, 4  ;;  %v2817_v40 = vor.u32 %v2816_v35, %v2812_v6  ;;  %v4140_v46 = vsel %vm6902_vm14, %v5711_v4, %v4139_v55  ;;  %v4141_v7 = vrot.slane %v4139_v55, 4  ;;  %3979 = vst.msk [vmem:[#allocation3 + $0x1a8] sm:$0xff] %vm1980_vm1, %v3942_v11  ;;  %v4017_v50 = vld [vmem:[#allocation2 + $0x98] sm:$0x1]  ;;  %v3944_v21 = vpop.permute.xlu0 %3943 }
 0x1aa   : > { %v4015_v28 = vld [vmem:[#allocation2 + $0x90] sm:$0xe]  ;;  %4953 = vmatprep.mubr.bf16.mxu1 %v4316_v10  ;;  %v4147_v38 = vsel %vm6902_vm14, %v5712_v18, %v4146_v44  ;;  %v4148_v53 = vrot.slane %v4146_v44, 4  ;;  %v2825_v1 = vshrl.u32 %v2503_v60, 16  ;;  %v2828_v33 = vshll.u32 %v2503_v60, 16  ;;  %3291 = vst.msk [vmem:[#allocation3 + $0x1c8] sm:$0xff] %vm1980_vm1, %v3255_v61 }
 0x1ab   : > { %v4016_v23 = vld [vmem:[#allocation2 + $0x94] sm:$0xf]  ;;  %v2813_v57 = vsel %vm6486_vm8, %v2808_v13, %v2812_v6  ;;  %v2818_v15 = vrot.slane %v2817_v40, 4  ;;  %v4143_v5 = vsel %vm6902_vm14, %v4141_v7, %v4142_v14  ;;  %v2834_v27 = vshll.u32 %v2504_v39, 16  ;;  %v4018_v59 = vld [vmem:[#allocation2 + $0x9c] sm:$0xe]  ;;  %4954 = vmatmul.mubr.bf16.gmra.mrb[48].mxu1 %v4315_v16 }
 0x1ac   : > { %v5727_v3 = vcombine.low %v4140_v46, %v4143_v5  ;;  %v4150_v30 = vsel %vm6902_vm14, %v4148_v53, %v4149_v9  ;;  %v2827_v26 = vrot.slane %v2825_v1, 4  ;;  %v2830_v49 = vrot.slane %v2828_v33, 5  ;;  %v4019_v17 = vld [vmem:[#allocation2 + $0xa0] sm:$0xf]  ;;  %v4321_v37 = vld [vmem:[#allocation3 + $0x180] sm:$0xff]  ;;  %6079 = vmatmul.mubr.msk.bf16.vlgmr.msra.gmra.mrb[48].mxu0 %vm1432_vm15, %v4282_v36  ;;  %3980 = vst.msk [vmem:[#allocation3 + $0x1d0] sm:$0xff] %vm1980_vm1, %v3944_v21 }
 0x1ad   : > { %v2823_v48 = vsel %vm6486_vm8, %v2818_v15, %v2822_v34  ;;  %v5728_v31 = vcombine.low %v4147_v38, %v4150_v30  ;;  %v2836_v32 = vrot.slane %v2834_v27, 5  ;;  %v2838_v25 = vshrl.u32 %v2504_v39, 16  ;;  %v4020_v42 = vld [vmem:[#allocation2 + $0xa4] sm:$0x1]  ;;  %4961 = vmatprep.mubr.bf16.mxu1 %v4321_v37  ;;  %v2506_v20 = vld [vmem:[#allocation2 + $0xb4] sm:$0xf]  ;;  %6082 = vmatprep.mubr.msk.bf16.mxu0 %vm1432_vm15, %v4287_v22 }
 0x1ae   : > { %v5635_v43 = vcombine.low %v2813_v57, %v2823_v48  ;;  %4265 = vst.msk [vmem:[#allocation3 + $0x160] sm:$0xff] %vm1432_vm15, %v5727_v3  ;;  %v2831_v56 = vor.u32 %v2830_v49, %v2827_v26  ;;  %v2844_v2 = vshll.u32 %v2505_v24, 16  ;;  %v5713_v52 = vrot.slane %v4015_v28, 9  ;;  %v2507_v62 = vld [vmem:[#allocation2 + $0xb8] sm:$0xf]  ;;  %v4320_v58 = vld [vmem:[#allocation3 + $0x178] sm:$0xff] }
 0x1af   : > { %4266 = vst.msk [vmem:[#allocation3 + $0x188] sm:$0xff] %vm1432_vm15, %v5728_v31  ;;  %v2840_v47 = vrot.slane %v2838_v25, 4  ;;  %v4153_v19 = vrot.slane %v4016_v23, 5  ;;  %v4156_v41 = vrot.slane %v4017_v50, 5  ;;  %v5714_v54 = vrot.slane %v4018_v59, 9  ;;  %v4292_v10 = vld [vmem:[#allocation3 + $0x98] sm:$0xff] }
 0x1b0   : > { %2972 = vst.msk [vmem:[#allocation3 + $0x1f0] sm:$0xff] %vm1432_vm15, %v5635_v43  ;;  %v2832_v12 = vrot.slane %v2831_v56, 4  ;;  %v2846_v63 = vrot.slane %v2844_v2, 5  ;;  %v4160_v45 = vrot.slane %v4019_v17, 5  ;;  %v4163_v8 = vrot.slane %v4020_v42, 5  ;;  %v4326_v60 = vld [vmem:[#allocation3 + $0x1a8] sm:$0xff] }
 0x1b1   : > { %v2508_v6 = vld [vmem:[#allocation2 + $0xbc] sm:$0x1]  ;;  %v2841_v4 = vor.u32 %v2840_v47, %v2836_v32  ;;  %v4154_v29 = vsel %vm6902_vm14, %v5713_v52, %v4153_v19  ;;  %v4155_v35 = vrot.slane %v4153_v19, 4  ;;  %v2849_v55 = vshrl.u32 %v2506_v20, 16  ;;  %v4021_v14 = vld [vmem:[#allocation2 + $0xa8] sm:$0xe] }
 0x1b2   : > { %v2837_v34 = vsel %vm6486_vm8, %v2832_v12, %v2836_v32  ;;  %v4161_v18 = vsel %vm6902_vm14, %v5714_v54, %v4160_v45  ;;  %v4162_v44 = vrot.slane %v4160_v45, 4  ;;  %v2852_v9 = vshll.u32 %v2506_v20, 16  ;;  %v4022_v39 = vld [vmem:[#allocation2 + $0xac] sm:$0xf]  ;;  %v4023_v46 = vld [vmem:[#allocation2 + $0xb0] sm:$0x1]  ;;  %v3257_v24 = vpop.permute.xlu1 %3256 }
 0x1b3   : > { %v2842_v16 = vrot.slane %v2841_v4, 4  ;;  %v4157_v11 = vsel %vm6902_vm14, %v4155_v35, %v4156_v41  ;;  %v2851_v13 = vrot.slane %v2849_v55, 4  ;;  %v2858_v40 = vshll.u32 %v2507_v62, 16  ;;  %4962 = vmatmul.mubr.bf16.gmra.mrb[52].mxu1 %v4320_v58  ;;  %v4297_v7 = vld [vmem:[#allocation3 + $0xc0] sm:$0xff]  ;;  %v4024_v1 = vld [vmem:[#allocation2 + $0xb4] sm:$0xe] }
 0x1b4   : > { %v5729_v28 = vcombine.low %v4154_v29, %v4157_v11  ;;  %v4164_v61 = vsel %vm6902_vm14, %v4162_v44, %v4163_v8  ;;  %v2854_v38 = vrot.slane %v2852_v9, 5  ;;  %v2862_v53 = vshrl.u32 %v2507_v62, 16  ;;  %4969 = vmatprep.mubr.bf16.mxu1 %v4326_v60  ;;  %3292 = vst.msk [vmem:[#allocation3 + $0x1f0] sm:$0xff] %vm1980_vm1, %v3257_v24  ;;  %v4025_v57 = vld [vmem:[#allocation2 + $0xb8] sm:$0xf]  ;;  %6083 = vmatmul.mubr.msk.bf16.gmra.mrb[52].mxu0 %vm1432_vm15, %v4292_v10  ;;  %v4331_v19 = vld [vmem:[#allocation3 + $0x1d0] sm:$0xff] }
 0x1b5   : > { %v2847_v33 = vsel %vm6486_vm8, %v2842_v16, %v2846_v63  ;;  %v5730_v23 = vcombine.low %v4161_v18, %v4164_v61  ;;  %v2860_v50 = vrot.slane %v2858_v40, 5  ;;  %v2868_v36 = vshll.u32 %v2508_v6, 16  ;;  %v4026_v15 = vld [vmem:[#allocation2 + $0xbc] sm:$0x1]  ;;  %v2509_v3 = vld [vmem:[#allocation2 + $0xc0] sm:$0xf]  ;;  %6086 = vmatprep.mubr.msk.bf16.mxu0 %vm1432_vm15, %v4297_v7 }
 0x1b6   : > { %v5636_v5 = vcombine.low %v2837_v34, %v2847_v33  ;;  %4267 = vst.msk [vmem:[#allocation3 + $0x1b0] sm:$0xff] %vm1432_vm15, %v5729_v28  ;;  %v2855_v27 = vor.u32 %v2854_v38, %v2851_v13  ;;  %v2864_v59 = vrot.slane %v2862_v53, 4  ;;  %v5715_v22 = vrot.slane %v4021_v14, 9  ;;  %v3946_v37 = vpop.permute.xlu0 %3945  ;;  %v2510_v25 = vld [vmem:[#allocation2 + $0xc4] sm:$0xf]  ;;  %v4325_v42 = vld [vmem:[#allocation3 + $0x1a0] sm:$0xff] }
 0x1b7   : > { %4268 = vst.msk [vmem:[#allocation3 + $0x1d8] sm:$0xff] %vm1432_vm15, %v5730_v23  ;;  %v2870_v30 = vrot.slane %v2868_v36, 5  ;;  %v4167_v26 = vrot.slane %v4022_v39, 5  ;;  %v4170_v49 = vrot.slane %v4023_v46, 5  ;;  %v5716_v17 = vrot.slane %v4024_v1, 9  ;;  %v4302_v45 = vld [vmem:[#allocation3 + $0xe8] sm:$0xff] }
 0x1b8   : > { %2973 = vst.msk [vmem:[#allocation3 + $0x218] sm:$0xff] %vm1432_vm15, %v5636_v5  ;;  %v2856_v21 = vrot.slane %v2855_v27, 4  ;;  %v2865_v48 = vor.u32 %v2864_v59, %v2860_v50  ;;  %v4174_v31 = vrot.slane %v4025_v57, 5  ;;  %v4177_v32 = vrot.slane %v4026_v15, 5  ;;  %v2511_v2 = vld [vmem:[#allocation2 + $0xc8] sm:$0x1] }
 0x1b9   : > { %3981 = vst.msk [vmem:[#allocation3 + $0x1f8] sm:$0xff] %vm1980_vm1, %v3946_v37  ;;  %v4168_v43 = vsel %vm6902_vm14, %v5715_v22, %v4167_v26  ;;  %v4169_v56 = vrot.slane %v4167_v26, 4  ;;  %v2873_v52 = vshrl.u32 %v2509_v3, 16  ;;  %v2876_v20 = vshll.u32 %v2509_v3, 16  ;;  %v4027_v47 = vld [vmem:[#allocation2 + $0xc0] sm:$0xe] }
 0x1ba   : > { %v2861_v41 = vsel %vm6486_vm8, %v2856_v21, %v2860_v50  ;;  %v2866_v54 = vrot.slane %v2865_v48, 4  ;;  %v4175_v62 = vsel %vm6902_vm14, %v5716_v17, %v4174_v31  ;;  %v4176_v12 = vrot.slane %v4174_v31, 4  ;;  %v4028_v63 = vld [vmem:[#allocation2 + $0xc4] sm:$0xf]  ;;  %v4029_v29 = vld [vmem:[#allocation2 + $0xc8] sm:$0x1] }
 0x1bb   : > { %v4171_v8 = vsel %vm6902_vm14, %v4169_v56, %v4170_v49  ;;  %v2875_v6 = vrot.slane %v2873_v52, 4  ;;  %v2878_v58 = vrot.slane %v2876_v20, 5  ;;  %v2882_v4 = vshll.u32 %v2510_v25, 16  ;;  %4970 = vmatmul.mubr.bf16.gmra.mrb[56].mxu1 %v4325_v42  ;;  %v4307_v35 = vld [vmem:[#allocation3 + $0x110] sm:$0xff]  ;;  %v4031_v44 = vld [vmem:[#allocation2 + $0xd0] sm:$0xf] }
 0x1bc   : > { %v2871_v55 = vsel %vm6486_vm8, %v2866_v54, %v2870_v30  ;;  %v5731_v14 = vcombine.low %v4168_v43, %v4171_v8  ;;  %v4178_v60 = vsel %vm6902_vm14, %v4176_v12, %v4177_v32  ;;  %v2886_v34 = vshrl.u32 %v2510_v25, 16  ;;  %v4030_v18 = vld [vmem:[#allocation2 + $0xcc] sm:$0xe]  ;;  %4977 = vmatprep.mubr.bf16.mxu1 %v4331_v19  ;;  %6087 = vmatmul.mubr.msk.bf16.gmra.mrb[56].mxu0 %vm1432_vm15, %v4302_v45  ;;  %v4032_v24 = vld [vmem:[#allocation2 + $0xd4] sm:$0x1]  ;;  %v4330_v57 = vld [vmem:[#allocation3 + $0x1c8] sm:$0xff] }
 0x1bd   : > { %v5637_v9 = vcombine.low %v2861_v41, %v2871_v55  ;;  %v5732_v39 = vcombine.low %v4175_v62, %v4178_v60  ;;  %v2879_v10 = vor.u32 %v2878_v58, %v2875_v6  ;;  %v2884_v16 = vrot.slane %v2882_v4, 5  ;;  %v3259_v11 = vpop.permute.xlu1 %3258  ;;  %6090 = vmatprep.mubr.msk.bf16.mxu0 %vm1432_vm15, %v4307_v35  ;;  %v4312_v26 = vld [vmem:[#allocation3 + $0x138] sm:$0xff]  ;;  %v4317_v37 = vld [vmem:[#allocation3 + $0x160] sm:$0xff]  ;;  %v4335_v0 = vld [vmem:[#allocation3 + $0x1f0] sm:$0xff] }
 0x1be   : > { %4269 = vst.msk [vmem:[#allocation3 + $0x200] sm:$0xff] %vm1432_vm15, %v5731_v14  ;;  %v2888_v13 = vrot.slane %v2886_v34, 4  ;;  %v2892_v40 = vshll.u32 %v2511_v2, 16  ;;  %v5717_v46 = vrot.slane %v4027_v47, 9  ;;  %v4181_v7 = vrot.slane %v4028_v63, 5  ;;  %v4322_v51 = vld [vmem:[#allocation3 + $0x188] sm:$0xff] }
 0x1bf   : > { %3293 = vst.msk [vmem:[#allocation3 + $0x218] sm:$0xff] %vm1980_vm1, %v3259_v11  ;;  %v2880_v28 = vrot.slane %v2879_v10, 4  ;;  %v4184_v61 = vrot.slane %v4029_v29, 5  ;;  %v5718_v38 = vrot.slane %v4030_v18, 9  ;;  %v4188_v53 = vrot.slane %v4031_v44, 5  ;;  %v3948_v1 = vpop.permute.xlu0 %3947  ;;  %v4327_v42 = vld [vmem:[#allocation3 + $0x1b0] sm:$0xff] }
 0x1c0   : > { %2974 = vst.msk [vmem:[#allocation3 + $0x240] sm:$0xff] %vm1432_vm15, %v5637_v9  ;;  %4270 = vst.msk [vmem:[#allocation3 + $0x228] sm:$0xff] %vm1432_vm15, %v5732_v39  ;;  %v2889_v33 = vor.u32 %v2888_v13, %v2884_v16  ;;  %v2894_v23 = vrot.slane %v2892_v40, 5  ;;  %v4182_v50 = vsel %vm6902_vm14, %v5717_v46, %v4181_v7  ;;  %v4183_v36 = vrot.slane %v4181_v7, 4  ;;  %v4336_v59 = vld [vmem:[#allocation3 + $0x1f8] sm:$0xff] }
 0x1c1   : > { %3982 = vst.msk [vmem:[#allocation3 + $0x220] sm:$0xff] %vm1980_vm1, %v3948_v1  ;;  %v4189_v15 = vsel %vm6902_vm14, %v5718_v38, %v4188_v53  ;;  %v4190_v5 = vrot.slane %v4188_v53, 4  ;;  %v4191_v27 = vrot.slane %v4032_v24, 5  ;;  %v2885_v22 = vsel %vm6486_vm8, %v2880_v28, %v2884_v16  ;;  %v4332_v2 = vld [vmem:[#allocation3 + $0x1d8] sm:$0xff] }
 0x1c2   : > { %v2890_v3 = vrot.slane %v2889_v33, 4  ;;  %v4185_v30 = vsel %vm6902_vm14, %v4183_v36, %v4184_v61 }
 0x1c3   : > { %v5733_v49 = vcombine.low %v4182_v50, %v4185_v30  ;;  %v4192_v17 = vsel %vm6902_vm14, %v4190_v5, %v4191_v27  ;;  %4978 = vmatmul.mubr.bf16.gmra.mrb[60].mxu1 %v4330_v57 }
 0x1c4   : > { %v2895_v21 = vsel %vm6486_vm8, %v2890_v3, %v2894_v23  ;;  %v5734_v48 = vcombine.low %v4189_v15, %v4192_v17  ;;  %4985 = vmatprep.mubr.bf16.mxu1 %v4336_v59  ;;  %6091 = vmatmul.mubr.msk.bf16.gmra.mrb[60].mxu0 %vm1432_vm15, %v4312_v26 }
 0x1c5   : > { %v5638_v31 = vcombine.low %v2885_v22, %v2895_v21  ;;  %4271 = vst.msk [vmem:[#allocation3 + $0x250] sm:$0xff] %vm1432_vm15, %v5733_v49  ;;  %v3261_v32 = vpop.permute.xlu1 %3260  ;;  %6094 = vmatprep.mubr.msk.bf16.mxu0 %vm1432_vm15, %v4317_v37  ;;  %v4337_v20 = vld [vmem:[#allocation3 + $0x200] sm:$0xff] }
 0x1c6   : > { %4272 = vst.msk [vmem:[#allocation3 + $0x278] sm:$0xff] %vm1432_vm15, %v5734_v48  ;;  %v4340_v43 = vld [vmem:[#allocation3 + $0x218] sm:$0xff] }
 0x1c7   : > { %3294 = vst.msk [vmem:[#allocation3 + $0x240] sm:$0xff] %vm1980_vm1, %v3261_v32  ;;  %v4342_v41 = vld [vmem:[#allocation3 + $0x228] sm:$0xff] }
 0x1c8   : > { %2975 = vst.msk [vmem:[#allocation3 + $0x268] sm:$0xff] %vm1432_vm15, %v5638_v31  ;;  %v4341_v25 = vld [vmem:[#allocation3 + $0x220] sm:$0xff] }
 0x1cb   : > { %4986 = vmatmul.mubr.bf16.gmra.mrb[64].mxu1 %v4335_v0 }
 0x1cc   : > { %4993 = vmatprep.mubr.bf16.mxu1 %v4341_v25  ;;  %6095 = vmatmul.mubr.msk.bf16.gmra.mrb[64].mxu0 %vm1432_vm15, %v4322_v51  ;;  %v4347_v62 = vld [vmem:[#allocation3 + $0x250] sm:$0xff] }
 0x1cd   : > { %6098 = vmatprep.mubr.msk.bf16.mxu0 %vm1432_vm15, %v4327_v42  ;;  %v4352_v45 = vld [vmem:[#allocation3 + $0x278] sm:$0xff] }
 0x1ce   : > { %v4345_v19 = vld [vmem:[#allocation3 + $0x240] sm:$0xff] }
 0x1d2   : > { %v3263_v56 = vpop.permute.xlu1 %3262  ;;  %v3950_v52 = vpop.permute.xlu0 %3949 }
 0x1d3   : > { %3295 = vst.msk [vmem:[#allocation3 + $0x268] sm:$0xff] %vm1980_vm1, %v3263_v56  ;;  %3983 = vst.msk [vmem:[#allocation3 + $0x248] sm:$0xff] %vm1980_vm1, %v3950_v52  ;;  %4994 = vmatmul.mubr.bf16.gmra.mrb[68].mxu1 %v4340_v43 }
 0x1d4   : > { %6099 = vmatmul.mubr.msk.bf16.gmra.mrb[68].mxu0 %vm1432_vm15, %v4332_v2 }
 0x1d5   : > { %6102 = vmatprep.mubr.msk.bf16.mxu0 %vm1432_vm15, %v4337_v20 }
 0x1d6   : > { %v3952_v47 = vpop.permute.xlu0 %3951 }
 0x1d7   : > { %3984 = vst.msk [vmem:[#allocation3 + $0x270] sm:$0xff] %vm1980_vm1, %v3952_v47 }
 0x1da   : > { %v4346_v54 = vld [vmem:[#allocation3 + $0x248] sm:$0xff] }
 0x1db   : > { %5001 = vmatprep.mubr.bf16.mxu1 %v4346_v54  ;;  %v4350_v63 = vld [vmem:[#allocation3 + $0x268] sm:$0xff] }
 0x1dc   : > { %5002 = vmatmul.mubr.bf16.gmra.mrb[72].mxu1 %v4345_v19  ;;  %6103 = vmatmul.mubr.msk.bf16.gmra.mrb[72].mxu0 %vm1432_vm15, %v4342_v41 }
 0x1dd   : > { %6106 = vmatprep.mubr.msk.bf16.mxu0 %vm1432_vm15, %v4347_v62  ;;  %v8129_v62 = vld [vmem:[%s8639_s5] ss:$0 sm:$0xff] }
 0x1de   : > { %v4351_v12 = vld [vmem:[#allocation3 + $0x270] sm:$0xff] }
 0x1df   : > { %5009 = vmatprep.mubr.bf16.mxu1 %v4351_v12 }
 0x1e4   : > { %5010 = vmatmul.mubr.bf16.gmra.mrb[76].mxu1 %v4350_v63  ;;  %6107 = vmatmul.mubr.msk.bf16.gmra.mrb[76].mxu0 %vm1432_vm15, %v4352_v45 }
 0x1fd   : > { %v5842_v8 = vpop.f32.mrb[0].mxu0 }
 0x1fe   : > { %v5843_v6 = vpop.f32.mrb[1].mxu0 }
 0x1ff   : > { %v5844_v58 = vadd.f32 %v5843_v6, %v5842_v8  ;;  %v5845_v4 = vpop.f32.mrb[2].mxu0 }
 0x200   : > { %v5846_v29 = vpop.f32.mrb[3].mxu0 }
 0x201   : > { %v5847_v35 = vadd.f32 %v5846_v29, %v5845_v4  ;;  %v4731_v45 = vadd.f32 %v5844_v58, %v8129_v62 }
 0x202   : > { %v5914_v55 = vpop.f32.mrb[0].mxu1 }
 0x203   : > { %v5915_v14 = vpop.f32.mrb[1].mxu1  ;;  %v4734_v29 = vadd.f32 %v5847_v35, %v8129_v62 }
 0x204   : > { %v8090_v60 = vadd.f32 %v5915_v14, %v5914_v55  ;;  %v5917_v34 = vpop.f32.mrb[2].mxu1 }
 0x205   : > { %v5918_v18 = vpop.f32.mrb[3].mxu1 }
 0x206   : > { %v8092_v44 = vadd.f32 %v5918_v18, %v5917_v34 }
 0x20a   : > { %v5848_v9 = vpop.f32.mrb[4].mxu0 }
 0x20b   : > { %v5849_v39 = vpop.f32.mrb[5].mxu0 }
 0x20c   : > { %v8094_v10 = vadd.f32 %v5849_v39, %v5848_v9  ;;  %v5851_v16 = vpop.f32.mrb[6].mxu0 }
 0x20d   : > { %v5852_v11 = vpop.f32.mrb[7].mxu0 }
 0x20e   : > { %v5920_v13 = vpop.f32.mrb[4].mxu1  ;;  %v8096_v40 = vadd.f32 %v5852_v11, %v5851_v16  ;;  %v4739_v35 = vadd.f32 %v8094_v10, %v8129_v62 }
 0x20f   : > { %v5921_v46 = vpop.f32.mrb[5].mxu1 }
 0x210   : > { %v8098_v7 = vadd.f32 %v5921_v46, %v5920_v13  ;;  %v5923_v24 = vpop.f32.mrb[6].mxu1 }
 0x211   : > { %v5924_v28 = vpop.f32.mrb[7].mxu1 }
 0x212   : > { %v8100_v61 = vadd.f32 %v5924_v28, %v5923_v24 }
 0x218   : > { %v5854_v38 = vpop.f32.mrb[8].mxu0 }
 0x219   : > { %v5855_v53 = vpop.f32.mrb[9].mxu0  ;;  %v5926_v1 = vpop.f32.mrb[8].mxu1 }
 0x21a   : > { %v8102_v33 = vadd.f32 %v5855_v53, %v5854_v38  ;;  %v5857_v23 = vpop.f32.mrb[10].mxu0  ;;  %v5927_v50 = vpop.f32.mrb[9].mxu1 }
 0x21b   : > { %v5858_v36 = vpop.f32.mrb[11].mxu0  ;;  %v8104_v57 = vadd.f32 %v5927_v50, %v5926_v1  ;;  %v5929_v15 = vpop.f32.mrb[10].mxu1 }
 0x21c   : > { %v8106_v5 = vadd.f32 %v5858_v36, %v5857_v23  ;;  %v5930_v27 = vpop.f32.mrb[11].mxu1 }
 0x21d   : > { %v8108_v59 = vadd.f32 %v5930_v27, %v5929_v15  ;;  %v4742_v15 = vadd.f32 %v8096_v40, %v8129_v62 }
 0x220   : > { %v5860_v22 = vpop.f32.mrb[12].mxu0 }
 0x221   : > { %v5861_v3 = vpop.f32.mrb[13].mxu0 }
 0x222   : > { %v8110_v30 = vadd.f32 %v5861_v3, %v5860_v22  ;;  %v5863_v26 = vpop.f32.mrb[14].mxu0  ;;  %v5932_v49 = vpop.f32.mrb[12].mxu1 }
 0x223   : > { %v5864_v17 = vpop.f32.mrb[15].mxu0  ;;  %v5933_v37 = vpop.f32.mrb[13].mxu1 }
 0x224   : > { %v8112_v21 = vadd.f32 %v5864_v17, %v5863_v26  ;;  %v8114_v48 = vadd.f32 %v5933_v37, %v5932_v49  ;;  %v5935_v31 = vpop.f32.mrb[14].mxu1 }
 0x225   : > { %v5936_v32 = vpop.f32.mrb[15].mxu1 }
 0x226   : > { %v8116_v0 = vadd.f32 %v5936_v32, %v5935_v31  ;;  %v4747_v31 = vadd.f32 %v8102_v33, %v8129_v62  ;;  %v4755_v33 = vadd.f32 %v8110_v30, %v8129_v62 }
 0x22a   : > { %v5866_v25 = vpop.f32.mrb[16].mxu0 }
 0x22b   : > { %v5867_v51 = vpop.f32.mrb[17].mxu0 }
 0x22c   : > { %v8118_v42 = vadd.f32 %v5867_v51, %v5866_v25  ;;  %v5869_v43 = vpop.f32.mrb[18].mxu0 }
 0x22d   : > { %v5870_v56 = vpop.f32.mrb[19].mxu0 }
 0x22e   : > { %v8120_v2 = vadd.f32 %v5870_v56, %v5869_v43 }
 0x232   : > { %v5872_v52 = vpop.f32.mrb[20].mxu0 }
 0x233   : > { %v5873_v20 = vpop.f32.mrb[21].mxu0 }
 0x234   : > { %v8122_v47 = vadd.f32 %v5873_v20, %v5872_v52  ;;  %v5875_v19 = vpop.f32.mrb[22].mxu0  ;;  %v4750_v52 = vadd.f32 %v8106_v5, %v8129_v62 }
 0x235   : > { %v5876_v41 = vpop.f32.mrb[23].mxu0 }
 0x236   : > { %v8124_v54 = vadd.f32 %v5876_v41, %v5875_v19 }
 0x23a   : > { %v5954_v12 = vpop.f32.mrb[16].mxu1 }
 0x23b   : > { %v5955_v63 = vpop.f32.mrb[17].mxu1 }
 0x23c   : > { %v5956_v8 = vadd.f32 %v5955_v63, %v5954_v12  ;;  %v5957_v6 = vpop.f32.mrb[18].mxu1 }
 0x23d   : > { %v5958_v4 = vpop.f32.mrb[19].mxu1 }
 0x23e   : > { %v5959_v55 = vadd.f32 %v5958_v4, %v5957_v6  ;;  %v8133_v14 = vadd.f32 %v5956_v8, %v4731_v45 }
 0x23f   : > { %v5878_v34 = vpop.f32.mrb[24].mxu0 }
 0x240   : > { %v5879_v18 = vpop.f32.mrb[25].mxu0  ;;  %v8135_v9 = vadd.f32 %v5959_v55, %v4734_v29  ;;  %v4758_v29 = vadd.f32 %v8112_v21, %v8129_v62  ;;  %v4766_v21 = vadd.f32 %v8120_v2, %v8129_v62 }
 0x241   : > { %v8137_v39 = vadd.f32 %v5879_v18, %v5878_v34  ;;  %v5881_v16 = vpop.f32.mrb[26].mxu0 }
 0x242   : > { %v5882_v11 = vpop.f32.mrb[27].mxu0 }
 0x243   : > { %v8139_v13 = vadd.f32 %v5882_v11, %v5881_v16 }
 0x246   : > { %v5960_v46 = vpop.f32.mrb[20].mxu1 }
 0x247   : > { %v5884_v58 = vpop.f32.mrb[28].mxu0  ;;  %v5961_v24 = vpop.f32.mrb[21].mxu1 }
 0x248   : > { %v5885_v28 = vpop.f32.mrb[29].mxu0  ;;  %v5962_v38 = vadd.f32 %v5961_v24, %v5960_v46  ;;  %v5963_v53 = vpop.f32.mrb[22].mxu1  ;;  %v4763_v46 = vadd.f32 %v8118_v42, %v8129_v62 }
 0x249   : > { %v8143_v1 = vadd.f32 %v5885_v28, %v5884_v58  ;;  %v5887_v23 = vpop.f32.mrb[30].mxu0  ;;  %v5964_v50 = vpop.f32.mrb[23].mxu1 }
 0x24a   : > { %v5888_v36 = vpop.f32.mrb[31].mxu0  ;;  %v5965_v27 = vadd.f32 %v5964_v50, %v5963_v53  ;;  %v8149_v3 = vadd.f32 %v5962_v38, %v4739_v35 }
 0x24b   : > { %v8147_v22 = vadd.f32 %v5888_v36, %v5887_v23 }
 0x24c   : > { %v8151_v26 = vadd.f32 %v5965_v27, %v4742_v15 }
 0x24e   : > { %v5966_v49 = vpop.f32.mrb[24].mxu1 }
 0x24f   : > { %v5890_v17 = vpop.f32.mrb[32].mxu0  ;;  %v5967_v10 = vpop.f32.mrb[25].mxu1 }
 0x250   : > { %v5891_v37 = vpop.f32.mrb[33].mxu0  ;;  %v5968_v32 = vadd.f32 %v5967_v10, %v5966_v49  ;;  %v5969_v25 = vpop.f32.mrb[26].mxu1  ;;  %v4771_v49 = vadd.f32 %v8122_v47, %v8129_v62 }
 0x251   : > { %v8155_v51 = vadd.f32 %v5891_v37, %v5890_v17  ;;  %v5893_v43 = vpop.f32.mrb[34].mxu0  ;;  %v5970_v40 = vpop.f32.mrb[27].mxu1 }
 0x252   : > { %v5894_v56 = vpop.f32.mrb[35].mxu0  ;;  %v5971_v20 = vadd.f32 %v5970_v40, %v5969_v25  ;;  %v8161_v41 = vadd.f32 %v5968_v32, %v4747_v31  ;;  %v4774_v31 = vadd.f32 %v8124_v54, %v8129_v62 }
 0x253   : > { %v8159_v19 = vadd.f32 %v5894_v56, %v5893_v43  ;;  %v4779_v56 = vadd.f32 %v8137_v39, %v8129_v62 }
 0x254   : > { %v8163_v12 = vadd.f32 %v5971_v20, %v4750_v52 }
 0x256   : > { %v5972_v63 = vpop.f32.mrb[28].mxu1 }
 0x257   : > { %v5973_v45 = vpop.f32.mrb[29].mxu1 }
 0x258   : > { %v5974_v8 = vadd.f32 %v5973_v45, %v5972_v63  ;;  %v5975_v6 = vpop.f32.mrb[30].mxu1 }
 0x259   : > { %v5976_v4 = vpop.f32.mrb[31].mxu1 }
 0x25a   : > { %v5977_v55 = vadd.f32 %v5976_v4, %v5975_v6  ;;  %v8169_v5 = vadd.f32 %v5974_v8, %v4755_v33  ;;  %v4782_v33 = vadd.f32 %v8139_v13, %v8129_v62 }
 0x25c   : > { %v8171_v34 = vadd.f32 %v5977_v55, %v4758_v29  ;;  %v5896_v11 = vpop.f32.mrb[36].mxu0 }
 0x25d   : > { %v5897_v30 = vpop.f32.mrb[37].mxu0 }
 0x25e   : > { %v5978_v18 = vpop.f32.mrb[32].mxu1  ;;  %v8175_v35 = vadd.f32 %v5897_v30, %v5896_v11  ;;  %v5899_v38 = vpop.f32.mrb[38].mxu0  ;;  %v4787_v11 = vadd.f32 %v8143_v1, %v8129_v62 }
 0x25f   : > { %v5979_v16 = vpop.f32.mrb[33].mxu1  ;;  %v5900_v23 = vpop.f32.mrb[39].mxu0 }
 0x260   : > { %v5980_v58 = vadd.f32 %v5979_v16, %v5978_v18  ;;  %v5981_v24 = vpop.f32.mrb[34].mxu1  ;;  %v8181_v36 = vadd.f32 %v5900_v23, %v5899_v38 }
 0x261   : > { %v5982_v28 = vpop.f32.mrb[35].mxu1 }
 0x262   : > { %v5983_v53 = vadd.f32 %v5982_v28, %v5981_v24  ;;  %v8179_v50 = vadd.f32 %v5980_v58, %v4763_v46  ;;  %v4790_v28 = vadd.f32 %v8147_v22, %v8129_v62 }
 0x264   : > { %v8183_v15 = vadd.f32 %v5983_v53, %v4766_v21 }
 0x266   : > { %v5984_v27 = vpop.f32.mrb[36].mxu1 }
 0x267   : > { %v5985_v42 = vpop.f32.mrb[37].mxu1 }
 0x268   : > { %v5986_v17 = vadd.f32 %v5985_v42, %v5984_v27  ;;  %v5987_v10 = vpop.f32.mrb[38].mxu1 }
 0x269   : > { %v5988_v37 = vpop.f32.mrb[39].mxu1 }
 0x26a   : > { %v5989_v2 = vadd.f32 %v5988_v37, %v5987_v10  ;;  %v8189_v32 = vadd.f32 %v5986_v17, %v4771_v49  ;;  %v4795_v10 = vadd.f32 %v8155_v51, %v8129_v62 }
 0x26c   : > { %v8191_v25 = vadd.f32 %v5989_v2, %v4774_v31 }
 0x26e   : > { %v5990_v43 = vpop.f32.mrb[40].mxu1 }
 0x26f   : > { %v5991_v40 = vpop.f32.mrb[41].mxu1  ;;  %v5902_v52 = vpop.f32.mrb[40].mxu0 }
 0x270   : > { %v5992_v20 = vadd.f32 %v5991_v40, %v5990_v43  ;;  %v5993_v63 = vpop.f32.mrb[42].mxu1  ;;  %v5903_v47 = vpop.f32.mrb[41].mxu0 }
 0x271   : > { %v5994_v45 = vpop.f32.mrb[43].mxu1  ;;  %v8197_v8 = vadd.f32 %v5903_v47, %v5902_v52  ;;  %v5905_v54 = vpop.f32.mrb[42].mxu0 }
 0x272   : > { %v5995_v6 = vadd.f32 %v5994_v45, %v5993_v63  ;;  %v8199_v4 = vadd.f32 %v5992_v20, %v4779_v56  ;;  %v5906_v29 = vpop.f32.mrb[43].mxu0  ;;  %v4798_v56 = vadd.f32 %v8159_v19, %v8129_v62 }
 0x273   : > { %v8201_v55 = vadd.f32 %v5906_v29, %v5905_v54 }
 0x274   : > { %v8203_v18 = vadd.f32 %v5995_v6, %v4782_v33 }
 0x276   : > { %v5996_v39 = vpop.f32.mrb[44].mxu1 }
 0x277   : > { %v5997_v16 = vpop.f32.mrb[45].mxu1  ;;  %v5908_v46 = vpop.f32.mrb[44].mxu0 }
 0x278   : > { %v5998_v58 = vadd.f32 %v5997_v16, %v5996_v39  ;;  %v5999_v24 = vpop.f32.mrb[46].mxu1  ;;  %v5909_v13 = vpop.f32.mrb[45].mxu0  ;;  %v4803_v39 = vadd.f32 %v8175_v35, %v8129_v62 }
 0x279   : > { %v6000_v30 = vpop.f32.mrb[47].mxu1  ;;  %v8209_v38 = vadd.f32 %v5909_v13, %v5908_v46  ;;  %v5911_v21 = vpop.f32.mrb[46].mxu0  ;;  %v4806_v46 = vadd.f32 %v8181_v36, %v8129_v62 }
 0x27a   : > { %v6001_v53 = vadd.f32 %v6000_v30, %v5999_v24  ;;  %v8211_v23 = vadd.f32 %v5998_v58, %v4787_v11  ;;  %v5912_v27 = vpop.f32.mrb[47].mxu0 }
 0x27b   : > { %v8213_v42 = vadd.f32 %v5912_v27, %v5911_v21 }
 0x27c   : > { %v8215_v49 = vadd.f32 %v6001_v53, %v4790_v28 }
 0x27e   : > { %v6002_v1 = vpop.f32.mrb[48].mxu1 }
 0x27f   : > { %v6003_v17 = vpop.f32.mrb[49].mxu1  ;;  %v6080_v37 = vpop.f32.mrb[48].mxu0 }
 0x280   : > { %v6004_v31 = vadd.f32 %v6003_v17, %v6002_v1  ;;  %v6005_v2 = vpop.f32.mrb[50].mxu1  ;;  %v8220_v22 = vadd.f32 %v6080_v37, %v8149_v3  ;;  %v5052_v43 = vpop.f32.mrb[49].mxu0 }
 0x281   : > { %v6006_v40 = vpop.f32.mrb[51].mxu1  ;;  %v8225_v52 = vadd.f32 %v5052_v43, %v8133_v14  ;;  %v6081_v20 = vpop.f32.mrb[50].mxu0 }
 0x282   : > { %v6007_v63 = vadd.f32 %v6006_v40, %v6005_v2  ;;  %v8227_v47 = vadd.f32 %v6004_v31, %v4795_v10  ;;  %v8230_v51 = vadd.f32 %v6081_v20, %v8151_v26  ;;  %v5055_v45 = vpop.f32.mrb[51].mxu0  ;;  %v5182_v26 = vsel %vm1432_vm15, %v8220_v22, 0.0 }
 0x283   : > { %v8233_v33 = vadd.f32 %v5055_v45, %v8135_v9  ;;  %v5179_v54 = vsel %vm1432_vm15, %v8225_v52, 0.0 }
 0x284   : > { %v8235_v3 = vadd.f32 %v6007_v63, %v4798_v56  ;;  %v5184_v28 = vsel %vm1432_vm15, %v8230_v51, 0.0 }
 0x285   : > { %v5180_v14 = vsel %vm1432_vm15, %v8233_v33, 0.0 }
 0x286   : > { %v6008_v19 = vpop.f32.mrb[52].mxu1  ;;  %v5181_v6 = vadd.f32 %v5180_v14, %v5179_v54 }
 0x287   : > { %v6009_v29 = vpop.f32.mrb[53].mxu1  ;;  %v6084_v16 = vpop.f32.mrb[52].mxu0 }
 0x288   : > { %v6010_v9 = vadd.f32 %v6009_v29, %v6008_v19  ;;  %v6011_v11 = vpop.f32.mrb[54].mxu1  ;;  %v5183_v58 = vadd.f32 %v5182_v26, %v5181_v6  ;;  %v8248_v24 = vadd.f32 %v6084_v16, %v8169_v5  ;;  %v5068_v13 = vpop.f32.mrb[53].mxu0 }
 0x289   : > { %v6012_v30 = vpop.f32.mrb[55].mxu1  ;;  %v8253_v35 = vadd.f32 %v5068_v13, %v8161_v41  ;;  %v6085_v21 = vpop.f32.mrb[54].mxu0 }
 0x28a   : > { %v6013_v53 = vadd.f32 %v6012_v30, %v6011_v11  ;;  %v8255_v27 = vadd.f32 %v6010_v9, %v4803_v39  ;;  %v5185_v1 = vadd.f32 %v5184_v28, %v5183_v58  ;;  %v8258_v17 = vadd.f32 %v6085_v21, %v8171_v34  ;;  %v5071_v36 = vpop.f32.mrb[55].mxu0 }
 0x28b   : > { %v5186_v5 = vsel %vm1432_vm15, %v8253_v35, 0.0  ;;  %v8263_v10 = vadd.f32 %v5071_v36, %v8163_v12  ;;  %v4811_v34 = vadd.f32 %v8197_v8, %v8129_v62  ;;  %v5190_v56 = vsel %vm1432_vm15, %v8248_v24, 0.0 }
 0x28c   : > { %v8265_v37 = vadd.f32 %v6013_v53, %v4806_v46  ;;  %v5187_v31 = vadd.f32 %v5186_v5, %v5185_v1  ;;  %v4814_v12 = vadd.f32 %v8201_v55, %v8129_v62  ;;  %v5192_v29 = vsel %vm1432_vm15, %v8258_v17, 0.0 }
 0x28d   : > { %v5188_v41 = vsel %vm1432_vm15, %v8263_v10, 0.0 }
 0x28e   : > { %v6014_v2 = vpop.f32.mrb[56].mxu1  ;;  %v5189_v43 = vadd.f32 %v5188_v41, %v5187_v31 }
 0x28f   : > { %v6015_v40 = vpop.f32.mrb[57].mxu1  ;;  %v6088_v20 = vpop.f32.mrb[56].mxu0 }
 0x290   : > { %v6016_v63 = vadd.f32 %v6015_v40, %v6014_v2  ;;  %v6017_v45 = vpop.f32.mrb[58].mxu1  ;;  %v5191_v54 = vadd.f32 %v5190_v56, %v5189_v43  ;;  %v8276_v14 = vadd.f32 %v6088_v20, %v8189_v32  ;;  %v5084_v19 = vpop.f32.mrb[57].mxu0 }
 0x291   : > { %v6018_v6 = vpop.f32.mrb[59].mxu1  ;;  %v8281_v8 = vadd.f32 %v5084_v19, %v8179_v50  ;;  %v6089_v39 = vpop.f32.mrb[58].mxu0 }
 0x292   : > { %v6019_v26 = vadd.f32 %v6018_v6, %v6017_v45  ;;  %v8283_v16 = vadd.f32 %v6016_v63, %v4811_v34  ;;  %v5193_v9 = vadd.f32 %v5192_v29, %v5191_v54  ;;  %v8286_v11 = vadd.f32 %v6089_v39, %v8191_v25  ;;  %v5087_v55 = vpop.f32.mrb[59].mxu0 }
 0x293   : > { %v5194_v32 = vsel %vm1432_vm15, %v8281_v8, 0.0  ;;  %v8291_v46 = vadd.f32 %v5087_v55, %v8183_v15  ;;  %v4819_v25 = vadd.f32 %v8209_v38, %v8129_v62  ;;  %v5198_v53 = vsel %vm1432_vm15, %v8276_v14, 0.0 }
 0x294   : > { %v8293_v58 = vadd.f32 %v6019_v26, %v4814_v12  ;;  %v5195_v13 = vadd.f32 %v5194_v32, %v5193_v9  ;;  %v4822_v15 = vadd.f32 %v8213_v42, %v8129_v62  ;;  %v5200_v40 = vsel %vm1432_vm15, %v8286_v11, 0.0 }
 0x295   : > { %v5196_v50 = vsel %vm1432_vm15, %v8291_v46, 0.0  ;;  %v4827_v26 = vadd.f32 %v8090_v60, %v8129_v62 }
 0x296   : > { %v6020_v30 = vpop.f32.mrb[60].mxu1  ;;  %v5197_v28 = vadd.f32 %v5196_v50, %v5195_v13 }
 0x297   : > { %v6021_v21 = vpop.f32.mrb[61].mxu1  ;;  %v6092_v1 = vpop.f32.mrb[60].mxu0 }
 0x298   : > { %v6022_v36 = vadd.f32 %v6021_v21, %v6020_v30  ;;  %v6023_v5 = vpop.f32.mrb[62].mxu1  ;;  %v5199_v31 = vadd.f32 %v5198_v53, %v5197_v28  ;;  %v8304_v41 = vadd.f32 %v6092_v1, %v8211_v23  ;;  %v5100_v2 = vpop.f32.mrb[61].mxu0 }
 0x299   : > { %v6024_v43 = vpop.f32.mrb[63].mxu1  ;;  %v8309_v38 = vadd.f32 %v5100_v2, %v8199_v4  ;;  %v6093_v34 = vpop.f32.mrb[62].mxu0 }
 0x29a   : > { %v6025_v56 = vadd.f32 %v6024_v43, %v6023_v5  ;;  %v4980_v20 = vadd.f32 %v6022_v36, %v4819_v25  ;;  %v5201_v63 = vadd.f32 %v5200_v40, %v5199_v31  ;;  %v8312_v45 = vadd.f32 %v6093_v34, %v8215_v49  ;;  %v5103_v42 = vpop.f32.mrb[63].mxu0 }
 0x29b   : > { %v5202_v23 = vsel %vm1432_vm15, %v8309_v38, 0.0  ;;  %v8317_v12 = vadd.f32 %v5103_v42, %v8203_v18  ;;  %v5206_v49 = vsel %vm1432_vm15, %v8304_v41, 0.0  ;;  %v4830_v18 = vadd.f32 %v8092_v44, %v8129_v62 }
 0x29c   : > { %v4983_v54 = vadd.f32 %v6025_v56, %v4822_v15  ;;  %v5203_v19 = vadd.f32 %v5202_v23, %v5201_v63  ;;  %v5208_v21 = vsel %vm1432_vm15, %v8312_v45, 0.0  ;;  %v4835_v56 = vadd.f32 %v8098_v7, %v8129_v62 }
 0x29d   : > { %v5204_v4 = vsel %vm1432_vm15, %v8317_v12, 0.0 }
 0x29e   : > { %v6026_v6 = vpop.f32.mrb[64].mxu1  ;;  %v5205_v29 = vadd.f32 %v5204_v4, %v5203_v19 }
 0x29f   : > { %v6027_v39 = vpop.f32.mrb[65].mxu1  ;;  %v6096_v9 = vpop.f32.mrb[64].mxu0 }
 0x2a0   : > { %v6028_v55 = vadd.f32 %v6027_v39, %v6026_v6  ;;  %v6029_v32 = vpop.f32.mrb[66].mxu1  ;;  %v5207_v13 = vadd.f32 %v5206_v49, %v5205_v29  ;;  %v8328_v50 = vadd.f32 %v6096_v9, %v8255_v27  ;;  %v5116_v30 = vpop.f32.mrb[65].mxu0 }
 0x2a1   : > { %v6030_v28 = vpop.f32.mrb[67].mxu1  ;;  %v8333_v60 = vadd.f32 %v5116_v30, %v8227_v47  ;;  %v6097_v25 = vpop.f32.mrb[66].mxu0 }
 0x2a2   : > { %v6031_v53 = vadd.f32 %v6030_v28, %v6029_v32  ;;  %v4988_v1 = vadd.f32 %v6028_v55, %v4827_v26  ;;  %v5209_v36 = vadd.f32 %v5208_v21, %v5207_v13  ;;  %v8336_v5 = vadd.f32 %v6097_v25, %v8265_v37  ;;  %v5119_v44 = vpop.f32.mrb[67].mxu0 }
 0x2a3   : > { %v5210_v27 = vsel %vm1432_vm15, %v8333_v60, 0.0  ;;  %v8341_v15 = vadd.f32 %v5119_v44, %v8235_v3  ;;  %v5214_v37 = vsel %vm1432_vm15, %v8328_v50, 0.0  ;;  %v4838_v3 = vadd.f32 %v8100_v61, %v8129_v62 }
 0x2a4   : > { %v4991_v31 = vadd.f32 %v6031_v53, %v4830_v18  ;;  %v5211_v2 = vadd.f32 %v5210_v27, %v5209_v36  ;;  %v5216_v39 = vsel %vm1432_vm15, %v8336_v5, 0.0 }
 0x2a5   : > { %v5212_v47 = vsel %vm1432_vm15, %v8341_v15, 0.0 }
 0x2a6   : > { %v6032_v43 = vpop.f32.mrb[68].mxu1  ;;  %v5213_v40 = vadd.f32 %v5212_v47, %v5211_v2 }
 0x2a7   : > { %v6033_v34 = vpop.f32.mrb[69].mxu1  ;;  %v6100_v63 = vpop.f32.mrb[68].mxu0 }
 0x2a8   : > { %v6034_v42 = vadd.f32 %v6033_v34, %v6032_v43  ;;  %v6035_v23 = vpop.f32.mrb[70].mxu1  ;;  %v5215_v19 = vadd.f32 %v5214_v37, %v5213_v40  ;;  %v8351_v4 = vadd.f32 %v6100_v63, %v4980_v20  ;;  %v5132_v6 = vpop.f32.mrb[69].mxu0  ;;  %v4846_v37 = vadd.f32 %v8108_v59, %v8129_v62 }
 0x2a9   : > { %v6036_v29 = vpop.f32.mrb[71].mxu1  ;;  %v8356_v26 = vadd.f32 %v5132_v6, %v8283_v16  ;;  %v6101_v7 = vpop.f32.mrb[70].mxu0 }
 0x2aa   : > { %v6037_v49 = vadd.f32 %v6036_v29, %v6035_v23  ;;  %v4996_v9 = vadd.f32 %v6034_v42, %v4835_v56  ;;  %v5217_v55 = vadd.f32 %v5216_v39, %v5215_v19  ;;  %v8358_v32 = vadd.f32 %v6101_v7, %v4983_v54  ;;  %v5135_v18 = vpop.f32.mrb[71].mxu0 }
 0x2ab   : > { %v5218_v61 = vsel %vm1432_vm15, %v8356_v26, 0.0  ;;  %v8363_v20 = vadd.f32 %v5135_v18, %v8293_v58  ;;  %v5222_v25 = vsel %vm1432_vm15, %v8351_v4, 0.0  ;;  %v4843_v58 = vadd.f32 %v8104_v57, %v8129_v62 }
 0x2ac   : > { %v4999_v13 = vadd.f32 %v6037_v49, %v4838_v3  ;;  %v5219_v30 = vadd.f32 %v5218_v61, %v5217_v55  ;;  %v5224_v43 = vsel %vm1432_vm15, %v8358_v32, 0.0  ;;  %v4851_v18 = vadd.f32 %v8114_v48, %v8129_v62 }
 0x2ad   : > { %v5220_v28 = vsel %vm1432_vm15, %v8363_v20, 0.0 }
 0x2ae   : > { %v5221_v16 = vadd.f32 %v5220_v28, %v5219_v30 }
 0x2af   : > { %v6038_v21 = vpop.f32.mrb[72].mxu1  ;;  %v6104_v53 = vpop.f32.mrb[72].mxu0 }
 0x2b0   : > { %v6039_v54 = vpop.f32.mrb[73].mxu1  ;;  %v5223_v36 = vadd.f32 %v5222_v25, %v5221_v16  ;;  %v8369_v44 = vadd.f32 %v6104_v53, %v4996_v9  ;;  %v5148_v27 = vpop.f32.mrb[73].mxu0  ;;  %v4854_v53 = vadd.f32 %v8116_v0, %v8129_v62 }
 0x2b1   : > { %v6040_v2 = vadd.f32 %v6039_v54, %v6038_v21  ;;  %v6041_v47 = vpop.f32.mrb[74].mxu1  ;;  %v8375_v40 = vadd.f32 %v5148_v27, %v4988_v1  ;;  %v6105_v34 = vpop.f32.mrb[74].mxu0 }
 0x2b2   : > { %v6042_v56 = vpop.f32.mrb[75].mxu1  ;;  %v5225_v63 = vadd.f32 %v5224_v43, %v5223_v36  ;;  %v8379_v42 = vadd.f32 %v6105_v34, %v4999_v13  ;;  %v5151_v23 = vpop.f32.mrb[75].mxu0  ;;  %v5230_v59 = vsel %vm1432_vm15, %v8369_v44, 0.0 }
 0x2b3   : > { %v6043_v3 = vadd.f32 %v6042_v56, %v6041_v47  ;;  %v5226_v19 = vsel %vm1432_vm15, %v8375_v40, 0.0  ;;  %v8383_v6 = vadd.f32 %v5151_v23, %v4991_v31  ;;  %v5004_v57 = vadd.f32 %v6040_v2, %v4843_v58 }
 0x2b4   : > { %v5227_v29 = vadd.f32 %v5226_v19, %v5225_v63  ;;  %v5232_v28 = vsel %vm1432_vm15, %v8379_v42, 0.0 }
 0x2b5   : > { %v5007_v39 = vadd.f32 %v6043_v3, %v4846_v37  ;;  %v5228_v1 = vsel %vm1432_vm15, %v8383_v6, 0.0 }
 0x2b6   : > { %v5229_v7 = vadd.f32 %v5228_v1, %v5227_v29 }
 0x2b7   : > { %v6044_v49 = vpop.f32.mrb[76].mxu1  ;;  %v6108_v9 = vpop.f32.mrb[76].mxu0 }
 0x2b8   : > { %v6045_v55 = vpop.f32.mrb[77].mxu1  ;;  %v5231_v61 = vadd.f32 %v5230_v59, %v5229_v7  ;;  %v5164_v13 = vpop.f32.mrb[77].mxu0 }
 0x2b9   : > { %v6046_v31 = vadd.f32 %v6045_v55, %v6044_v49  ;;  %v6047_v30 = vpop.f32.mrb[78].mxu1  ;;  %v8393_v16 = vadd.f32 %v5164_v13, %v5004_v57  ;;  %v6109_v21 = vpop.f32.mrb[78].mxu0  ;;  %v5250_v49 = vld [vmem:[%s8640_s6] sm:$0xff] }
 0x2ba   : > { %v6048_v25 = vpop.f32.mrb[79].mxu1  ;;  %v5233_v54 = vadd.f32 %v5232_v28, %v5231_v61  ;;  %v5167_v36 = vpop.f32.mrb[79].mxu0 }
 0x2bb   : > { %v5012_v27 = vadd.f32 %v6046_v31, %v4851_v18  ;;  %v6049_v2 = vadd.f32 %v6048_v25, %v6047_v30  ;;  %v5234_v48 = vsel %vm1432_vm15, %v8393_v16, 0.0  ;;  %v8399_v47 = vadd.f32 %v5167_v36, %v5007_v39  ;;  %v5256_v18 = vld [vmem:[%s8641_s7] sm:$0xff] }
 0x2bc   : > { %v5235_v58 = vadd.f32 %v5234_v48, %v5233_v54 }
 0x2bd   : > { %v8401_v43 = vadd.f32 %v6108_v9, %v5012_v27  ;;  %v5015_v34 = vadd.f32 %v6049_v2, %v4854_v53  ;;  %v5236_v56 = vsel %vm1432_vm15, %v8399_v47, 0.0 }
 0x2be   : > { %v5237_v37 = vadd.f32 %v5236_v56, %v5235_v58 }
 0x2bf   : > { %v5238_v0 = vsel %vm1432_vm15, %v8401_v43, 0.0  ;;  %v8407_v62 = vadd.f32 %v6109_v21, %v5015_v34 }
 0x2c0   : > { %v5239_v63 = vadd.f32 %v5238_v0, %v5237_v37 }
 0x2c1   : > { %v5240_v23 = vsel %vm1432_vm15, %v8407_v62, 0.0 }
 0x2c2   : > { %v5241_v3 = vadd.f32 %v5240_v23, %v5239_v63 }
 0x2c4   : > { %v5242_v19 = vrot.slane %v5241_v3, 4 }
 0x2c6   : > { %v5243_v57 = vadd.f32 %v5242_v19, %v5241_v3  ;;  %v5305_v19 = vld [vmem:[%s8423_s10 + $0x10] sm:$0xff] }
 0x2c8   : > { %v5244_v29 = vrot.slane %v5243_v57, 2 }
 0x2ca   : > { %v5245_v39 = vadd.f32 %v5244_v29, %v5243_v57  ;;  %v5307_v57 = vld [vmem:[%s8423_s10 + $0x20] sm:$0xff]  ;;  %v5308_v29 = vld [vmem:[%s8423_s10 + $0x28] sm:$0xff] }
 0x2cc   : > { %v5246_v1 = vrot.slane %v5245_v39, 1 }
 0x2ce   : > { %v5247_v7 = vadd.f32 %v5246_v1, %v5245_v39  ;;  %v5309_v39 = vld [vmem:[%s8423_s10 + $0x30] sm:$0xff]  ;;  %v5310_v1 = vld [vmem:[%s8423_s10 + $0x38] sm:$0xff] }
 0x2d0   : > { %v5249_v59 = vmul.f32 0.00390625, %v5247_v7  ;;  %v5311_v7 = vld [vmem:[%s8423_s10 + $0x40] sm:$0xff] }
 0x2d2   : > { %v5251_v9 = vmul.f32 %v5250_v49, %v5249_v59  ;;  %v5312_v49 = vld [vmem:[%s8423_s10 + $0x48] sm:$0xff]  ;;  %v5313_v59 = vld [vmem:[%s8423_s10 + $0x50] sm:$0xff] }
 0x2d4   : > { %v5252_v55 = vsel %vm1432_vm15, %v5251_v9, 0.0  ;;  %v5314_v9 = vld [vmem:[%s8423_s10 + $0x58] sm:$0xff] }
 0x2d5   : > { %5253 = vadd.xlane.f32.xlu0 %v5252_v55  ;;  %v5315_v55 = vld [vmem:[%s8423_s10 + $0x60] sm:$0xff] }
 0x362   : > { %v5254_v61 = vpop.xlane.xlu0 %5253 }
 0x363   : > { %v5255_v13 = vmax.f32 %v5254_v61, 0.0  ;;  %v5317_v61 = vld [vmem:[%s8423_s10 + $0x70] sm:$0xff] }
 0x365   : > { %v5257_v31 = vmul.f32 %v5256_v18, %v5255_v13  ;;  %v5316_v18 = vld [vmem:[%s8423_s10 + $0x68] sm:$0xff] }
 0x367   : > { %v5258_v30 = vsel %vm1432_vm15, %v5257_v31, 0.0  ;;  %v5319_v31 = vld [vmem:[%s8423_s10 + $0x80] sm:$0xff] }
 0x368   : > { %v5259_v28 = vrot.slane %v5258_v30, 4 }
 0x36a   : > { %v5260_v21 = vadd.f32 %v5259_v28, %v5258_v30  ;;  %v5321_v30 = vld [vmem:[%s8423_s10 + $0x90] sm:$0xff]  ;;  %v5322_v28 = vld [vmem:[%s8423_s10 + $0x98] sm:$0xff] }
 0x36c   : > { %v5261_v25 = vrot.slane %v5260_v21, 2 }
 0x36e   : > { %v5262_v53 = vadd.f32 %v5261_v25, %v5260_v21  ;;  %v5324_v21 = vld [vmem:[%s8423_s10 + $0xa8] sm:$0xff]  ;;  %v5326_v25 = vld [vmem:[%s8423_s10 + $0xb8] sm:$0xff] }
 0x370   : > { %v5263_v54 = vrot.slane %v5262_v53, 1 }
 0x372   : > { %v5264_v36 = vadd.f32 %v5263_v54, %v5262_v53  ;;  %v5328_v53 = vld [vmem:[%s8423_s10 + $0xc8] sm:$0xff] }
 0x374   : > { %v5788_v27 = vmul.f32 -1.442695, %v5264_v36 }
 0x376   : > { %6348 = vpow2.f32 %v5788_v27 }
 0x380   : > { %v6349_v2 = vpop.eup %6348 }
 0x381   : > { %v5268_v48 = vadd.f32 1.0, %v6349_v2 }
 0x383   : > { %6350 = vrcp.f32 %v5268_v48  ;;  %v5329_v48 = vld [vmem:[%s8423_s10 + $0xd0] sm:$0xff] }
 0x38d   : > { %v6351_v58 = vpop.eup %6350 }
 0x38e   : > { %v5271_v34 = vmul.f32 %v6351_v58, %v8225_v52  ;;  %v5272_v56 = vmul.f32 %v6351_v58, %v8233_v33  ;;  %v5273_v37 = vmul.f32 %v6351_v58, %v8220_v22  ;;  %v5274_v0 = vmul.f32 %v6351_v58, %v8230_v51 }
 0x38f   : > { %v8430_v63 = vmul.f32 %v6351_v58, %v8253_v35  ;;  %v8433_v23 = vmul.f32 %v6351_v58, %v8263_v10  ;;  %v8436_v3 = vmul.f32 %v6351_v58, %v8248_v24  ;;  %v8439_v52 = vmul.f32 %v6351_v58, %v8258_v17  ;;  %v5303_v10 = vld [vmem:[%s8423_s10] sm:$0xff]  ;;  %v5304_v24 = vld [vmem:[%s8423_s10 + $0x8] sm:$0xff]  ;;  %v5306_v17 = vld [vmem:[%s8423_s10 + $0x18] sm:$0xff] }
 0x390   : > { %v8442_v22 = vmul.f32 %v6351_v58, %v8281_v8  ;;  %v8445_v51 = vmul.f32 %v6351_v58, %v8291_v46  ;;  %v8448_v33 = vmul.f32 %v6351_v58, %v8276_v14  ;;  %v8451_v35 = vmul.f32 %v6351_v58, %v8286_v11 }
 0x391   : > { %v8458_v8 = vmul.f32 %v6351_v58, %v8309_v38  ;;  %v8461_v46 = vmul.f32 %v6351_v58, %v8317_v12  ;;  %v8464_v14 = vmul.f32 %v6351_v58, %v8304_v41  ;;  %v8467_v11 = vmul.f32 %v6351_v58, %v8312_v45 }
 0x392   : > { %v8474_v38 = vmul.f32 %v6351_v58, %v8333_v60  ;;  %v8477_v12 = vmul.f32 %v6351_v58, %v8341_v15  ;;  %v8480_v41 = vmul.f32 %v6351_v58, %v8328_v50  ;;  %v8483_v45 = vmul.f32 %v6351_v58, %v8336_v5 }
 0x393   : > { %v8490_v60 = vmul.f32 %v6351_v58, %v8356_v26  ;;  %v8493_v15 = vmul.f32 %v6351_v58, %v8363_v20  ;;  %v8496_v50 = vmul.f32 %v6351_v58, %v8351_v4  ;;  %v8499_v5 = vmul.f32 %v6351_v58, %v8358_v32  ;;  %v5318_v26 = vld [vmem:[%s8423_s10 + $0x78] sm:$0xff] }
 0x394   : > { %v8506_v13 = vmul.f32 %v6351_v58, %v8375_v40  ;;  %v8509_v20 = vmul.f32 %v6351_v58, %v8383_v6  ;;  %v8512_v4 = vmul.f32 %v6351_v58, %v8369_v44  ;;  %v8515_v32 = vmul.f32 %v6351_v58, %v8379_v42  ;;  %v5320_v40 = vld [vmem:[%s8423_s10 + $0x88] sm:$0xff]  ;;  %v5323_v6 = vld [vmem:[%s8423_s10 + $0xa0] sm:$0xff]  ;;  %v5325_v44 = vld [vmem:[%s8423_s10 + $0xb0] sm:$0xff] }
 0x395   : > { %8655 = vst [vmem:[#allocation4_spill] sm:$0xff] %v8490_v60  ;;  %8656 = vst [vmem:[#allocation5_spill] sm:$0xff] %v8493_v15  ;;  %v5327_v42 = vld [vmem:[%s8423_s10 + $0xc0] sm:$0xff]  ;;  %v5299_v54 = vmul.f32 %v6351_v58, %v8393_v16  ;;  %v5300_v36 = vmul.f32 %v6351_v58, %v8399_v47  ;;  %v5301_v27 = vmul.f32 %v6351_v58, %v8401_v43  ;;  %v5332_v15 = vld [vmem:[%s8423_s10 + $0xe8] sm:$0xff] }
 0x396   : > { %8657 = vst [vmem:[#allocation6_spill] sm:$0xff] %v8496_v50  ;;  %8658 = vst [vmem:[#allocation7_spill] sm:$0xff] %v8499_v5  ;;  %v5302_v2 = vmul.f32 %v6351_v58, %v8407_v62  ;;  %v5337_v5 = vadd.f32 %v5305_v19, %v5273_v37  ;;  %v5338_v50 = vadd.f32 %v5306_v17, %v5274_v0  ;;  %v5333_v60 = vld [vmem:[%s8423_s10 + $0xf0] sm:$0xff]  ;;  %v5334_v16 = vld [vmem:[%s8423_s10 + $0xf8] sm:$0xff] }
 0x397   : > { %8659 = vst [vmem:[#allocation8_spill] sm:$0xff] %v8506_v13  ;;  %8660 = vst [vmem:[#allocation9_spill] sm:$0xff] %v8509_v20  ;;  %v5335_v20 = vadd.f32 %v5303_v10, %v5271_v34  ;;  %v5336_v13 = vadd.f32 %v5304_v24, %v5272_v56  ;;  %v5339_v47 = vadd.f32 %v5307_v57, %v8430_v63 }
 0x398   : > { %8661 = vst [vmem:[#allocation10_spill] sm:$0xff] %v8512_v4  ;;  %8662 = vst [vmem:[#allocation11_spill] sm:$0xff] %v8515_v32  ;;  %v5330_v32 = vld [vmem:[%s8423_s10 + $0xd8] sm:$0xff]  ;;  %v5331_v4 = vld [vmem:[%s8423_s10 + $0xe0] sm:$0xff]  ;;  %v5340_v43 = vadd.f32 %v5308_v29, %v8433_v23  ;;  %v5341_v62 = vadd.f32 %v5309_v39, %v8436_v3  ;;  %v5342_v58 = vadd.f32 %v5310_v1, %v8439_v52 }
 0x399   : > { %v5343_v34 = vadd.f32 %v5311_v7, %v8442_v22  ;;  %v5344_v56 = vadd.f32 %v5312_v49, %v8445_v51  ;;  %v5345_v37 = vadd.f32 %v5313_v59, %v8448_v33  ;;  %v5346_v0 = vadd.f32 %v5314_v9, %v8451_v35  ;;  %5367 = vst.msk [vmem:[%s8521_s14] sm:$0xff] %vm1432_vm15, %v5335_v20 }
 0x39a   : > { %5368 = vst.msk [vmem:[%s8521_s14 + $0x8] sm:$0xff] %vm1432_vm15, %v5336_v13  ;;  %5369 = vst.msk [vmem:[%s8521_s14 + $0x10] sm:$0xff] %vm1432_vm15, %v5337_v5  ;;  %v5347_v63 = vadd.f32 %v5315_v55, %v8458_v8  ;;  %v5348_v23 = vadd.f32 %v5316_v18, %v8461_v46  ;;  %v5349_v3 = vadd.f32 %v5317_v61, %v8464_v14 }
 0x39b   : > { %5370 = vst.msk [vmem:[%s8521_s14 + $0x18] sm:$0xff] %vm1432_vm15, %v5338_v50  ;;  %v5350_v52 = vadd.f32 %v5318_v26, %v8467_v11  ;;  %5371 = vst.msk [vmem:[%s8521_s14 + $0x20] sm:$0xff] %vm1432_vm15, %v5339_v47  ;;  %v5351_v22 = vadd.f32 %v5319_v31, %v8474_v38  ;;  %v5352_v51 = vadd.f32 %v5320_v40, %v8477_v12 }
 0x39c   : > { %5372 = vst.msk [vmem:[%s8521_s14 + $0x28] sm:$0xff] %vm1432_vm15, %v5340_v43  ;;  %5373 = vst.msk [vmem:[%s8521_s14 + $0x30] sm:$0xff] %vm1432_vm15, %v5341_v62  ;;  %v5353_v33 = vadd.f32 %v5321_v30, %v8480_v41  ;;  %v5354_v35 = vadd.f32 %v5322_v28, %v8483_v45  ;;  %v8663_v10 = vld [vmem:[#allocation4_spill] sm:$0xff]  ;;  %v8664_v19 = vld [vmem:[#allocation5_spill] sm:$0xff]  ;;  %v5363_v7 = vadd.f32 %v5331_v4, %v5299_v54 }
 0x39d   : > { %5374 = vst.msk [vmem:[%s8521_s14 + $0x38] sm:$0xff] %vm1432_vm15, %v5342_v58  ;;  %5375 = vst.msk [vmem:[%s8521_s14 + $0x40] sm:$0xff] %vm1432_vm15, %v5343_v34  ;;  %v5355_v24 = vadd.f32 %v5323_v6, %v8663_v10  ;;  %v5356_v17 = vadd.f32 %v5324_v21, %v8664_v19  ;;  %v8665_v8 = vld [vmem:[#allocation6_spill] sm:$0xff]  ;;  %v8666_v14 = vld [vmem:[#allocation7_spill] sm:$0xff]  ;;  %v5364_v49 = vadd.f32 %v5332_v15, %v5300_v36 }
 0x39e   : > { %5376 = vst.msk [vmem:[%s8521_s14 + $0x48] sm:$0xff] %vm1432_vm15, %v5344_v56  ;;  %5377 = vst.msk [vmem:[%s8521_s14 + $0x50] sm:$0xff] %vm1432_vm15, %v5345_v37  ;;  %v5357_v46 = vadd.f32 %v5325_v44, %v8665_v8  ;;  %v5358_v11 = vadd.f32 %v5326_v25, %v8666_v14  ;;  %v8667_v57 = vld [vmem:[#allocation8_spill] sm:$0xff]  ;;  %v8668_v39 = vld [vmem:[#allocation9_spill] sm:$0xff]  ;;  %v5365_v59 = vadd.f32 %v5333_v60, %v5301_v27 }
 0x39f   : > { %5378 = vst.msk [vmem:[%s8521_s14 + $0x58] sm:$0xff] %vm1432_vm15, %v5346_v0  ;;  %5379 = vst.msk [vmem:[%s8521_s14 + $0x60] sm:$0xff] %vm1432_vm15, %v5347_v63  ;;  %v5359_v29 = vadd.f32 %v5327_v42, %v8667_v57  ;;  %v5360_v1 = vadd.f32 %v5328_v53, %v8668_v39  ;;  %v8669_v38 = vld [vmem:[#allocation10_spill] sm:$0xff]  ;;  %v8670_v41 = vld [vmem:[#allocation11_spill] sm:$0xff]  ;;  %v5366_v9 = vadd.f32 %v5334_v16, %v5302_v2 }
 0x3a0   : > { %5380 = vst.msk [vmem:[%s8521_s14 + $0x68] sm:$0xff] %vm1432_vm15, %v5348_v23  ;;  %5381 = vst.msk [vmem:[%s8521_s14 + $0x70] sm:$0xff] %vm1432_vm15, %v5349_v3  ;;  %v5361_v12 = vadd.f32 %v5329_v48, %v8669_v38  ;;  %v5362_v45 = vadd.f32 %v5330_v32, %v8670_v41 }
 0x3a1   : > { %5382 = vst.msk [vmem:[%s8521_s14 + $0x78] sm:$0xff] %vm1432_vm15, %v5350_v52  ;;  %5383 = vst.msk [vmem:[%s8521_s14 + $0x80] sm:$0xff] %vm1432_vm15, %v5351_v22 }
 0x3a2   : > { %5384 = vst.msk [vmem:[%s8521_s14 + $0x88] sm:$0xff] %vm1432_vm15, %v5352_v51  ;;  %5385 = vst.msk [vmem:[%s8521_s14 + $0x90] sm:$0xff] %vm1432_vm15, %v5353_v33 }
 0x3a3   : > { %5386 = vst.msk [vmem:[%s8521_s14 + $0x98] sm:$0xff] %vm1432_vm15, %v5354_v35  ;;  %5387 = vst.msk [vmem:[%s8521_s14 + $0xa0] sm:$0xff] %vm1432_vm15, %v5355_v24 }
 0x3a4   : > { %5388 = vst.msk [vmem:[%s8521_s14 + $0xa8] sm:$0xff] %vm1432_vm15, %v5356_v17  ;;  %5389 = vst.msk [vmem:[%s8521_s14 + $0xb0] sm:$0xff] %vm1432_vm15, %v5357_v46 }
 0x3a5   : > { %5390 = vst.msk [vmem:[%s8521_s14 + $0xb8] sm:$0xff] %vm1432_vm15, %v5358_v11  ;;  %5391 = vst.msk [vmem:[%s8521_s14 + $0xc0] sm:$0xff] %vm1432_vm15, %v5359_v29 }
 0x3a6   : > { %5392 = vst.msk [vmem:[%s8521_s14 + $0xc8] sm:$0xff] %vm1432_vm15, %v5360_v1  ;;  %5393 = vst.msk [vmem:[%s8521_s14 + $0xd0] sm:$0xff] %vm1432_vm15, %v5361_v12 }
 0x3a7   : > { %5394 = vst.msk [vmem:[%s8521_s14 + $0xd8] sm:$0xff] %vm1432_vm15, %v5362_v45  ;;  %5395 = vst.msk [vmem:[%s8521_s14 + $0xe0] sm:$0xff] %vm1432_vm15, %v5363_v7 }
 0x3a8   : > { %5396 = vst.msk [vmem:[%s8521_s14 + $0xe8] sm:$0xff] %vm1432_vm15, %v5364_v49  ;;  %5397 = vst.msk [vmem:[%s8521_s14 + $0xf0] sm:$0xff] %vm1432_vm15, %v5365_v59 }
 0x3a9   : > { %5398 = vst.msk [vmem:[%s8521_s14 + $0xf8] sm:$0xff] %vm1432_vm15, %v5366_v9 }
 0x3aa PF: > { %s18_s27 = sadd.s32 1, %s6363_s27  }
 0x3ab   : > { %p15_p4 = scmp.ge.s32.totalorder %s18_s27, 4  }
 0x3ad   :  { %17 = sbr.rel (!%p15_p4) target bundleno = 1 (0x1), region = 88 }

</bundles_post_ra>
